<compile_context>
chip_gen: v7x
topology: tpu7x:2x2x1
jax: 0.10.0
libtpu: 0.0.40
codegen_flags: <defaults>
</compile_context>

<pallas_src>
import jax
import jax.numpy as jnp
from jax.experimental import pallas as pl
from jax.experimental.pallas import tpu as pltpu

EPS = 1e-5


def _encoding_block_kernel(xp_ref, w1_ref, g1_ref, b1_ref, w2t_ref, g2_ref, b2_ref,
                           out_ref, hpad_ref):
    """
    xp_ref  : (N, H+2, W+2, Cin)  zero-padded NHWC input
    w1_ref  : (9*Cin, Cout)       conv1 weights in im2col layout (dy, dx, ci) x co
    g1/b1   : (1, Cout)           BN1 gamma / beta
    w2t_ref : (Cout, 9*Cout)      conv2 weights, transposed im2col layout
    g2/b2   : (Cout, 1)           BN2 gamma / beta
    out_ref : (Cout, N*H*W)       lane-dense transposed output
    hpad_ref: (N, H+2, W+2, Cout) VMEM scratch for the padded intermediate
    """
    N, Hp, Wp, Cin = xp_ref.shape
    H, W = Hp - 2, Wp - 2
    Cout = out_ref.shape[0]
    M = N * H * W
    inv_m = 1.0 / M

    xp = xp_ref[...]

    # ---- conv1: im2col -> one K = 9*Cin matmul on the MXU ----
    taps1 = [xp[:, dy:dy + H, dx:dx + W, :] for dy in range(3) for dx in range(3)]
    x1 = jnp.concatenate(taps1, axis=-1).reshape(M, 9 * Cin)
    h1 = jnp.dot(x1, w1_ref[...], preferred_element_type=jnp.float32)   # (M, Cout)

    # ---- BN1: single stats pass, fused scale/shift, ReLU ----
    s1 = jnp.sum(h1, axis=0, keepdims=True)
    ss1 = jnp.sum(h1 * h1, axis=0, keepdims=True)
    mean1 = s1 * inv_m
    var1 = ss1 * inv_m - mean1 * mean1
    scale1 = g1_ref[...] * jax.lax.rsqrt(var1 + EPS)
    shift1 = b1_ref[...] - mean1 * scale1
    h1 = jnp.maximum(h1 * scale1 + shift1, 0.0)

    # ---- halo for conv2: VMEM scratch, zero ONLY the 1-px border ----
    hpad_ref[:, 0:1, :, :] = jnp.zeros((N, 1, Wp, Cout), jnp.float32)
    hpad_ref[:, H + 1:H + 2, :, :] = jnp.zeros((N, 1, Wp, Cout), jnp.float32)
    hpad_ref[:, :, 0:1, :] = jnp.zeros((N, Hp, 1, Cout), jnp.float32)
    hpad_ref[:, :, W + 1:W + 2, :] = jnp.zeros((N, Hp, 1, Cout), jnp.float32)
    hpad_ref[:, 1:H + 1, 1:W + 1, :] = h1.reshape(N, H, W, Cout)
    hp = hpad_ref[...]

    # ---- conv2: im2col matmul computed transposed -> (Cout, M), lane-dense ----
    taps2 = [hp[:, dy:dy + H, dx:dx + W, :] for dy in range(3) for dx in range(3)]
    x2 = jnp.concatenate(taps2, axis=-1).reshape(M, 9 * Cout)
    h2t = jax.lax.dot_general(
        w2t_ref[...], x2,
        dimension_numbers=(((1,), (1,)), ((), ())),
        preferred_element_type=jnp.float32)                             # (Cout, M)

    # ---- BN2 + ReLU in the dense (Cout, M) layout; lane-dense output store ----
    s2 = jnp.sum(h2t, axis=1, keepdims=True)
    ss2 = jnp.sum(h2t * h2t, axis=1, keepdims=True)
    mean2 = s2 * inv_m
    var2 = ss2 * inv_m - mean2 * mean2
    scale2 = g2_ref[...] * jax.lax.rsqrt(var2 + EPS)
    shift2 = b2_ref[...] - mean2 * scale2
    out_ref[...] = jnp.maximum(h2t * scale2 + shift2, 0.0)


def encoding_block_pallas(x_nchw, w1, g1, b1, w2, g2, b2):
    """Forward pass of encoding_block. x_nchw: (N, Cin, H, W) float32."""
    N, Cin, H, W = x_nchw.shape
    Cout = w1.shape[-1]

    # NCHW -> NHWC, zero-pad spatially by 1 (glue in plain JAX).
    x_nhwc = jnp.transpose(x_nchw, (0, 2, 3, 1)).astype(jnp.float32)
    xp = jnp.pad(x_nhwc, ((0, 0), (1, 1), (1, 1), (0, 0)))

    # Weights HWIO (3,3,Ci,Co) -> im2col matrices matching the (dy, dx, ci) tap order.
    w1r = w1.astype(jnp.float32).reshape(9 * Cin, Cout)
    w2t = w2.astype(jnp.float32).reshape(9 * Cout, Cout).T               # (Cout, 9*Cout)

    vmem = pl.BlockSpec(memory_space=pltpu.MemorySpace.VMEM)
    out_t = pl.pallas_call(
        _encoding_block_kernel,
        out_shape=jax.ShapeDtypeStruct((Cout, N * H * W), jnp.float32),
        in_specs=[vmem] * 7,
        out_specs=vmem,
        scratch_shapes=[pltpu.VMEM((N, H + 2, W + 2, Cout), jnp.float32)],
    )(xp, w1r, g1.reshape(1, Cout), b1.reshape(1, Cout),
      w2t, g2.reshape(Cout, 1), b2.reshape(Cout, 1))

    # (Cout, N*H*W) -> (N, Cout, H, W) to match PyTorch output convention.
    return out_t.reshape(Cout, N, H, W).transpose(1, 0, 2, 3)


def encoding_block_ref(x_nchw, w1, g1, b1, w2, g2, b2):
    """Pure-JAX reference (training-mode BatchNorm, biased variance)."""
    def conv(x, w):
        return jax.lax.conv_general_dilated(
            x, w, window_strides=(1, 1), padding="SAME",
            dimension_numbers=("NCHW", "HWIO", "NCHW"))

    def bn_relu(x, g, b):
        mean = jnp.mean(x, axis=(0, 2, 3), keepdims=True)
        var = jnp.mean((x - mean) ** 2, axis=(0, 2, 3), keepdims=True)
        y = (x - mean) * jax.lax.rsqrt(var + EPS)
        y = y * g.reshape(1, -1, 1, 1) + b.reshape(1, -1, 1, 1)
        return jnp.maximum(y, 0.0)

    h = bn_relu(conv(x_nchw, w1), g1, b1)
    return bn_relu(conv(h, w2), g2, b2)


if __name__ == "__main__":
    N, Cin, Cout, H, W = 2, 4, 8, 16, 16

    key = jax.random.PRNGKey(0)
    kx, kw1, kw2 = jax.random.split(key, 3)

    x = jax.random.normal(kx, (N, Cin, H, W), dtype=jnp.float32)

    # Deterministic parameter init (shapes per nn.Conv2d / nn.BatchNorm2d).
    # Conv weights ~ uniform(-1/sqrt(fan_in), 1/sqrt(fan_in)); BN: gamma=1, beta=0.
    fan1 = Cin * 9
    w1 = jax.random.uniform(kw1, (3, 3, Cin, Cout), jnp.float32,
                            minval=-1.0 / (fan1 ** 0.5), maxval=1.0 / (fan1 ** 0.5))
    fan2 = Cout * 9
    w2 = jax.random.uniform(kw2, (3, 3, Cout, Cout), jnp.float32,
                            minval=-1.0 / (fan2 ** 0.5), maxval=1.0 / (fan2 ** 0.5))
    g1 = jnp.ones((Cout,), jnp.float32)
    b1 = jnp.zeros((Cout,), jnp.float32)
    g2 = jnp.ones((Cout,), jnp.float32)
    b2 = jnp.zeros((Cout,), jnp.float32)

    out = encoding_block_pallas(x, w1, g1, b1, w2, g2, b2)
    out = jax.block_until_ready(out)

    ref = jax.block_until_ready(encoding_block_ref(x, w1, g1, b1, w2, g2, b2))
    assert out.shape == (N, Cout, H, W)
    assert jnp.allclose(out, ref, atol=1e-4, rtol=1e-4), \
        f"max abs err = {jnp.max(jnp.abs(out - ref))}"

    print("KERNEL_OK")
</pallas_src>

<mosaic_0001>
module attributes {stable_mosaic.version = 11 : i64} {
  func.func @_encoding_block_kernel(%arg0: memref<2x18x18x4xf32, #tpu.memory_space<vmem>>, %arg1: memref<36x8xf32, #tpu.memory_space<vmem>>, %arg2: memref<1x8xf32, #tpu.memory_space<vmem>>, %arg3: memref<1x8xf32, #tpu.memory_space<vmem>>, %arg4: memref<8x72xf32, #tpu.memory_space<vmem>>, %arg5: memref<8x1xf32, #tpu.memory_space<vmem>>, %arg6: memref<8x1xf32, #tpu.memory_space<vmem>>, %arg7: memref<8x512xf32, #tpu.memory_space<vmem>>, %arg8: memref<2x18x18x8xf32, #tpu.memory_space<vmem>>) attributes {dimension_semantics = [], scalar_prefetch = 0 : i64, scratch_operands = 1 : i64, tpu.core_type = #tpu.core_type<tc>} {
    %c0 = arith.constant 0 : index
    %c0_0 = arith.constant 0 : index
    %c0_1 = arith.constant 0 : index
    %c0_2 = arith.constant 0 : index
    %0 = vector.load %arg0[%c0, %c0_0, %c0_1, %c0_2] : memref<2x18x18x4xf32, #tpu.memory_space<vmem>>, vector<2x18x18x4xf32>
    %1 = vector.extract_strided_slice %0 {offsets = [0, 0, 0, 0], sizes = [2, 16, 16, 4], strides = [1, 1, 1, 1]} : vector<2x18x18x4xf32> to vector<2x16x16x4xf32>
    %2 = vector.extract_strided_slice %0 {offsets = [0, 0, 1, 0], sizes = [2, 16, 16, 4], strides = [1, 1, 1, 1]} : vector<2x18x18x4xf32> to vector<2x16x16x4xf32>
    %3 = vector.extract_strided_slice %0 {offsets = [0, 0, 2, 0], sizes = [2, 16, 16, 4], strides = [1, 1, 1, 1]} : vector<2x18x18x4xf32> to vector<2x16x16x4xf32>
    %4 = vector.extract_strided_slice %0 {offsets = [0, 1, 0, 0], sizes = [2, 16, 16, 4], strides = [1, 1, 1, 1]} : vector<2x18x18x4xf32> to vector<2x16x16x4xf32>
    %5 = vector.extract_strided_slice %0 {offsets = [0, 1, 1, 0], sizes = [2, 16, 16, 4], strides = [1, 1, 1, 1]} : vector<2x18x18x4xf32> to vector<2x16x16x4xf32>
    %6 = vector.extract_strided_slice %0 {offsets = [0, 1, 2, 0], sizes = [2, 16, 16, 4], strides = [1, 1, 1, 1]} : vector<2x18x18x4xf32> to vector<2x16x16x4xf32>
    %7 = vector.extract_strided_slice %0 {offsets = [0, 2, 0, 0], sizes = [2, 16, 16, 4], strides = [1, 1, 1, 1]} : vector<2x18x18x4xf32> to vector<2x16x16x4xf32>
    %8 = vector.extract_strided_slice %0 {offsets = [0, 2, 1, 0], sizes = [2, 16, 16, 4], strides = [1, 1, 1, 1]} : vector<2x18x18x4xf32> to vector<2x16x16x4xf32>
    %9 = vector.extract_strided_slice %0 {offsets = [0, 2, 2, 0], sizes = [2, 16, 16, 4], strides = [1, 1, 1, 1]} : vector<2x18x18x4xf32> to vector<2x16x16x4xf32>
    %10 = tpu.concatenate %1, %2, %3, %4, %5, %6, %7, %8, %9 in 3 : vector<2x16x16x4xf32>, vector<2x16x16x4xf32>, vector<2x16x16x4xf32>, vector<2x16x16x4xf32>, vector<2x16x16x4xf32>, vector<2x16x16x4xf32>, vector<2x16x16x4xf32>, vector<2x16x16x4xf32>, vector<2x16x16x4xf32> -> vector<2x16x16x36xf32>
    %11 = vector.shape_cast %10 : vector<2x16x16x36xf32> to vector<512x36xf32>
    %c0_3 = arith.constant 0 : index
    %c0_4 = arith.constant 0 : index
    %12 = vector.load %arg1[%c0_3, %c0_4] : memref<36x8xf32, #tpu.memory_space<vmem>>, vector<36x8xf32>
    %cst = arith.constant dense<0.000000e+00> : vector<512x8xf32>
    %13 = tpu.matmul %11, %12, %cst {dimension_numbers = #tpu.dot_dimension_numbers<[1], [0], [0], [1], [0, 0, 1, 1], [], []>} : vector<512x36xf32>, vector<36x8xf32>, vector<512x8xf32> -> vector<512x8xf32>
    %cst_5 = arith.constant dense<0.000000e+00> : vector<8xf32>
    %14 = vector.multi_reduction <add>, %13, %cst_5 [0] : vector<512x8xf32> to vector<8xf32>
    %15 = vector.shape_cast %14 : vector<8xf32> to vector<1x8xf32>
    %16 = arith.mulf %13, %13 : vector<512x8xf32>
    %cst_6 = arith.constant dense<0.000000e+00> : vector<8xf32>
    %17 = vector.multi_reduction <add>, %16, %cst_6 [0] : vector<512x8xf32> to vector<8xf32>
    %18 = vector.shape_cast %17 : vector<8xf32> to vector<1x8xf32>
    %cst_7 = arith.constant 0.001953125 : f32
    %19 = vector.broadcast %cst_7 : f32 to vector<1x8xf32>
    %20 = arith.mulf %15, %19 : vector<1x8xf32>
    %cst_8 = arith.constant 0.001953125 : f32
    %21 = vector.broadcast %cst_8 : f32 to vector<1x8xf32>
    %22 = arith.mulf %18, %21 : vector<1x8xf32>
    %23 = arith.mulf %20, %20 : vector<1x8xf32>
    %24 = arith.subf %22, %23 : vector<1x8xf32>
    %c0_9 = arith.constant 0 : index
    %c0_10 = arith.constant 0 : index
    %25 = vector.load %arg2[%c0_9, %c0_10] : memref<1x8xf32, #tpu.memory_space<vmem>>, vector<1x8xf32>
    %cst_11 = arith.constant 9.99999974E-6 : f32
    %26 = vector.broadcast %cst_11 : f32 to vector<1x8xf32>
    %27 = arith.addf %24, %26 : vector<1x8xf32>
    %28 = math.rsqrt %27 : vector<1x8xf32>
    %29 = arith.mulf %25, %28 : vector<1x8xf32>
    %c0_12 = arith.constant 0 : index
    %c0_13 = arith.constant 0 : index
    %30 = vector.load %arg3[%c0_12, %c0_13] : memref<1x8xf32, #tpu.memory_space<vmem>>, vector<1x8xf32>
    %31 = arith.mulf %20, %29 : vector<1x8xf32>
    %32 = arith.subf %30, %31 : vector<1x8xf32>
    %33 = vector.broadcast %29 : vector<1x8xf32> to vector<512x8xf32>
    %34 = arith.mulf %13, %33 : vector<512x8xf32>
    %35 = vector.broadcast %32 : vector<1x8xf32> to vector<512x8xf32>
    %36 = arith.addf %34, %35 : vector<512x8xf32>
    %cst_14 = arith.constant 0.000000e+00 : f32
    %37 = vector.broadcast %cst_14 : f32 to vector<512x8xf32>
    %38 = arith.maximumf %36, %37 : vector<512x8xf32>
    %cst_15 = arith.constant 0.000000e+00 : f32
    %39 = vector.broadcast %cst_15 : f32 to vector<2x1x18x8xf32>
    %c0_16 = arith.constant 0 : index
    %c0_17 = arith.constant 0 : index
    %c0_18 = arith.constant 0 : index
    %c0_19 = arith.constant 0 : index
    %40 = vector.load %arg8[%c0_16, %c0_17, %c0_18, %c0_19] : memref<2x18x18x8xf32, #tpu.memory_space<vmem>>, vector<2x1x18x8xf32>
    tpu.vector_store %arg8[%c0_16, %c0_17, %c0_18, %c0_19], %39 {strides = array<i32>} : memref<2x18x18x8xf32, #tpu.memory_space<vmem>>, vector<2x1x18x8xf32>,
    %cst_20 = arith.constant 0.000000e+00 : f32
    %41 = vector.broadcast %cst_20 : f32 to vector<2x1x18x8xf32>
    %c0_21 = arith.constant 0 : index
    %c17 = arith.constant 17 : index
    %c0_22 = arith.constant 0 : index
    %c0_23 = arith.constant 0 : index
    %42 = vector.load %arg8[%c0_21, %c17, %c0_22, %c0_23] : memref<2x18x18x8xf32, #tpu.memory_space<vmem>>, vector<2x1x18x8xf32>
    tpu.vector_store %arg8[%c0_21, %c17, %c0_22, %c0_23], %41 {strides = array<i32>} : memref<2x18x18x8xf32, #tpu.memory_space<vmem>>, vector<2x1x18x8xf32>,
    %cst_24 = arith.constant 0.000000e+00 : f32
    %43 = vector.broadcast %cst_24 : f32 to vector<2x18x1x8xf32>
    %c0_25 = arith.constant 0 : index
    %c0_26 = arith.constant 0 : index
    %c0_27 = arith.constant 0 : index
    %c0_28 = arith.constant 0 : index
    %44 = vector.load %arg8[%c0_25, %c0_26, %c0_27, %c0_28] : memref<2x18x18x8xf32, #tpu.memory_space<vmem>>, vector<2x18x1x8xf32>
    tpu.vector_store %arg8[%c0_25, %c0_26, %c0_27, %c0_28], %43 {strides = array<i32>} : memref<2x18x18x8xf32, #tpu.memory_space<vmem>>, vector<2x18x1x8xf32>,
    %cst_29 = arith.constant 0.000000e+00 : f32
    %45 = vector.broadcast %cst_29 : f32 to vector<2x18x1x8xf32>
    %c0_30 = arith.constant 0 : index
    %c0_31 = arith.constant 0 : index
    %c17_32 = arith.constant 17 : index
    %c0_33 = arith.constant 0 : index
    %46 = vector.load %arg8[%c0_30, %c0_31, %c17_32, %c0_33] : memref<2x18x18x8xf32, #tpu.memory_space<vmem>>, vector<2x18x1x8xf32>
    tpu.vector_store %arg8[%c0_30, %c0_31, %c17_32, %c0_33], %45 {strides = array<i32>} : memref<2x18x18x8xf32, #tpu.memory_space<vmem>>, vector<2x18x1x8xf32>,
    %47 = vector.shape_cast %38 : vector<512x8xf32> to vector<2x16x16x8xf32>
    %c0_34 = arith.constant 0 : index
    %c1 = arith.constant 1 : index
    %c1_35 = arith.constant 1 : index
    %c0_36 = arith.constant 0 : index
    %48 = vector.load %arg8[%c0_34, %c1, %c1_35, %c0_36] : memref<2x18x18x8xf32, #tpu.memory_space<vmem>>, vector<2x16x16x8xf32>
    tpu.vector_store %arg8[%c0_34, %c1, %c1_35, %c0_36], %47 {strides = array<i32>} : memref<2x18x18x8xf32, #tpu.memory_space<vmem>>, vector<2x16x16x8xf32>,
    %c0_37 = arith.constant 0 : index
    %c0_38 = arith.constant 0 : index
    %c0_39 = arith.constant 0 : index
    %c0_40 = arith.constant 0 : index
    %49 = vector.load %arg8[%c0_37, %c0_38, %c0_39, %c0_40] : memref<2x18x18x8xf32, #tpu.memory_space<vmem>>, vector<2x18x18x8xf32>
    %50 = vector.extract_strided_slice %49 {offsets = [0, 0, 0, 0], sizes = [2, 16, 16, 8], strides = [1, 1, 1, 1]} : vector<2x18x18x8xf32> to vector<2x16x16x8xf32>
    %51 = vector.extract_strided_slice %49 {offsets = [0, 0, 1, 0], sizes = [2, 16, 16, 8], strides = [1, 1, 1, 1]} : vector<2x18x18x8xf32> to vector<2x16x16x8xf32>
    %52 = vector.extract_strided_slice %49 {offsets = [0, 0, 2, 0], sizes = [2, 16, 16, 8], strides = [1, 1, 1, 1]} : vector<2x18x18x8xf32> to vector<2x16x16x8xf32>
    %53 = vector.extract_strided_slice %49 {offsets = [0, 1, 0, 0], sizes = [2, 16, 16, 8], strides = [1, 1, 1, 1]} : vector<2x18x18x8xf32> to vector<2x16x16x8xf32>
    %54 = vector.extract_strided_slice %49 {offsets = [0, 1, 1, 0], sizes = [2, 16, 16, 8], strides = [1, 1, 1, 1]} : vector<2x18x18x8xf32> to vector<2x16x16x8xf32>
    %55 = vector.extract_strided_slice %49 {offsets = [0, 1, 2, 0], sizes = [2, 16, 16, 8], strides = [1, 1, 1, 1]} : vector<2x18x18x8xf32> to vector<2x16x16x8xf32>
    %56 = vector.extract_strided_slice %49 {offsets = [0, 2, 0, 0], sizes = [2, 16, 16, 8], strides = [1, 1, 1, 1]} : vector<2x18x18x8xf32> to vector<2x16x16x8xf32>
    %57 = vector.extract_strided_slice %49 {offsets = [0, 2, 1, 0], sizes = [2, 16, 16, 8], strides = [1, 1, 1, 1]} : vector<2x18x18x8xf32> to vector<2x16x16x8xf32>
    %58 = vector.extract_strided_slice %49 {offsets = [0, 2, 2, 0], sizes = [2, 16, 16, 8], strides = [1, 1, 1, 1]} : vector<2x18x18x8xf32> to vector<2x16x16x8xf32>
    %59 = tpu.concatenate %50, %51, %52, %53, %54, %55, %56, %57, %58 in 3 : vector<2x16x16x8xf32>, vector<2x16x16x8xf32>, vector<2x16x16x8xf32>, vector<2x16x16x8xf32>, vector<2x16x16x8xf32>, vector<2x16x16x8xf32>, vector<2x16x16x8xf32>, vector<2x16x16x8xf32>, vector<2x16x16x8xf32> -> vector<2x16x16x72xf32>
    %60 = vector.shape_cast %59 : vector<2x16x16x72xf32> to vector<512x72xf32>
    %c0_41 = arith.constant 0 : index
    %c0_42 = arith.constant 0 : index
    %61 = vector.load %arg4[%c0_41, %c0_42] : memref<8x72xf32, #tpu.memory_space<vmem>>, vector<8x72xf32>
    %cst_43 = arith.constant dense<0.000000e+00> : vector<8x512xf32>
    %62 = tpu.matmul %61, %60, %cst_43 {dimension_numbers = #tpu.dot_dimension_numbers<[1], [1], [0], [0], [0, 0, 1, 0], [], []>} : vector<8x72xf32>, vector<512x72xf32>, vector<8x512xf32> -> vector<8x512xf32>
    %cst_44 = arith.constant dense<0.000000e+00> : vector<8xf32>
    %63 = vector.multi_reduction <add>, %62, %cst_44 [1] : vector<8x512xf32> to vector<8xf32>
    %64 = vector.shape_cast %63 : vector<8xf32> to vector<8x1xf32>
    %65 = arith.mulf %62, %62 : vector<8x512xf32>
    %cst_45 = arith.constant dense<0.000000e+00> : vector<8xf32>
    %66 = vector.multi_reduction <add>, %65, %cst_45 [1] : vector<8x512xf32> to vector<8xf32>
    %67 = vector.shape_cast %66 : vector<8xf32> to vector<8x1xf32>
    %cst_46 = arith.constant 0.001953125 : f32
    %68 = vector.broadcast %cst_46 : f32 to vector<8x1xf32>
    %69 = arith.mulf %64, %68 : vector<8x1xf32>
    %cst_47 = arith.constant 0.001953125 : f32
    %70 = vector.broadcast %cst_47 : f32 to vector<8x1xf32>
    %71 = arith.mulf %67, %70 : vector<8x1xf32>
    %72 = arith.mulf %69, %69 : vector<8x1xf32>
    %73 = arith.subf %71, %72 : vector<8x1xf32>
    %c0_48 = arith.constant 0 : index
    %c0_49 = arith.constant 0 : index
    %74 = vector.load %arg5[%c0_48, %c0_49] : memref<8x1xf32, #tpu.memory_space<vmem>>, vector<8x1xf32>
    %cst_50 = arith.constant 9.99999974E-6 : f32
    %75 = vector.broadcast %cst_50 : f32 to vector<8x1xf32>
    %76 = arith.addf %73, %75 : vector<8x1xf32>
    %77 = math.rsqrt %76 : vector<8x1xf32>
    %78 = arith.mulf %74, %77 : vector<8x1xf32>
    %c0_51 = arith.constant 0 : index
    %c0_52 = arith.constant 0 : index
    %79 = vector.load %arg6[%c0_51, %c0_52] : memref<8x1xf32, #tpu.memory_space<vmem>>, vector<8x1xf32>
    %80 = arith.mulf %69, %78 : vector<8x1xf32>
    %81 = arith.subf %79, %80 : vector<8x1xf32>
    %82 = vector.broadcast %78 : vector<8x1xf32> to vector<8x512xf32>
    %83 = arith.mulf %62, %82 : vector<8x512xf32>
    %84 = vector.broadcast %81 : vector<8x1xf32> to vector<8x512xf32>
    %85 = arith.addf %83, %84 : vector<8x512xf32>
    %cst_53 = arith.constant 0.000000e+00 : f32
    %86 = vector.broadcast %cst_53 : f32 to vector<8x512xf32>
    %87 = arith.maximumf %85, %86 : vector<8x512xf32>
    %c0_54 = arith.constant 0 : index
    %c0_55 = arith.constant 0 : index
    %88 = vector.load %arg7[%c0_54, %c0_55] : memref<8x512xf32, #tpu.memory_space<vmem>>, vector<8x512xf32>
    tpu.vector_store %arg7[%c0_54, %c0_55], %87 {strides = array<i32>} : memref<8x512xf32, #tpu.memory_space<vmem>>, vector<8x512xf32>,
    return
  }
}

</mosaic_0001>

<bundles_post_ra>
// kernel: tpu_custom_call.1
= control target key start
LH: loop header
LB: loop body
LE: loop exit
PB: predicated region body
PF: predicated region fallthrough
CT: control target
= control target key end

     0   :  { %vm231_vm0 = vcmask 1046528   ;;  %s8997_s19 = smov 4   ;;  %s17548_s0 = inlined_call_operand.vmem [shape: f32[2,18,18,4], index: 0, kind: input, shape index: {}]   ;;  %s17549_s1 = inlined_call_operand.vmem [shape: f32[36,8], index: 1, kind: input, shape index: {}]   ;;  %s17550_s2 = inlined_call_operand.vmem [shape: f32[1,8], index: 2, kind: input, shape index: {}]   ;;  %s17551_s3 = inlined_call_operand.vmem [shape: f32[1,8], index: 3, kind: input, shape index: {}]   ;;  %s17552_s4 = inlined_call_operand.vmem [shape: f32[8,72], index: 4, kind: input, shape index: {}]   ;;  %s17553_s5 = inlined_call_operand.vmem [shape: f32[8,1], index: 5, kind: input, shape index: {}]   ;;  %s17554_s6 = inlined_call_operand.vmem [shape: f32[8,1], index: 6, kind: input, shape index: {}]   ;;  %s17555_s7 = inlined_call_operand.hbm [shape: f32[8,512], index: 7, kind: output, shape index: {}]  }
   0x1   :  { %v9055_v0 = vld [vmem:[%s17548_s0 + $0x18] sm:$0xff]  ;;  %v9060_v1 = vld [vmem:[%s17548_s0 + $0x20] sm:$0xff]  ;;  %v9072_v5 = vld [vmem:[%s17548_s0 + $0x8] sm:$0xff] }
   0x2   :  { %v9065_v2 = vld [vmem:[%s17548_s0] sm:$0xff]  ;;  %v237_v3 = vrot.slane %v9055_v0, 1  ;;  %v238_v4 = vrot.slane %v9060_v1, 1  ;;  %v9078_v7 = vld [vmem:[%s17548_s0 + $0x28] sm:$0x3]  ;;  %v233_v8 = vrot.slane %v9072_v5, 1 }
   0x3   :  { %v232_v6 = vrot.slane %v9065_v2, 1  ;;  %v240_v9 = vrot.slane %v9078_v7, 1  ;;  %v9085_v10 = vld [vmem:[%s17548_s0 + $0x10] sm:$0x3]  ;;  %v9090_v11 = vld [vmem:[%s17548_s0 + $0x38] sm:$0xff]  ;;  %v9130_v24 = vld [vmem:[%s17548_s0 + $0x48] sm:$0xff] }
   0x4   :  { %v9093_v12 = vsel %vm231_vm0, %v237_v3, %v238_v4  ;;  %v235_v13 = vrot.slane %v9085_v10, 1  ;;  %v9099_v14 = vld [vmem:[%s17548_s0 + $0x40] sm:$0x3]  ;;  %v9104_v15 = vld [vmem:[%s17548_s0 + $0x30] sm:$0xff]  ;;  %v243_v18 = vrot.slane %v9090_v11, 1  ;;  %v247_v29 = vrot.slane %v9130_v24, 1 }
   0x5   :  { %18183 = vst [vmem:[#allocation6_spill] sm:$0xff] %v9093_v12  ;;  %396 = vrot.lane.b32.xlu1 %v9093_v12, %s8997_s19  ;;  %v234_v16 = vsel %vm231_vm0, %v232_v6, %v233_v8  ;;  %v9111_v17 = vsel %vm231_vm0, %v238_v4, %v240_v9  ;;  %v245_v19 = vrot.slane %v9099_v14, 1  ;;  %v242_v21 = vrot.slane %v9104_v15, 1  ;;  %v9120_v22 = vld [vmem:[%s17548_s0 + $0x50] sm:$0xff]  ;;  %v9125_v23 = vld [vmem:[%s17548_s0 + $0x58] sm:$0x3] }
   0x6   :  { %392 = vrot.lane.b32.xlu0 %v234_v16, %s8997_s19  ;;  %18184 = vst [vmem:[#allocation7_spill] sm:$0xff] %v9111_v17  ;;  %v236_v20 = vsel %vm231_vm0, %v233_v8, %v235_v13  ;;  %v248_v26 = vrot.slane %v9120_v22, 1  ;;  %v250_v27 = vrot.slane %v9125_v23, 1  ;;  %v9147_v30 = vld [vmem:[%s17548_s0 + $0x68] sm:$0xff]  ;;  %v9152_v31 = vld [vmem:[%s17548_s0 + $0x70] sm:$0x3] }
   0x7   :  { %v9136_v25 = vsel %vm231_vm0, %v243_v18, %v245_v19  ;;  %v9141_v28 = vsel %vm231_vm0, %v242_v21, %v243_v18  ;;  %v9157_v32 = vld [vmem:[%s17548_s0 + $0x60] sm:$0xff]  ;;  %v253_v34 = vrot.slane %v9147_v30, 1  ;;  %v255_v35 = vrot.slane %v9152_v31, 1  ;;  %v9180_v39 = vld [vmem:[%s17548_s0 + $0x88] sm:$0x3]  ;;  %v9185_v40 = vld [vmem:[%s17548_s0 + $0x78] sm:$0xff] }
   0x8   :  { %18185 = vst [vmem:[#allocation8_spill] sm:$0xff] %v9136_v25  ;;  %18186 = vst [vmem:[#allocation9_spill] sm:$0xff] %v9141_v28  ;;  %v9164_v33 = vsel %vm231_vm0, %v248_v26, %v250_v27  ;;  %v9169_v36 = vsel %vm231_vm0, %v247_v29, %v248_v26  ;;  %v252_v37 = vrot.slane %v9157_v32, 1  ;;  %v9175_v38 = vld [vmem:[%s17548_s0 + $0x80] sm:$0xff]  ;;  %v260_v43 = vrot.slane %v9180_v39, 1  ;;  %v9203_v46 = vld [vmem:[%s17548_s0 + $0x98] sm:$0xff] }
   0x9   :  { %398 = vrot.lane.b32.xlu1 %v9111_v17, %s8997_s19  ;;  %18187 = vst [vmem:[#allocation10_spill] sm:$0xff] %v9164_v33  ;;  %18188 = vst [vmem:[#allocation11_spill] sm:$0xff] %v9169_v36  ;;  %v9192_v41 = vsel %vm231_vm0, %v253_v34, %v255_v35  ;;  %v258_v42 = vrot.slane %v9175_v38, 1  ;;  %v257_v45 = vrot.slane %v9185_v40, 1  ;;  %v9208_v47 = vld [vmem:[%s17548_s0 + $0xa0] sm:$0x3] }
   0xa   :  { %394 = vrot.lane.b32.xlu0 %v236_v20, %s8997_s19  ;;  %18189 = vst [vmem:[#allocation12_spill] sm:$0xff] %v9192_v41  ;;  %v9197_v44 = vsel %vm231_vm0, %v252_v37, %v253_v34  ;;  %v9213_v48 = vld [vmem:[%s17548_s0 + $0x90] sm:$0xff]  ;;  %v263_v50 = vrot.slane %v9203_v46, 1  ;;  %v265_v51 = vrot.slane %v9208_v47, 1  ;;  %v9236_v55 = vld [vmem:[%s17548_s0 + $0xb8] sm:$0x3] }
   0xb   :  { %18190 = vst [vmem:[#allocation13_spill] sm:$0xff] %v9197_v44  ;;  %v9220_v49 = vsel %vm231_vm0, %v258_v42, %v260_v43  ;;  %v9225_v52 = vsel %vm231_vm0, %v257_v45, %v258_v42  ;;  %v262_v53 = vrot.slane %v9213_v48, 1  ;;  %v9231_v54 = vld [vmem:[%s17548_s0 + $0xb0] sm:$0xff]  ;;  %v9241_v56 = vld [vmem:[%s17548_s0 + $0xa8] sm:$0xff]  ;;  %v270_v59 = vrot.slane %v9236_v55, 1  ;;  %v9269_v3 = vld [vmem:[%s17548_s0 + $0xc0] sm:$0xff] }
   0xc   :  { %18191 = vst [vmem:[#allocation14_spill] sm:$0xff] %v9220_v49  ;;  %18192 = vst [vmem:[#allocation15_spill] sm:$0xff] %v9225_v52  ;;  %v9248_v57 = vsel %vm231_vm0, %v263_v50, %v265_v51  ;;  %v268_v58 = vrot.slane %v9231_v54, 1  ;;  %v267_v61 = vrot.slane %v9241_v56, 1  ;;  %v9259_v62 = vld [vmem:[%s17548_s0 + $0xc8] sm:$0xff]  ;;  %v272_v13 = vrot.slane %v9269_v3, 1 }
   0xd   :  { %402 = vrot.lane.b32.xlu1 %v9136_v25, %s8997_s19  ;;  %18193 = vst [vmem:[#allocation16_spill] sm:$0xff] %v9248_v57  ;;  %v9253_v60 = vsel %vm231_vm0, %v262_v53, %v263_v50  ;;  %v9264_v63 = vld [vmem:[%s17548_s0 + $0xd0] sm:$0x3]  ;;  %v273_v6 = vrot.slane %v9259_v62, 1  ;;  %v9287_v16 = vld [vmem:[%s17548_s0 + $0xe0] sm:$0xff]  ;;  %v9297_v19 = vld [vmem:[%s17548_s0 + $0xd8] sm:$0xff] }
   0xe   :  { %400 = vrot.lane.b32.xlu0 %v9141_v28, %s8997_s19  ;;  %18194 = vst [vmem:[#allocation17_spill] sm:$0xff] %v9253_v60  ;;  %v9276_v4 = vsel %vm231_vm0, %v268_v58, %v270_v59  ;;  %v275_v8 = vrot.slane %v9264_v63, 1  ;;  %v9281_v9 = vsel %vm231_vm0, %v267_v61, %v268_v58  ;;  %v9292_v18 = vld [vmem:[%s17548_s0 + $0xe8] sm:$0x3]  ;;  %v278_v21 = vrot.slane %v9287_v16, 1  ;;  %v9315_v34 = vld [vmem:[%s17548_s0 + $0xf8] sm:$0xff] }
   0xf   :  { %18195 = vst [vmem:[#allocation18_spill] sm:$0xff] %v9276_v4  ;;  %18196 = vst [vmem:[#allocation19_spill] sm:$0xff] %v9281_v9  ;;  %v280_v26 = vrot.slane %v9292_v18, 1  ;;  %v9309_v27 = vsel %vm231_vm0, %v272_v13, %v273_v6  ;;  %v277_v29 = vrot.slane %v9297_v19, 1  ;;  %v9320_v35 = vld [vmem:[%s17548_s0 + $0x100] sm:$0x3] }
  0x10   :  { %v9304_v20 = vsel %vm231_vm0, %v273_v6, %v275_v8  ;;  %18198 = vst [vmem:[#allocation21_spill] sm:$0xff] %v9309_v27  ;;  %v9325_v37 = vld [vmem:[%s17548_s0 + $0xf0] sm:$0xff] }
  0x11   :  { %406 = vrot.lane.b32.xlu1 %v9164_v33, %s8997_s19  ;;  %18197 = vst [vmem:[#allocation20_spill] sm:$0xff] %v9304_v20 }
  0x12   :  { %404 = vrot.lane.b32.xlu0 %v9169_v36, %s8997_s19 }
  0x15   :  { %410 = vrot.lane.b32.xlu1 %v9192_v41, %s8997_s19 }
  0x16   :  { %408 = vrot.lane.b32.xlu0 %v9197_v44, %s8997_s19 }
  0x19   :  { %414 = vrot.lane.b32.xlu1 %v9220_v49, %s8997_s19 }
  0x1a   :  { %412 = vrot.lane.b32.xlu0 %v9225_v52, %s8997_s19 }
  0x1d   :  { %418 = vrot.lane.b32.xlu1 %v9248_v57, %s8997_s19 }
  0x1e   :  { %416 = vrot.lane.b32.xlu0 %v9253_v60, %s8997_s19 }
  0x21   :  { %422 = vrot.lane.b32.xlu1 %v9276_v4, %s8997_s19 }
  0x22   :  { %420 = vrot.lane.b32.xlu0 %v9281_v9, %s8997_s19 }
  0x25   :  { %426 = vrot.lane.b32.xlu1 %v9304_v20, %s8997_s19 }
  0x26   :  { %12 = vsyncpa [#allocation4], 0  ;;  %424 = vrot.lane.b32.xlu0 %v9309_v27, %s8997_s19  ;;  %v9332_v42 = vsel %vm231_vm0, %v278_v21, %v280_v26  ;;  %v283_v43 = vrot.slane %v9315_v34, 1  ;;  %v285_v45 = vrot.slane %v9320_v35, 1  ;;  %v9337_v50 = vsel %vm231_vm0, %v277_v29, %v278_v21  ;;  %v9343_v53 = vld [vmem:[%s17548_s0 + $0x110] sm:$0xff]  ;;  %v9353_v59 = vld [vmem:[%s17548_s0 + $0x108] sm:$0xff] }
  0x27   :  { %18199 = vst [vmem:[#allocation22_spill] sm:$0xff] %v9332_v42  ;;  %18200 = vst [vmem:[#allocation23_spill] sm:$0xff] %v9337_v50  ;;  %v282_v51 = vrot.slane %v9325_v37, 1  ;;  %v9348_v58 = vld [vmem:[%s17548_s0 + $0x118] sm:$0x3]  ;;  %v288_v6 = vrot.slane %v9343_v53, 1 }
  0x28   :  { %v9360_v61 = vsel %vm231_vm0, %v283_v43, %v285_v45  ;;  %v290_v8 = vrot.slane %v9348_v58, 1  ;;  %v287_v21 = vrot.slane %v9353_v59, 1  ;;  %v9371_v26 = vld [vmem:[%s17548_s0 + $0x128] sm:$0xff]  ;;  %v9376_v29 = vld [vmem:[%s17548_s0 + $0x130] sm:$0x3]  ;;  %v9381_v45 = vld [vmem:[%s17548_s0 + $0x120] sm:$0xff] }
  0x29   :  { %430 = vrot.lane.b32.xlu1 %v9332_v42, %s8997_s19  ;;  %18201 = vst [vmem:[#allocation24_spill] sm:$0xff] %v9360_v61  ;;  %v9365_v13 = vsel %vm231_vm0, %v282_v51, %v283_v43  ;;  %v293_v51 = vrot.slane %v9371_v26, 1  ;;  %v292_v27 = vrot.slane %v9381_v45, 1  ;;  %v9399_v20 = vld [vmem:[%s17548_s0 + $0x140] sm:$0xff]  ;;  %v9427_v60 = vld [vmem:[%s17548_s0 + $0x158] sm:$0xff]  ;;  %v9455_v49 = vld [vmem:[%s17548_s0 + $0x170] sm:$0xff] }
  0x2a   :  { %428 = vrot.lane.b32.xlu0 %v9337_v50, %s8997_s19  ;;  %18202 = vst [vmem:[#allocation25_spill] sm:$0xff] %v9365_v13  ;;  %v9388_v43 = vsel %vm231_vm0, %v288_v6, %v290_v8  ;;  %v295_v50 = vrot.slane %v9376_v29, 1  ;;  %v9393_v42 = vsel %vm231_vm0, %v287_v21, %v288_v6  ;;  %v9409_v8 = vld [vmem:[%s17548_s0 + $0x138] sm:$0xff]  ;;  %v298_v21 = vrot.slane %v9399_v20, 1  ;;  %v9511_v25 = vld [vmem:[%s17548_s0 + $0x1d0] sm:$0xff]  ;;  %s8998_s17 = smov 8  }
  0x2b   :  { %18203 = vst [vmem:[#allocation26_spill] sm:$0xff] %v9388_v43  ;;  %18204 = vst [vmem:[#allocation27_spill] sm:$0xff] %v9393_v42  ;;  %v9421_v9 = vsel %vm231_vm0, %v292_v27, %v293_v51  ;;  %v297_v4 = vrot.slane %v9409_v8, 1  ;;  %v9483_v36 = vld [vmem:[%s17548_s0 + $0x1b8] sm:$0xff]  ;;  %vm584_vm1 = vcmask 1045504   ;;  %s8999_s20 = smov 12  }
  0x2c   :  { %v9416_v6 = vsel %vm231_vm0, %v293_v51, %v295_v50  ;;  %18206 = vst [vmem:[#allocation29_spill] sm:$0xff] %v9421_v9  ;;  %v9437_v50 = vld [vmem:[%s17548_s0 + $0x150] sm:$0xff]  ;;  %v303_v51 = vrot.slane %v9427_v60, 1  ;;  %18215 = vst [vmem:[#allocation38_spill] sm:$0xff] %v9511_v25  ;;  %s9000_s9 = smov 16   ;;  %s9001_s13 = smov 20  }
  0x2d   :  { %434 = vrot.lane.b32.xlu1 %v9360_v61, %s8997_s19  ;;  %18205 = vst [vmem:[#allocation28_spill] sm:$0xff] %v9416_v6  ;;  %v9449_v57 = vsel %vm231_vm0, %v297_v4, %v298_v21  ;;  %v302_v52 = vrot.slane %v9437_v50, 1  ;;  %s9002_s14 = smov 24   ;;  %s9003_s15 = smov 28   ;;  %vm2859_vm2 = vcmask 1043456   ;;  %vm2141_vm3 = vcmask 31744  }
  0x2e   :  { %432 = vrot.lane.b32.xlu0 %v9365_v13, %s8997_s19  ;;  %v9404_v13 = vld [vmem:[%s17548_s0 + $0x148] sm:$0x3]  ;;  %18208 = vst [vmem:[#allocation31_spill] sm:$0xff] %v9449_v57  ;;  %vm2206_vm4 = vcmask 64512   ;;  %vm2271_vm5 = vcmask 97280   ;;  %vm2336_vm6 = vcmask 130048  }
  0x2f   :  { %v300_v61 = vrot.slane %v9404_v13, 1  ;;  %v9477_v44 = vsel %vm231_vm0, %v302_v52, %v303_v51  ;;  %vm2401_vm7 = vcmask 162816   ;;  %vm2466_vm8 = vcmask 195584   ;;  %s9011_s30 = smov [#allocation3]  }
  0x30   :  { %18210 = vst [vmem:[#allocation33_spill] sm:$0xff] %v9477_v44  ;;  %vm2531_vm9 = vcmask 228352   ;;  %vm2596_vm10 = vcmask 261120   ;;  %vm2666_vm11 = vcmask 293888   ;;  %vm3795_vm12 = vcmask 58368   ;;  %s6969_s8 = sshll.u32 %s9011_s30, 4  ;;  %s6970_s8 = int_to_ptr.vmem [resolvable:$true] %s6969_s8 }
  0x31   :  { %438 = vrot.lane.b32.xlu1 %v9388_v43, %s8997_s19  ;;  %v9444_v27 = vsel %vm231_vm0, %v298_v21, %v300_v61  ;;  %v9465_v61 = vld [vmem:[%s17548_s0 + $0x168] sm:$0xff]  ;;  %v308_v21 = vrot.slane %v9455_v49, 1  ;;  %vm3807_vm13 = vcmask 57344   ;;  %vm6313_vm14 = vcmask 326656   ;;  %p8978_p1 = scmp.lt.s32.totalorder %s6970_s8, %s6970_s8 }
  0x32   :  { %436 = vrot.lane.b32.xlu0 %v9393_v42, %s8997_s19  ;;  %v9432_v42 = vld [vmem:[%s17548_s0 + $0x160] sm:$0x3]  ;;  %18207 = vst [vmem:[#allocation30_spill] sm:$0xff] %v9444_v27  ;;  %v307_v41 = vrot.slane %v9465_v61, 1  ;;  %vm6378_vm15 = vcmask 392192  }
  0x33   :  { %v305_v43 = vrot.slane %v9432_v42, 1 }
  0x34   :  { %v9505_v33 = vsel %vm231_vm0, %v307_v41, %v308_v21 }
  0x35   :  { %442 = vrot.lane.b32.xlu1 %v9416_v6, %s8997_s19  ;;  %v9472_v4 = vsel %vm231_vm0, %v303_v51, %v305_v43  ;;  %v9493_v43 = vld [vmem:[%s17548_s0 + $0x1b0] sm:$0xff]  ;;  %v313_v51 = vrot.slane %v9483_v36, 1  ;;  %18214 = vst [vmem:[#allocation37_spill] sm:$0xff] %v9505_v33 }
  0x36   :  { %440 = vrot.lane.b32.xlu0 %v9421_v9, %s8997_s19  ;;  %v9460_v9 = vld [vmem:[%s17548_s0 + $0x178] sm:$0x3]  ;;  %18209 = vst [vmem:[#allocation32_spill] sm:$0xff] %v9472_v4  ;;  %18212 = vst [vmem:[#allocation35_spill] sm:$0xff] %v9493_v43  ;;  %v312_v28 = vrot.slane %v9493_v43, 1  ;;  %v9535_v43 = vld [vmem:[%s17548_s0 + $0x1e8] sm:$0xff] }
  0x37   :  { %v310_v6 = vrot.slane %v9460_v9, 1  ;;  %18218 = vst [vmem:[#allocation41_spill] sm:$0xff] %v9535_v43 }
  0x38   :  { %v314_v12 = vsel %vm231_vm0, %v312_v28, %v313_v51 }
  0x39   :  { %446 = vrot.lane.b32.xlu1 %v9444_v27, %s8997_s19  ;;  %v9500_v52 = vsel %vm231_vm0, %v308_v21, %v310_v6  ;;  %v9521_v6 = vld [vmem:[%s17548_s0 + $0x1c8] sm:$0xff]  ;;  %v318_v21 = vrot.slane %v9511_v25, 1  ;;  %v9561_v25 = vld [vmem:[%s17548_s0 + $0x200] sm:$0xff] }
  0x3a   :  { %444 = vrot.lane.b32.xlu0 %v9449_v57, %s8997_s19  ;;  %v9488_v57 = vld [vmem:[%s17548_s0 + $0x1c0] sm:$0x3]  ;;  %18213 = vst [vmem:[#allocation36_spill] sm:$0xff] %v9500_v52  ;;  %18217 = vst [vmem:[#allocation40_spill] sm:$0xff] %v9521_v6  ;;  %v317_v17 = vrot.slane %v9521_v6, 1 }
  0x3b   :  { %18211 = vst [vmem:[#allocation34_spill] sm:$0xff] %v9488_v57  ;;  %v315_v27 = vrot.slane %v9488_v57, 1  ;;  %18223 = vst [vmem:[#allocation46_spill] sm:$0xff] %v9561_v25 }
  0x3c   :  { %v9555_v6 = vsel %vm231_vm0, %v317_v17, %v318_v21 }
  0x3d   :  { %450 = vrot.lane.b32.xlu1 %v9472_v4, %s8997_s19  ;;  %v316_v41 = vsel %vm231_vm0, %v313_v51, %v315_v27  ;;  %v9545_v27 = vld [vmem:[%s17548_s0 + $0x1e0] sm:$0xff]  ;;  %v323_v51 = vrot.slane %v9535_v43, 1  ;;  %18222 = vst [vmem:[#allocation45_spill] sm:$0xff] %v9555_v6  ;;  %v9589_v43 = vld [vmem:[%s17548_s0 + $0x218] sm:$0xff] }
  0x3e   :  { %448 = vrot.lane.b32.xlu0 %v9477_v44, %s8997_s19  ;;  %v9516_v44 = vld [vmem:[%s17548_s0 + $0x1d8] sm:$0x3]  ;;  %18220 = vst [vmem:[#allocation43_spill] sm:$0xff] %v9545_v27  ;;  %18228 = vst [vmem:[#allocation51_spill] sm:$0xff] %v9589_v43 }
  0x3f   :  { %18216 = vst [vmem:[#allocation39_spill] sm:$0xff] %v9516_v44  ;;  %v320_v4 = vrot.slane %v9516_v44, 1  ;;  %v322_v44 = vrot.slane %v9545_v27, 1 }
  0x41   :  { %454 = vrot.lane.b32.xlu1 %v9500_v52, %s8997_s19  ;;  %v9540_v52 = vld [vmem:[%s17548_s0 + $0x1f0] sm:$0x3]  ;;  %v9550_v28 = vsel %vm231_vm0, %v318_v21, %v320_v4  ;;  %v9571_v4 = vld [vmem:[%s17548_s0 + $0x1f8] sm:$0xff]  ;;  %v9583_v27 = vsel %vm231_vm0, %v322_v44, %v323_v51 }
  0x42   :  { %452 = vrot.lane.b32.xlu0 %v9505_v33, %s8997_s19  ;;  %18219 = vst [vmem:[#allocation42_spill] sm:$0xff] %v9540_v52  ;;  %18221 = vst [vmem:[#allocation44_spill] sm:$0xff] %v9550_v28  ;;  %v325_v33 = vrot.slane %v9540_v52, 1  ;;  %v327_v52 = vrot.slane %v9571_v4, 1 }
  0x43   :  { %18225 = vst [vmem:[#allocation48_spill] sm:$0xff] %v9571_v4  ;;  %18227 = vst [vmem:[#allocation50_spill] sm:$0xff] %v9583_v27 }
  0x44   :  { %v9578_v17 = vsel %vm231_vm0, %v323_v51, %v325_v33  ;;  %v9599_v33 = vld [vmem:[%s17548_s0 + $0x210] sm:$0xff]  ;;  %v333_v51 = vrot.slane %v9589_v43, 1  ;;  %v9645_v43 = vld [vmem:[%s17548_s0 + $0x248] sm:$0xff] }
  0x45   :  { %458 = vrot.lane.b32.xlu1 %v316_v41, %s8997_s19  ;;  %18226 = vst [vmem:[#allocation49_spill] sm:$0xff] %v9578_v17  ;;  %v328_v41 = vrot.slane %v9561_v25, 1  ;;  %18230 = vst [vmem:[#allocation53_spill] sm:$0xff] %v9599_v33  ;;  %v9617_v25 = vld [vmem:[%s17548_s0 + $0x230] sm:$0xff] }
  0x46   :  { %456 = vrot.lane.b32.xlu0 %v314_v12, %s8997_s19  ;;  %v9566_v12 = vld [vmem:[%s17548_s0 + $0x208] sm:$0x3]  ;;  %18233 = vst [vmem:[#allocation56_spill] sm:$0xff] %v9617_v25  ;;  %18238 = vst [vmem:[#allocation61_spill] sm:$0xff] %v9645_v43 }
  0x47   :  { %18224 = vst [vmem:[#allocation47_spill] sm:$0xff] %v9566_v12  ;;  %v330_v21 = vrot.slane %v9566_v12, 1  ;;  %v9611_v4 = vsel %vm231_vm0, %v327_v52, %v328_v41  ;;  %v332_v12 = vrot.slane %v9599_v33, 1 }
  0x48   :  { %18232 = vst [vmem:[#allocation55_spill] sm:$0xff] %v9611_v4 }
  0x49   :  { %462 = vrot.lane.b32.xlu1 %v9550_v28, %s8997_s19  ;;  %v9606_v44 = vsel %vm231_vm0, %v328_v41, %v330_v21  ;;  %v9627_v21 = vld [vmem:[%s17548_s0 + $0x228] sm:$0xff]  ;;  %v338_v41 = vrot.slane %v9617_v25, 1  ;;  %v9639_v33 = vsel %vm231_vm0, %v332_v12, %v333_v51  ;;  %v9673_v25 = vld [vmem:[%s17548_s0 + $0x260] sm:$0xff] }
  0x4a   :  { %460 = vrot.lane.b32.xlu0 %v9555_v6, %s8997_s19  ;;  %v9594_v6 = vld [vmem:[%s17548_s0 + $0x220] sm:$0x3]  ;;  %18231 = vst [vmem:[#allocation54_spill] sm:$0xff] %v9606_v44  ;;  %18235 = vst [vmem:[#allocation58_spill] sm:$0xff] %v9627_v21 }
  0x4b   :  { %18229 = vst [vmem:[#allocation52_spill] sm:$0xff] %v9594_v6  ;;  %v335_v28 = vrot.slane %v9594_v6, 1  ;;  %18237 = vst [vmem:[#allocation60_spill] sm:$0xff] %v9639_v33  ;;  %v337_v6 = vrot.slane %v9627_v21, 1 }
  0x4c   :  { %18243 = vst [vmem:[#allocation66_spill] sm:$0xff] %v9673_v25 }
  0x4d   :  { %466 = vrot.lane.b32.xlu1 %v9578_v17, %s8997_s19  ;;  %v9634_v52 = vsel %vm231_vm0, %v333_v51, %v335_v28  ;;  %v9655_v28 = vld [vmem:[%s17548_s0 + $0x240] sm:$0xff]  ;;  %v343_v51 = vrot.slane %v9645_v43, 1  ;;  %v9667_v21 = vsel %vm231_vm0, %v337_v6, %v338_v41  ;;  %v9701_v43 = vld [vmem:[%s17548_s0 + $0x278] sm:$0xff] }
  0x4e   :  { %464 = vrot.lane.b32.xlu0 %v9583_v27, %s8997_s19  ;;  %v9622_v27 = vld [vmem:[%s17548_s0 + $0x238] sm:$0x3]  ;;  %18236 = vst [vmem:[#allocation59_spill] sm:$0xff] %v9634_v52  ;;  %18240 = vst [vmem:[#allocation63_spill] sm:$0xff] %v9655_v28 }
  0x4f   :  { %18234 = vst [vmem:[#allocation57_spill] sm:$0xff] %v9622_v27  ;;  %v340_v17 = vrot.slane %v9622_v27, 1  ;;  %18242 = vst [vmem:[#allocation65_spill] sm:$0xff] %v9667_v21  ;;  %v342_v27 = vrot.slane %v9655_v28, 1 }
  0x50   :  { %18248 = vst [vmem:[#allocation71_spill] sm:$0xff] %v9701_v43 }
  0x51   :  { %470 = vrot.lane.b32.xlu1 %v9606_v44, %s8997_s19  ;;  %v9662_v12 = vsel %vm231_vm0, %v338_v41, %v340_v17  ;;  %v9683_v17 = vld [vmem:[%s17548_s0 + $0x258] sm:$0xff]  ;;  %v348_v41 = vrot.slane %v9673_v25, 1  ;;  %v9695_v28 = vsel %vm231_vm0, %v342_v27, %v343_v51  ;;  %v9729_v25 = vld [vmem:[%s17548_s0 + $0x290] sm:$0xff] }
  0x52   :  { %468 = vrot.lane.b32.xlu0 %v9611_v4, %s8997_s19  ;;  %v9650_v4 = vld [vmem:[%s17548_s0 + $0x250] sm:$0x3]  ;;  %18241 = vst [vmem:[#allocation64_spill] sm:$0xff] %v9662_v12  ;;  %18245 = vst [vmem:[#allocation68_spill] sm:$0xff] %v9683_v17 }
  0x53   :  { %18239 = vst [vmem:[#allocation62_spill] sm:$0xff] %v9650_v4  ;;  %v345_v44 = vrot.slane %v9650_v4, 1  ;;  %18247 = vst [vmem:[#allocation70_spill] sm:$0xff] %v9695_v28  ;;  %v347_v4 = vrot.slane %v9683_v17, 1 }
  0x54   :  { %18253 = vst [vmem:[#allocation76_spill] sm:$0xff] %v9729_v25 }
  0x55   :  { %474 = vrot.lane.b32.xlu1 %v9634_v52, %s8997_s19  ;;  %v9690_v6 = vsel %vm231_vm0, %v343_v51, %v345_v44  ;;  %v9711_v44 = vld [vmem:[%s17548_s0 + $0x270] sm:$0xff]  ;;  %v353_v51 = vrot.slane %v9701_v43, 1  ;;  %v9723_v17 = vsel %vm231_vm0, %v347_v4, %v348_v41  ;;  %v9757_v43 = vld [vmem:[%s17548_s0 + $0x2a8] sm:$0xff] }
  0x56   :  { %472 = vrot.lane.b32.xlu0 %v9639_v33, %s8997_s19  ;;  %v9678_v33 = vld [vmem:[%s17548_s0 + $0x268] sm:$0x3]  ;;  %18246 = vst [vmem:[#allocation69_spill] sm:$0xff] %v9690_v6  ;;  %18250 = vst [vmem:[#allocation73_spill] sm:$0xff] %v9711_v44 }
  0x57   :  { %18244 = vst [vmem:[#allocation67_spill] sm:$0xff] %v9678_v33  ;;  %v350_v52 = vrot.slane %v9678_v33, 1  ;;  %18252 = vst [vmem:[#allocation75_spill] sm:$0xff] %v9723_v17  ;;  %v352_v33 = vrot.slane %v9711_v44, 1 }
  0x58   :  { %18258 = vst [vmem:[#allocation81_spill] sm:$0xff] %v9757_v43 }
  0x59   :  { %478 = vrot.lane.b32.xlu1 %v9662_v12, %s8997_s19  ;;  %v9718_v27 = vsel %vm231_vm0, %v348_v41, %v350_v52  ;;  %v9739_v52 = vld [vmem:[%s17548_s0 + $0x288] sm:$0xff]  ;;  %v358_v41 = vrot.slane %v9729_v25, 1  ;;  %v9751_v44 = vsel %vm231_vm0, %v352_v33, %v353_v51  ;;  %v9785_v25 = vld [vmem:[%s17548_s0 + $0x2c0] sm:$0xff] }
  0x5a   :  { %476 = vrot.lane.b32.xlu0 %v9667_v21, %s8997_s19  ;;  %v9706_v21 = vld [vmem:[%s17548_s0 + $0x280] sm:$0x3]  ;;  %18251 = vst [vmem:[#allocation74_spill] sm:$0xff] %v9718_v27  ;;  %18255 = vst [vmem:[#allocation78_spill] sm:$0xff] %v9739_v52 }
  0x5b   :  { %18249 = vst [vmem:[#allocation72_spill] sm:$0xff] %v9706_v21  ;;  %v355_v12 = vrot.slane %v9706_v21, 1  ;;  %18257 = vst [vmem:[#allocation80_spill] sm:$0xff] %v9751_v44  ;;  %v357_v21 = vrot.slane %v9739_v52, 1 }
  0x5c   :  { %18263 = vst [vmem:[#allocation86_spill] sm:$0xff] %v9785_v25 }
  0x5d   :  { %482 = vrot.lane.b32.xlu1 %v9690_v6, %s8997_s19  ;;  %v9746_v4 = vsel %vm231_vm0, %v353_v51, %v355_v12  ;;  %v9767_v12 = vld [vmem:[%s17548_s0 + $0x2a0] sm:$0xff]  ;;  %v363_v51 = vrot.slane %v9757_v43, 1  ;;  %v9779_v52 = vsel %vm231_vm0, %v357_v21, %v358_v41  ;;  %v9813_v43 = vld [vmem:[%s17548_s0 + $0x2d8] sm:$0xff] }
  0x5e   :  { %480 = vrot.lane.b32.xlu0 %v9695_v28, %s8997_s19  ;;  %v9734_v28 = vld [vmem:[%s17548_s0 + $0x298] sm:$0x3]  ;;  %18256 = vst [vmem:[#allocation79_spill] sm:$0xff] %v9746_v4  ;;  %18260 = vst [vmem:[#allocation83_spill] sm:$0xff] %v9767_v12 }
  0x5f   :  { %18254 = vst [vmem:[#allocation77_spill] sm:$0xff] %v9734_v28  ;;  %v360_v6 = vrot.slane %v9734_v28, 1  ;;  %18262 = vst [vmem:[#allocation85_spill] sm:$0xff] %v9779_v52  ;;  %v362_v28 = vrot.slane %v9767_v12, 1 }
  0x60   :  { %18268 = vst [vmem:[#allocation91_spill] sm:$0xff] %v9813_v43 }
  0x61   :  { %486 = vrot.lane.b32.xlu1 %v9718_v27, %s8997_s19  ;;  %v9774_v33 = vsel %vm231_vm0, %v358_v41, %v360_v6  ;;  %v9795_v6 = vld [vmem:[%s17548_s0 + $0x2b8] sm:$0xff]  ;;  %v368_v41 = vrot.slane %v9785_v25, 1  ;;  %v9807_v12 = vsel %vm231_vm0, %v362_v28, %v363_v51  ;;  %v9841_v25 = vld [vmem:[%s17548_s0 + $0x2f0] sm:$0xff] }
  0x62   :  { %484 = vrot.lane.b32.xlu0 %v9723_v17, %s8997_s19  ;;  %v9762_v17 = vld [vmem:[%s17548_s0 + $0x2b0] sm:$0x3]  ;;  %18261 = vst [vmem:[#allocation84_spill] sm:$0xff] %v9774_v33  ;;  %18265 = vst [vmem:[#allocation88_spill] sm:$0xff] %v9795_v6 }
  0x63   :  { %18259 = vst [vmem:[#allocation82_spill] sm:$0xff] %v9762_v17  ;;  %v365_v27 = vrot.slane %v9762_v17, 1  ;;  %18267 = vst [vmem:[#allocation90_spill] sm:$0xff] %v9807_v12  ;;  %v367_v17 = vrot.slane %v9795_v6, 1 }
  0x64   :  { %18273 = vst [vmem:[#allocation96_spill] sm:$0xff] %v9841_v25 }
  0x65   :  { %490 = vrot.lane.b32.xlu1 %v9746_v4, %s8997_s19  ;;  %v9802_v21 = vsel %vm231_vm0, %v363_v51, %v365_v27  ;;  %v9823_v27 = vld [vmem:[%s17548_s0 + $0x2d0] sm:$0xff]  ;;  %v373_v51 = vrot.slane %v9813_v43, 1  ;;  %v9835_v6 = vsel %vm231_vm0, %v367_v17, %v368_v41  ;;  %v9869_v43 = vld [vmem:[%s17548_s0 + $0x308] sm:$0xff] }
  0x66   :  { %488 = vrot.lane.b32.xlu0 %v9751_v44, %s8997_s19  ;;  %v9790_v44 = vld [vmem:[%s17548_s0 + $0x2c8] sm:$0x3]  ;;  %18266 = vst [vmem:[#allocation89_spill] sm:$0xff] %v9802_v21  ;;  %18270 = vst [vmem:[#allocation93_spill] sm:$0xff] %v9823_v27 }
  0x67   :  { %18264 = vst [vmem:[#allocation87_spill] sm:$0xff] %v9790_v44  ;;  %v370_v4 = vrot.slane %v9790_v44, 1  ;;  %18272 = vst [vmem:[#allocation95_spill] sm:$0xff] %v9835_v6  ;;  %v372_v44 = vrot.slane %v9823_v27, 1 }
  0x68   :  { %18278 = vst [vmem:[#allocation101_spill] sm:$0xff] %v9869_v43 }
  0x69   :  { %494 = vrot.lane.b32.xlu1 %v9774_v33, %s8997_s19  ;;  %v9830_v28 = vsel %vm231_vm0, %v368_v41, %v370_v4  ;;  %v9851_v4 = vld [vmem:[%s17548_s0 + $0x2e8] sm:$0xff]  ;;  %v378_v41 = vrot.slane %v9841_v25, 1  ;;  %v9863_v27 = vsel %vm231_vm0, %v372_v44, %v373_v51 }
  0x6a   :  { %492 = vrot.lane.b32.xlu0 %v9779_v52, %s8997_s19  ;;  %v9818_v52 = vld [vmem:[%s17548_s0 + $0x2e0] sm:$0x3]  ;;  %18271 = vst [vmem:[#allocation94_spill] sm:$0xff] %v9830_v28  ;;  %18275 = vst [vmem:[#allocation98_spill] sm:$0xff] %v9851_v4 }
  0x6b   :  { %18269 = vst [vmem:[#allocation92_spill] sm:$0xff] %v9818_v52  ;;  %v375_v33 = vrot.slane %v9818_v52, 1  ;;  %18277 = vst [vmem:[#allocation100_spill] sm:$0xff] %v9863_v27  ;;  %v377_v52 = vrot.slane %v9851_v4, 1 }
  0x6d   :  { %498 = vrot.lane.b32.xlu1 %v9802_v21, %s8997_s19  ;;  %v9858_v17 = vsel %vm231_vm0, %v373_v51, %v375_v33  ;;  %v9879_v33 = vld [vmem:[%s17548_s0 + $0x300] sm:$0xff]  ;;  %v383_v51 = vrot.slane %v9869_v43, 1 }
  0x6e   :  { %496 = vrot.lane.b32.xlu0 %v9807_v12, %s8997_s19  ;;  %v9846_v12 = vld [vmem:[%s17548_s0 + $0x2f8] sm:$0x3]  ;;  %18276 = vst [vmem:[#allocation99_spill] sm:$0xff] %v9858_v17  ;;  %18280 = vst [vmem:[#allocation103_spill] sm:$0xff] %v9879_v33  ;;  %v382_v25 = vrot.slane %v9879_v33, 1 }
  0x6f   :  { %18274 = vst [vmem:[#allocation97_spill] sm:$0xff] %v9846_v12  ;;  %v380_v21 = vrot.slane %v9846_v12, 1  ;;  %v9893_v12 = vsel %vm231_vm0, %v377_v52, %v378_v41 }
  0x70   :  { %18283 = vst [vmem:[#allocation106_spill] sm:$0xff] %v9893_v12 }
  0x71   :  { %502 = vrot.lane.b32.xlu1 %v9830_v28, %s8997_s19  ;;  %v9886_v44 = vsel %vm231_vm0, %v378_v41, %v380_v21  ;;  %v9904_v21 = vld [vmem:[%s17548_s0 + $0x328] sm:$0x3] }
  0x72   :  { %500 = vrot.lane.b32.xlu0 %v9835_v6, %s8997_s19  ;;  %v9874_v6 = vld [vmem:[%s17548_s0 + $0x310] sm:$0x3]  ;;  %18281 = vst [vmem:[#allocation104_spill] sm:$0xff] %v9886_v44  ;;  %v390_v33 = vrot.slane %v9904_v21, 1 }
  0x73   :  { %18279 = vst [vmem:[#allocation102_spill] sm:$0xff] %v9874_v6  ;;  %v385_v28 = vrot.slane %v9874_v6, 1 }
  0x75   :  { %506 = vrot.lane.b32.xlu1 %v9858_v17, %s8997_s19  ;;  %v9899_v17 = vld [vmem:[%s17548_s0 + $0x320] sm:$0xff]  ;;  %v9918_v52 = vsel %vm231_vm0, %v383_v51, %v385_v28 }
  0x76   :  { %504 = vrot.lane.b32.xlu0 %v9863_v27, %s8997_s19  ;;  %18285 = vst [vmem:[#allocation108_spill] sm:$0xff] %v9918_v52  ;;  %v388_v41 = vrot.slane %v9899_v17, 1 }
  0x77   :  { %v9890_v4 = vpop.permute.xlu1 %396 }
  0x78   :  { %18282 = vst [vmem:[#allocation105_spill] sm:$0xff] %v9890_v4  ;;  %v9906_v27 = vpop.permute.xlu0 %392  ;;  %v9911_v4 = vld [vmem:[%s17548_s0 + $0x318] sm:$0xff]  ;;  %v9935_v28 = vsel %vm231_vm0, %v388_v41, %v390_v33  ;;  %v593_v33 = vrot.slane %v9078_v7, 2  ;;  %v598_v7 = vrot.slane %v9099_v14, 2  ;;  %v603_v14 = vrot.slane %v9125_v23, 2 }
  0x79   :  { %18284 = vst [vmem:[#allocation107_spill] sm:$0xff] %v9906_v27  ;;  %510 = vrot.lane.b32.xlu1 %v9886_v44, %s8997_s19  ;;  %v9925_v27 = vsel %vm231_vm0, %v382_v25, %v383_v51  ;;  %v387_v43 = vrot.slane %v9911_v4, 1  ;;  %v585_v51 = vrot.slane %v9065_v2, 2  ;;  %v590_v2 = vrot.slane %v9055_v0, 2 }
  0x7a   :  { %508 = vrot.lane.b32.xlu0 %v9893_v12, %s8997_s19  ;;  %18287 = vst [vmem:[#allocation110_spill] sm:$0xff] %v9925_v27  ;;  %v586_v12 = vrot.slane %v9072_v5, 2  ;;  %v595_v0 = vrot.slane %v9104_v15, 2  ;;  %v600_v15 = vrot.slane %v9130_v24, 2  ;;  %v608_v23 = vrot.slane %v9152_v31, 2 }
  0x7b   :  { %v9922_v6 = vpop.permute.xlu1 %398  ;;  %v9942_v25 = vsel %vm231_vm0, %v387_v43, %v388_v41  ;;  %v605_v24 = vrot.slane %v9157_v32, 2  ;;  %v613_v31 = vrot.slane %v9180_v39, 2  ;;  %v610_v32 = vrot.slane %v9185_v40, 2 }
  0x7c   :  { %18286 = vst [vmem:[#allocation109_spill] sm:$0xff] %v9922_v6  ;;  %v9928_v57 = vpop.permute.xlu0 %394  ;;  %v588_v6 = vrot.slane %v9085_v10, 2  ;;  %v591_v10 = vrot.slane %v9060_v1, 2  ;;  %v587_v43 = vsel %vm584_vm1, %v585_v51, %v586_v12  ;;  %v596_v1 = vrot.slane %v9090_v11, 2 }
  0x7d   :  { %18288 = vst [vmem:[#allocation111_spill] sm:$0xff] %v9928_v57  ;;  %514 = vrot.lane.b32.xlu1 %v9918_v52, %s8997_s19  ;;  %v601_v11 = vrot.slane %v9120_v22, 2  ;;  %v606_v22 = vrot.slane %v9147_v30, 2  ;;  %v611_v30 = vrot.slane %v9175_v38, 2  ;;  %v616_v38 = vrot.slane %v9203_v46, 2 }
  0x7e   :  { %512 = vrot.lane.b32.xlu0 %v9925_v27, %s8997_s19  ;;  %v589_v5 = vsel %vm584_vm1, %v586_v12, %v588_v6  ;;  %v9970_v12 = vsel %vm584_vm1, %v590_v2, %v591_v10  ;;  %v618_v39 = vrot.slane %v9208_v47, 2  ;;  %v615_v40 = vrot.slane %v9213_v48, 2 }
  0x7f   :  { %v9939_v44 = vpop.permute.xlu1 %402  ;;  %v9997_v2 = vsel %vm584_vm1, %v601_v11, %v603_v14  ;;  %v10014_v14 = vsel %vm584_vm1, %v606_v22, %v608_v23  ;;  %v10031_v23 = vsel %vm584_vm1, %v611_v30, %v613_v31  ;;  %v621_v46 = vrot.slane %v9231_v54, 2 }
  0x80   :  { %18289 = vst [vmem:[#allocation112_spill] sm:$0xff] %v9939_v44  ;;  %v9945_v57 = vpop.permute.xlu0 %400  ;;  %v10048_v31 = vsel %vm584_vm1, %v616_v38, %v618_v39  ;;  %v623_v47 = vrot.slane %v9236_v55, 2  ;;  %v620_v48 = vrot.slane %v9241_v56, 2  ;;  %v626_v54 = vrot.slane %v9259_v62, 2 }
  0x81   :  { %18290 = vst [vmem:[#allocation113_spill] sm:$0xff] %v9945_v57  ;;  %518 = vrot.lane.b32.xlu1 %v9935_v28, %s8997_s19  ;;  %v9963_v57 = vsel %vm584_vm1, %v591_v10, %v593_v33  ;;  %v9987_v10 = vsel %vm584_vm1, %v595_v0, %v596_v1  ;;  %v628_v55 = vrot.slane %v9264_v63, 2  ;;  %v625_v56 = vrot.slane %v9269_v3, 2 }
  0x82   :  { %516 = vrot.lane.b32.xlu0 %v9942_v25, %s8997_s19  ;;  %v10065_v39 = vsel %vm584_vm1, %v621_v46, %v623_v47  ;;  %v631_v62 = vrot.slane %v9287_v16, 2  ;;  %v633_v63 = vrot.slane %v9292_v18, 2  ;;  %v630_v3 = vrot.slane %v9297_v19, 2 }
  0x83   :  { %v9954_v44 = vpop.permute.xlu1 %406  ;;  %v10082_v47 = vsel %vm584_vm1, %v626_v54, %v628_v55  ;;  %v636_v16 = vrot.slane %v9315_v34, 2  ;;  %v638_v18 = vrot.slane %v9320_v35, 2  ;;  %v635_v19 = vrot.slane %v9325_v37, 2 }
  0x84   :  { %18291 = vst [vmem:[#allocation114_spill] sm:$0xff] %v9954_v44  ;;  %v9958_v41 = vpop.permute.xlu0 %404  ;;  %v10099_v55 = vsel %vm584_vm1, %v631_v62, %v633_v63  ;;  %v641_v34 = vrot.slane %v9343_v53, 2  ;;  %v643_v35 = vrot.slane %v9348_v58, 2  ;;  %v640_v37 = vrot.slane %v9353_v59, 2 }
  0x85   :  { %18292 = vst [vmem:[#allocation115_spill] sm:$0xff] %v9958_v41  ;;  %747 = vrot.lane.b32.xlu1 %v589_v5, %s8998_s17  ;;  %v9980_v5 = vsel %vm584_vm1, %v596_v1, %v598_v7  ;;  %v10004_v1 = vsel %vm584_vm1, %v600_v15, %v601_v11  ;;  %v10021_v11 = vsel %vm584_vm1, %v605_v24, %v606_v22  ;;  %v646_v53 = vrot.slane %v9371_v26, 2 }
  0x86   :  { %745 = vrot.lane.b32.xlu0 %v587_v43, %s8998_s17  ;;  %v10038_v22 = vsel %vm584_vm1, %v610_v32, %v611_v30  ;;  %v10055_v30 = vsel %vm584_vm1, %v615_v40, %v616_v38  ;;  %v10072_v38 = vsel %vm584_vm1, %v620_v48, %v621_v46  ;;  %v10089_v46 = vsel %vm584_vm1, %v625_v56, %v626_v54 }
  0x87   :  { %v9967_v6 = vpop.permute.xlu1 %410  ;;  %v10106_v54 = vsel %vm584_vm1, %v630_v3, %v631_v62  ;;  %v10116_v63 = vsel %vm584_vm1, %v636_v16, %v638_v18  ;;  %v10123_v62 = vsel %vm584_vm1, %v635_v19, %v636_v16  ;;  %v10133_v18 = vsel %vm584_vm1, %v641_v34, %v643_v35 }
  0x88   :  { %18293 = vst [vmem:[#allocation116_spill] sm:$0xff] %v9967_v6  ;;  %v9973_v51 = vpop.permute.xlu0 %408  ;;  %18312 = vst [vmem:[#allocation135_spill] sm:$0xff] %v10123_v62  ;;  %v648_v58 = vrot.slane %v9376_v29, 2  ;;  %v10140_v16 = vsel %vm584_vm1, %v640_v37, %v641_v34  ;;  %v645_v59 = vrot.slane %v9381_v45, 2  ;;  %v651_v26 = vrot.slane %v9399_v20, 2  ;;  %v18371_v6 = vld [vmem:[#allocation62_spill] sm:$0xff] }
  0x89   :  { %18294 = vst [vmem:[#allocation117_spill] sm:$0xff] %v9973_v51  ;;  %751 = vrot.lane.b32.xlu1 %v9963_v57, %s8998_s17  ;;  %18314 = vst [vmem:[#allocation137_spill] sm:$0xff] %v10133_v18  ;;  %v653_v29 = vrot.slane %v9404_v13, 2  ;;  %v650_v45 = vrot.slane %v9409_v8, 2  ;;  %v656_v20 = vrot.slane %v9427_v60, 2  ;;  %v658_v13 = vrot.slane %v9432_v42, 2 }
  0x8a   :  { %749 = vrot.lane.b32.xlu0 %v9970_v12, %s8998_s17  ;;  %18316 = vst [vmem:[#allocation139_spill] sm:$0xff] %v10140_v16  ;;  %v10150_v35 = vsel %vm584_vm1, %v646_v53, %v648_v58  ;;  %v10157_v34 = vsel %vm584_vm1, %v645_v59, %v646_v53  ;;  %v655_v8 = vrot.slane %v9437_v50, 2  ;;  %v661_v60 = vrot.slane %v9455_v49, 2  ;;  %v18370_v51 = vld [vmem:[#allocation61_spill] sm:$0xff] }
  0x8b   :  { %v9984_v33 = vpop.permute.xlu1 %414  ;;  %18318 = vst [vmem:[#allocation141_spill] sm:$0xff] %v10150_v35  ;;  %18320 = vst [vmem:[#allocation143_spill] sm:$0xff] %v10157_v34  ;;  %v10167_v58 = vsel %vm584_vm1, %v651_v26, %v653_v29  ;;  %v10174_v53 = vsel %vm584_vm1, %v650_v45, %v651_v26  ;;  %v10184_v29 = vsel %vm584_vm1, %v656_v20, %v658_v13  ;;  %v663_v42 = vrot.slane %v9460_v9, 2  ;;  %v18331_v9 = vld [vmem:[#allocation34_spill] sm:$0xff] }
  0x8c   :  { %18295 = vst [vmem:[#allocation118_spill] sm:$0xff] %v9984_v33  ;;  %v9990_v43 = vpop.permute.xlu0 %412  ;;  %18322 = vst [vmem:[#allocation145_spill] sm:$0xff] %v10167_v58  ;;  %v10191_v26 = vsel %vm584_vm1, %v655_v8, %v656_v20  ;;  %v660_v50 = vrot.slane %v9465_v61, 2  ;;  %v666_v49 = vrot.slane %v9483_v36, 2  ;;  %v18334_v61 = vld [vmem:[#allocation35_spill] sm:$0xff]  ;;  %v18336_v36 = vld [vmem:[#allocation38_spill] sm:$0xff] }
  0x8d   :  { %18296 = vst [vmem:[#allocation119_spill] sm:$0xff] %v9990_v43  ;;  %755 = vrot.lane.b32.xlu1 %v9980_v5, %s8998_s17  ;;  %18324 = vst [vmem:[#allocation147_spill] sm:$0xff] %v10174_v53  ;;  %v10201_v13 = vsel %vm584_vm1, %v661_v60, %v663_v42  ;;  %v665_v8 = vrot.slane %v18334_v61, 2 }
  0x8e   :  { %753 = vrot.lane.b32.xlu0 %v9987_v10, %s8998_s17  ;;  %18326 = vst [vmem:[#allocation149_spill] sm:$0xff] %v10184_v29  ;;  %18328 = vst [vmem:[#allocation151_spill] sm:$0xff] %v10191_v26  ;;  %v10208_v20 = vsel %vm584_vm1, %v660_v50, %v661_v60  ;;  %v18339_v50 = vld [vmem:[#allocation40_spill] sm:$0xff] }
  0x8f   :  { %v10001_v7 = vpop.permute.xlu1 %418  ;;  %18330 = vst [vmem:[#allocation153_spill] sm:$0xff] %v10201_v13  ;;  %18333 = vst [vmem:[#allocation154_spill] sm:$0xff] %v10208_v20  ;;  %v667_v60 = vsel %vm584_vm1, %v665_v8, %v666_v49  ;;  %v670_v61 = vrot.slane %v18339_v50, 2 }
  0x90   :  { %18297 = vst [vmem:[#allocation120_spill] sm:$0xff] %v10001_v7  ;;  %v10007_v0 = vpop.permute.xlu0 %416 }
  0x91   :  { %18298 = vst [vmem:[#allocation121_spill] sm:$0xff] %v10007_v0  ;;  %759 = vrot.lane.b32.xlu1 %v9997_v2, %s8998_s17  ;;  %v18364_v0 = vld [vmem:[#allocation57_spill] sm:$0xff] }
  0x92   :  { %757 = vrot.lane.b32.xlu0 %v10004_v1, %s8998_s17 }
  0x93   :  { %v10018_v7 = vpop.permute.xlu1 %422 }
  0x94   :  { %18299 = vst [vmem:[#allocation122_spill] sm:$0xff] %v10018_v7  ;;  %v10024_v15 = vpop.permute.xlu0 %420 }
  0x95   :  { %18300 = vst [vmem:[#allocation123_spill] sm:$0xff] %v10024_v15  ;;  %763 = vrot.lane.b32.xlu1 %v10014_v14, %s8998_s17  ;;  %v18363_v15 = vld [vmem:[#allocation56_spill] sm:$0xff] }
  0x96   :  { %761 = vrot.lane.b32.xlu0 %v10021_v11, %s8998_s17 }
  0x97   :  { %v10035_v7 = vpop.permute.xlu1 %426 }
  0x98   :  { %18301 = vst [vmem:[#allocation124_spill] sm:$0xff] %v10035_v7  ;;  %v10041_v24 = vpop.permute.xlu0 %424 }
  0x99   :  { %18302 = vst [vmem:[#allocation125_spill] sm:$0xff] %v10041_v24  ;;  %767 = vrot.lane.b32.xlu1 %v10031_v23, %s8998_s17 }
  0x9a   :  { %765 = vrot.lane.b32.xlu0 %v10038_v22, %s8998_s17 }
  0x9b   :  { %v10052_v7 = vpop.permute.xlu1 %430 }
  0x9c   :  { %18303 = vst [vmem:[#allocation126_spill] sm:$0xff] %v10052_v7  ;;  %v10058_v32 = vpop.permute.xlu0 %428 }
  0x9d   :  { %18304 = vst [vmem:[#allocation127_spill] sm:$0xff] %v10058_v32  ;;  %771 = vrot.lane.b32.xlu1 %v10048_v31, %s8998_s17 }
  0x9e   :  { %769 = vrot.lane.b32.xlu0 %v10055_v30, %s8998_s17 }
  0x9f   :  { %v10069_v7 = vpop.permute.xlu1 %434 }
  0xa0   :  { %18305 = vst [vmem:[#allocation128_spill] sm:$0xff] %v10069_v7  ;;  %v10075_v40 = vpop.permute.xlu0 %432 }
  0xa1   :  { %18306 = vst [vmem:[#allocation129_spill] sm:$0xff] %v10075_v40  ;;  %775 = vrot.lane.b32.xlu1 %v10065_v39, %s8998_s17  ;;  %v18357_v40 = vld [vmem:[#allocation52_spill] sm:$0xff] }
  0xa2   :  { %773 = vrot.lane.b32.xlu0 %v10072_v38, %s8998_s17 }
  0xa3   :  { %v10086_v7 = vpop.permute.xlu1 %438 }
  0xa4   :  { %18307 = vst [vmem:[#allocation130_spill] sm:$0xff] %v10086_v7  ;;  %v10092_v48 = vpop.permute.xlu0 %436 }
  0xa5   :  { %18308 = vst [vmem:[#allocation131_spill] sm:$0xff] %v10092_v48  ;;  %779 = vrot.lane.b32.xlu1 %v10082_v47, %s8998_s17 }
  0xa6   :  { %777 = vrot.lane.b32.xlu0 %v10089_v46, %s8998_s17 }
  0xa7   :  { %v10103_v7 = vpop.permute.xlu1 %442 }
  0xa8   :  { %18309 = vst [vmem:[#allocation132_spill] sm:$0xff] %v10103_v7  ;;  %v10109_v56 = vpop.permute.xlu0 %440 }
  0xa9   :  { %18310 = vst [vmem:[#allocation133_spill] sm:$0xff] %v10109_v56  ;;  %783 = vrot.lane.b32.xlu1 %v10099_v55, %s8998_s17 }
  0xaa   :  { %781 = vrot.lane.b32.xlu0 %v10106_v54, %s8998_s17 }
  0xab   :  { %v10120_v7 = vpop.permute.xlu1 %446 }
  0xac   :  { %18311 = vst [vmem:[#allocation134_spill] sm:$0xff] %v10120_v7  ;;  %v10126_v3 = vpop.permute.xlu0 %444 }
  0xad   :  { %18313 = vst [vmem:[#allocation136_spill] sm:$0xff] %v10126_v3  ;;  %787 = vrot.lane.b32.xlu1 %v10116_v63, %s8998_s17 }
  0xae   :  { %785 = vrot.lane.b32.xlu0 %v10123_v62, %s8998_s17 }
  0xaf   :  { %v10137_v7 = vpop.permute.xlu1 %450 }
  0xb0   :  { %18315 = vst [vmem:[#allocation138_spill] sm:$0xff] %v10137_v7  ;;  %v10143_v19 = vpop.permute.xlu0 %448 }
  0xb1   :  { %18317 = vst [vmem:[#allocation140_spill] sm:$0xff] %v10143_v19  ;;  %791 = vrot.lane.b32.xlu1 %v10133_v18, %s8998_s17 }
  0xb2   :  { %789 = vrot.lane.b32.xlu0 %v10140_v16, %s8998_s17 }
  0xb3   :  { %v10154_v7 = vpop.permute.xlu1 %454 }
  0xb4   :  { %18319 = vst [vmem:[#allocation142_spill] sm:$0xff] %v10154_v7  ;;  %v10160_v37 = vpop.permute.xlu0 %452 }
  0xb5   :  { %18321 = vst [vmem:[#allocation144_spill] sm:$0xff] %v10160_v37  ;;  %795 = vrot.lane.b32.xlu1 %v10150_v35, %s8998_s17  ;;  %v671_v37 = vrot.slane %v18336_v36, 2  ;;  %v18343_v36 = vld [vmem:[#allocation42_spill] sm:$0xff] }
  0xb6   :  { %793 = vrot.lane.b32.xlu0 %v10157_v34, %s8998_s17  ;;  %v678_v48 = vrot.slane %v18343_v36, 2 }
  0xb7   :  { %v10171_v7 = vpop.permute.xlu1 %458 }
  0xb8   :  { %18323 = vst [vmem:[#allocation146_spill] sm:$0xff] %v10171_v7  ;;  %v10177_v59 = vpop.permute.xlu0 %456 }
  0xb9   :  { %18325 = vst [vmem:[#allocation148_spill] sm:$0xff] %v10177_v59  ;;  %799 = vrot.lane.b32.xlu1 %v10167_v58, %s8998_s17 }
  0xba   :  { %797 = vrot.lane.b32.xlu0 %v10174_v53, %s8998_s17 }
  0xbb   :  { %v10188_v7 = vpop.permute.xlu1 %462 }
  0xbc   :  { %18327 = vst [vmem:[#allocation150_spill] sm:$0xff] %v10188_v7  ;;  %v10194_v45 = vpop.permute.xlu0 %460  ;;  %v668_v7 = vrot.slane %v18331_v9, 2  ;;  %v18337_v9 = vld [vmem:[#allocation39_spill] sm:$0xff] }
  0xbd   :  { %18329 = vst [vmem:[#allocation152_spill] sm:$0xff] %v10194_v45  ;;  %803 = vrot.lane.b32.xlu1 %v10184_v29, %s8998_s17  ;;  %v673_v19 = vrot.slane %v18337_v9, 2 }
  0xbe   :  { %801 = vrot.lane.b32.xlu0 %v10191_v26, %s8998_s17  ;;  %v669_v42 = vsel %vm584_vm1, %v666_v49, %v668_v7  ;;  %v18342_v7 = vld [vmem:[#allocation41_spill] sm:$0xff]  ;;  %v18346_v49 = vld [vmem:[#allocation43_spill] sm:$0xff] }
  0xbf   :  { %v10205_v59 = vpop.permute.xlu1 %466  ;;  %v676_v56 = vrot.slane %v18342_v7, 2  ;;  %v675_v8 = vrot.slane %v18346_v49, 2  ;;  %v18350_v7 = vld [vmem:[#allocation47_spill] sm:$0xff] }
  0xc0   :  { %18332 = vst [vmem:[#allocation34_spill] sm:$0xff] %v10205_v59  ;;  %v10211_v45 = vpop.permute.xlu0 %464  ;;  %v683_v36 = vrot.slane %v18350_v7, 2 }
  0xc1   :  { %18335 = vst [vmem:[#allocation35_spill] sm:$0xff] %v10211_v45  ;;  %807 = vrot.lane.b32.xlu1 %v10201_v13, %s8998_s17  ;;  %v10229_v45 = vsel %vm584_vm1, %v671_v37, %v673_v19  ;;  %v10246_v19 = vsel %vm584_vm1, %v676_v56, %v678_v48 }
  0xc2   :  { %805 = vrot.lane.b32.xlu0 %v10208_v20, %s8998_s17  ;;  %18341 = vst [vmem:[#allocation40_spill] sm:$0xff] %v10229_v45  ;;  %18348 = vst [vmem:[#allocation155_spill] sm:$0xff] %v10246_v19 }
  0xc3   :  { %v10220_v59 = vpop.permute.xlu1 %470 }
  0xc4   :  { %18338 = vst [vmem:[#allocation38_spill] sm:$0xff] %v10220_v59  ;;  %v10224_v3 = vpop.permute.xlu0 %468  ;;  %v10236_v59 = vsel %vm584_vm1, %v670_v61, %v671_v37  ;;  %v10253_v37 = vsel %vm584_vm1, %v675_v8, %v676_v56  ;;  %v18353_v61 = vld [vmem:[#allocation48_spill] sm:$0xff]  ;;  %v18360_v8 = vld [vmem:[#allocation53_spill] sm:$0xff] }
  0xc5   :  { %18340 = vst [vmem:[#allocation39_spill] sm:$0xff] %v10224_v3  ;;  %811 = vrot.lane.b32.xlu1 %v669_v42, %s8998_s17  ;;  %18345 = vst [vmem:[#allocation42_spill] sm:$0xff] %v10236_v59  ;;  %v18349_v42 = vld [vmem:[#allocation46_spill] sm:$0xff]  ;;  %v680_v49 = vrot.slane %v18353_v61, 2  ;;  %v18356_v3 = vld [vmem:[#allocation51_spill] sm:$0xff] }
  0xc6   :  { %809 = vrot.lane.b32.xlu0 %v667_v60, %s8998_s17  ;;  %v681_v60 = vrot.slane %v18349_v42, 2  ;;  %18352 = vst [vmem:[#allocation47_spill] sm:$0xff] %v10253_v37  ;;  %v686_v7 = vrot.slane %v18356_v3, 2 }
  0xc7   :  { %v10233_v9 = vpop.permute.xlu1 %474 }
  0xc8   :  { %18344 = vst [vmem:[#allocation41_spill] sm:$0xff] %v10233_v9  ;;  %v10239_v50 = vpop.permute.xlu0 %472  ;;  %v10263_v48 = vsel %vm584_vm1, %v681_v60, %v683_v36  ;;  %v10270_v56 = vsel %vm584_vm1, %v680_v49, %v681_v60  ;;  %v18367_v49 = vld [vmem:[#allocation58_spill] sm:$0xff] }
  0xc9   :  { %18347 = vst [vmem:[#allocation43_spill] sm:$0xff] %v10239_v50  ;;  %815 = vrot.lane.b32.xlu1 %v10229_v45, %s8998_s17  ;;  %18355 = vst [vmem:[#allocation156_spill] sm:$0xff] %v10263_v48 }
  0xca   :  { %813 = vrot.lane.b32.xlu0 %v10236_v59, %s8998_s17  ;;  %18359 = vst [vmem:[#allocation52_spill] sm:$0xff] %v10270_v56 }
  0xcb   :  { %v10250_v9 = vpop.permute.xlu1 %478 }
  0xcc   :  { %18351 = vst [vmem:[#allocation46_spill] sm:$0xff] %v10250_v9  ;;  %v10256_v50 = vpop.permute.xlu0 %476  ;;  %v688_v9 = vrot.slane %v18357_v40, 2  ;;  %v691_v40 = vrot.slane %v18363_v15, 2 }
  0xcd   :  { %18354 = vst [vmem:[#allocation48_spill] sm:$0xff] %v10256_v50  ;;  %819 = vrot.lane.b32.xlu1 %v10246_v19, %s8998_s17  ;;  %v685_v50 = vrot.slane %v18360_v8, 2 }
  0xce   :  { %817 = vrot.lane.b32.xlu0 %v10253_v37, %s8998_s17  ;;  %v10280_v36 = vsel %vm584_vm1, %v686_v7, %v688_v9 }
  0xcf   :  { %v10267_v32 = vpop.permute.xlu1 %482  ;;  %18362 = vst [vmem:[#allocation157_spill] sm:$0xff] %v10280_v36  ;;  %v10287_v60 = vsel %vm584_vm1, %v685_v50, %v686_v7  ;;  %v18374_v7 = vld [vmem:[#allocation63_spill] sm:$0xff] }
  0xd0   :  { %18358 = vst [vmem:[#allocation51_spill] sm:$0xff] %v10267_v32  ;;  %v10273_v24 = vpop.permute.xlu0 %480  ;;  %v693_v32 = vrot.slane %v18364_v0, 2  ;;  %18366 = vst [vmem:[#allocation57_spill] sm:$0xff] %v10287_v60  ;;  %v696_v0 = vrot.slane %v18370_v51, 2 }
  0xd1   :  { %18361 = vst [vmem:[#allocation53_spill] sm:$0xff] %v10273_v24  ;;  %823 = vrot.lane.b32.xlu1 %v10263_v48, %s8998_s17  ;;  %v690_v24 = vrot.slane %v18367_v49, 2 }
  0xd2   :  { %821 = vrot.lane.b32.xlu0 %v10270_v56, %s8998_s17  ;;  %v10297_v9 = vsel %vm584_vm1, %v691_v40, %v693_v32 }
  0xd3   :  { %v10284_v43 = vpop.permute.xlu1 %486  ;;  %18369 = vst [vmem:[#allocation158_spill] sm:$0xff] %v10297_v9  ;;  %v10304_v50 = vsel %vm584_vm1, %v690_v24, %v691_v40  ;;  %v18381_v40 = vld [vmem:[#allocation68_spill] sm:$0xff] }
  0xd4   :  { %18365 = vst [vmem:[#allocation56_spill] sm:$0xff] %v10284_v43  ;;  %v10290_v33 = vpop.permute.xlu0 %484  ;;  %v698_v43 = vrot.slane %v18371_v6, 2  ;;  %18373 = vst [vmem:[#allocation62_spill] sm:$0xff] %v10304_v50 }
  0xd5   :  { %18368 = vst [vmem:[#allocation58_spill] sm:$0xff] %v10290_v33  ;;  %827 = vrot.lane.b32.xlu1 %v10280_v36, %s8998_s17  ;;  %v695_v33 = vrot.slane %v18374_v7, 2  ;;  %v18378_v36 = vld [vmem:[#allocation67_spill] sm:$0xff] }
  0xd6   :  { %825 = vrot.lane.b32.xlu0 %v10287_v60, %s8998_s17  ;;  %v10314_v32 = vsel %vm584_vm1, %v696_v0, %v698_v43  ;;  %v18377_v60 = vld [vmem:[#allocation66_spill] sm:$0xff] }
  0xd7   :  { %v10301_v41 = vpop.permute.xlu1 %490  ;;  %18376 = vst [vmem:[#allocation159_spill] sm:$0xff] %v10314_v32  ;;  %v701_v6 = vrot.slane %v18377_v60, 2  ;;  %v10321_v24 = vsel %vm584_vm1, %v695_v33, %v696_v0  ;;  %v18388_v0 = vld [vmem:[#allocation73_spill] sm:$0xff] }
  0xd8   :  { %18372 = vst [vmem:[#allocation61_spill] sm:$0xff] %v10301_v41  ;;  %v10307_v44 = vpop.permute.xlu0 %488  ;;  %v703_v41 = vrot.slane %v18378_v36, 2  ;;  %18380 = vst [vmem:[#allocation67_spill] sm:$0xff] %v10321_v24 }
  0xd9   :  { %18375 = vst [vmem:[#allocation63_spill] sm:$0xff] %v10307_v44  ;;  %831 = vrot.lane.b32.xlu1 %v10297_v9, %s8998_s17  ;;  %v700_v44 = vrot.slane %v18381_v40, 2  ;;  %v18385_v9 = vld [vmem:[#allocation72_spill] sm:$0xff] }
  0xda   :  { %829 = vrot.lane.b32.xlu0 %v10304_v50, %s8998_s17  ;;  %v10331_v43 = vsel %vm584_vm1, %v701_v6, %v703_v41  ;;  %v18384_v50 = vld [vmem:[#allocation71_spill] sm:$0xff] }
  0xdb   :  { %v10318_v56 = vpop.permute.xlu1 %494  ;;  %18383 = vst [vmem:[#allocation160_spill] sm:$0xff] %v10331_v43  ;;  %v706_v36 = vrot.slane %v18384_v50, 2  ;;  %v10338_v33 = vsel %vm584_vm1, %v700_v44, %v701_v6  ;;  %v18395_v6 = vld [vmem:[#allocation78_spill] sm:$0xff] }
  0xdc   :  { %18379 = vst [vmem:[#allocation66_spill] sm:$0xff] %v10318_v56  ;;  %v10324_v48 = vpop.permute.xlu0 %492  ;;  %v708_v56 = vrot.slane %v18385_v9, 2  ;;  %18387 = vst [vmem:[#allocation72_spill] sm:$0xff] %v10338_v33 }
  0xdd   :  { %18382 = vst [vmem:[#allocation68_spill] sm:$0xff] %v10324_v48  ;;  %835 = vrot.lane.b32.xlu1 %v10314_v32, %s8998_s17  ;;  %v705_v48 = vrot.slane %v18388_v0, 2  ;;  %v18392_v32 = vld [vmem:[#allocation77_spill] sm:$0xff] }
  0xde   :  { %833 = vrot.lane.b32.xlu0 %v10321_v24, %s8998_s17  ;;  %v10348_v41 = vsel %vm584_vm1, %v706_v36, %v708_v56  ;;  %v18391_v24 = vld [vmem:[#allocation76_spill] sm:$0xff] }
  0xdf   :  { %v10335_v37 = vpop.permute.xlu1 %498  ;;  %18390 = vst [vmem:[#allocation161_spill] sm:$0xff] %v10348_v41  ;;  %v711_v9 = vrot.slane %v18391_v24, 2  ;;  %v10355_v44 = vsel %vm584_vm1, %v705_v48, %v706_v36  ;;  %v18402_v36 = vld [vmem:[#allocation83_spill] sm:$0xff] }
  0xe0   :  { %18386 = vst [vmem:[#allocation71_spill] sm:$0xff] %v10335_v37  ;;  %v10341_v19 = vpop.permute.xlu0 %496  ;;  %v713_v37 = vrot.slane %v18392_v32, 2  ;;  %18394 = vst [vmem:[#allocation77_spill] sm:$0xff] %v10355_v44 }
  0xe1   :  { %18389 = vst [vmem:[#allocation73_spill] sm:$0xff] %v10341_v19  ;;  %839 = vrot.lane.b32.xlu1 %v10331_v43, %s8998_s17  ;;  %v710_v19 = vrot.slane %v18395_v6, 2  ;;  %v18399_v43 = vld [vmem:[#allocation82_spill] sm:$0xff] }
  0xe2   :  { %837 = vrot.lane.b32.xlu0 %v10338_v33, %s8998_s17  ;;  %v10365_v56 = vsel %vm584_vm1, %v711_v9, %v713_v37  ;;  %v18398_v33 = vld [vmem:[#allocation81_spill] sm:$0xff] }
  0xe3   :  { %v10352_v59 = vpop.permute.xlu1 %502  ;;  %18397 = vst [vmem:[#allocation162_spill] sm:$0xff] %v10365_v56  ;;  %v716_v32 = vrot.slane %v18398_v33, 2  ;;  %v10372_v48 = vsel %vm584_vm1, %v710_v19, %v711_v9  ;;  %v18409_v9 = vld [vmem:[#allocation88_spill] sm:$0xff] }
  0xe4   :  { %18393 = vst [vmem:[#allocation76_spill] sm:$0xff] %v10352_v59  ;;  %v10358_v45 = vpop.permute.xlu0 %500  ;;  %v718_v59 = vrot.slane %v18399_v43, 2  ;;  %18401 = vst [vmem:[#allocation82_spill] sm:$0xff] %v10372_v48 }
  0xe5   :  { %18396 = vst [vmem:[#allocation78_spill] sm:$0xff] %v10358_v45  ;;  %843 = vrot.lane.b32.xlu1 %v10348_v41, %s8998_s17  ;;  %v715_v45 = vrot.slane %v18402_v36, 2  ;;  %v18406_v41 = vld [vmem:[#allocation87_spill] sm:$0xff] }
  0xe6   :  { %841 = vrot.lane.b32.xlu0 %v10355_v44, %s8998_s17  ;;  %v10382_v37 = vsel %vm584_vm1, %v716_v32, %v718_v59  ;;  %v18405_v44 = vld [vmem:[#allocation86_spill] sm:$0xff] }
  0xe7   :  { %v10369_v20 = vpop.permute.xlu1 %506  ;;  %18404 = vst [vmem:[#allocation163_spill] sm:$0xff] %v10382_v37  ;;  %v721_v43 = vrot.slane %v18405_v44, 2  ;;  %v10389_v19 = vsel %vm584_vm1, %v715_v45, %v716_v32  ;;  %v18416_v32 = vld [vmem:[#allocation93_spill] sm:$0xff] }
  0xe8   :  { %18400 = vst [vmem:[#allocation81_spill] sm:$0xff] %v10369_v20  ;;  %v10375_v13 = vpop.permute.xlu0 %504  ;;  %v723_v20 = vrot.slane %v18406_v41, 2  ;;  %18408 = vst [vmem:[#allocation87_spill] sm:$0xff] %v10389_v19 }
  0xe9   :  { %18403 = vst [vmem:[#allocation83_spill] sm:$0xff] %v10375_v13  ;;  %847 = vrot.lane.b32.xlu1 %v10365_v56, %s8998_s17  ;;  %v720_v13 = vrot.slane %v18409_v9, 2  ;;  %v18413_v56 = vld [vmem:[#allocation92_spill] sm:$0xff] }
  0xea   :  { %845 = vrot.lane.b32.xlu0 %v10372_v48, %s8998_s17  ;;  %v10399_v59 = vsel %vm584_vm1, %v721_v43, %v723_v20  ;;  %v18412_v48 = vld [vmem:[#allocation91_spill] sm:$0xff] }
  0xeb   :  { %v10386_v26 = vpop.permute.xlu1 %510  ;;  %18411 = vst [vmem:[#allocation164_spill] sm:$0xff] %v10399_v59  ;;  %v726_v41 = vrot.slane %v18412_v48, 2  ;;  %v10406_v45 = vsel %vm584_vm1, %v720_v13, %v721_v43  ;;  %v18422_v43 = vld [vmem:[#allocation98_spill] sm:$0xff] }
  0xec   :  { %18407 = vst [vmem:[#allocation86_spill] sm:$0xff] %v10386_v26  ;;  %v10392_v29 = vpop.permute.xlu0 %508  ;;  %v728_v26 = vrot.slane %v18413_v56, 2  ;;  %18415 = vst [vmem:[#allocation92_spill] sm:$0xff] %v10406_v45 }
  0xed   :  { %18410 = vst [vmem:[#allocation88_spill] sm:$0xff] %v10392_v29  ;;  %851 = vrot.lane.b32.xlu1 %v10382_v37, %s8998_s17  ;;  %v725_v29 = vrot.slane %v18416_v32, 2  ;;  %v18419_v37 = vld [vmem:[#allocation97_spill] sm:$0xff] }
  0xee   :  { %849 = vrot.lane.b32.xlu0 %v10389_v19, %s8998_s17  ;;  %v10416_v20 = vsel %vm584_vm1, %v726_v41, %v728_v26  ;;  %v18418_v19 = vld [vmem:[#allocation96_spill] sm:$0xff] }
  0xef   :  { %v10403_v53 = vpop.permute.xlu1 %514  ;;  %v731_v56 = vrot.slane %v18418_v19, 2  ;;  %v10423_v13 = vsel %vm584_vm1, %v725_v29, %v726_v41  ;;  %v18429_v41 = vld [vmem:[#allocation103_spill] sm:$0xff] }
  0xf0   :  { %18414 = vst [vmem:[#allocation91_spill] sm:$0xff] %v10403_v53  ;;  %v10409_v58 = vpop.permute.xlu0 %512  ;;  %v733_v53 = vrot.slane %v18419_v37, 2  ;;  %18421 = vst [vmem:[#allocation97_spill] sm:$0xff] %v10423_v13 }
  0xf1   :  { %18417 = vst [vmem:[#allocation93_spill] sm:$0xff] %v10409_v58  ;;  %855 = vrot.lane.b32.xlu1 %v10399_v59, %s8998_s17  ;;  %v730_v58 = vrot.slane %v18422_v43, 2  ;;  %v18426_v59 = vld [vmem:[#allocation102_spill] sm:$0xff] }
  0xf2   :  { %853 = vrot.lane.b32.xlu0 %v10406_v45, %s8998_s17  ;;  %v10433_v26 = vsel %vm584_vm1, %v731_v56, %v733_v53  ;;  %v18425_v45 = vld [vmem:[#allocation101_spill] sm:$0xff] }
  0xf3   :  { %v10420_v34 = vpop.permute.xlu1 %518  ;;  %18424 = vst [vmem:[#allocation165_spill] sm:$0xff] %v10433_v26  ;;  %v736_v37 = vrot.slane %v18425_v45, 2  ;;  %v10440_v29 = vsel %vm584_vm1, %v730_v58, %v731_v56  ;;  %v740_v56 = vrot.slane %v9911_v4, 2 }
  0xf4   :  { %18420 = vst [vmem:[#allocation96_spill] sm:$0xff] %v10420_v34  ;;  %v10426_v35 = vpop.permute.xlu0 %516  ;;  %v738_v34 = vrot.slane %v18426_v59, 2  ;;  %18428 = vst [vmem:[#allocation102_spill] sm:$0xff] %v10440_v29  ;;  %v741_v59 = vrot.slane %v9899_v17, 2 }
  0xf5   :  { %18423 = vst [vmem:[#allocation98_spill] sm:$0xff] %v10426_v35  ;;  %859 = vrot.lane.b32.xlu1 %v10416_v20, %s8998_s17  ;;  %v735_v35 = vrot.slane %v18429_v41, 2 }
  0xf6   :  { %857 = vrot.lane.b32.xlu0 %v10423_v13, %s8998_s17  ;;  %v10450_v53 = vsel %vm584_vm1, %v736_v37, %v738_v34 }
  0xf7   :  { %v10437_v16 = vpop.permute.xlu1 %747  ;;  %18431 = vst [vmem:[#allocation166_spill] sm:$0xff] %v10450_v53  ;;  %v10457_v58 = vsel %vm584_vm1, %v735_v35, %v736_v37 }
  0xf8   :  { %18427 = vst [vmem:[#allocation101_spill] sm:$0xff] %v10437_v16  ;;  %v10443_v18 = vpop.permute.xlu0 %745  ;;  %v743_v16 = vrot.slane %v9904_v21, 2  ;;  %18433 = vst [vmem:[#allocation168_spill] sm:$0xff] %v10457_v58  ;;  %v10472_v21 = vsel %vm584_vm1, %v740_v56, %v741_v59 }
  0xf9   :  { %18430 = vst [vmem:[#allocation103_spill] sm:$0xff] %v10443_v18  ;;  %863 = vrot.lane.b32.xlu1 %v10433_v26, %s8998_s17 }
  0xfa   :  { %861 = vrot.lane.b32.xlu0 %v10440_v29, %s8998_s17  ;;  %v10467_v34 = vsel %vm584_vm1, %v741_v59, %v743_v16  ;;  %v8756_v16 = vld [vmem:[%s17548_s0 + $0x20] sm:$0xff]  ;;  %v8757_v59 = vld [vmem:[%s17548_s0 + $0x18] sm:$0xff] }
  0xfb   :  { %v10454_v13 = vpop.permute.xlu1 %751  ;;  %18435 = vst [vmem:[#allocation170_spill] sm:$0xff] %v10467_v34 }
  0xfc   :  { %18432 = vst [vmem:[#allocation167_spill] sm:$0xff] %v10454_v13  ;;  %v10460_v18 = vpop.permute.xlu0 %749  ;;  %v10542_v13 = vld [vmem:[%s17548_s0 + $0x60] sm:$0xff] }
  0xfd   :  { %18434 = vst [vmem:[#allocation169_spill] sm:$0xff] %v10460_v18  ;;  %867 = vrot.lane.b32.xlu1 %v10450_v53, %s8998_s17  ;;  %18451 = vst [vmem:[#allocation186_spill] sm:$0xff] %v10542_v13 }
  0xfe   :  { %865 = vrot.lane.b32.xlu0 %v10457_v58, %s8998_s17 }
  0xff   :  { %v10469_v29 = vpop.permute.xlu1 %755 }
 0x100   :  { %18436 = vst [vmem:[#allocation171_spill] sm:$0xff] %v10469_v29  ;;  %v10474_v35 = vpop.permute.xlu0 %753 }
 0x101   :  { %18437 = vst [vmem:[#allocation172_spill] sm:$0xff] %v10474_v35  ;;  %871 = vrot.lane.b32.xlu1 %v10467_v34, %s8998_s17 }
 0x102   :  { %869 = vrot.lane.b32.xlu0 %v10472_v21, %s8998_s17 }
 0x103   :  { %v10480_v37 = vpop.permute.xlu1 %759 }
 0x104   :  { %18438 = vst [vmem:[#allocation173_spill] sm:$0xff] %v10480_v37  ;;  %v10482_v18 = vpop.permute.xlu0 %757  ;;  %v10524_v37 = vld [vmem:[%s17548_s0 + $0x48] sm:$0xff] }
 0x105   :  { %18439 = vst [vmem:[#allocation174_spill] sm:$0xff] %v10482_v18  ;;  %943 = vrot.lane.b32.xlu1 %v8756_v16, %s8999_s20  ;;  %v10499_v18 = vld [vmem:[%s17548_s0 + $0x38] sm:$0xff]  ;;  %v10506_v16 = vld [vmem:[%s17548_s0 + $0x30] sm:$0xff]  ;;  %18447 = vst [vmem:[#allocation182_spill] sm:$0xff] %v10524_v37 }
 0x106   :  { %941 = vrot.lane.b32.xlu0 %v8757_v59, %s8999_s20  ;;  %18442 = vst [vmem:[#allocation177_spill] sm:$0xff] %v10499_v18  ;;  %18443 = vst [vmem:[#allocation178_spill] sm:$0xff] %v10506_v16 }
 0x107   :  { %v10492_v56 = vpop.permute.xlu1 %763 }
 0x108   :  { %18440 = vst [vmem:[#allocation175_spill] sm:$0xff] %v10492_v56  ;;  %v10494_v35 = vpop.permute.xlu0 %761 }
 0x109   :  { %18441 = vst [vmem:[#allocation176_spill] sm:$0xff] %v10494_v35  ;;  %947 = vrot.lane.b32.xlu1 %v10499_v18, %s8999_s20  ;;  %v10517_v35 = vld [vmem:[%s17548_s0 + $0x50] sm:$0xff] }
 0x10a   :  { %945 = vrot.lane.b32.xlu0 %v10506_v16, %s8999_s20  ;;  %18446 = vst [vmem:[#allocation181_spill] sm:$0xff] %v10517_v35 }
 0x10b   :  { %v10510_v59 = vpop.permute.xlu1 %767 }
 0x10c   :  { %18444 = vst [vmem:[#allocation179_spill] sm:$0xff] %v10510_v59  ;;  %v10512_v56 = vpop.permute.xlu0 %765 }
 0x10d   :  { %18445 = vst [vmem:[#allocation180_spill] sm:$0xff] %v10512_v56  ;;  %951 = vrot.lane.b32.xlu1 %v10517_v35, %s8999_s20  ;;  %v10535_v56 = vld [vmem:[%s17548_s0 + $0x68] sm:$0xff] }
 0x10e   :  { %949 = vrot.lane.b32.xlu0 %v10524_v37, %s8999_s20  ;;  %18450 = vst [vmem:[#allocation185_spill] sm:$0xff] %v10535_v56 }
 0x10f   :  { %v10528_v29 = vpop.permute.xlu1 %771 }
 0x110   :  { %18448 = vst [vmem:[#allocation183_spill] sm:$0xff] %v10528_v29  ;;  %v10530_v59 = vpop.permute.xlu0 %769 }
 0x111   :  { %18449 = vst [vmem:[#allocation184_spill] sm:$0xff] %v10530_v59  ;;  %955 = vrot.lane.b32.xlu1 %v10535_v56, %s8999_s20  ;;  %v10553_v59 = vld [vmem:[%s17548_s0 + $0x80] sm:$0xff]  ;;  %v10560_v56 = vld [vmem:[%s17548_s0 + $0x78] sm:$0xff] }
 0x112   :  { %953 = vrot.lane.b32.xlu0 %v10542_v13, %s8999_s20  ;;  %18454 = vst [vmem:[#allocation189_spill] sm:$0xff] %v10553_v59  ;;  %18455 = vst [vmem:[#allocation190_spill] sm:$0xff] %v10560_v56 }
 0x113   :  { %v10546_v37 = vpop.permute.xlu1 %775 }
 0x114   :  { %18452 = vst [vmem:[#allocation187_spill] sm:$0xff] %v10546_v37  ;;  %v10548_v29 = vpop.permute.xlu0 %773 }
 0x115   :  { %18453 = vst [vmem:[#allocation188_spill] sm:$0xff] %v10548_v29  ;;  %959 = vrot.lane.b32.xlu1 %v10553_v59, %s8999_s20  ;;  %v10571_v29 = vld [vmem:[%s17548_s0 + $0x98] sm:$0xff]  ;;  %v10578_v59 = vld [vmem:[%s17548_s0 + $0x90] sm:$0xff] }
 0x116   :  { %957 = vrot.lane.b32.xlu0 %v10560_v56, %s8999_s20  ;;  %18458 = vst [vmem:[#allocation193_spill] sm:$0xff] %v10571_v29  ;;  %18459 = vst [vmem:[#allocation194_spill] sm:$0xff] %v10578_v59 }
 0x117   :  { %v10564_v13 = vpop.permute.xlu1 %779 }
 0x118   :  { %18456 = vst [vmem:[#allocation191_spill] sm:$0xff] %v10564_v13  ;;  %v10566_v37 = vpop.permute.xlu0 %777 }
 0x119   :  { %18457 = vst [vmem:[#allocation192_spill] sm:$0xff] %v10566_v37  ;;  %963 = vrot.lane.b32.xlu1 %v10571_v29, %s8999_s20  ;;  %v10589_v37 = vld [vmem:[%s17548_s0 + $0xb0] sm:$0xff]  ;;  %v10596_v29 = vld [vmem:[%s17548_s0 + $0xa8] sm:$0xff] }
 0x11a   :  { %961 = vrot.lane.b32.xlu0 %v10578_v59, %s8999_s20  ;;  %18462 = vst [vmem:[#allocation197_spill] sm:$0xff] %v10589_v37  ;;  %18463 = vst [vmem:[#allocation198_spill] sm:$0xff] %v10596_v29 }
 0x11b   :  { %v10582_v56 = vpop.permute.xlu1 %783 }
 0x11c   :  { %18460 = vst [vmem:[#allocation195_spill] sm:$0xff] %v10582_v56  ;;  %v10584_v13 = vpop.permute.xlu0 %781 }
 0x11d   :  { %18461 = vst [vmem:[#allocation196_spill] sm:$0xff] %v10584_v13  ;;  %967 = vrot.lane.b32.xlu1 %v10589_v37, %s8999_s20  ;;  %v10607_v13 = vld [vmem:[%s17548_s0 + $0xc8] sm:$0xff]  ;;  %v10614_v37 = vld [vmem:[%s17548_s0 + $0xc0] sm:$0xff] }
 0x11e   :  { %965 = vrot.lane.b32.xlu0 %v10596_v29, %s8999_s20  ;;  %18466 = vst [vmem:[#allocation201_spill] sm:$0xff] %v10607_v13  ;;  %18467 = vst [vmem:[#allocation202_spill] sm:$0xff] %v10614_v37 }
 0x11f   :  { %v10600_v59 = vpop.permute.xlu1 %787 }
 0x120   :  { %18464 = vst [vmem:[#allocation199_spill] sm:$0xff] %v10600_v59  ;;  %v10602_v56 = vpop.permute.xlu0 %785 }
 0x121   :  { %18465 = vst [vmem:[#allocation200_spill] sm:$0xff] %v10602_v56  ;;  %971 = vrot.lane.b32.xlu1 %v10607_v13, %s8999_s20  ;;  %v10625_v56 = vld [vmem:[%s17548_s0 + $0xe0] sm:$0xff]  ;;  %v10632_v13 = vld [vmem:[%s17548_s0 + $0xd8] sm:$0xff] }
 0x122   :  { %969 = vrot.lane.b32.xlu0 %v10614_v37, %s8999_s20  ;;  %18470 = vst [vmem:[#allocation205_spill] sm:$0xff] %v10625_v56  ;;  %18471 = vst [vmem:[#allocation206_spill] sm:$0xff] %v10632_v13 }
 0x123   :  { %v10618_v29 = vpop.permute.xlu1 %791 }
 0x124   :  { %18468 = vst [vmem:[#allocation203_spill] sm:$0xff] %v10618_v29  ;;  %v10620_v59 = vpop.permute.xlu0 %789 }
 0x125   :  { %18469 = vst [vmem:[#allocation204_spill] sm:$0xff] %v10620_v59  ;;  %975 = vrot.lane.b32.xlu1 %v10625_v56, %s8999_s20  ;;  %v10643_v59 = vld [vmem:[%s17548_s0 + $0xf8] sm:$0xff]  ;;  %v10650_v56 = vld [vmem:[%s17548_s0 + $0xf0] sm:$0xff] }
 0x126   :  { %973 = vrot.lane.b32.xlu0 %v10632_v13, %s8999_s20  ;;  %18474 = vst [vmem:[#allocation209_spill] sm:$0xff] %v10643_v59  ;;  %18475 = vst [vmem:[#allocation210_spill] sm:$0xff] %v10650_v56 }
 0x127   :  { %v10636_v37 = vpop.permute.xlu1 %795 }
 0x128   :  { %18472 = vst [vmem:[#allocation207_spill] sm:$0xff] %v10636_v37  ;;  %v10638_v29 = vpop.permute.xlu0 %793 }
 0x129   :  { %18473 = vst [vmem:[#allocation208_spill] sm:$0xff] %v10638_v29  ;;  %979 = vrot.lane.b32.xlu1 %v10643_v59, %s8999_s20  ;;  %v10661_v29 = vld [vmem:[%s17548_s0 + $0x110] sm:$0xff]  ;;  %v10668_v59 = vld [vmem:[%s17548_s0 + $0x108] sm:$0xff] }
 0x12a   :  { %977 = vrot.lane.b32.xlu0 %v10650_v56, %s8999_s20  ;;  %18478 = vst [vmem:[#allocation213_spill] sm:$0xff] %v10661_v29  ;;  %18479 = vst [vmem:[#allocation214_spill] sm:$0xff] %v10668_v59 }
 0x12b   :  { %v10654_v13 = vpop.permute.xlu1 %799 }
 0x12c   :  { %18476 = vst [vmem:[#allocation211_spill] sm:$0xff] %v10654_v13  ;;  %v10656_v37 = vpop.permute.xlu0 %797 }
 0x12d   :  { %18477 = vst [vmem:[#allocation212_spill] sm:$0xff] %v10656_v37  ;;  %983 = vrot.lane.b32.xlu1 %v10661_v29, %s8999_s20  ;;  %v10679_v37 = vld [vmem:[%s17548_s0 + $0x128] sm:$0xff]  ;;  %v10686_v29 = vld [vmem:[%s17548_s0 + $0x120] sm:$0xff] }
 0x12e   :  { %981 = vrot.lane.b32.xlu0 %v10668_v59, %s8999_s20  ;;  %18482 = vst [vmem:[#allocation217_spill] sm:$0xff] %v10679_v37  ;;  %18483 = vst [vmem:[#allocation218_spill] sm:$0xff] %v10686_v29 }
 0x12f   :  { %v10672_v56 = vpop.permute.xlu1 %803 }
 0x130   :  { %18480 = vst [vmem:[#allocation215_spill] sm:$0xff] %v10672_v56  ;;  %v10674_v13 = vpop.permute.xlu0 %801 }
 0x131   :  { %18481 = vst [vmem:[#allocation216_spill] sm:$0xff] %v10674_v13  ;;  %987 = vrot.lane.b32.xlu1 %v10679_v37, %s8999_s20  ;;  %v10697_v13 = vld [vmem:[%s17548_s0 + $0x140] sm:$0xff]  ;;  %v10704_v37 = vld [vmem:[%s17548_s0 + $0x138] sm:$0xff] }
 0x132   :  { %985 = vrot.lane.b32.xlu0 %v10686_v29, %s8999_s20  ;;  %18486 = vst [vmem:[#allocation221_spill] sm:$0xff] %v10697_v13  ;;  %18487 = vst [vmem:[#allocation222_spill] sm:$0xff] %v10704_v37 }
 0x133   :  { %v10690_v59 = vpop.permute.xlu1 %807 }
 0x134   :  { %18484 = vst [vmem:[#allocation219_spill] sm:$0xff] %v10690_v59  ;;  %v10692_v56 = vpop.permute.xlu0 %805 }
 0x135   :  { %18485 = vst [vmem:[#allocation220_spill] sm:$0xff] %v10692_v56  ;;  %991 = vrot.lane.b32.xlu1 %v10697_v13, %s8999_s20  ;;  %v10715_v56 = vld [vmem:[%s17548_s0 + $0x158] sm:$0xff]  ;;  %v10722_v13 = vld [vmem:[%s17548_s0 + $0x150] sm:$0xff] }
 0x136   :  { %989 = vrot.lane.b32.xlu0 %v10704_v37, %s8999_s20  ;;  %18490 = vst [vmem:[#allocation225_spill] sm:$0xff] %v10715_v56  ;;  %18491 = vst [vmem:[#allocation226_spill] sm:$0xff] %v10722_v13 }
 0x137   :  { %v10708_v29 = vpop.permute.xlu1 %811 }
 0x138   :  { %18488 = vst [vmem:[#allocation223_spill] sm:$0xff] %v10708_v29  ;;  %v10710_v59 = vpop.permute.xlu0 %809 }
 0x139   :  { %18489 = vst [vmem:[#allocation224_spill] sm:$0xff] %v10710_v59  ;;  %995 = vrot.lane.b32.xlu1 %v10715_v56, %s8999_s20  ;;  %v10733_v59 = vld [vmem:[%s17548_s0 + $0x170] sm:$0xff]  ;;  %v10740_v56 = vld [vmem:[%s17548_s0 + $0x168] sm:$0xff] }
 0x13a   :  { %993 = vrot.lane.b32.xlu0 %v10722_v13, %s8999_s20  ;;  %18494 = vst [vmem:[#allocation229_spill] sm:$0xff] %v10733_v59  ;;  %18495 = vst [vmem:[#allocation230_spill] sm:$0xff] %v10740_v56  ;;  %v10754_v13 = vld [vmem:[%s17548_s0 + $0x180] sm:$0xff] }
 0x13b   :  { %v10726_v37 = vpop.permute.xlu1 %815 }
 0x13c   :  { %18492 = vst [vmem:[#allocation227_spill] sm:$0xff] %v10726_v37  ;;  %v10728_v29 = vpop.permute.xlu0 %813 }
 0x13d   :  { %18493 = vst [vmem:[#allocation228_spill] sm:$0xff] %v10728_v29  ;;  %999 = vrot.lane.b32.xlu1 %v10733_v59, %s8999_s20  ;;  %v10747_v29 = vld [vmem:[%s17548_s0 + $0x188] sm:$0xff] }
 0x13e   :  { %997 = vrot.lane.b32.xlu0 %v10740_v56, %s8999_s20 }
 0x13f   :  { %v10749_v37 = vpop.permute.xlu1 %819 }
 0x140   :  { %18496 = vst [vmem:[#allocation231_spill] sm:$0xff] %v10749_v37  ;;  %v10756_v59 = vpop.permute.xlu0 %817  ;;  %v8786_v37 = vld [vmem:[%s17548_s0 + $0x1d0] sm:$0xff] }
 0x141   :  { %18497 = vst [vmem:[#allocation232_spill] sm:$0xff] %v10756_v59  ;;  %1003 = vrot.lane.b32.xlu1 %v10747_v29, %s8999_s20  ;;  %v8787_v59 = vld [vmem:[%s17548_s0 + $0x1c8] sm:$0xff] }
 0x142   :  { %1001 = vrot.lane.b32.xlu0 %v10754_v13, %s8999_s20 }
 0x143   :  { %v10762_v56 = vpop.permute.xlu1 %823 }
 0x144   :  { %18498 = vst [vmem:[#allocation233_spill] sm:$0xff] %v10762_v56  ;;  %v10764_v35 = vpop.permute.xlu0 %821 }
 0x145   :  { %18499 = vst [vmem:[#allocation234_spill] sm:$0xff] %v10764_v35  ;;  %1007 = vrot.lane.b32.xlu1 %v8786_v37, %s8999_s20  ;;  %v10781_v35 = vld [vmem:[%s17548_s0 + $0x1e8] sm:$0xff]  ;;  %v10788_v37 = vld [vmem:[%s17548_s0 + $0x1e0] sm:$0xff] }
 0x146   :  { %1005 = vrot.lane.b32.xlu0 %v8787_v59, %s8999_s20  ;;  %18502 = vst [vmem:[#allocation237_spill] sm:$0xff] %v10788_v37 }
 0x147   :  { %v10774_v16 = vpop.permute.xlu1 %827 }
 0x148   :  { %18500 = vst [vmem:[#allocation235_spill] sm:$0xff] %v10774_v16  ;;  %v10776_v18 = vpop.permute.xlu0 %825 }
 0x149   :  { %18501 = vst [vmem:[#allocation236_spill] sm:$0xff] %v10776_v18  ;;  %1011 = vrot.lane.b32.xlu1 %v10781_v35, %s8999_s20 }
 0x14a   :  { %1009 = vrot.lane.b32.xlu0 %v10788_v37, %s8999_s20 }
 0x14b   :  { %v10792_v59 = vpop.permute.xlu1 %831 }
 0x14c   :  { %18503 = vst [vmem:[#allocation238_spill] sm:$0xff] %v10792_v59  ;;  %v10794_v16 = vpop.permute.xlu0 %829 }
 0x14d   :  { %18504 = vst [vmem:[#allocation239_spill] sm:$0xff] %v10794_v16  ;;  %1015 = vrot.lane.b32.xlu1 %v18349_v42, %s8999_s20 }
 0x14e   :  { %1013 = vrot.lane.b32.xlu0 %v18353_v61, %s8999_s20 }
 0x14f   :  { %v10800_v18 = vpop.permute.xlu1 %835 }
 0x150   :  { %18505 = vst [vmem:[#allocation240_spill] sm:$0xff] %v10800_v18  ;;  %v10802_v56 = vpop.permute.xlu0 %833  ;;  %v18554_v18 = vld [vmem:[#allocation17_spill] sm:$0xff] }
 0x151   :  { %18506 = vst [vmem:[#allocation241_spill] sm:$0xff] %v10802_v56  ;;  %1019 = vrot.lane.b32.xlu1 %v18356_v3, %s8999_s20  ;;  %v18553_v56 = vld [vmem:[#allocation16_spill] sm:$0xff] }
 0x152   :  { %1017 = vrot.lane.b32.xlu0 %v18360_v8, %s8999_s20 }
 0x153   :  { %v10808_v37 = vpop.permute.xlu1 %839 }
 0x154   :  { %18507 = vst [vmem:[#allocation242_spill] sm:$0xff] %v10808_v37  ;;  %v10810_v59 = vpop.permute.xlu0 %837 }
 0x155   :  { %18508 = vst [vmem:[#allocation243_spill] sm:$0xff] %v10810_v59  ;;  %1023 = vrot.lane.b32.xlu1 %v18363_v15, %s8999_s20 }
 0x156   :  { %1021 = vrot.lane.b32.xlu0 %v18367_v49, %s8999_s20 }
 0x157   :  { %v10816_v42 = vpop.permute.xlu1 %843 }
 0x158   :  { %18509 = vst [vmem:[#allocation244_spill] sm:$0xff] %v10816_v42  ;;  %v10818_v61 = vpop.permute.xlu0 %841  ;;  %v18550_v42 = vld [vmem:[#allocation15_spill] sm:$0xff] }
 0x159   :  { %18510 = vst [vmem:[#allocation245_spill] sm:$0xff] %v10818_v61  ;;  %1027 = vrot.lane.b32.xlu1 %v18370_v51, %s8999_s20  ;;  %v18549_v61 = vld [vmem:[#allocation14_spill] sm:$0xff] }
 0x15a   :  { %1025 = vrot.lane.b32.xlu0 %v18374_v7, %s8999_s20 }
 0x15b   :  { %v10824_v3 = vpop.permute.xlu1 %847 }
 0x15c   :  { %18511 = vst [vmem:[#allocation246_spill] sm:$0xff] %v10824_v3  ;;  %v10826_v8 = vpop.permute.xlu0 %845 }
 0x15d   :  { %18512 = vst [vmem:[#allocation247_spill] sm:$0xff] %v10826_v8  ;;  %1031 = vrot.lane.b32.xlu1 %v18377_v60, %s8999_s20 }
 0x15e   :  { %1029 = vrot.lane.b32.xlu0 %v18381_v40, %s8999_s20 }
 0x15f   :  { %v10832_v15 = vpop.permute.xlu1 %851 }
 0x160   :  { %18513 = vst [vmem:[#allocation248_spill] sm:$0xff] %v10832_v15  ;;  %v10834_v49 = vpop.permute.xlu0 %849  ;;  %v18546_v15 = vld [vmem:[#allocation13_spill] sm:$0xff] }
 0x161   :  { %18514 = vst [vmem:[#allocation249_spill] sm:$0xff] %v10834_v49  ;;  %1035 = vrot.lane.b32.xlu1 %v18384_v50, %s8999_s20  ;;  %v18545_v49 = vld [vmem:[#allocation12_spill] sm:$0xff] }
 0x162   :  { %1033 = vrot.lane.b32.xlu0 %v18388_v0, %s8999_s20 }
 0x163   :  { %v10840_v51 = vpop.permute.xlu1 %855 }
 0x164   :  { %18515 = vst [vmem:[#allocation250_spill] sm:$0xff] %v10840_v51  ;;  %v10842_v7 = vpop.permute.xlu0 %853 }
 0x165   :  { %18516 = vst [vmem:[#allocation251_spill] sm:$0xff] %v10842_v7  ;;  %1039 = vrot.lane.b32.xlu1 %v18391_v24, %s8999_s20  ;;  %v18541_v7 = vld [vmem:[#allocation10_spill] sm:$0xff] }
 0x166   :  { %1037 = vrot.lane.b32.xlu0 %v18395_v6, %s8999_s20 }
 0x167   :  { %v10848_v60 = vpop.permute.xlu1 %859 }
 0x168   :  { %18517 = vst [vmem:[#allocation252_spill] sm:$0xff] %v10848_v60  ;;  %v10850_v40 = vpop.permute.xlu0 %857 }
 0x169   :  { %18518 = vst [vmem:[#allocation253_spill] sm:$0xff] %v10850_v40  ;;  %1043 = vrot.lane.b32.xlu1 %v18398_v33, %s8999_s20 }
 0x16a   :  { %1041 = vrot.lane.b32.xlu0 %v18402_v36, %s8999_s20 }
 0x16b   :  { %v10856_v50 = vpop.permute.xlu1 %863 }
 0x16c   :  { %18519 = vst [vmem:[#allocation254_spill] sm:$0xff] %v10856_v50  ;;  %v10858_v0 = vpop.permute.xlu0 %861  ;;  %v18538_v50 = vld [vmem:[#allocation9_spill] sm:$0xff] }
 0x16d   :  { %18520 = vst [vmem:[#allocation255_spill] sm:$0xff] %v10858_v0  ;;  %1047 = vrot.lane.b32.xlu1 %v18405_v44, %s8999_s20  ;;  %v18537_v0 = vld [vmem:[#allocation8_spill] sm:$0xff] }
 0x16e   :  { %1045 = vrot.lane.b32.xlu0 %v18409_v9, %s8999_s20 }
 0x16f   :  { %v10864_v24 = vpop.permute.xlu1 %867 }
 0x170   :  { %18521 = vst [vmem:[#allocation256_spill] sm:$0xff] %v10864_v24  ;;  %v10866_v6 = vpop.permute.xlu0 %865 }
 0x171   :  { %18522 = vst [vmem:[#allocation257_spill] sm:$0xff] %v10866_v6  ;;  %1051 = vrot.lane.b32.xlu1 %v18412_v48, %s8999_s20 }
 0x172   :  { %1049 = vrot.lane.b32.xlu0 %v18416_v32, %s8999_s20 }
 0x173   :  { %v10872_v33 = vpop.permute.xlu1 %871 }
 0x174   :  { %18523 = vst [vmem:[#allocation258_spill] sm:$0xff] %v10872_v33  ;;  %v10874_v36 = vpop.permute.xlu0 %869  ;;  %v18534_v33 = vld [vmem:[#allocation6_spill] sm:$0xff] }
 0x175   :  { %18524 = vst [vmem:[#allocation259_spill] sm:$0xff] %v10874_v36  ;;  %1055 = vrot.lane.b32.xlu1 %v18418_v19, %s8999_s20  ;;  %v10899_v19 = vld [vmem:[%s17548_s0 + $0x338] sm:$0xff]  ;;  %v18533_v36 = vld [vmem:[#allocation7_spill] sm:$0xff] }
 0x176   :  { %1053 = vrot.lane.b32.xlu0 %v18422_v43, %s8999_s20 }
 0x177   :  { %v10880_v44 = vpop.permute.xlu1 %943 }
 0x178   :  { %18525 = vst [vmem:[#allocation260_spill] sm:$0xff] %v10880_v44  ;;  %v10882_v9 = vpop.permute.xlu0 %941 }
 0x179   :  { %18526 = vst [vmem:[#allocation261_spill] sm:$0xff] %v10882_v9  ;;  %1059 = vrot.lane.b32.xlu1 %v18425_v45, %s8999_s20  ;;  %v10906_v45 = vld [vmem:[%s17548_s0 + $0x330] sm:$0xff]  ;;  %v18582_v9 = vld [vmem:[#allocation31_spill] sm:$0xff] }
 0x17a   :  { %1057 = vrot.lane.b32.xlu0 %v18429_v41, %s8999_s20 }
 0x17b   :  { %v10888_v48 = vpop.permute.xlu1 %947 }
 0x17c   :  { %18527 = vst [vmem:[#allocation262_spill] sm:$0xff] %v10888_v48  ;;  %v10890_v32 = vpop.permute.xlu0 %945 }
 0x17d   :  { %18528 = vst [vmem:[#allocation263_spill] sm:$0xff] %v10890_v32  ;;  %1063 = vrot.lane.b32.xlu1 %v9899_v17, %s8999_s20  ;;  %v18578_v32 = vld [vmem:[#allocation29_spill] sm:$0xff] }
 0x17e   :  { %1061 = vrot.lane.b32.xlu0 %v9911_v4, %s8999_s20 }
 0x17f   :  { %v10901_v43 = vpop.permute.xlu1 %951 }
 0x180   :  { %18529 = vst [vmem:[#allocation264_spill] sm:$0xff] %v10901_v43  ;;  %v10908_v41 = vpop.permute.xlu0 %949 }
 0x181   :  { %18530 = vst [vmem:[#allocation265_spill] sm:$0xff] %v10908_v41  ;;  %1067 = vrot.lane.b32.xlu1 %v10899_v19, %s8999_s20  ;;  %v18574_v41 = vld [vmem:[#allocation27_spill] sm:$0xff] }
 0x182   :  { %1065 = vrot.lane.b32.xlu0 %v10906_v45, %s8999_s20 }
 0x183   :  { %v10914_v4 = vpop.permute.xlu1 %955 }
 0x184   :  { %18531 = vst [vmem:[#allocation266_spill] sm:$0xff] %v10914_v4  ;;  %v10916_v17 = vpop.permute.xlu0 %953 }
 0x185   :  { %18532 = vst [vmem:[#allocation267_spill] sm:$0xff] %v10916_v17  ;;  %1147 = vrot.lane.b32.xlu1 %v18533_v36, %s9000_s9  ;;  %v18542_v36 = vld [vmem:[#allocation11_spill] sm:$0xff]  ;;  %v18570_v17 = vld [vmem:[#allocation25_spill] sm:$0xff] }
 0x186   :  { %1145 = vrot.lane.b32.xlu0 %v18534_v33, %s9000_s9 }
 0x187   :  { %v10922_v6 = vpop.permute.xlu1 %959 }
 0x188   :  { %18535 = vst [vmem:[#allocation7_spill] sm:$0xff] %v10922_v6  ;;  %v10924_v24 = vpop.permute.xlu0 %957 }
 0x189   :  { %18536 = vst [vmem:[#allocation6_spill] sm:$0xff] %v10924_v24  ;;  %1151 = vrot.lane.b32.xlu1 %v18537_v0, %s9000_s9  ;;  %v18566_v24 = vld [vmem:[#allocation23_spill] sm:$0xff] }
 0x18a   :  { %1149 = vrot.lane.b32.xlu0 %v18538_v50, %s9000_s9 }
 0x18b   :  { %v10930_v40 = vpop.permute.xlu1 %963 }
 0x18c   :  { %18539 = vst [vmem:[#allocation8_spill] sm:$0xff] %v10930_v40  ;;  %v10932_v60 = vpop.permute.xlu0 %961 }
 0x18d   :  { %18540 = vst [vmem:[#allocation9_spill] sm:$0xff] %v10932_v60  ;;  %1155 = vrot.lane.b32.xlu1 %v18541_v7, %s9000_s9  ;;  %v18562_v60 = vld [vmem:[#allocation21_spill] sm:$0xff] }
 0x18e   :  { %1153 = vrot.lane.b32.xlu0 %v18542_v36, %s9000_s9 }
 0x18f   :  { %v10938_v33 = vpop.permute.xlu1 %967 }
 0x190   :  { %18543 = vst [vmem:[#allocation10_spill] sm:$0xff] %v10938_v33  ;;  %v10940_v51 = vpop.permute.xlu0 %965 }
 0x191   :  { %18544 = vst [vmem:[#allocation11_spill] sm:$0xff] %v10940_v51  ;;  %1159 = vrot.lane.b32.xlu1 %v18545_v49, %s9000_s9  ;;  %v18558_v51 = vld [vmem:[#allocation19_spill] sm:$0xff] }
 0x192   :  { %1157 = vrot.lane.b32.xlu0 %v18546_v15, %s9000_s9 }
 0x193   :  { %v10946_v8 = vpop.permute.xlu1 %971 }
 0x194   :  { %18547 = vst [vmem:[#allocation12_spill] sm:$0xff] %v10946_v8  ;;  %v10948_v3 = vpop.permute.xlu0 %969 }
 0x195   :  { %18548 = vst [vmem:[#allocation13_spill] sm:$0xff] %v10948_v3  ;;  %1163 = vrot.lane.b32.xlu1 %v18549_v61, %s9000_s9  ;;  %v18557_v3 = vld [vmem:[#allocation18_spill] sm:$0xff] }
 0x196   :  { %1161 = vrot.lane.b32.xlu0 %v18550_v42, %s9000_s9 }
 0x197   :  { %v10954_v59 = vpop.permute.xlu1 %975 }
 0x198   :  { %18551 = vst [vmem:[#allocation14_spill] sm:$0xff] %v10954_v59  ;;  %v10956_v37 = vpop.permute.xlu0 %973 }
 0x199   :  { %18552 = vst [vmem:[#allocation15_spill] sm:$0xff] %v10956_v37  ;;  %1167 = vrot.lane.b32.xlu1 %v18553_v56, %s9000_s9  ;;  %v18561_v37 = vld [vmem:[#allocation20_spill] sm:$0xff] }
 0x19a   :  { %1165 = vrot.lane.b32.xlu0 %v18554_v18, %s9000_s9 }
 0x19b   :  { %v10962_v16 = vpop.permute.xlu1 %979 }
 0x19c   :  { %18555 = vst [vmem:[#allocation16_spill] sm:$0xff] %v10962_v16  ;;  %v10964_v8 = vpop.permute.xlu0 %977 }
 0x19d   :  { %18556 = vst [vmem:[#allocation17_spill] sm:$0xff] %v10964_v8  ;;  %1171 = vrot.lane.b32.xlu1 %v18557_v3, %s9000_s9  ;;  %v18565_v8 = vld [vmem:[#allocation22_spill] sm:$0xff] }
 0x19e   :  { %1169 = vrot.lane.b32.xlu0 %v18558_v51, %s9000_s9 }
 0x19f   :  { %v10970_v33 = vpop.permute.xlu1 %983 }
 0x1a0   :  { %18559 = vst [vmem:[#allocation18_spill] sm:$0xff] %v10970_v33  ;;  %v10972_v59 = vpop.permute.xlu0 %981 }
 0x1a1   :  { %18560 = vst [vmem:[#allocation19_spill] sm:$0xff] %v10972_v59  ;;  %1175 = vrot.lane.b32.xlu1 %v18561_v37, %s9000_s9  ;;  %v18569_v59 = vld [vmem:[#allocation24_spill] sm:$0xff] }
 0x1a2   :  { %1173 = vrot.lane.b32.xlu0 %v18562_v60, %s9000_s9 }
 0x1a3   :  { %v10978_v40 = vpop.permute.xlu1 %987 }
 0x1a4   :  { %18563 = vst [vmem:[#allocation20_spill] sm:$0xff] %v10978_v40  ;;  %v10980_v16 = vpop.permute.xlu0 %985 }
 0x1a5   :  { %18564 = vst [vmem:[#allocation21_spill] sm:$0xff] %v10980_v16  ;;  %1179 = vrot.lane.b32.xlu1 %v18565_v8, %s9000_s9  ;;  %v18573_v16 = vld [vmem:[#allocation26_spill] sm:$0xff] }
 0x1a6   :  { %1177 = vrot.lane.b32.xlu0 %v18566_v24, %s9000_s9 }
 0x1a7   :  { %v10986_v6 = vpop.permute.xlu1 %991 }
 0x1a8   :  { %18567 = vst [vmem:[#allocation22_spill] sm:$0xff] %v10986_v6  ;;  %v10988_v33 = vpop.permute.xlu0 %989 }
 0x1a9   :  { %18568 = vst [vmem:[#allocation23_spill] sm:$0xff] %v10988_v33  ;;  %1183 = vrot.lane.b32.xlu1 %v18569_v59, %s9000_s9  ;;  %v18577_v33 = vld [vmem:[#allocation28_spill] sm:$0xff] }
 0x1aa   :  { %1181 = vrot.lane.b32.xlu0 %v18570_v17, %s9000_s9 }
 0x1ab   :  { %v10994_v4 = vpop.permute.xlu1 %995 }
 0x1ac   :  { %18571 = vst [vmem:[#allocation24_spill] sm:$0xff] %v10994_v4  ;;  %v10996_v40 = vpop.permute.xlu0 %993 }
 0x1ad   :  { %18572 = vst [vmem:[#allocation268_spill] sm:$0xff] %v10996_v40  ;;  %1187 = vrot.lane.b32.xlu1 %v18573_v16, %s9000_s9  ;;  %v18581_v40 = vld [vmem:[#allocation30_spill] sm:$0xff] }
 0x1ae   :  { %1185 = vrot.lane.b32.xlu0 %v18574_v41, %s9000_s9  ;;  %v18589_v41 = vld [vmem:[#allocation36_spill] sm:$0xff] }
 0x1af   :  { %v11002_v43 = vpop.permute.xlu1 %999 }
 0x1b0   :  { %18575 = vst [vmem:[#allocation269_spill] sm:$0xff] %v11002_v43  ;;  %v11004_v6 = vpop.permute.xlu0 %997 }
 0x1b1   :  { %18576 = vst [vmem:[#allocation270_spill] sm:$0xff] %v11004_v6  ;;  %1191 = vrot.lane.b32.xlu1 %v18577_v33, %s9000_s9  ;;  %v11023_v6 = vld [vmem:[%s17548_s0 + $0x190] sm:$0x3] }
 0x1b2   :  { %1189 = vrot.lane.b32.xlu0 %v18578_v32, %s9000_s9  ;;  %v18585_v32 = vld [vmem:[#allocation32_spill] sm:$0xff] }
 0x1b3   :  { %v11010_v48 = vpop.permute.xlu1 %1003 }
 0x1b4   :  { %18579 = vst [vmem:[#allocation271_spill] sm:$0xff] %v11010_v48  ;;  %v11012_v4 = vpop.permute.xlu0 %1001  ;;  %v18586_v48 = vld [vmem:[#allocation33_spill] sm:$0xff] }
 0x1b5   :  { %18580 = vst [vmem:[#allocation272_spill] sm:$0xff] %v11012_v4  ;;  %1195 = vrot.lane.b32.xlu1 %v18581_v40, %s9000_s9  ;;  %v1136_v4 = vrot.slane %v10747_v29, 1  ;;  %v1138_v40 = vrot.slane %v11023_v6, 1 }
 0x1b6   :  { %1193 = vrot.lane.b32.xlu0 %v18582_v9, %s9000_s9  ;;  %v1135_v9 = vrot.slane %v10754_v13, 1 }
 0x1b7   :  { %v11018_v44 = vpop.permute.xlu1 %1007 }
 0x1b8   :  { %18583 = vst [vmem:[#allocation273_spill] sm:$0xff] %v11018_v44  ;;  %v11025_v43 = vpop.permute.xlu0 %1005 }
 0x1b9   :  { %18584 = vst [vmem:[#allocation274_spill] sm:$0xff] %v11025_v43  ;;  %1199 = vrot.lane.b32.xlu1 %v18585_v32, %s9000_s9  ;;  %v18590_v43 = vld [vmem:[#allocation37_spill] sm:$0xff]  ;;  %v11043_v32 = vsel %vm231_vm0, %v1136_v4, %v1138_v40  ;;  %v18597_v40 = vld [vmem:[#allocation44_spill] sm:$0xff] }
 0x1ba   :  { %1197 = vrot.lane.b32.xlu0 %v18586_v48, %s9000_s9  ;;  %18591 = vst [vmem:[#allocation36_spill] sm:$0xff] %v11043_v32  ;;  %v11048_v48 = vsel %vm231_vm0, %v1135_v9, %v1136_v4 }
 0x1bb   :  { %v11034_v44 = vpop.permute.xlu1 %1011  ;;  %18593 = vst [vmem:[#allocation277_spill] sm:$0xff] %v11048_v48 }
 0x1bc   :  { %18587 = vst [vmem:[#allocation275_spill] sm:$0xff] %v11034_v44  ;;  %v11036_v33 = vpop.permute.xlu0 %1009 }
 0x1bd   :  { %18588 = vst [vmem:[#allocation276_spill] sm:$0xff] %v11036_v33  ;;  %1203 = vrot.lane.b32.xlu1 %v18589_v41, %s9000_s9 }
 0x1be   :  { %1201 = vrot.lane.b32.xlu0 %v18590_v43, %s9000_s9 }
 0x1bf   :  { %v11045_v16 = vpop.permute.xlu1 %1015 }
 0x1c0   :  { %18592 = vst [vmem:[#allocation37_spill] sm:$0xff] %v11045_v16  ;;  %v11050_v17 = vpop.permute.xlu0 %1013  ;;  %v18598_v16 = vld [vmem:[#allocation45_spill] sm:$0xff] }
 0x1c1   :  { %18594 = vst [vmem:[#allocation278_spill] sm:$0xff] %v11050_v17  ;;  %1207 = vrot.lane.b32.xlu1 %v11043_v32, %s9000_s9  ;;  %v18601_v17 = vld [vmem:[#allocation49_spill] sm:$0xff]  ;;  %v18602_v32 = vld [vmem:[#allocation50_spill] sm:$0xff] }
 0x1c2   :  { %1205 = vrot.lane.b32.xlu0 %v11048_v48, %s9000_s9 }
 0x1c3   :  { %v11056_v33 = vpop.permute.xlu1 %1019 }
 0x1c4   :  { %18595 = vst [vmem:[#allocation279_spill] sm:$0xff] %v11056_v33  ;;  %v11058_v44 = vpop.permute.xlu0 %1017 }
 0x1c5   :  { %18596 = vst [vmem:[#allocation280_spill] sm:$0xff] %v11058_v44  ;;  %1211 = vrot.lane.b32.xlu1 %v18597_v40, %s9000_s9  ;;  %v18605_v44 = vld [vmem:[#allocation54_spill] sm:$0xff]  ;;  %v18606_v40 = vld [vmem:[#allocation55_spill] sm:$0xff] }
 0x1c6   :  { %1209 = vrot.lane.b32.xlu0 %v18598_v16, %s9000_s9 }
 0x1c7   :  { %v11064_v9 = vpop.permute.xlu1 %1023 }
 0x1c8   :  { %18599 = vst [vmem:[#allocation44_spill] sm:$0xff] %v11064_v9  ;;  %v11066_v4 = vpop.permute.xlu0 %1021 }
 0x1c9   :  { %18600 = vst [vmem:[#allocation45_spill] sm:$0xff] %v11066_v4  ;;  %1215 = vrot.lane.b32.xlu1 %v18601_v17, %s9000_s9  ;;  %v18609_v4 = vld [vmem:[#allocation59_spill] sm:$0xff]  ;;  %v18610_v17 = vld [vmem:[#allocation60_spill] sm:$0xff] }
 0x1ca   :  { %1213 = vrot.lane.b32.xlu0 %v18602_v32, %s9000_s9 }
 0x1cb   :  { %v11072_v48 = vpop.permute.xlu1 %1027 }
 0x1cc   :  { %18603 = vst [vmem:[#allocation281_spill] sm:$0xff] %v11072_v48  ;;  %v11074_v33 = vpop.permute.xlu0 %1025 }
 0x1cd   :  { %18604 = vst [vmem:[#allocation282_spill] sm:$0xff] %v11074_v33  ;;  %1219 = vrot.lane.b32.xlu1 %v18605_v44, %s9000_s9  ;;  %v18613_v33 = vld [vmem:[#allocation64_spill] sm:$0xff]  ;;  %v18614_v44 = vld [vmem:[#allocation65_spill] sm:$0xff] }
 0x1ce   :  { %1217 = vrot.lane.b32.xlu0 %v18606_v40, %s9000_s9 }
 0x1cf   :  { %v11080_v16 = vpop.permute.xlu1 %1031 }
 0x1d0   :  { %18607 = vst [vmem:[#allocation283_spill] sm:$0xff] %v11080_v16  ;;  %v11082_v9 = vpop.permute.xlu0 %1029 }
 0x1d1   :  { %18608 = vst [vmem:[#allocation284_spill] sm:$0xff] %v11082_v9  ;;  %1223 = vrot.lane.b32.xlu1 %v18609_v4, %s9000_s9  ;;  %v18617_v9 = vld [vmem:[#allocation69_spill] sm:$0xff]  ;;  %v18618_v4 = vld [vmem:[#allocation70_spill] sm:$0xff] }
 0x1d2   :  { %1221 = vrot.lane.b32.xlu0 %v18610_v17, %s9000_s9 }
 0x1d3   :  { %v11088_v32 = vpop.permute.xlu1 %1035 }
 0x1d4   :  { %18611 = vst [vmem:[#allocation285_spill] sm:$0xff] %v11088_v32  ;;  %v11090_v48 = vpop.permute.xlu0 %1033 }
 0x1d5   :  { %18612 = vst [vmem:[#allocation286_spill] sm:$0xff] %v11090_v48  ;;  %1227 = vrot.lane.b32.xlu1 %v18613_v33, %s9000_s9  ;;  %v18621_v48 = vld [vmem:[#allocation74_spill] sm:$0xff]  ;;  %v18622_v33 = vld [vmem:[#allocation75_spill] sm:$0xff] }
 0x1d6   :  { %1225 = vrot.lane.b32.xlu0 %v18614_v44, %s9000_s9 }
 0x1d7   :  { %v11096_v40 = vpop.permute.xlu1 %1039 }
 0x1d8   :  { %18615 = vst [vmem:[#allocation287_spill] sm:$0xff] %v11096_v40  ;;  %v11098_v16 = vpop.permute.xlu0 %1037 }
 0x1d9   :  { %18616 = vst [vmem:[#allocation288_spill] sm:$0xff] %v11098_v16  ;;  %1231 = vrot.lane.b32.xlu1 %v18617_v9, %s9000_s9  ;;  %v18625_v16 = vld [vmem:[#allocation79_spill] sm:$0xff]  ;;  %v18626_v9 = vld [vmem:[#allocation80_spill] sm:$0xff] }
 0x1da   :  { %1229 = vrot.lane.b32.xlu0 %v18618_v4, %s9000_s9 }
 0x1db   :  { %v11104_v17 = vpop.permute.xlu1 %1043 }
 0x1dc   :  { %18619 = vst [vmem:[#allocation289_spill] sm:$0xff] %v11104_v17  ;;  %v11106_v32 = vpop.permute.xlu0 %1041 }
 0x1dd   :  { %18620 = vst [vmem:[#allocation290_spill] sm:$0xff] %v11106_v32  ;;  %1235 = vrot.lane.b32.xlu1 %v18621_v48, %s9000_s9  ;;  %v18629_v32 = vld [vmem:[#allocation84_spill] sm:$0xff]  ;;  %v18630_v48 = vld [vmem:[#allocation85_spill] sm:$0xff] }
 0x1de   :  { %1233 = vrot.lane.b32.xlu0 %v18622_v33, %s9000_s9 }
 0x1df   :  { %v11112_v44 = vpop.permute.xlu1 %1047 }
 0x1e0   :  { %18623 = vst [vmem:[#allocation291_spill] sm:$0xff] %v11112_v44  ;;  %v11114_v40 = vpop.permute.xlu0 %1045 }
 0x1e1   :  { %18624 = vst [vmem:[#allocation292_spill] sm:$0xff] %v11114_v40  ;;  %1239 = vrot.lane.b32.xlu1 %v18625_v16, %s9000_s9  ;;  %v18633_v40 = vld [vmem:[#allocation89_spill] sm:$0xff]  ;;  %v18634_v16 = vld [vmem:[#allocation90_spill] sm:$0xff] }
 0x1e2   :  { %1237 = vrot.lane.b32.xlu0 %v18626_v9, %s9000_s9 }
 0x1e3   :  { %v11120_v4 = vpop.permute.xlu1 %1051 }
 0x1e4   :  { %18627 = vst [vmem:[#allocation293_spill] sm:$0xff] %v11120_v4  ;;  %v11122_v17 = vpop.permute.xlu0 %1049 }
 0x1e5   :  { %18628 = vst [vmem:[#allocation294_spill] sm:$0xff] %v11122_v17  ;;  %1243 = vrot.lane.b32.xlu1 %v18629_v32, %s9000_s9  ;;  %v18637_v17 = vld [vmem:[#allocation94_spill] sm:$0xff]  ;;  %v18638_v32 = vld [vmem:[#allocation95_spill] sm:$0xff] }
 0x1e6   :  { %1241 = vrot.lane.b32.xlu0 %v18630_v48, %s9000_s9 }
 0x1e7   :  { %v11128_v33 = vpop.permute.xlu1 %1055 }
 0x1e8   :  { %18631 = vst [vmem:[#allocation295_spill] sm:$0xff] %v11128_v33  ;;  %v11130_v44 = vpop.permute.xlu0 %1053 }
 0x1e9   :  { %18632 = vst [vmem:[#allocation296_spill] sm:$0xff] %v11130_v44  ;;  %1247 = vrot.lane.b32.xlu1 %v18633_v40, %s9000_s9  ;;  %v18641_v44 = vld [vmem:[#allocation99_spill] sm:$0xff]  ;;  %v18642_v40 = vld [vmem:[#allocation100_spill] sm:$0xff] }
 0x1ea   :  { %1245 = vrot.lane.b32.xlu0 %v18634_v16, %s9000_s9 }
 0x1eb   :  { %v11136_v9 = vpop.permute.xlu1 %1059 }
 0x1ec   :  { %18635 = vst [vmem:[#allocation297_spill] sm:$0xff] %v11136_v9  ;;  %v11138_v4 = vpop.permute.xlu0 %1057 }
 0x1ed   :  { %18636 = vst [vmem:[#allocation298_spill] sm:$0xff] %v11138_v4  ;;  %1251 = vrot.lane.b32.xlu1 %v18637_v17, %s9000_s9  ;;  %v18645_v4 = vld [vmem:[#allocation104_spill] sm:$0xff]  ;;  %v18646_v17 = vld [vmem:[#allocation106_spill] sm:$0xff] }
 0x1ee   :  { %1249 = vrot.lane.b32.xlu0 %v18638_v32, %s9000_s9 }
 0x1ef   :  { %v11144_v48 = vpop.permute.xlu1 %1063 }
 0x1f0   :  { %18639 = vst [vmem:[#allocation299_spill] sm:$0xff] %v11144_v48  ;;  %v11146_v33 = vpop.permute.xlu0 %1061 }
 0x1f1   :  { %18640 = vst [vmem:[#allocation300_spill] sm:$0xff] %v11146_v33  ;;  %1255 = vrot.lane.b32.xlu1 %v18641_v44, %s9000_s9  ;;  %v11165_v33 = vld [vmem:[%s17548_s0 + $0x340] sm:$0x3] }
 0x1f2   :  { %1253 = vrot.lane.b32.xlu0 %v18642_v40, %s9000_s9 }
 0x1f3   :  { %v11152_v16 = vpop.permute.xlu1 %1067 }
 0x1f4   :  { %18643 = vst [vmem:[#allocation99_spill] sm:$0xff] %v11152_v16  ;;  %v11154_v9 = vpop.permute.xlu0 %1065  ;;  %v1143_v16 = vrot.slane %v11165_v33, 1 }
 0x1f5   :  { %18644 = vst [vmem:[#allocation301_spill] sm:$0xff] %v11154_v9  ;;  %1259 = vrot.lane.b32.xlu1 %v18645_v4, %s9000_s9  ;;  %v1141_v9 = vrot.slane %v10899_v19, 1 }
 0x1f6   :  { %1257 = vrot.lane.b32.xlu0 %v18646_v17, %s9000_s9  ;;  %v1140_v17 = vrot.slane %v10906_v45, 1 }
 0x1f7   :  { %v11160_v32 = vpop.permute.xlu1 %1147 }
 0x1f8   :  { %18647 = vst [vmem:[#allocation302_spill] sm:$0xff] %v11160_v32  ;;  %v11167_v48 = vpop.permute.xlu0 %1145 }
 0x1f9   :  { %18648 = vst [vmem:[#allocation303_spill] sm:$0xff] %v11167_v48  ;;  %1263 = vrot.lane.b32.xlu1 %v9918_v52, %s9000_s9  ;;  %v11185_v48 = vsel %vm231_vm0, %v1141_v9, %v1143_v16 }
 0x1fa   :  { %1261 = vrot.lane.b32.xlu0 %v9925_v27, %s9000_s9  ;;  %v11190_v27 = vsel %vm231_vm0, %v1140_v17, %v1141_v9 }
 0x1fb   :  { %v11176_v32 = vpop.permute.xlu1 %1151 }
 0x1fc   :  { %18649 = vst [vmem:[#allocation304_spill] sm:$0xff] %v11176_v32  ;;  %v11178_v4 = vpop.permute.xlu0 %1149 }
 0x1fd   :  { %18650 = vst [vmem:[#allocation305_spill] sm:$0xff] %v11178_v4  ;;  %1267 = vrot.lane.b32.xlu1 %v9935_v28, %s9000_s9 }
 0x1fe   :  { %1265 = vrot.lane.b32.xlu0 %v9942_v25, %s9000_s9 }
 0x1ff   :  { %v11187_v52 = vpop.permute.xlu1 %1155 }
 0x200   :  { %18651 = vst [vmem:[#allocation306_spill] sm:$0xff] %v11187_v52  ;;  %v11192_v40 = vpop.permute.xlu0 %1153 }
 0x201   :  { %18652 = vst [vmem:[#allocation307_spill] sm:$0xff] %v11192_v40  ;;  %1271 = vrot.lane.b32.xlu1 %v11185_v48, %s9000_s9  ;;  %v18680_v40 = vld [vmem:[#allocation143_spill] sm:$0xff] }
 0x202   :  { %1269 = vrot.lane.b32.xlu0 %v11190_v27, %s9000_s9 }
 0x203   :  { %v11198_v4 = vpop.permute.xlu1 %1159 }
 0x204   :  { %18653 = vst [vmem:[#allocation308_spill] sm:$0xff] %v11198_v4  ;;  %v11200_v32 = vpop.permute.xlu0 %1157 }
 0x205   :  { %18654 = vst [vmem:[#allocation309_spill] sm:$0xff] %v11200_v32  ;;  %1349 = vrot.lane.b32.xlu1 %v9963_v57, %s9001_s13 }
 0x206   :  { %1347 = vrot.lane.b32.xlu0 %v9970_v12, %s9001_s13 }
 0x207   :  { %v11206_v17 = vpop.permute.xlu1 %1163 }
 0x208   :  { %18655 = vst [vmem:[#allocation310_spill] sm:$0xff] %v11206_v17  ;;  %v11208_v9 = vpop.permute.xlu0 %1161  ;;  %v18676_v17 = vld [vmem:[#allocation139_spill] sm:$0xff] }
 0x209   :  { %18656 = vst [vmem:[#allocation311_spill] sm:$0xff] %v11208_v9  ;;  %1353 = vrot.lane.b32.xlu1 %v9980_v5, %s9001_s13 }
 0x20a   :  { %1351 = vrot.lane.b32.xlu0 %v9987_v10, %s9001_s13 }
 0x20b   :  { %v11214_v16 = vpop.permute.xlu1 %1167 }
 0x20c   :  { %18657 = vst [vmem:[#allocation312_spill] sm:$0xff] %v11214_v16  ;;  %v11216_v32 = vpop.permute.xlu0 %1165 }
 0x20d   :  { %18658 = vst [vmem:[#allocation313_spill] sm:$0xff] %v11216_v32  ;;  %1357 = vrot.lane.b32.xlu1 %v9997_v2, %s9001_s13 }
 0x20e   :  { %1355 = vrot.lane.b32.xlu0 %v10004_v1, %s9001_s13 }
 0x20f   :  { %v11222_v57 = vpop.permute.xlu1 %1171 }
 0x210   :  { %18659 = vst [vmem:[#allocation314_spill] sm:$0xff] %v11222_v57  ;;  %v11224_v12 = vpop.permute.xlu0 %1169 }
 0x211   :  { %18660 = vst [vmem:[#allocation315_spill] sm:$0xff] %v11224_v12  ;;  %1361 = vrot.lane.b32.xlu1 %v10014_v14, %s9001_s13 }
 0x212   :  { %1359 = vrot.lane.b32.xlu0 %v10021_v11, %s9001_s13 }
 0x213   :  { %v11230_v9 = vpop.permute.xlu1 %1175 }
 0x214   :  { %18661 = vst [vmem:[#allocation316_spill] sm:$0xff] %v11230_v9  ;;  %v11232_v16 = vpop.permute.xlu0 %1173 }
 0x215   :  { %18662 = vst [vmem:[#allocation317_spill] sm:$0xff] %v11232_v16  ;;  %1365 = vrot.lane.b32.xlu1 %v10031_v23, %s9001_s13 }
 0x216   :  { %1363 = vrot.lane.b32.xlu0 %v10038_v22, %s9001_s13 }
 0x217   :  { %v11238_v32 = vpop.permute.xlu1 %1179 }
 0x218   :  { %18663 = vst [vmem:[#allocation318_spill] sm:$0xff] %v11238_v32  ;;  %v11240_v57 = vpop.permute.xlu0 %1177 }
 0x219   :  { %18664 = vst [vmem:[#allocation319_spill] sm:$0xff] %v11240_v57  ;;  %1369 = vrot.lane.b32.xlu1 %v10048_v31, %s9001_s13 }
 0x21a   :  { %1367 = vrot.lane.b32.xlu0 %v10055_v30, %s9001_s13 }
 0x21b   :  { %v11246_v12 = vpop.permute.xlu1 %1183 }
 0x21c   :  { %18665 = vst [vmem:[#allocation320_spill] sm:$0xff] %v11246_v12  ;;  %v11248_v9 = vpop.permute.xlu0 %1181 }
 0x21d   :  { %18666 = vst [vmem:[#allocation321_spill] sm:$0xff] %v11248_v9  ;;  %1373 = vrot.lane.b32.xlu1 %v10065_v39, %s9001_s13 }
 0x21e   :  { %1371 = vrot.lane.b32.xlu0 %v10072_v38, %s9001_s13 }
 0x21f   :  { %v11254_v16 = vpop.permute.xlu1 %1187 }
 0x220   :  { %18667 = vst [vmem:[#allocation322_spill] sm:$0xff] %v11254_v16  ;;  %v11256_v32 = vpop.permute.xlu0 %1185 }
 0x221   :  { %18668 = vst [vmem:[#allocation323_spill] sm:$0xff] %v11256_v32  ;;  %1377 = vrot.lane.b32.xlu1 %v10082_v47, %s9001_s13 }
 0x222   :  { %1375 = vrot.lane.b32.xlu0 %v10089_v46, %s9001_s13 }
 0x223   :  { %v11262_v57 = vpop.permute.xlu1 %1191 }
 0x224   :  { %18669 = vst [vmem:[#allocation324_spill] sm:$0xff] %v11262_v57  ;;  %v11264_v12 = vpop.permute.xlu0 %1189 }
 0x225   :  { %18670 = vst [vmem:[#allocation325_spill] sm:$0xff] %v11264_v12  ;;  %1381 = vrot.lane.b32.xlu1 %v10099_v55, %s9001_s13  ;;  %v18675_v12 = vld [vmem:[#allocation137_spill] sm:$0xff] }
 0x226   :  { %1379 = vrot.lane.b32.xlu0 %v10106_v54, %s9001_s13 }
 0x227   :  { %v11270_v9 = vpop.permute.xlu1 %1195 }
 0x228   :  { %18671 = vst [vmem:[#allocation326_spill] sm:$0xff] %v11270_v9  ;;  %v11272_v16 = vpop.permute.xlu0 %1193 }
 0x229   :  { %18672 = vst [vmem:[#allocation327_spill] sm:$0xff] %v11272_v16  ;;  %1385 = vrot.lane.b32.xlu1 %v10116_v63, %s9001_s13  ;;  %v18679_v16 = vld [vmem:[#allocation141_spill] sm:$0xff] }
 0x22a   :  { %1383 = vrot.lane.b32.xlu0 %v10123_v62, %s9001_s13 }
 0x22b   :  { %v11278_v32 = vpop.permute.xlu1 %1199 }
 0x22c   :  { %18673 = vst [vmem:[#allocation328_spill] sm:$0xff] %v11278_v32  ;;  %v11280_v57 = vpop.permute.xlu0 %1197 }
 0x22d   :  { %18674 = vst [vmem:[#allocation329_spill] sm:$0xff] %v11280_v57  ;;  %1389 = vrot.lane.b32.xlu1 %v18675_v12, %s9001_s13  ;;  %v18683_v57 = vld [vmem:[#allocation145_spill] sm:$0xff]  ;;  %v18684_v12 = vld [vmem:[#allocation147_spill] sm:$0xff] }
 0x22e   :  { %1387 = vrot.lane.b32.xlu0 %v18676_v17, %s9001_s13 }
 0x22f   :  { %v11286_v4 = vpop.permute.xlu1 %1203 }
 0x230   :  { %18677 = vst [vmem:[#allocation330_spill] sm:$0xff] %v11286_v4  ;;  %v11288_v9 = vpop.permute.xlu0 %1201 }
 0x231   :  { %18678 = vst [vmem:[#allocation331_spill] sm:$0xff] %v11288_v9  ;;  %1393 = vrot.lane.b32.xlu1 %v18679_v16, %s9001_s13  ;;  %v18687_v9 = vld [vmem:[#allocation149_spill] sm:$0xff]  ;;  %v1338_v16 = vrot.slane %v10747_v29, 2 }
 0x232   :  { %1391 = vrot.lane.b32.xlu0 %v18680_v40, %s9001_s13  ;;  %v18688_v40 = vld [vmem:[#allocation151_spill] sm:$0xff] }
 0x233   :  { %v11294_v52 = vpop.permute.xlu1 %1207 }
 0x234   :  { %18681 = vst [vmem:[#allocation332_spill] sm:$0xff] %v11294_v52  ;;  %v11296_v32 = vpop.permute.xlu0 %1205  ;;  %v1337_v52 = vrot.slane %v10754_v13, 2 }
 0x235   :  { %18682 = vst [vmem:[#allocation333_spill] sm:$0xff] %v11296_v32  ;;  %1397 = vrot.lane.b32.xlu1 %v18683_v57, %s9001_s13  ;;  %v1340_v32 = vrot.slane %v11023_v6, 2 }
 0x236   :  { %1395 = vrot.lane.b32.xlu0 %v18684_v12, %s9001_s13 }
 0x237   :  { %v11302_v17 = vpop.permute.xlu1 %1211 }
 0x238   :  { %18685 = vst [vmem:[#allocation334_spill] sm:$0xff] %v11302_v17  ;;  %v11304_v4 = vpop.permute.xlu0 %1209  ;;  %v18691_v17 = vld [vmem:[#allocation153_spill] sm:$0xff] }
 0x239   :  { %18686 = vst [vmem:[#allocation335_spill] sm:$0xff] %v11304_v4  ;;  %1401 = vrot.lane.b32.xlu1 %v18687_v9, %s9001_s13  ;;  %v18692_v4 = vld [vmem:[#allocation154_spill] sm:$0xff]  ;;  %v11322_v9 = vsel %vm584_vm1, %v1338_v16, %v1340_v32  ;;  %v18699_v32 = vld [vmem:[#allocation40_spill] sm:$0xff] }
 0x23a   :  { %1399 = vrot.lane.b32.xlu0 %v18688_v40, %s9001_s13  ;;  %18693 = vst [vmem:[#allocation153_spill] sm:$0xff] %v11322_v9  ;;  %v11327_v40 = vsel %vm584_vm1, %v1337_v52, %v1338_v16 }
 0x23b   :  { %v11313_v57 = vpop.permute.xlu1 %1215  ;;  %18695 = vst [vmem:[#allocation338_spill] sm:$0xff] %v11327_v40 }
 0x23c   :  { %18689 = vst [vmem:[#allocation336_spill] sm:$0xff] %v11313_v57  ;;  %v11315_v62 = vpop.permute.xlu0 %1213 }
 0x23d   :  { %18690 = vst [vmem:[#allocation337_spill] sm:$0xff] %v11315_v62  ;;  %1405 = vrot.lane.b32.xlu1 %v18691_v17, %s9001_s13 }
 0x23e   :  { %1403 = vrot.lane.b32.xlu0 %v18692_v4, %s9001_s13 }
 0x23f   :  { %v11324_v12 = vpop.permute.xlu1 %1219 }
 0x240   :  { %18694 = vst [vmem:[#allocation154_spill] sm:$0xff] %v11324_v12  ;;  %v11329_v6 = vpop.permute.xlu0 %1217  ;;  %v18700_v12 = vld [vmem:[#allocation42_spill] sm:$0xff] }
 0x241   :  { %18696 = vst [vmem:[#allocation339_spill] sm:$0xff] %v11329_v6  ;;  %1409 = vrot.lane.b32.xlu1 %v11322_v9, %s9001_s13  ;;  %v18703_v6 = vld [vmem:[#allocation155_spill] sm:$0xff] }
 0x242   :  { %1407 = vrot.lane.b32.xlu0 %v11327_v40, %s9001_s13  ;;  %v18704_v9 = vld [vmem:[#allocation47_spill] sm:$0xff] }
 0x243   :  { %v11335_v62 = vpop.permute.xlu1 %1223 }
 0x244   :  { %18697 = vst [vmem:[#allocation340_spill] sm:$0xff] %v11335_v62  ;;  %v11337_v57 = vpop.permute.xlu0 %1221 }
 0x245   :  { %18698 = vst [vmem:[#allocation341_spill] sm:$0xff] %v11337_v57  ;;  %1413 = vrot.lane.b32.xlu1 %v18699_v32, %s9001_s13  ;;  %v18707_v57 = vld [vmem:[#allocation156_spill] sm:$0xff] }
 0x246   :  { %1411 = vrot.lane.b32.xlu0 %v18700_v12, %s9001_s13  ;;  %v18708_v32 = vld [vmem:[#allocation52_spill] sm:$0xff] }
 0x247   :  { %v11343_v52 = vpop.permute.xlu1 %1227 }
 0x248   :  { %18701 = vst [vmem:[#allocation40_spill] sm:$0xff] %v11343_v52  ;;  %v11345_v16 = vpop.permute.xlu0 %1225 }
 0x249   :  { %18702 = vst [vmem:[#allocation42_spill] sm:$0xff] %v11345_v16  ;;  %1417 = vrot.lane.b32.xlu1 %v18703_v6, %s9001_s13  ;;  %v18711_v16 = vld [vmem:[#allocation157_spill] sm:$0xff] }
 0x24a   :  { %1415 = vrot.lane.b32.xlu0 %v18704_v9, %s9001_s13  ;;  %v18712_v6 = vld [vmem:[#allocation57_spill] sm:$0xff] }
 0x24b   :  { %v11351_v40 = vpop.permute.xlu1 %1231 }
 0x24c   :  { %18705 = vst [vmem:[#allocation342_spill] sm:$0xff] %v11351_v40  ;;  %v11353_v62 = vpop.permute.xlu0 %1229 }
 0x24d   :  { %18706 = vst [vmem:[#allocation343_spill] sm:$0xff] %v11353_v62  ;;  %1421 = vrot.lane.b32.xlu1 %v18707_v57, %s9001_s13  ;;  %v18715_v62 = vld [vmem:[#allocation158_spill] sm:$0xff] }
 0x24e   :  { %1419 = vrot.lane.b32.xlu0 %v18708_v32, %s9001_s13  ;;  %v18716_v57 = vld [vmem:[#allocation62_spill] sm:$0xff] }
 0x24f   :  { %v11359_v12 = vpop.permute.xlu1 %1235 }
 0x250   :  { %18709 = vst [vmem:[#allocation344_spill] sm:$0xff] %v11359_v12  ;;  %v11361_v52 = vpop.permute.xlu0 %1233 }
 0x251   :  { %18710 = vst [vmem:[#allocation345_spill] sm:$0xff] %v11361_v52  ;;  %1425 = vrot.lane.b32.xlu1 %v18711_v16, %s9001_s13  ;;  %v18719_v52 = vld [vmem:[#allocation159_spill] sm:$0xff] }
 0x252   :  { %1423 = vrot.lane.b32.xlu0 %v18712_v6, %s9001_s13  ;;  %v18720_v16 = vld [vmem:[#allocation67_spill] sm:$0xff] }
 0x253   :  { %v11367_v9 = vpop.permute.xlu1 %1239 }
 0x254   :  { %18713 = vst [vmem:[#allocation346_spill] sm:$0xff] %v11367_v9  ;;  %v11369_v40 = vpop.permute.xlu0 %1237 }
 0x255   :  { %18714 = vst [vmem:[#allocation347_spill] sm:$0xff] %v11369_v40  ;;  %1429 = vrot.lane.b32.xlu1 %v18715_v62, %s9001_s13  ;;  %v18723_v40 = vld [vmem:[#allocation160_spill] sm:$0xff] }
 0x256   :  { %1427 = vrot.lane.b32.xlu0 %v18716_v57, %s9001_s13  ;;  %v18724_v62 = vld [vmem:[#allocation72_spill] sm:$0xff] }
 0x257   :  { %v11375_v32 = vpop.permute.xlu1 %1243 }
 0x258   :  { %18717 = vst [vmem:[#allocation348_spill] sm:$0xff] %v11375_v32  ;;  %v11377_v12 = vpop.permute.xlu0 %1241 }
 0x259   :  { %18718 = vst [vmem:[#allocation349_spill] sm:$0xff] %v11377_v12  ;;  %1433 = vrot.lane.b32.xlu1 %v18719_v52, %s9001_s13  ;;  %v18727_v12 = vld [vmem:[#allocation161_spill] sm:$0xff] }
 0x25a   :  { %1431 = vrot.lane.b32.xlu0 %v18720_v16, %s9001_s13  ;;  %v18728_v52 = vld [vmem:[#allocation77_spill] sm:$0xff] }
 0x25b   :  { %v11383_v6 = vpop.permute.xlu1 %1247 }
 0x25c   :  { %18721 = vst [vmem:[#allocation350_spill] sm:$0xff] %v11383_v6  ;;  %v11385_v9 = vpop.permute.xlu0 %1245 }
 0x25d   :  { %18722 = vst [vmem:[#allocation351_spill] sm:$0xff] %v11385_v9  ;;  %1437 = vrot.lane.b32.xlu1 %v18723_v40, %s9001_s13  ;;  %v18731_v9 = vld [vmem:[#allocation162_spill] sm:$0xff] }
 0x25e   :  { %1435 = vrot.lane.b32.xlu0 %v18724_v62, %s9001_s13  ;;  %v18732_v40 = vld [vmem:[#allocation82_spill] sm:$0xff] }
 0x25f   :  { %v11391_v57 = vpop.permute.xlu1 %1251 }
 0x260   :  { %18725 = vst [vmem:[#allocation352_spill] sm:$0xff] %v11391_v57  ;;  %v11393_v32 = vpop.permute.xlu0 %1249 }
 0x261   :  { %18726 = vst [vmem:[#allocation353_spill] sm:$0xff] %v11393_v32  ;;  %1441 = vrot.lane.b32.xlu1 %v18727_v12, %s9001_s13  ;;  %v18735_v32 = vld [vmem:[#allocation163_spill] sm:$0xff] }
 0x262   :  { %1439 = vrot.lane.b32.xlu0 %v18728_v52, %s9001_s13  ;;  %v18736_v12 = vld [vmem:[#allocation87_spill] sm:$0xff] }
 0x263   :  { %v11399_v16 = vpop.permute.xlu1 %1255 }
 0x264   :  { %18729 = vst [vmem:[#allocation354_spill] sm:$0xff] %v11399_v16  ;;  %v11401_v6 = vpop.permute.xlu0 %1253 }
 0x265   :  { %18730 = vst [vmem:[#allocation355_spill] sm:$0xff] %v11401_v6  ;;  %1445 = vrot.lane.b32.xlu1 %v18731_v9, %s9001_s13  ;;  %v18739_v6 = vld [vmem:[#allocation164_spill] sm:$0xff] }
 0x266   :  { %1443 = vrot.lane.b32.xlu0 %v18732_v40, %s9001_s13  ;;  %v18740_v9 = vld [vmem:[#allocation92_spill] sm:$0xff] }
 0x267   :  { %v11407_v62 = vpop.permute.xlu1 %1259 }
 0x268   :  { %18733 = vst [vmem:[#allocation356_spill] sm:$0xff] %v11407_v62  ;;  %v11409_v57 = vpop.permute.xlu0 %1257 }
 0x269   :  { %18734 = vst [vmem:[#allocation357_spill] sm:$0xff] %v11409_v57  ;;  %1449 = vrot.lane.b32.xlu1 %v18735_v32, %s9001_s13  ;;  %v18743_v57 = vld [vmem:[#allocation97_spill] sm:$0xff] }
 0x26a   :  { %1447 = vrot.lane.b32.xlu0 %v18736_v12, %s9001_s13 }
 0x26b   :  { %v11415_v52 = vpop.permute.xlu1 %1263 }
 0x26c   :  { %18737 = vst [vmem:[#allocation163_spill] sm:$0xff] %v11415_v52  ;;  %v11417_v16 = vpop.permute.xlu0 %1261 }
 0x26d   :  { %18738 = vst [vmem:[#allocation358_spill] sm:$0xff] %v11417_v16  ;;  %1453 = vrot.lane.b32.xlu1 %v18739_v6, %s9001_s13  ;;  %v18746_v16 = vld [vmem:[#allocation102_spill] sm:$0xff] }
 0x26e   :  { %1451 = vrot.lane.b32.xlu0 %v18740_v9, %s9001_s13 }
 0x26f   :  { %v11423_v40 = vpop.permute.xlu1 %1267 }
 0x270   :  { %18741 = vst [vmem:[#allocation164_spill] sm:$0xff] %v11423_v40  ;;  %v11425_v62 = vpop.permute.xlu0 %1265 }
 0x271   :  { %18742 = vst [vmem:[#allocation359_spill] sm:$0xff] %v11425_v62  ;;  %1457 = vrot.lane.b32.xlu1 %v10416_v20, %s9001_s13  ;;  %v1343_v62 = vrot.slane %v10899_v19, 2 }
 0x272   :  { %1455 = vrot.lane.b32.xlu0 %v18743_v57, %s9001_s13 }
 0x273   :  { %v11431_v12 = vpop.permute.xlu1 %1271 }
 0x274   :  { %18744 = vst [vmem:[#allocation360_spill] sm:$0xff] %v11431_v12  ;;  %v11433_v52 = vpop.permute.xlu0 %1269  ;;  %v1342_v12 = vrot.slane %v10906_v45, 2 }
 0x275   :  { %18745 = vst [vmem:[#allocation361_spill] sm:$0xff] %v11433_v52  ;;  %1461 = vrot.lane.b32.xlu1 %v10433_v26, %s9001_s13  ;;  %v1345_v52 = vrot.slane %v11165_v33, 2 }
 0x276   :  { %1459 = vrot.lane.b32.xlu0 %v18746_v16, %s9001_s13 }
 0x277   :  { %v11439_v9 = vpop.permute.xlu1 %1349 }
 0x278   :  { %v11441_v40 = vpop.permute.xlu0 %1347 }
 0x279   :  { %18747 = vst [vmem:[#allocation102_spill] sm:$0xff] %v11441_v40  ;;  %1465 = vrot.lane.b32.xlu1 %v10450_v53, %s9001_s13  ;;  %v11459_v40 = vsel %vm584_vm1, %v1343_v62, %v1345_v52  ;;  %v18755_v52 = vld [vmem:[#allocation177_spill] sm:$0xff] }
 0x27a   :  { %1463 = vrot.lane.b32.xlu0 %v10457_v58, %s9001_s13  ;;  %18749 = vst [vmem:[#allocation363_spill] sm:$0xff] %v11459_v40  ;;  %v11464_v58 = vsel %vm584_vm1, %v1342_v12, %v1343_v62 }
 0x27b   :  { %v11450_v26 = vpop.permute.xlu1 %1353  ;;  %18751 = vst [vmem:[#allocation365_spill] sm:$0xff] %v11464_v58 }
 0x27c   :  { %v11452_v57 = vpop.permute.xlu0 %1351 }
 0x27d   :  { %18748 = vst [vmem:[#allocation362_spill] sm:$0xff] %v11452_v57  ;;  %1469 = vrot.lane.b32.xlu1 %v10467_v34, %s9001_s13 }
 0x27e   :  { %1467 = vrot.lane.b32.xlu0 %v10472_v21, %s9001_s13 }
 0x27f   :  { %v11461_v53 = vpop.permute.xlu1 %1357 }
 0x280   :  { %18750 = vst [vmem:[#allocation364_spill] sm:$0xff] %v11461_v53  ;;  %v11466_v33 = vpop.permute.xlu0 %1355  ;;  %v18756_v53 = vld [vmem:[#allocation178_spill] sm:$0xff] }
 0x281   :  { %18752 = vst [vmem:[#allocation366_spill] sm:$0xff] %v11466_v33  ;;  %1473 = vrot.lane.b32.xlu1 %v11459_v40, %s9001_s13  ;;  %v18759_v33 = vld [vmem:[#allocation181_spill] sm:$0xff] }
 0x282   :  { %1471 = vrot.lane.b32.xlu0 %v11464_v58, %s9001_s13  ;;  %v18760_v58 = vld [vmem:[#allocation182_spill] sm:$0xff]  ;;  %v18763_v40 = vld [vmem:[#allocation185_spill] sm:$0xff] }
 0x283   :  { %v11472_v57 = vpop.permute.xlu1 %1361 }
 0x284   :  { %18753 = vst [vmem:[#allocation367_spill] sm:$0xff] %v11472_v57  ;;  %v11474_v34 = vpop.permute.xlu0 %1359 }
 0x285   :  { %18754 = vst [vmem:[#allocation368_spill] sm:$0xff] %v11474_v34  ;;  %1545 = vrot.lane.b32.xlu1 %v18755_v52, %s9002_s14  ;;  %v18764_v52 = vld [vmem:[#allocation186_spill] sm:$0xff] }
 0x286   :  { %1543 = vrot.lane.b32.xlu0 %v18756_v53, %s9002_s14 }
 0x287   :  { %v11480_v62 = vpop.permute.xlu1 %1365 }
 0x288   :  { %18757 = vst [vmem:[#allocation177_spill] sm:$0xff] %v11480_v62  ;;  %v11482_v12 = vpop.permute.xlu0 %1363 }
 0x289   :  { %18758 = vst [vmem:[#allocation178_spill] sm:$0xff] %v11482_v12  ;;  %1549 = vrot.lane.b32.xlu1 %v18759_v33, %s9002_s14  ;;  %v18767_v12 = vld [vmem:[#allocation189_spill] sm:$0xff]  ;;  %v18768_v33 = vld [vmem:[#allocation190_spill] sm:$0xff] }
 0x28a   :  { %1547 = vrot.lane.b32.xlu0 %v18760_v58, %s9002_s14 }
 0x28b   :  { %v11488_v57 = vpop.permute.xlu1 %1369 }
 0x28c   :  { %18761 = vst [vmem:[#allocation181_spill] sm:$0xff] %v11488_v57  ;;  %v11490_v34 = vpop.permute.xlu0 %1367 }
 0x28d   :  { %18762 = vst [vmem:[#allocation182_spill] sm:$0xff] %v11490_v34  ;;  %1553 = vrot.lane.b32.xlu1 %v18763_v40, %s9002_s14  ;;  %v18771_v34 = vld [vmem:[#allocation193_spill] sm:$0xff]  ;;  %v18772_v40 = vld [vmem:[#allocation194_spill] sm:$0xff] }
 0x28e   :  { %1551 = vrot.lane.b32.xlu0 %v18764_v52, %s9002_s14 }
 0x28f   :  { %v11496_v53 = vpop.permute.xlu1 %1373 }
 0x290   :  { %18765 = vst [vmem:[#allocation185_spill] sm:$0xff] %v11496_v53  ;;  %v11498_v62 = vpop.permute.xlu0 %1371 }
 0x291   :  { %18766 = vst [vmem:[#allocation186_spill] sm:$0xff] %v11498_v62  ;;  %1557 = vrot.lane.b32.xlu1 %v18767_v12, %s9002_s14  ;;  %v18775_v62 = vld [vmem:[#allocation197_spill] sm:$0xff]  ;;  %v18776_v12 = vld [vmem:[#allocation198_spill] sm:$0xff] }
 0x292   :  { %1555 = vrot.lane.b32.xlu0 %v18768_v33, %s9002_s14 }
 0x293   :  { %v11504_v58 = vpop.permute.xlu1 %1377 }
 0x294   :  { %18769 = vst [vmem:[#allocation189_spill] sm:$0xff] %v11504_v58  ;;  %v11506_v57 = vpop.permute.xlu0 %1375 }
 0x295   :  { %18770 = vst [vmem:[#allocation190_spill] sm:$0xff] %v11506_v57  ;;  %1561 = vrot.lane.b32.xlu1 %v18771_v34, %s9002_s14  ;;  %v18779_v57 = vld [vmem:[#allocation201_spill] sm:$0xff]  ;;  %v18780_v34 = vld [vmem:[#allocation202_spill] sm:$0xff] }
 0x296   :  { %1559 = vrot.lane.b32.xlu0 %v18772_v40, %s9002_s14 }
 0x297   :  { %v11512_v52 = vpop.permute.xlu1 %1381 }
 0x298   :  { %18773 = vst [vmem:[#allocation193_spill] sm:$0xff] %v11512_v52  ;;  %v11514_v53 = vpop.permute.xlu0 %1379 }
 0x299   :  { %18774 = vst [vmem:[#allocation194_spill] sm:$0xff] %v11514_v53  ;;  %1565 = vrot.lane.b32.xlu1 %v18775_v62, %s9002_s14  ;;  %v18783_v53 = vld [vmem:[#allocation205_spill] sm:$0xff]  ;;  %v18784_v62 = vld [vmem:[#allocation206_spill] sm:$0xff] }
 0x29a   :  { %1563 = vrot.lane.b32.xlu0 %v18776_v12, %s9002_s14 }
 0x29b   :  { %v11520_v33 = vpop.permute.xlu1 %1385 }
 0x29c   :  { %18777 = vst [vmem:[#allocation197_spill] sm:$0xff] %v11520_v33  ;;  %v11522_v58 = vpop.permute.xlu0 %1383 }
 0x29d   :  { %18778 = vst [vmem:[#allocation198_spill] sm:$0xff] %v11522_v58  ;;  %1569 = vrot.lane.b32.xlu1 %v18779_v57, %s9002_s14  ;;  %v18787_v58 = vld [vmem:[#allocation209_spill] sm:$0xff]  ;;  %v18788_v57 = vld [vmem:[#allocation210_spill] sm:$0xff] }
 0x29e   :  { %1567 = vrot.lane.b32.xlu0 %v18780_v34, %s9002_s14 }
 0x29f   :  { %v11528_v40 = vpop.permute.xlu1 %1389 }
 0x2a0   :  { %18781 = vst [vmem:[#allocation201_spill] sm:$0xff] %v11528_v40  ;;  %v11530_v52 = vpop.permute.xlu0 %1387 }
 0x2a1   :  { %18782 = vst [vmem:[#allocation202_spill] sm:$0xff] %v11530_v52  ;;  %1573 = vrot.lane.b32.xlu1 %v18783_v53, %s9002_s14  ;;  %v18791_v52 = vld [vmem:[#allocation213_spill] sm:$0xff]  ;;  %v18792_v53 = vld [vmem:[#allocation214_spill] sm:$0xff] }
 0x2a2   :  { %1571 = vrot.lane.b32.xlu0 %v18784_v62, %s9002_s14 }
 0x2a3   :  { %v11536_v12 = vpop.permute.xlu1 %1393 }
 0x2a4   :  { %18785 = vst [vmem:[#allocation205_spill] sm:$0xff] %v11536_v12  ;;  %v11538_v33 = vpop.permute.xlu0 %1391 }
 0x2a5   :  { %18786 = vst [vmem:[#allocation206_spill] sm:$0xff] %v11538_v33  ;;  %1577 = vrot.lane.b32.xlu1 %v18787_v58, %s9002_s14  ;;  %v18795_v33 = vld [vmem:[#allocation217_spill] sm:$0xff]  ;;  %v18796_v58 = vld [vmem:[#allocation218_spill] sm:$0xff] }
 0x2a6   :  { %1575 = vrot.lane.b32.xlu0 %v18788_v57, %s9002_s14 }
 0x2a7   :  { %v11544_v34 = vpop.permute.xlu1 %1397 }
 0x2a8   :  { %18789 = vst [vmem:[#allocation209_spill] sm:$0xff] %v11544_v34  ;;  %v11546_v40 = vpop.permute.xlu0 %1395 }
 0x2a9   :  { %18790 = vst [vmem:[#allocation210_spill] sm:$0xff] %v11546_v40  ;;  %1581 = vrot.lane.b32.xlu1 %v18791_v52, %s9002_s14  ;;  %v18799_v40 = vld [vmem:[#allocation221_spill] sm:$0xff]  ;;  %v18800_v52 = vld [vmem:[#allocation222_spill] sm:$0xff] }
 0x2aa   :  { %1579 = vrot.lane.b32.xlu0 %v18792_v53, %s9002_s14 }
 0x2ab   :  { %v11552_v62 = vpop.permute.xlu1 %1401 }
 0x2ac   :  { %18793 = vst [vmem:[#allocation213_spill] sm:$0xff] %v11552_v62  ;;  %v11554_v12 = vpop.permute.xlu0 %1399 }
 0x2ad   :  { %18794 = vst [vmem:[#allocation214_spill] sm:$0xff] %v11554_v12  ;;  %1585 = vrot.lane.b32.xlu1 %v18795_v33, %s9002_s14  ;;  %v18803_v12 = vld [vmem:[#allocation225_spill] sm:$0xff]  ;;  %v18804_v33 = vld [vmem:[#allocation226_spill] sm:$0xff] }
 0x2ae   :  { %1583 = vrot.lane.b32.xlu0 %v18796_v58, %s9002_s14 }
 0x2af   :  { %v11560_v57 = vpop.permute.xlu1 %1405 }
 0x2b0   :  { %18797 = vst [vmem:[#allocation217_spill] sm:$0xff] %v11560_v57  ;;  %v11562_v34 = vpop.permute.xlu0 %1403 }
 0x2b1   :  { %18798 = vst [vmem:[#allocation218_spill] sm:$0xff] %v11562_v34  ;;  %1589 = vrot.lane.b32.xlu1 %v18799_v40, %s9002_s14  ;;  %v18807_v34 = vld [vmem:[#allocation229_spill] sm:$0xff]  ;;  %v18808_v40 = vld [vmem:[#allocation230_spill] sm:$0xff] }
 0x2b2   :  { %1587 = vrot.lane.b32.xlu0 %v18800_v52, %s9002_s14 }
 0x2b3   :  { %v11568_v53 = vpop.permute.xlu1 %1409 }
 0x2b4   :  { %18801 = vst [vmem:[#allocation221_spill] sm:$0xff] %v11568_v53  ;;  %v11570_v62 = vpop.permute.xlu0 %1407 }
 0x2b5   :  { %18802 = vst [vmem:[#allocation222_spill] sm:$0xff] %v11570_v62  ;;  %1593 = vrot.lane.b32.xlu1 %v18803_v12, %s9002_s14  ;;  %v11595_v12 = vld [vmem:[%s17548_s0 + $0x1a0] sm:$0xff] }
 0x2b6   :  { %1591 = vrot.lane.b32.xlu0 %v18804_v33, %s9002_s14 }
 0x2b7   :  { %v11576_v58 = vpop.permute.xlu1 %1413 }
 0x2b8   :  { %18805 = vst [vmem:[#allocation225_spill] sm:$0xff] %v11576_v58  ;;  %v11578_v57 = vpop.permute.xlu0 %1411 }
 0x2b9   :  { %18806 = vst [vmem:[#allocation226_spill] sm:$0xff] %v11578_v57  ;;  %1597 = vrot.lane.b32.xlu1 %v18807_v34, %s9002_s14  ;;  %v11602_v34 = vld [vmem:[%s17548_s0 + $0x198] sm:$0xff] }
 0x2ba   :  { %1595 = vrot.lane.b32.xlu0 %v18808_v40, %s9002_s14 }
 0x2bb   :  { %v11584_v52 = vpop.permute.xlu1 %1417 }
 0x2bc   :  { %18809 = vst [vmem:[#allocation229_spill] sm:$0xff] %v11584_v52  ;;  %v11586_v53 = vpop.permute.xlu0 %1415 }
 0x2bd   :  { %18810 = vst [vmem:[#allocation230_spill] sm:$0xff] %v11586_v53  ;;  %1601 = vrot.lane.b32.xlu1 %v10747_v29, %s9002_s14 }
 0x2be   :  { %1599 = vrot.lane.b32.xlu0 %v10754_v13, %s9002_s14 }
 0x2bf   :  { %v11597_v33 = vpop.permute.xlu1 %1421 }
 0x2c0   :  { %18811 = vst [vmem:[#allocation369_spill] sm:$0xff] %v11597_v33  ;;  %v11604_v40 = vpop.permute.xlu0 %1419  ;;  %v18815_v33 = vld [vmem:[#allocation237_spill] sm:$0xff] }
 0x2c1   :  { %18812 = vst [vmem:[#allocation370_spill] sm:$0xff] %v11604_v40  ;;  %1605 = vrot.lane.b32.xlu1 %v11595_v12, %s9002_s14  ;;  %v8790_v40 = vld [vmem:[%s17548_s0 + $0x200] sm:$0xff] }
 0x2c2   :  { %1603 = vrot.lane.b32.xlu0 %v11602_v34, %s9002_s14 }
 0x2c3   :  { %v11610_v13 = vpop.permute.xlu1 %1425 }
 0x2c4   :  { %18813 = vst [vmem:[#allocation371_spill] sm:$0xff] %v11610_v13  ;;  %v11612_v29 = vpop.permute.xlu0 %1423 }
 0x2c5   :  { %18814 = vst [vmem:[#allocation372_spill] sm:$0xff] %v11612_v29  ;;  %1609 = vrot.lane.b32.xlu1 %v10781_v35, %s9002_s14  ;;  %v8791_v29 = vld [vmem:[%s17548_s0 + $0x1f8] sm:$0xff] }
 0x2c6   :  { %1607 = vrot.lane.b32.xlu0 %v18815_v33, %s9002_s14  ;;  %v8792_v33 = vld [vmem:[%s17548_s0 + $0x218] sm:$0xff] }
 0x2c7   :  { %v11618_v53 = vpop.permute.xlu1 %1429 }
 0x2c8   :  { %18816 = vst [vmem:[#allocation237_spill] sm:$0xff] %v11618_v53  ;;  %v11620_v52 = vpop.permute.xlu0 %1427 }
 0x2c9   :  { %18817 = vst [vmem:[#allocation373_spill] sm:$0xff] %v11620_v52  ;;  %1613 = vrot.lane.b32.xlu1 %v8790_v40, %s9002_s14  ;;  %v8793_v40 = vld [vmem:[%s17548_s0 + $0x210] sm:$0xff] }
 0x2ca   :  { %1611 = vrot.lane.b32.xlu0 %v8791_v29, %s9002_s14  ;;  %v8794_v29 = vld [vmem:[%s17548_s0 + $0x230] sm:$0xff] }
 0x2cb   :  { %v11630_v35 = vpop.permute.xlu1 %1433 }
 0x2cc   :  { %18818 = vst [vmem:[#allocation374_spill] sm:$0xff] %v11630_v35  ;;  %v11632_v13 = vpop.permute.xlu0 %1431 }
 0x2cd   :  { %18819 = vst [vmem:[#allocation375_spill] sm:$0xff] %v11632_v13  ;;  %1617 = vrot.lane.b32.xlu1 %v8792_v33, %s9002_s14  ;;  %v8795_v33 = vld [vmem:[%s17548_s0 + $0x228] sm:$0xff] }
 0x2ce   :  { %1615 = vrot.lane.b32.xlu0 %v8793_v40, %s9002_s14  ;;  %v8796_v40 = vld [vmem:[%s17548_s0 + $0x248] sm:$0xff] }
 0x2cf   :  { %v11642_v52 = vpop.permute.xlu1 %1437 }
 0x2d0   :  { %18820 = vst [vmem:[#allocation376_spill] sm:$0xff] %v11642_v52  ;;  %v11644_v53 = vpop.permute.xlu0 %1435 }
 0x2d1   :  { %18821 = vst [vmem:[#allocation377_spill] sm:$0xff] %v11644_v53  ;;  %1621 = vrot.lane.b32.xlu1 %v8794_v29, %s9002_s14  ;;  %v8797_v29 = vld [vmem:[%s17548_s0 + $0x240] sm:$0xff] }
 0x2d2   :  { %1619 = vrot.lane.b32.xlu0 %v8795_v33, %s9002_s14  ;;  %v8798_v33 = vld [vmem:[%s17548_s0 + $0x260] sm:$0xff] }
 0x2d3   :  { %v11654_v13 = vpop.permute.xlu1 %1441 }
 0x2d4   :  { %18822 = vst [vmem:[#allocation378_spill] sm:$0xff] %v11654_v13  ;;  %v11656_v35 = vpop.permute.xlu0 %1439 }
 0x2d5   :  { %18823 = vst [vmem:[#allocation379_spill] sm:$0xff] %v11656_v35  ;;  %1625 = vrot.lane.b32.xlu1 %v8796_v40, %s9002_s14  ;;  %v8799_v40 = vld [vmem:[%s17548_s0 + $0x258] sm:$0xff] }
 0x2d6   :  { %1623 = vrot.lane.b32.xlu0 %v8797_v29, %s9002_s14  ;;  %v8800_v29 = vld [vmem:[%s17548_s0 + $0x278] sm:$0xff] }
 0x2d7   :  { %v11666_v53 = vpop.permute.xlu1 %1445 }
 0x2d8   :  { %18824 = vst [vmem:[#allocation380_spill] sm:$0xff] %v11666_v53  ;;  %v11668_v52 = vpop.permute.xlu0 %1443 }
 0x2d9   :  { %18825 = vst [vmem:[#allocation381_spill] sm:$0xff] %v11668_v52  ;;  %1629 = vrot.lane.b32.xlu1 %v8798_v33, %s9002_s14  ;;  %v8801_v33 = vld [vmem:[%s17548_s0 + $0x270] sm:$0xff] }
 0x2da   :  { %1627 = vrot.lane.b32.xlu0 %v8799_v40, %s9002_s14  ;;  %v8802_v40 = vld [vmem:[%s17548_s0 + $0x290] sm:$0xff] }
 0x2db   :  { %v11678_v35 = vpop.permute.xlu1 %1449 }
 0x2dc   :  { %18826 = vst [vmem:[#allocation382_spill] sm:$0xff] %v11678_v35  ;;  %v11680_v13 = vpop.permute.xlu0 %1447 }
 0x2dd   :  { %18827 = vst [vmem:[#allocation383_spill] sm:$0xff] %v11680_v13  ;;  %1633 = vrot.lane.b32.xlu1 %v8800_v29, %s9002_s14  ;;  %v8803_v29 = vld [vmem:[%s17548_s0 + $0x288] sm:$0xff] }
 0x2de   :  { %1631 = vrot.lane.b32.xlu0 %v8801_v33, %s9002_s14  ;;  %v8804_v33 = vld [vmem:[%s17548_s0 + $0x2a8] sm:$0xff] }
 0x2df   :  { %v11690_v52 = vpop.permute.xlu1 %1453 }
 0x2e0   :  { %18828 = vst [vmem:[#allocation384_spill] sm:$0xff] %v11690_v52  ;;  %v11692_v53 = vpop.permute.xlu0 %1451 }
 0x2e1   :  { %18829 = vst [vmem:[#allocation385_spill] sm:$0xff] %v11692_v53  ;;  %1637 = vrot.lane.b32.xlu1 %v8802_v40, %s9002_s14  ;;  %v8805_v40 = vld [vmem:[%s17548_s0 + $0x2a0] sm:$0xff] }
 0x2e2   :  { %1635 = vrot.lane.b32.xlu0 %v8803_v29, %s9002_s14  ;;  %v8806_v29 = vld [vmem:[%s17548_s0 + $0x2c0] sm:$0xff] }
 0x2e3   :  { %v11702_v13 = vpop.permute.xlu1 %1457 }
 0x2e4   :  { %18830 = vst [vmem:[#allocation386_spill] sm:$0xff] %v11702_v13  ;;  %v11704_v35 = vpop.permute.xlu0 %1455 }
 0x2e5   :  { %18831 = vst [vmem:[#allocation387_spill] sm:$0xff] %v11704_v35  ;;  %1641 = vrot.lane.b32.xlu1 %v8804_v33, %s9002_s14  ;;  %v8807_v33 = vld [vmem:[%s17548_s0 + $0x2b8] sm:$0xff] }
 0x2e6   :  { %1639 = vrot.lane.b32.xlu0 %v8805_v40, %s9002_s14  ;;  %v8808_v40 = vld [vmem:[%s17548_s0 + $0x2d8] sm:$0xff] }
 0x2e7   :  { %v11714_v53 = vpop.permute.xlu1 %1461 }
 0x2e8   :  { %18832 = vst [vmem:[#allocation388_spill] sm:$0xff] %v11714_v53  ;;  %v11716_v52 = vpop.permute.xlu0 %1459 }
 0x2e9   :  { %18833 = vst [vmem:[#allocation389_spill] sm:$0xff] %v11716_v52  ;;  %1645 = vrot.lane.b32.xlu1 %v8806_v29, %s9002_s14  ;;  %v8809_v29 = vld [vmem:[%s17548_s0 + $0x2d0] sm:$0xff] }
 0x2ea   :  { %1643 = vrot.lane.b32.xlu0 %v8807_v33, %s9002_s14  ;;  %v8810_v33 = vld [vmem:[%s17548_s0 + $0x2f0] sm:$0xff] }
 0x2eb   :  { %v11726_v35 = vpop.permute.xlu1 %1465 }
 0x2ec   :  { %18834 = vst [vmem:[#allocation390_spill] sm:$0xff] %v11726_v35  ;;  %v11728_v13 = vpop.permute.xlu0 %1463 }
 0x2ed   :  { %18835 = vst [vmem:[#allocation391_spill] sm:$0xff] %v11728_v13  ;;  %1649 = vrot.lane.b32.xlu1 %v8808_v40, %s9002_s14  ;;  %v8811_v40 = vld [vmem:[%s17548_s0 + $0x2e8] sm:$0xff] }
 0x2ee   :  { %1647 = vrot.lane.b32.xlu0 %v8809_v29, %s9002_s14  ;;  %v8812_v29 = vld [vmem:[%s17548_s0 + $0x308] sm:$0xff] }
 0x2ef   :  { %v11738_v52 = vpop.permute.xlu1 %1469 }
 0x2f0   :  { %18836 = vst [vmem:[#allocation392_spill] sm:$0xff] %v11738_v52  ;;  %v11740_v53 = vpop.permute.xlu0 %1467 }
 0x2f1   :  { %18837 = vst [vmem:[#allocation393_spill] sm:$0xff] %v11740_v53  ;;  %1653 = vrot.lane.b32.xlu1 %v8810_v33, %s9002_s14  ;;  %v8813_v33 = vld [vmem:[%s17548_s0 + $0x300] sm:$0xff] }
 0x2f2   :  { %1651 = vrot.lane.b32.xlu0 %v8811_v40, %s9002_s14  ;;  %v8814_v40 = vld [vmem:[%s17548_s0 + $0x320] sm:$0xff] }
 0x2f3   :  { %v11750_v13 = vpop.permute.xlu1 %1473 }
 0x2f4   :  { %18838 = vst [vmem:[#allocation394_spill] sm:$0xff] %v11750_v13  ;;  %v11752_v35 = vpop.permute.xlu0 %1471 }
 0x2f5   :  { %18839 = vst [vmem:[#allocation395_spill] sm:$0xff] %v11752_v35  ;;  %1657 = vrot.lane.b32.xlu1 %v8812_v29, %s9002_s14  ;;  %v8815_v29 = vld [vmem:[%s17548_s0 + $0x318] sm:$0xff] }
 0x2f6   :  { %1655 = vrot.lane.b32.xlu0 %v8813_v33, %s9002_s14  ;;  %v11785_v33 = vld [vmem:[%s17548_s0 + $0x350] sm:$0xff] }
 0x2f7   :  { %v11762_v53 = vpop.permute.xlu1 %1545 }
 0x2f8   :  { %v11764_v52 = vpop.permute.xlu0 %1543 }
 0x2f9   :  { %1661 = vrot.lane.b32.xlu1 %v8814_v40, %s9002_s14 }
 0x2fa   :  { %1659 = vrot.lane.b32.xlu0 %v8815_v29, %s9002_s14  ;;  %v11792_v29 = vld [vmem:[%s17548_s0 + $0x348] sm:$0xff] }
 0x2fb   :  { %v11774_v35 = vpop.permute.xlu1 %1549 }
 0x2fc   :  { %v11776_v13 = vpop.permute.xlu0 %1547 }
 0x2fd   :  { %1665 = vrot.lane.b32.xlu1 %v10899_v19, %s9002_s14 }
 0x2fe   :  { %1663 = vrot.lane.b32.xlu0 %v10906_v45, %s9002_s14 }
 0x2ff   :  { %v11787_v40 = vpop.permute.xlu1 %1553 }
 0x300   :  { %v11794_v57 = vpop.permute.xlu0 %1551 }
 0x301   :  { %1669 = vrot.lane.b32.xlu1 %v11785_v33, %s9002_s14 }
 0x302   :  { %1667 = vrot.lane.b32.xlu0 %v11792_v29, %s9002_s14 }
 0x303   :  { %v11800_v19 = vpop.permute.xlu1 %1557 }
 0x304   :  { %18840 = vst [vmem:[#allocation396_spill] sm:$0xff] %v11800_v19  ;;  %v11802_v45 = vpop.permute.xlu0 %1555 }
 0x305   :  { %18841 = vst [vmem:[#allocation397_spill] sm:$0xff] %v11802_v45  ;;  %1749 = vrot.lane.b32.xlu1 %v18537_v0, %s9003_s15 }
 0x306   :  { %1747 = vrot.lane.b32.xlu0 %v18538_v50, %s9003_s15 }
 0x307   :  { %v11808_v58 = vpop.permute.xlu1 %1561 }
 0x308   :  { %v11810_v62 = vpop.permute.xlu0 %1559 }
 0x309   :  { %1753 = vrot.lane.b32.xlu1 %v18541_v7, %s9003_s15 }
 0x30a   :  { %1751 = vrot.lane.b32.xlu0 %v18542_v36, %s9003_s15 }
 0x30b   :  { %v11816_v19 = vpop.permute.xlu1 %1565 }
 0x30c   :  { %v11818_v45 = vpop.permute.xlu0 %1563 }
 0x30d   :  { %1757 = vrot.lane.b32.xlu1 %v18545_v49, %s9003_s15 }
 0x30e   :  { %1755 = vrot.lane.b32.xlu0 %v18546_v15, %s9003_s15 }
 0x30f   :  { %v11824_v50 = vpop.permute.xlu1 %1569 }
 0x310   :  { %v11826_v0 = vpop.permute.xlu0 %1567 }
 0x311   :  { %1761 = vrot.lane.b32.xlu1 %v18549_v61, %s9003_s15 }
 0x312   :  { %1759 = vrot.lane.b32.xlu0 %v18550_v42, %s9003_s15 }
 0x313   :  { %v11832_v7 = vpop.permute.xlu1 %1573 }
 0x314   :  { %v11834_v36 = vpop.permute.xlu0 %1571 }
 0x315   :  { %1765 = vrot.lane.b32.xlu1 %v18553_v56, %s9003_s15 }
 0x316   :  { %1763 = vrot.lane.b32.xlu0 %v18554_v18, %s9003_s15 }
 0x317   :  { %v11840_v15 = vpop.permute.xlu1 %1577 }
 0x318   :  { %v11842_v49 = vpop.permute.xlu0 %1575 }
 0x319   :  { %1769 = vrot.lane.b32.xlu1 %v18557_v3, %s9003_s15 }
 0x31a   :  { %1767 = vrot.lane.b32.xlu0 %v18558_v51, %s9003_s15 }
 0x31b   :  { %v11848_v42 = vpop.permute.xlu1 %1581 }
 0x31c   :  { %v11850_v61 = vpop.permute.xlu0 %1579 }
 0x31d   :  { %18842 = vst [vmem:[#allocation398_spill] sm:$0xff] %v11850_v61  ;;  %1773 = vrot.lane.b32.xlu1 %v18561_v37, %s9003_s15  ;;  %v18847_v37 = vld [vmem:[#allocation25_spill] sm:$0xff] }
 0x31e   :  { %1771 = vrot.lane.b32.xlu0 %v18562_v60, %s9003_s15 }
 0x31f   :  { %v11856_v18 = vpop.permute.xlu1 %1585 }
 0x320   :  { %18843 = vst [vmem:[#allocation399_spill] sm:$0xff] %v11856_v18  ;;  %v11858_v56 = vpop.permute.xlu0 %1583 }
 0x321   :  { %18844 = vst [vmem:[#allocation400_spill] sm:$0xff] %v11858_v56  ;;  %1777 = vrot.lane.b32.xlu1 %v18565_v8, %s9003_s15  ;;  %v18850_v56 = vld [vmem:[#allocation26_spill] sm:$0xff]  ;;  %v18851_v8 = vld [vmem:[#allocation27_spill] sm:$0xff] }
 0x322   :  { %1775 = vrot.lane.b32.xlu0 %v18566_v24, %s9003_s15 }
 0x323   :  { %v11864_v3 = vpop.permute.xlu1 %1589 }
 0x324   :  { %18845 = vst [vmem:[#allocation401_spill] sm:$0xff] %v11864_v3  ;;  %v11866_v51 = vpop.permute.xlu0 %1587 }
 0x325   :  { %18846 = vst [vmem:[#allocation402_spill] sm:$0xff] %v11866_v51  ;;  %1781 = vrot.lane.b32.xlu1 %v18569_v59, %s9003_s15  ;;  %v18854_v51 = vld [vmem:[#allocation28_spill] sm:$0xff]  ;;  %v18855_v59 = vld [vmem:[#allocation29_spill] sm:$0xff] }
 0x326   :  { %1779 = vrot.lane.b32.xlu0 %v18847_v37, %s9003_s15 }
 0x327   :  { %v11872_v60 = vpop.permute.xlu1 %1593 }
 0x328   :  { %18848 = vst [vmem:[#allocation25_spill] sm:$0xff] %v11872_v60  ;;  %v11874_v18 = vpop.permute.xlu0 %1591 }
 0x329   :  { %18849 = vst [vmem:[#allocation403_spill] sm:$0xff] %v11874_v18  ;;  %1785 = vrot.lane.b32.xlu1 %v18850_v56, %s9003_s15  ;;  %v18858_v18 = vld [vmem:[#allocation30_spill] sm:$0xff]  ;;  %v18859_v56 = vld [vmem:[#allocation31_spill] sm:$0xff] }
 0x32a   :  { %1783 = vrot.lane.b32.xlu0 %v18851_v8, %s9003_s15 }
 0x32b   :  { %v11880_v24 = vpop.permute.xlu1 %1597 }
 0x32c   :  { %18852 = vst [vmem:[#allocation26_spill] sm:$0xff] %v11880_v24  ;;  %v11882_v3 = vpop.permute.xlu0 %1595 }
 0x32d   :  { %18853 = vst [vmem:[#allocation27_spill] sm:$0xff] %v11882_v3  ;;  %1789 = vrot.lane.b32.xlu1 %v18854_v51, %s9003_s15  ;;  %v18862_v3 = vld [vmem:[#allocation32_spill] sm:$0xff]  ;;  %v18863_v51 = vld [vmem:[#allocation33_spill] sm:$0xff] }
 0x32e   :  { %1787 = vrot.lane.b32.xlu0 %v18855_v59, %s9003_s15 }
 0x32f   :  { %v11888_v37 = vpop.permute.xlu1 %1601 }
 0x330   :  { %18856 = vst [vmem:[#allocation28_spill] sm:$0xff] %v11888_v37  ;;  %v11890_v60 = vpop.permute.xlu0 %1599 }
 0x331   :  { %18857 = vst [vmem:[#allocation29_spill] sm:$0xff] %v11890_v60  ;;  %1793 = vrot.lane.b32.xlu1 %v18858_v18, %s9003_s15  ;;  %v11909_v60 = vld [vmem:[%s17548_s0 + $0x1a8] sm:$0x3] }
 0x332   :  { %1791 = vrot.lane.b32.xlu0 %v18859_v56, %s9003_s15  ;;  %v1738_v56 = vrot.slane %v11595_v12, 1 }
 0x333   :  { %v11896_v8 = vpop.permute.xlu1 %1605 }
 0x334   :  { %18860 = vst [vmem:[#allocation30_spill] sm:$0xff] %v11896_v8  ;;  %v11898_v24 = vpop.permute.xlu0 %1603  ;;  %v18868_v8 = vld [vmem:[#allocation36_spill] sm:$0xff] }
 0x335   :  { %18861 = vst [vmem:[#allocation31_spill] sm:$0xff] %v11898_v24  ;;  %1797 = vrot.lane.b32.xlu1 %v18862_v3, %s9003_s15  ;;  %v1740_v3 = vrot.slane %v11909_v60, 1 }
 0x336   :  { %1795 = vrot.lane.b32.xlu0 %v18863_v51, %s9003_s15  ;;  %v1737_v51 = vrot.slane %v11602_v34, 1 }
 0x337   :  { %v11904_v59 = vpop.permute.xlu1 %1609 }
 0x338   :  { %18864 = vst [vmem:[#allocation32_spill] sm:$0xff] %v11904_v59  ;;  %v11911_v18 = vpop.permute.xlu0 %1607 }
 0x339   :  { %18865 = vst [vmem:[#allocation33_spill] sm:$0xff] %v11911_v18  ;;  %1801 = vrot.lane.b32.xlu1 %v18589_v41, %s9003_s15  ;;  %v18869_v18 = vld [vmem:[#allocation277_spill] sm:$0xff]  ;;  %v1741_v41 = vsel %vm231_vm0, %v1738_v56, %v1740_v3 }
 0x33a   :  { %1799 = vrot.lane.b32.xlu0 %v18590_v43, %s9003_s15  ;;  %v1739_v43 = vsel %vm231_vm0, %v1737_v51, %v1738_v56  ;;  %v18878_v56 = vld [vmem:[#allocation54_spill] sm:$0xff]  ;;  %v18879_v51 = vld [vmem:[#allocation55_spill] sm:$0xff] }
 0x33b   :  { %v11920_v59 = vpop.permute.xlu1 %1613 }
 0x33c   :  { %18866 = vst [vmem:[#allocation404_spill] sm:$0xff] %v11920_v59  ;;  %v11922_v24 = vpop.permute.xlu0 %1611 }
 0x33d   :  { %18867 = vst [vmem:[#allocation405_spill] sm:$0xff] %v11922_v24  ;;  %1805 = vrot.lane.b32.xlu1 %v18868_v8, %s9003_s15  ;;  %v18874_v8 = vld [vmem:[#allocation49_spill] sm:$0xff] }
 0x33e   :  { %1803 = vrot.lane.b32.xlu0 %v18869_v18, %s9003_s15  ;;  %v18875_v18 = vld [vmem:[#allocation50_spill] sm:$0xff] }
 0x33f   :  { %v11929_v37 = vpop.permute.xlu1 %1617 }
 0x340   :  { %18870 = vst [vmem:[#allocation36_spill] sm:$0xff] %v11929_v37  ;;  %v11932_v61 = vpop.permute.xlu0 %1615 }
 0x341   :  { %18871 = vst [vmem:[#allocation277_spill] sm:$0xff] %v11932_v61  ;;  %1809 = vrot.lane.b32.xlu1 %v1741_v41, %s9003_s15 }
 0x342   :  { %1807 = vrot.lane.b32.xlu0 %v1739_v43, %s9003_s15 }
 0x343   :  { %v11936_v59 = vpop.permute.xlu1 %1621 }
 0x344   :  { %18872 = vst [vmem:[#allocation406_spill] sm:$0xff] %v11936_v59  ;;  %v11938_v24 = vpop.permute.xlu0 %1619 }
 0x345   :  { %18873 = vst [vmem:[#allocation407_spill] sm:$0xff] %v11938_v24  ;;  %1813 = vrot.lane.b32.xlu1 %v18874_v8, %s9003_s15  ;;  %v18882_v24 = vld [vmem:[#allocation59_spill] sm:$0xff]  ;;  %v18883_v8 = vld [vmem:[#allocation60_spill] sm:$0xff] }
 0x346   :  { %1811 = vrot.lane.b32.xlu0 %v18875_v18, %s9003_s15 }
 0x347   :  { %v11944_v3 = vpop.permute.xlu1 %1625 }
 0x348   :  { %18876 = vst [vmem:[#allocation49_spill] sm:$0xff] %v11944_v3  ;;  %v11946_v37 = vpop.permute.xlu0 %1623 }
 0x349   :  { %18877 = vst [vmem:[#allocation50_spill] sm:$0xff] %v11946_v37  ;;  %1817 = vrot.lane.b32.xlu1 %v18878_v56, %s9003_s15  ;;  %v18886_v37 = vld [vmem:[#allocation64_spill] sm:$0xff]  ;;  %v18887_v56 = vld [vmem:[#allocation65_spill] sm:$0xff] }
 0x34a   :  { %1815 = vrot.lane.b32.xlu0 %v18879_v51, %s9003_s15 }
 0x34b   :  { %v11952_v41 = vpop.permute.xlu1 %1629 }
 0x34c   :  { %18880 = vst [vmem:[#allocation54_spill] sm:$0xff] %v11952_v41  ;;  %v11954_v43 = vpop.permute.xlu0 %1627 }
 0x34d   :  { %18881 = vst [vmem:[#allocation55_spill] sm:$0xff] %v11954_v43  ;;  %1821 = vrot.lane.b32.xlu1 %v18882_v24, %s9003_s15  ;;  %v18890_v43 = vld [vmem:[#allocation69_spill] sm:$0xff]  ;;  %v18891_v24 = vld [vmem:[#allocation70_spill] sm:$0xff] }
 0x34e   :  { %1819 = vrot.lane.b32.xlu0 %v18883_v8, %s9003_s15 }
 0x34f   :  { %v11960_v18 = vpop.permute.xlu1 %1633 }
 0x350   :  { %18884 = vst [vmem:[#allocation59_spill] sm:$0xff] %v11960_v18  ;;  %v11962_v3 = vpop.permute.xlu0 %1631 }
 0x351   :  { %18885 = vst [vmem:[#allocation60_spill] sm:$0xff] %v11962_v3  ;;  %1825 = vrot.lane.b32.xlu1 %v18886_v37, %s9003_s15  ;;  %v18894_v3 = vld [vmem:[#allocation74_spill] sm:$0xff]  ;;  %v18895_v37 = vld [vmem:[#allocation75_spill] sm:$0xff] }
 0x352   :  { %1823 = vrot.lane.b32.xlu0 %v18887_v56, %s9003_s15 }
 0x353   :  { %v11968_v51 = vpop.permute.xlu1 %1637 }
 0x354   :  { %18888 = vst [vmem:[#allocation64_spill] sm:$0xff] %v11968_v51  ;;  %v11970_v41 = vpop.permute.xlu0 %1635 }
 0x355   :  { %18889 = vst [vmem:[#allocation65_spill] sm:$0xff] %v11970_v41  ;;  %1829 = vrot.lane.b32.xlu1 %v18890_v43, %s9003_s15  ;;  %v18898_v41 = vld [vmem:[#allocation79_spill] sm:$0xff]  ;;  %v18899_v43 = vld [vmem:[#allocation80_spill] sm:$0xff] }
 0x356   :  { %1827 = vrot.lane.b32.xlu0 %v18891_v24, %s9003_s15 }
 0x357   :  { %v11976_v8 = vpop.permute.xlu1 %1641 }
 0x358   :  { %18892 = vst [vmem:[#allocation69_spill] sm:$0xff] %v11976_v8  ;;  %v11978_v18 = vpop.permute.xlu0 %1639 }
 0x359   :  { %18893 = vst [vmem:[#allocation70_spill] sm:$0xff] %v11978_v18  ;;  %1833 = vrot.lane.b32.xlu1 %v18894_v3, %s9003_s15  ;;  %v18902_v18 = vld [vmem:[#allocation84_spill] sm:$0xff]  ;;  %v18903_v3 = vld [vmem:[#allocation85_spill] sm:$0xff] }
 0x35a   :  { %1831 = vrot.lane.b32.xlu0 %v18895_v37, %s9003_s15 }
 0x35b   :  { %v11984_v56 = vpop.permute.xlu1 %1645 }
 0x35c   :  { %18896 = vst [vmem:[#allocation74_spill] sm:$0xff] %v11984_v56  ;;  %v11986_v51 = vpop.permute.xlu0 %1643 }
 0x35d   :  { %18897 = vst [vmem:[#allocation75_spill] sm:$0xff] %v11986_v51  ;;  %1837 = vrot.lane.b32.xlu1 %v18898_v41, %s9003_s15  ;;  %v18906_v51 = vld [vmem:[#allocation89_spill] sm:$0xff]  ;;  %v18907_v41 = vld [vmem:[#allocation90_spill] sm:$0xff] }
 0x35e   :  { %1835 = vrot.lane.b32.xlu0 %v18899_v43, %s9003_s15 }
 0x35f   :  { %v11992_v24 = vpop.permute.xlu1 %1649 }
 0x360   :  { %18900 = vst [vmem:[#allocation79_spill] sm:$0xff] %v11992_v24  ;;  %v11994_v8 = vpop.permute.xlu0 %1647 }
 0x361   :  { %18901 = vst [vmem:[#allocation80_spill] sm:$0xff] %v11994_v8  ;;  %1841 = vrot.lane.b32.xlu1 %v18902_v18, %s9003_s15  ;;  %v18910_v8 = vld [vmem:[#allocation94_spill] sm:$0xff]  ;;  %v18911_v18 = vld [vmem:[#allocation95_spill] sm:$0xff] }
 0x362   :  { %1839 = vrot.lane.b32.xlu0 %v18903_v3, %s9003_s15 }
 0x363   :  { %v12000_v37 = vpop.permute.xlu1 %1653 }
 0x364   :  { %18904 = vst [vmem:[#allocation84_spill] sm:$0xff] %v12000_v37  ;;  %v12002_v56 = vpop.permute.xlu0 %1651 }
 0x365   :  { %18905 = vst [vmem:[#allocation85_spill] sm:$0xff] %v12002_v56  ;;  %1845 = vrot.lane.b32.xlu1 %v18906_v51, %s9003_s15  ;;  %v18914_v51 = vld [vmem:[#allocation100_spill] sm:$0xff] }
 0x366   :  { %1843 = vrot.lane.b32.xlu0 %v18907_v41, %s9003_s15  ;;  %v2661_v41 = vld [vmem:[%s17549_s1] sm:$0xff] }
 0x367   :  { %v12008_v43 = vpop.permute.xlu1 %1657 }
 0x368   :  { %18908 = vst [vmem:[#allocation89_spill] sm:$0xff] %v12008_v43  ;;  %v12010_v24 = vpop.permute.xlu0 %1655  ;;  %v2664_v43 = vld [vmem:[%s17549_s1 + $0x18] sm:$0xff] }
 0x369   :  { %18909 = vst [vmem:[#allocation90_spill] sm:$0xff] %v12010_v24  ;;  %1849 = vrot.lane.b32.xlu1 %v18910_v8, %s9003_s15  ;;  %v2662_v8 = vld [vmem:[%s17549_s1 + $0x8] sm:$0xff] }
 0x36a   :  { %1847 = vrot.lane.b32.xlu0 %v18911_v18, %s9003_s15  ;;  %v7351_v18 = vpack.c.bf16 %v2662_v8, %v2661_v41 }
 0x36b   :  { %v12016_v3 = vpop.permute.xlu1 %1661 }
 0x36c   :  { %18912 = vst [vmem:[#allocation94_spill] sm:$0xff] %v12016_v3  ;;  %v12018_v37 = vpop.permute.xlu0 %1659  ;;  %7352 = vmatprep.subr.bf16.mxu0 %v7351_v18 }
 0x36d   :  { %18913 = vst [vmem:[#allocation95_spill] sm:$0xff] %v12018_v37  ;;  %1853 = vrot.lane.b32.xlu1 %v18641_v44, %s9003_s15  ;;  %v18917_v37 = vld [vmem:[#allocation104_spill] sm:$0xff]  ;;  %v18918_v44 = vld [vmem:[#allocation106_spill] sm:$0xff]  ;;  %7354 = vmatpush3.bf16.msra.mxu0 %v7351_v18 }
 0x36e   :  { %1851 = vrot.lane.b32.xlu0 %v18914_v51, %s9003_s15  ;;  %v2663_v51 = vld [vmem:[%s17549_s1 + $0x10] sm:$0xff] }
 0x36f   :  { %v12030_v24 = vpop.permute.xlu1 %1665  ;;  %v7355_v41 = vpack.c.bf16 %v2664_v43, %v2663_v51  ;;  %v2665_v43 = vld [vmem:[%s17549_s1 + $0x20] sm:$0xf]  ;;  %v1743_v51 = vrot.slane %v11785_v33, 1  ;;  %s9004_s1 = smov 32  }
 0x370   :  { %18915 = vst [vmem:[#allocation100_spill] sm:$0xff] %v12030_v24  ;;  %v12032_v3 = vpop.permute.xlu0 %1663 }
 0x371   :  { %18916 = vst [vmem:[#allocation408_spill] sm:$0xff] %v12032_v3  ;;  %1857 = vrot.lane.b32.xlu1 %v18917_v37, %s9003_s15  ;;  %v18921_v37 = vld [vmem:[#allocation108_spill] sm:$0xff]  ;;  %7356 = vmatprep.subr.bf16.mxu0 %v7355_v41  ;;  %v12057_v3 = vld [vmem:[%s17548_s0 + $0x358] sm:$0x3] }
 0x372   :  { %1855 = vrot.lane.b32.xlu0 %v18918_v44, %s9003_s15  ;;  %v18922_v44 = vld [vmem:[#allocation110_spill] sm:$0xff]  ;;  %7358 = vmatpush3.bf16.msra.mxu0 %v7355_v41  ;;  %v1745_v41 = vrot.slane %v12057_v3, 1 }
 0x373   :  { %v12044_v24 = vpop.permute.xlu1 %1669  ;;  %7253 = vmatprep.subr.msk.mxu0 %vm2859_vm2, %v2665_v43 }
 0x374   :  { %18919 = vst [vmem:[#allocation104_spill] sm:$0xff] %v12044_v24  ;;  %v12046_v8 = vpop.permute.xlu0 %1667 }
 0x375   :  { %18920 = vst [vmem:[#allocation106_spill] sm:$0xff] %v12046_v8  ;;  %1861 = vrot.lane.b32.xlu1 %v18921_v37, %s9003_s15  ;;  %v1742_v37 = vrot.slane %v11792_v29, 1 }
 0x376   :  { %1859 = vrot.lane.b32.xlu0 %v18922_v44, %s9003_s15  ;;  %7254 = vmatpush3.msk.msra.mxu0 %vm2859_vm2, %v2665_v43  ;;  %vm6443_vm2 = vcmask 457728  }
 0x377   :  { %v12052_v18 = vpop.permute.xlu1 %1749 }
 0x378   :  { %v12059_v56 = vpop.permute.xlu0 %1747 }
 0x379   :  { %1865 = vrot.lane.b32.xlu1 %v9935_v28, %s9003_s15  ;;  %v1746_v28 = vsel %vm231_vm0, %v1743_v51, %v1745_v41 }
 0x37a   :  { %1863 = vrot.lane.b32.xlu0 %v9942_v25, %s9003_s15  ;;  %v1744_v25 = vsel %vm231_vm0, %v1742_v37, %v1743_v51 }
 0x37b   :  { %v12071_v44 = vpop.permute.xlu1 %1753 }
 0x37c   :  { %v12073_v8 = vpop.permute.xlu0 %1751 }
 0x37d   :  { %1869 = vrot.lane.b32.xlu1 %v11185_v48, %s9003_s15 }
 0x37e   :  { %1867 = vrot.lane.b32.xlu0 %v11190_v27, %s9003_s15 }
 0x37f   :  { %v12080_v24 = vpop.permute.xlu1 %1757 }
 0x380   :  { %v12083_v59 = vpop.permute.xlu0 %1755 }
 0x381   :  { %1873 = vrot.lane.b32.xlu1 %v1746_v28, %s9003_s15  ;;  %v18931_v28 = vld [vmem:[#allocation137_spill] sm:$0xff] }
 0x382   :  { %1871 = vrot.lane.b32.xlu0 %v1744_v25, %s9003_s15 }
 0x383   :  { %v12087_v43 = vpop.permute.xlu1 %1761 }
 0x384   :  { %v12089_v61 = vpop.permute.xlu0 %1759 }
 0x385   :  { %1951 = vrot.lane.b32.xlu1 %v9980_v5, %s9004_s1 }
 0x386   :  { %1949 = vrot.lane.b32.xlu0 %v9987_v10, %s9004_s1 }
 0x387   :  { %v12095_v27 = vpop.permute.xlu1 %1765 }
 0x388   :  { %v12097_v48 = vpop.permute.xlu0 %1763 }
 0x389   :  { %1955 = vrot.lane.b32.xlu1 %v9997_v2, %s9004_s1 }
 0x38a   :  { %1953 = vrot.lane.b32.xlu0 %v10004_v1, %s9004_s1 }
 0x38b   :  { %v12103_v51 = vpop.permute.xlu1 %1769 }
 0x38c   :  { %v12105_v41 = vpop.permute.xlu0 %1767 }
 0x38d   :  { %1959 = vrot.lane.b32.xlu1 %v10014_v14, %s9004_s1 }
 0x38e   :  { %1957 = vrot.lane.b32.xlu0 %v10021_v11, %s9004_s1 }
 0x38f   :  { %v12111_v5 = vpop.permute.xlu1 %1773 }
 0x390   :  { %v12113_v10 = vpop.permute.xlu0 %1771 }
 0x391   :  { %1963 = vrot.lane.b32.xlu1 %v10031_v23, %s9004_s1 }
 0x392   :  { %1961 = vrot.lane.b32.xlu0 %v10038_v22, %s9004_s1 }
 0x393   :  { %v12119_v2 = vpop.permute.xlu1 %1777 }
 0x394   :  { %v12121_v1 = vpop.permute.xlu0 %1775 }
 0x395   :  { %1967 = vrot.lane.b32.xlu1 %v10048_v31, %s9004_s1 }
 0x396   :  { %1965 = vrot.lane.b32.xlu0 %v10055_v30, %s9004_s1 }
 0x397   :  { %v12127_v14 = vpop.permute.xlu1 %1781 }
 0x398   :  { %v12129_v11 = vpop.permute.xlu0 %1779 }
 0x399   :  { %1971 = vrot.lane.b32.xlu1 %v10065_v39, %s9004_s1 }
 0x39a   :  { %1969 = vrot.lane.b32.xlu0 %v10072_v38, %s9004_s1 }
 0x39b   :  { %v12135_v23 = vpop.permute.xlu1 %1785 }
 0x39c   :  { %v12137_v22 = vpop.permute.xlu0 %1783 }
 0x39d   :  { %18923 = vst [vmem:[#allocation108_spill] sm:$0xff] %v12137_v22  ;;  %1975 = vrot.lane.b32.xlu1 %v10082_v47, %s9004_s1  ;;  %v18928_v47 = vld [vmem:[#allocation135_spill] sm:$0xff] }
 0x39e   :  { %1973 = vrot.lane.b32.xlu0 %v10089_v46, %s9004_s1 }
 0x39f   :  { %v12143_v31 = vpop.permute.xlu1 %1789 }
 0x3a0   :  { %18924 = vst [vmem:[#allocation110_spill] sm:$0xff] %v12143_v31  ;;  %v12145_v30 = vpop.permute.xlu0 %1787  ;;  %v19011_v31 = vld [vmem:[#allocation302_spill] sm:$0xff] }
 0x3a1   :  { %18925 = vst [vmem:[#allocation409_spill] sm:$0xff] %v12145_v30  ;;  %1979 = vrot.lane.b32.xlu1 %v10099_v55, %s9004_s1  ;;  %v18932_v55 = vld [vmem:[#allocation139_spill] sm:$0xff] }
 0x3a2   :  { %1977 = vrot.lane.b32.xlu0 %v10106_v54, %s9004_s1 }
 0x3a3   :  { %v12151_v39 = vpop.permute.xlu1 %1793 }
 0x3a4   :  { %18926 = vst [vmem:[#allocation410_spill] sm:$0xff] %v12151_v39  ;;  %v12153_v38 = vpop.permute.xlu0 %1791  ;;  %v19008_v39 = vld [vmem:[#allocation260_spill] sm:$0xff] }
 0x3a5   :  { %18927 = vst [vmem:[#allocation411_spill] sm:$0xff] %v12153_v38  ;;  %1983 = vrot.lane.b32.xlu1 %v10116_v63, %s9004_s1  ;;  %v18935_v38 = vld [vmem:[#allocation141_spill] sm:$0xff]  ;;  %v18936_v63 = vld [vmem:[#allocation143_spill] sm:$0xff] }
 0x3a6   :  { %1981 = vrot.lane.b32.xlu0 %v18928_v47, %s9004_s1 }
 0x3a7   :  { %v12159_v46 = vpop.permute.xlu1 %1797 }
 0x3a8   :  { %18929 = vst [vmem:[#allocation135_spill] sm:$0xff] %v12159_v46  ;;  %v12161_v37 = vpop.permute.xlu0 %1795 }
 0x3a9   :  { %18930 = vst [vmem:[#allocation412_spill] sm:$0xff] %v12161_v37  ;;  %1987 = vrot.lane.b32.xlu1 %v18931_v28, %s9004_s1  ;;  %v18939_v37 = vld [vmem:[#allocation145_spill] sm:$0xff]  ;;  %v18940_v28 = vld [vmem:[#allocation147_spill] sm:$0xff] }
 0x3aa   :  { %1985 = vrot.lane.b32.xlu0 %v18932_v55, %s9004_s1 }
 0x3ab   :  { %v12167_v54 = vpop.permute.xlu1 %1801 }
 0x3ac   :  { %18933 = vst [vmem:[#allocation137_spill] sm:$0xff] %v12167_v54  ;;  %v12169_v25 = vpop.permute.xlu0 %1799 }
 0x3ad   :  { %18934 = vst [vmem:[#allocation139_spill] sm:$0xff] %v12169_v25  ;;  %1991 = vrot.lane.b32.xlu1 %v18935_v38, %s9004_s1  ;;  %v18943_v25 = vld [vmem:[#allocation149_spill] sm:$0xff]  ;;  %v18944_v38 = vld [vmem:[#allocation151_spill] sm:$0xff] }
 0x3ae   :  { %1989 = vrot.lane.b32.xlu0 %v18936_v63, %s9004_s1 }
 0x3af   :  { %v12175_v47 = vpop.permute.xlu1 %1805 }
 0x3b0   :  { %18937 = vst [vmem:[#allocation141_spill] sm:$0xff] %v12175_v47  ;;  %v12177_v46 = vpop.permute.xlu0 %1803 }
 0x3b1   :  { %18938 = vst [vmem:[#allocation143_spill] sm:$0xff] %v12177_v46  ;;  %1995 = vrot.lane.b32.xlu1 %v18939_v37, %s9004_s1  ;;  %v1940_v37 = vrot.slane %v11595_v12, 2 }
 0x3b2   :  { %1993 = vrot.lane.b32.xlu0 %v18940_v28, %s9004_s1  ;;  %v1942_v28 = vrot.slane %v11909_v60, 2 }
 0x3b3   :  { %v12183_v55 = vpop.permute.xlu1 %1809 }
 0x3b4   :  { %18941 = vst [vmem:[#allocation145_spill] sm:$0xff] %v12183_v55  ;;  %v12185_v54 = vpop.permute.xlu0 %1807 }
 0x3b5   :  { %18942 = vst [vmem:[#allocation147_spill] sm:$0xff] %v12185_v54  ;;  %1999 = vrot.lane.b32.xlu1 %v18943_v25, %s9004_s1  ;;  %v1939_v54 = vrot.slane %v11602_v34, 2 }
 0x3b6   :  { %1997 = vrot.lane.b32.xlu0 %v18944_v38, %s9004_s1  ;;  %v18949_v38 = vld [vmem:[#allocation153_spill] sm:$0xff] }
 0x3b7   :  { %v12191_v63 = vpop.permute.xlu1 %1813 }
 0x3b8   :  { %18945 = vst [vmem:[#allocation149_spill] sm:$0xff] %v12191_v63  ;;  %v12193_v47 = vpop.permute.xlu0 %1811 }
 0x3b9   :  { %18946 = vst [vmem:[#allocation151_spill] sm:$0xff] %v12193_v47  ;;  %2003 = vrot.lane.b32.xlu1 %v18691_v17, %s9004_s1  ;;  %v18950_v47 = vld [vmem:[#allocation338_spill] sm:$0xff]  ;;  %v1943_v17 = vsel %vm584_vm1, %v1940_v37, %v1942_v28 }
 0x3ba   :  { %2001 = vrot.lane.b32.xlu0 %v18692_v4, %s9004_s1  ;;  %v1941_v4 = vsel %vm584_vm1, %v1939_v54, %v1940_v37  ;;  %v18959_v54 = vld [vmem:[#allocation156_spill] sm:$0xff] }
 0x3bb   :  { %v12202_v25 = vpop.permute.xlu1 %1817  ;;  %v18960_v37 = vld [vmem:[#allocation52_spill] sm:$0xff] }
 0x3bc   :  { %18947 = vst [vmem:[#allocation413_spill] sm:$0xff] %v12202_v25  ;;  %v12204_v55 = vpop.permute.xlu0 %1815  ;;  %v19005_v25 = vld [vmem:[#allocation101_spill] sm:$0xff] }
 0x3bd   :  { %18948 = vst [vmem:[#allocation414_spill] sm:$0xff] %v12204_v55  ;;  %2007 = vrot.lane.b32.xlu1 %v18949_v38, %s9004_s1  ;;  %v18955_v38 = vld [vmem:[#allocation155_spill] sm:$0xff] }
 0x3be   :  { %2005 = vrot.lane.b32.xlu0 %v18950_v47, %s9004_s1  ;;  %v18956_v47 = vld [vmem:[#allocation47_spill] sm:$0xff] }
 0x3bf   :  { %v12211_v12 = vpop.permute.xlu1 %1821 }
 0x3c0   :  { %18951 = vst [vmem:[#allocation153_spill] sm:$0xff] %v12211_v12  ;;  %v12214_v63 = vpop.permute.xlu0 %1819 }
 0x3c1   :  { %18952 = vst [vmem:[#allocation338_spill] sm:$0xff] %v12214_v63  ;;  %2011 = vrot.lane.b32.xlu1 %v1943_v17, %s9004_s1 }
 0x3c2   :  { %2009 = vrot.lane.b32.xlu0 %v1941_v4, %s9004_s1 }
 0x3c3   :  { %v12218_v34 = vpop.permute.xlu1 %1825 }
 0x3c4   :  { %18953 = vst [vmem:[#allocation415_spill] sm:$0xff] %v12218_v34  ;;  %v12220_v60 = vpop.permute.xlu0 %1823  ;;  %v19002_v34 = vld [vmem:[#allocation165_spill] sm:$0xff] }
 0x3c5   :  { %18954 = vst [vmem:[#allocation416_spill] sm:$0xff] %v12220_v60  ;;  %2015 = vrot.lane.b32.xlu1 %v18955_v38, %s9004_s1  ;;  %v18963_v60 = vld [vmem:[#allocation157_spill] sm:$0xff] }
 0x3c6   :  { %2013 = vrot.lane.b32.xlu0 %v18956_v47, %s9004_s1  ;;  %v18964_v38 = vld [vmem:[#allocation57_spill] sm:$0xff] }
 0x3c7   :  { %v12226_v28 = vpop.permute.xlu1 %1829 }
 0x3c8   :  { %18957 = vst [vmem:[#allocation155_spill] sm:$0xff] %v12226_v28  ;;  %v12228_v12 = vpop.permute.xlu0 %1827 }
 0x3c9   :  { %18958 = vst [vmem:[#allocation47_spill] sm:$0xff] %v12228_v12  ;;  %2019 = vrot.lane.b32.xlu1 %v18959_v54, %s9004_s1  ;;  %v18967_v12 = vld [vmem:[#allocation158_spill] sm:$0xff] }
 0x3ca   :  { %2017 = vrot.lane.b32.xlu0 %v18960_v37, %s9004_s1  ;;  %v18968_v54 = vld [vmem:[#allocation62_spill] sm:$0xff] }
 0x3cb   :  { %v12234_v17 = vpop.permute.xlu1 %1833 }
 0x3cc   :  { %18961 = vst [vmem:[#allocation156_spill] sm:$0xff] %v12234_v17  ;;  %v12236_v4 = vpop.permute.xlu0 %1831 }
 0x3cd   :  { %18962 = vst [vmem:[#allocation52_spill] sm:$0xff] %v12236_v4  ;;  %2023 = vrot.lane.b32.xlu1 %v18963_v60, %s9004_s1  ;;  %v18971_v4 = vld [vmem:[#allocation159_spill] sm:$0xff] }
 0x3ce   :  { %2021 = vrot.lane.b32.xlu0 %v18964_v38, %s9004_s1  ;;  %v18972_v60 = vld [vmem:[#allocation67_spill] sm:$0xff] }
 0x3cf   :  { %v12242_v47 = vpop.permute.xlu1 %1837 }
 0x3d0   :  { %18965 = vst [vmem:[#allocation157_spill] sm:$0xff] %v12242_v47  ;;  %v12244_v28 = vpop.permute.xlu0 %1835 }
 0x3d1   :  { %18966 = vst [vmem:[#allocation57_spill] sm:$0xff] %v12244_v28  ;;  %2027 = vrot.lane.b32.xlu1 %v18967_v12, %s9004_s1  ;;  %v18975_v28 = vld [vmem:[#allocation160_spill] sm:$0xff] }
 0x3d2   :  { %2025 = vrot.lane.b32.xlu0 %v18968_v54, %s9004_s1  ;;  %v18976_v12 = vld [vmem:[#allocation72_spill] sm:$0xff] }
 0x3d3   :  { %v12250_v37 = vpop.permute.xlu1 %1841 }
 0x3d4   :  { %18969 = vst [vmem:[#allocation158_spill] sm:$0xff] %v12250_v37  ;;  %v12252_v17 = vpop.permute.xlu0 %1839 }
 0x3d5   :  { %18970 = vst [vmem:[#allocation62_spill] sm:$0xff] %v12252_v17  ;;  %2031 = vrot.lane.b32.xlu1 %v18971_v4, %s9004_s1  ;;  %v18979_v17 = vld [vmem:[#allocation161_spill] sm:$0xff] }
 0x3d6   :  { %2029 = vrot.lane.b32.xlu0 %v18972_v60, %s9004_s1  ;;  %v18980_v4 = vld [vmem:[#allocation77_spill] sm:$0xff] }
 0x3d7   :  { %v12258_v38 = vpop.permute.xlu1 %1845 }
 0x3d8   :  { %18973 = vst [vmem:[#allocation159_spill] sm:$0xff] %v12258_v38  ;;  %v12260_v47 = vpop.permute.xlu0 %1843 }
 0x3d9   :  { %18974 = vst [vmem:[#allocation67_spill] sm:$0xff] %v12260_v47  ;;  %2035 = vrot.lane.b32.xlu1 %v18975_v28, %s9004_s1  ;;  %v18983_v47 = vld [vmem:[#allocation162_spill] sm:$0xff] }
 0x3da   :  { %2033 = vrot.lane.b32.xlu0 %v18976_v12, %s9004_s1  ;;  %v18984_v28 = vld [vmem:[#allocation82_spill] sm:$0xff] }
 0x3db   :  { %v12266_v54 = vpop.permute.xlu1 %1849 }
 0x3dc   :  { %18977 = vst [vmem:[#allocation160_spill] sm:$0xff] %v12266_v54  ;;  %v12268_v37 = vpop.permute.xlu0 %1847 }
 0x3dd   :  { %18978 = vst [vmem:[#allocation72_spill] sm:$0xff] %v12268_v37  ;;  %2039 = vrot.lane.b32.xlu1 %v18979_v17, %s9004_s1  ;;  %v18987_v17 = vld [vmem:[#allocation87_spill] sm:$0xff] }
 0x3de   :  { %2037 = vrot.lane.b32.xlu0 %v18980_v4, %s9004_s1 }
 0x3df   :  { %v12274_v60 = vpop.permute.xlu1 %1853 }
 0x3e0   :  { %18981 = vst [vmem:[#allocation161_spill] sm:$0xff] %v12274_v60  ;;  %v12276_v38 = vpop.permute.xlu0 %1851 }
 0x3e1   :  { %18982 = vst [vmem:[#allocation77_spill] sm:$0xff] %v12276_v38  ;;  %2043 = vrot.lane.b32.xlu1 %v18983_v47, %s9004_s1  ;;  %v18990_v47 = vld [vmem:[#allocation92_spill] sm:$0xff] }
 0x3e2   :  { %2041 = vrot.lane.b32.xlu0 %v18984_v28, %s9004_s1 }
 0x3e3   :  { %v12282_v12 = vpop.permute.xlu1 %1857 }
 0x3e4   :  { %18985 = vst [vmem:[#allocation162_spill] sm:$0xff] %v12282_v12  ;;  %v12284_v54 = vpop.permute.xlu0 %1855 }
 0x3e5   :  { %18986 = vst [vmem:[#allocation82_spill] sm:$0xff] %v12284_v54  ;;  %2047 = vrot.lane.b32.xlu1 %v18735_v32, %s9004_s1  ;;  %v18993_v32 = vld [vmem:[#allocation97_spill] sm:$0xff] }
 0x3e6   :  { %2045 = vrot.lane.b32.xlu0 %v18987_v17, %s9004_s1 }
 0x3e7   :  { %v12290_v4 = vpop.permute.xlu1 %1861 }
 0x3e8   :  { %18988 = vst [vmem:[#allocation87_spill] sm:$0xff] %v12290_v4  ;;  %v12292_v60 = vpop.permute.xlu0 %1859  ;;  %v18997_v4 = vld [vmem:[#allocation109_spill] sm:$0xff] }
 0x3e9   :  { %18989 = vst [vmem:[#allocation417_spill] sm:$0xff] %v12292_v60  ;;  %2051 = vrot.lane.b32.xlu1 %v18739_v6, %s9004_s1  ;;  %v8816_v6 = vld [vmem:[%s17548_s0 + $0x18] sm:$0xff] }
 0x3ea   :  { %2049 = vrot.lane.b32.xlu0 %v18990_v47, %s9004_s1  ;;  %v18995_v60 = vld [vmem:[#allocation105_spill] sm:$0xff] }
 0x3eb   :  { %v12298_v28 = vpop.permute.xlu1 %1865  ;;  %v2144_v47 = vsel %vm2141_vm3, %v8816_v6, %v18995_v60  ;;  %v8819_v60 = vld [vmem:[%s17548_s0 + $0x8] sm:$0xff] }
 0x3ec   :  { %18991 = vst [vmem:[#allocation92_spill] sm:$0xff] %v12298_v28  ;;  %v12300_v12 = vpop.permute.xlu0 %1863  ;;  %v18996_v28 = vld [vmem:[#allocation107_spill] sm:$0xff] }
 0x3ed   :  { %18992 = vst [vmem:[#allocation418_spill] sm:$0xff] %v12300_v12  ;;  %2055 = vrot.lane.b32.xlu1 %v10416_v20, %s9004_s1  ;;  %v8817_v12 = vld [vmem:[%s17548_s0] sm:$0xff]  ;;  %v18999_v6 = vld [vmem:[#allocation111_spill] sm:$0xff] }
 0x3ee   :  { %2053 = vrot.lane.b32.xlu0 %v18993_v32, %s9004_s1  ;;  %v2142_v20 = vsel %vm2141_vm3, %v8817_v12, %v18996_v28  ;;  %v8818_v32 = vld [vmem:[%s17548_s0 + $0x20] sm:$0xff]  ;;  %v2143_v38 = vsel %vm2141_vm3, %v8819_v60, %v18999_v6  ;;  %v8820_v12 = vld [vmem:[%s17548_s0 + $0x38] sm:$0xff]  ;;  %v19000_v28 = vld [vmem:[#allocation112_spill] sm:$0xff] }
 0x3ef   :  { %v12306_v17 = vpop.permute.xlu1 %1869  ;;  %v2147_v37 = vsel %vm2141_vm3, %v8820_v12, %v19000_v28  ;;  %v8822_v60 = vld [vmem:[%s17548_s0 + $0x50] sm:$0xff]  ;;  %v19003_v6 = vld [vmem:[#allocation114_spill] sm:$0xff]  ;;  %v8823_v12 = vld [vmem:[%s17548_s0 + $0x48] sm:$0xff] }
 0x3f0   :  { %18994 = vst [vmem:[#allocation97_spill] sm:$0xff] %v12306_v17  ;;  %v2145_v17 = vsel %vm2141_vm3, %v8818_v32, %v18997_v4  ;;  %v12323_v54 = vpop.permute.xlu0 %1867  ;;  %v8821_v4 = vld [vmem:[%s17548_s0 + $0x30] sm:$0xff]  ;;  %v19001_v32 = vld [vmem:[#allocation113_spill] sm:$0xff]  ;;  %v2149_v63 = vsel %vm2141_vm3, %v8822_v60, %v19003_v6  ;;  %v19004_v28 = vld [vmem:[#allocation115_spill] sm:$0xff] }
 0x3f1   :  { %18998 = vst [vmem:[#allocation105_spill] sm:$0xff] %v12323_v54  ;;  %v2146_v54 = vsel %vm2141_vm3, %v8821_v4, %v19001_v32  ;;  %2059 = vrot.lane.b32.xlu1 %v19002_v34, %s9004_s1  ;;  %v2148_v55 = vsel %vm2141_vm3, %v8823_v12, %v19004_v28  ;;  %v2208_v4 = vsel %vm2206_vm4, %v2143_v38, %v19005_v25  ;;  %v8824_v34 = vld [vmem:[%s17548_s0 + $0x68] sm:$0xff]  ;;  %v19006_v32 = vld [vmem:[#allocation116_spill] sm:$0xff]  ;;  %v19010_v28 = vld [vmem:[#allocation261_spill] sm:$0xff] }
 0x3f2   :  { %2057 = vrot.lane.b32.xlu0 %v18746_v16, %s9004_s1  ;;  %v12361_v60 = vsel %vm2141_vm3, %v8824_v34, %v19006_v32  ;;  %v19007_v6 = vld [vmem:[#allocation103_spill] sm:$0xff]  ;;  %v2273_v12 = vsel %vm2271_vm5, %v2208_v4, %v19008_v39  ;;  %v19013_v32 = vld [vmem:[#allocation169_spill] sm:$0xff] }
 0x3f3   :  { %v2207_v46 = vsel %vm2206_vm4, %v2142_v20, %v19007_v6  ;;  %v12367_v25 = vpop.permute.xlu1 %1873  ;;  %v19009_v38 = vld [vmem:[#allocation167_spill] sm:$0xff]  ;;  %v2338_v22 = vsel %vm2336_vm6, %v2273_v12, %v19011_v31  ;;  %v2209_v20 = vsel %vm2206_vm4, %v2144_v47, %v19013_v32  ;;  %v19017_v31 = vld [vmem:[#allocation172_spill] sm:$0xff] }
 0x3f4   :  { %v2210_v16 = vsel %vm2206_vm4, %v2145_v17, %v19009_v38  ;;  %v2272_v30 = vsel %vm2271_vm5, %v2207_v46, %v19010_v28  ;;  %v12375_v34 = vpop.permute.xlu0 %1871  ;;  %v19014_v6 = vld [vmem:[#allocation303_spill] sm:$0xff]  ;;  %v2403_v4 = vsel %vm2401_vm7, %v2338_v22, %v11439_v9  ;;  %v19015_v17 = vld [vmem:[#allocation166_spill] sm:$0xff]  ;;  %v2211_v12 = vsel %vm2206_vm4, %v2146_v54, %v19017_v31  ;;  %v19023_v31 = vld [vmem:[#allocation173_spill] sm:$0xff] }
 0x3f5   :  { %19012 = vst [vmem:[#allocation107_spill] sm:$0xff] %v12375_v34  ;;  %v2337_v39 = vsel %vm2336_vm6, %v2272_v30, %v19014_v6  ;;  %2063 = vrot.lane.b32.xlu1 %v19015_v17, %s9004_s1  ;;  %v19016_v46 = vld [vmem:[#allocation171_spill] sm:$0xff]  ;;  %v19018_v28 = vld [vmem:[#allocation102_spill] sm:$0xff]  ;;  %v2468_v47 = vsel %vm2466_vm8, %v2403_v4, %v11762_v53  ;;  %v19019_v30 = vld [vmem:[#allocation168_spill] sm:$0xff] }
 0x3f6   :  { %v2212_v38 = vsel %vm2206_vm4, %v2147_v37, %v19016_v46  ;;  %v2402_v34 = vsel %vm2401_vm7, %v2337_v39, %v19018_v28  ;;  %2061 = vrot.lane.b32.xlu0 %v19019_v30, %s9004_s1  ;;  %v19020_v9 = vld [vmem:[#allocation262_spill] sm:$0xff]  ;;  %v2533_v37 = vsel %vm2531_vm9, %v2468_v47, %v12052_v18  ;;  %v19021_v54 = vld [vmem:[#allocation263_spill] sm:$0xff]  ;;  %v19022_v17 = vld [vmem:[#allocation304_spill] sm:$0xff] }
 0x3f7   :  { %v2275_v22 = vsel %vm2271_vm5, %v2210_v16, %v19020_v9  ;;  %v2467_v32 = vsel %vm2466_vm8, %v2402_v34, %v11764_v52  ;;  %v1952_v6 = vpop.permute.xlu1 %1951  ;;  %v2274_v39 = vsel %vm2271_vm5, %v2209_v20, %v19021_v54  ;;  %v2214_v52 = vsel %vm2206_vm4, %v2149_v63, %v19023_v31  ;;  %v19024_v34 = vld [vmem:[#allocation305_spill] sm:$0xff]  ;;  %v19025_v20 = vld [vmem:[#allocation170_spill] sm:$0xff]  ;;  %v19027_v63 = vld [vmem:[#allocation264_spill] sm:$0xff] }
 0x3f8   :  { %v2340_v53 = vsel %vm2336_vm6, %v2275_v22, %v19022_v17  ;;  %v2532_v4 = vsel %vm2531_vm9, %v2467_v32, %v12059_v56  ;;  %v2598_v46 = vsel %vm2596_vm10, %v2533_v37, %v1952_v6  ;;  %v1950_v16 = vpop.permute.xlu0 %1949  ;;  %v2339_v18 = vsel %vm2336_vm6, %v2274_v39, %v19024_v34  ;;  %v19026_v30 = vld [vmem:[#allocation362_spill] sm:$0xff]  ;;  %v19028_v54 = vld [vmem:[#allocation265_spill] sm:$0xff]  ;;  %v19033_v31 = vld [vmem:[#allocation363_spill] sm:$0xff] }
 0x3f9   :  { %v2405_v28 = vsel %vm2401_vm7, %v2340_v53, %v11450_v26  ;;  %2067 = vrot.lane.b32.xlu1 %v19025_v20, %s9004_s1  ;;  %v2597_v47 = vsel %vm2596_vm10, %v2532_v4, %v1950_v16  ;;  %v2404_v56 = vsel %vm2401_vm7, %v2339_v18, %v19026_v30  ;;  %v1945_v22 = vrot.slane %v11785_v33, 2  ;;  %v19029_v39 = vld [vmem:[#allocation306_spill] sm:$0xff]  ;;  %v19031_v4 = vld [vmem:[#allocation307_spill] sm:$0xff] }
 0x3fa   :  { %v2470_v9 = vsel %vm2466_vm8, %v2405_v28, %v11774_v35  ;;  %2065 = vrot.lane.b32.xlu0 %v10472_v21, %s9004_s1  ;;  %7255 = vmatprep.mubr.msk.f32.mxu0 %vm2666_vm11, %v2597_v47  ;;  %v1947_v26 = vrot.slane %v12057_v3, 2  ;;  %v2277_v32 = vsel %vm2271_vm5, %v2212_v38, %v19027_v63  ;;  %v2469_v37 = vsel %vm2466_vm8, %v2404_v56, %v11776_v13  ;;  %v19030_v53 = vld [vmem:[#allocation174_spill] sm:$0xff]  ;;  %v19035_v28 = vld [vmem:[#allocation365_spill] sm:$0xff]  ;;  %v19037_v63 = vld [vmem:[#allocation267_spill] sm:$0xff] }
 0x3fb   :  { %v1944_v6 = vrot.slane %v11792_v29, 2  ;;  %v2535_v35 = vsel %vm2531_vm9, %v2470_v9, %v12071_v44  ;;  %7256 = vmatmul.mubr.msk.f32.vlgmr.msra.gmra.mrb[0].mxu0 %vm2666_vm11, %v2598_v46  ;;  %v1956_v33 = vpop.permute.xlu1 %1955  ;;  %v2276_v21 = vsel %vm2271_vm5, %v2211_v12, %v19028_v54  ;;  %v2342_v3 = vsel %vm2336_vm6, %v2277_v32, %v19029_v39  ;;  %v19032_v46 = vld [vmem:[#allocation364_spill] sm:$0xff]  ;;  %v19034_v34 = vld [vmem:[#allocation366_spill] sm:$0xff] }
 0x3fc   :  { %v2534_v38 = vsel %vm2531_vm9, %v2469_v37, %v12073_v8  ;;  %v2600_v17 = vsel %vm2596_vm10, %v2535_v35, %v1956_v33  ;;  %v1954_v13 = vpop.permute.xlu0 %1953  ;;  %v2213_v29 = vsel %vm2206_vm4, %v2148_v55, %v19030_v53  ;;  %v2341_v44 = vsel %vm2336_vm6, %v2276_v21, %v19031_v4  ;;  %v19036_v20 = vld [vmem:[#allocation266_spill] sm:$0xff]  ;;  %v19038_v37 = vld [vmem:[#allocation308_spill] sm:$0xff]  ;;  %v19039_v33 = vld [vmem:[#allocation117_spill] sm:$0xff] }
 0x3fd   :  { %v2407_v16 = vsel %vm2401_vm7, %v2342_v3, %v19032_v46  ;;  %v2599_v12 = vsel %vm2596_vm10, %v2534_v38, %v1954_v13  ;;  %2071 = vrot.lane.b32.xlu1 %v19033_v31, %s9004_s1  ;;  %v2406_v8 = vsel %vm2401_vm7, %v2341_v44, %v19034_v34  ;;  %v1948_v55 = vsel %vm584_vm1, %v1945_v22, %v1947_v26  ;;  %v19041_v21 = vld [vmem:[#allocation367_spill] sm:$0xff]  ;;  %v19044_v53 = vld [vmem:[#allocation396_spill] sm:$0xff] }
 0x3fe   :  { %v2472_v18 = vsel %vm2466_vm8, %v2407_v16, %v11787_v40  ;;  %2069 = vrot.lane.b32.xlu0 %v19035_v28, %s9004_s1  ;;  %7258 = vmatprep.mubr.msk.f32.mxu0 %vm2666_vm11, %v2599_v12  ;;  %v2279_v47 = vsel %vm2271_vm5, %v2214_v52, %v19036_v20  ;;  %v2471_v30 = vsel %vm2466_vm8, %v2406_v8, %v11794_v57  ;;  %v19045_v4 = vld [vmem:[#allocation176_spill] sm:$0xff]  ;;  %v19046_v46 = vld [vmem:[#allocation7_spill] sm:$0xff]  ;;  %v19047_v12 = vld [vmem:[#allocation397_spill] sm:$0xff] }
 0x3ff   :  { %v2537_v56 = vsel %vm2531_vm9, %v2472_v18, %v12080_v24  ;;  %7259 = vmatmul.mubr.msk.f32.gmra.mrb[2].mxu0 %vm2666_vm11, %v2600_v17  ;;  %v1960_v9 = vpop.permute.xlu1 %1959  ;;  %v1946_v40 = vsel %vm584_vm1, %v1944_v6, %v1945_v22  ;;  %v2278_v32 = vsel %vm2271_vm5, %v2213_v29, %v19037_v63  ;;  %v2344_v26 = vsel %vm2336_vm6, %v2279_v47, %v19038_v37  ;;  %v8825_v24 = vld [vmem:[%s17548_s0 + $0x60] sm:$0xff]  ;;  %v19040_v22 = vld [vmem:[#allocation309_spill] sm:$0xff]  ;;  %v19043_v17 = vld [vmem:[#allocation368_spill] sm:$0xff] }
 0x400   :  { %v2536_v52 = vsel %vm2531_vm9, %v2471_v30, %v12083_v59  ;;  %v2602_v35 = vsel %vm2596_vm10, %v2537_v56, %v1960_v9  ;;  %v1958_v57 = vpop.permute.xlu0 %1957  ;;  %v2150_v54 = vsel %vm2141_vm3, %v8825_v24, %v19039_v33  ;;  %v2343_v6 = vsel %vm2336_vm6, %v2278_v32, %v19040_v22  ;;  %v19042_v59 = vld [vmem:[#allocation175_spill] sm:$0xff]  ;;  %v19048_v8 = vld [vmem:[#allocation6_spill] sm:$0xff]  ;;  %v19052_v32 = vld [vmem:[#allocation177_spill] sm:$0xff] }
 0x401   :  { %v2409_v39 = vsel %vm2401_vm7, %v2344_v26, %v19041_v21  ;;  %v2601_v3 = vsel %vm2596_vm10, %v2536_v52, %v1958_v57  ;;  %2075 = vrot.lane.b32.xlu1 %v1948_v55, %s9004_s1  ;;  %v2216_v38 = vsel %vm2206_vm4, %v12361_v60, %v19042_v59  ;;  %v2408_v13 = vsel %vm2401_vm7, %v2343_v6, %v19043_v17  ;;  %v19049_v28 = vld [vmem:[#allocation310_spill] sm:$0xff]  ;;  %v19053_v52 = vld [vmem:[#allocation119_spill] sm:$0xff]  ;;  %v19056_v6 = vld [vmem:[#allocation180_spill] sm:$0xff] }
 0x402   :  { %v2474_v29 = vsel %vm2466_vm8, %v2409_v39, %v19044_v53  ;;  %2073 = vrot.lane.b32.xlu0 %v1946_v40, %s9004_s1  ;;  %7261 = vmatprep.mubr.msk.f32.mxu0 %vm2666_vm11, %v2601_v3  ;;  %v2215_v44 = vsel %vm2206_vm4, %v2150_v54, %v19045_v4  ;;  %v2281_v16 = vsel %vm2271_vm5, %v2216_v38, %v19046_v46  ;;  %v8826_v56 = vld [vmem:[%s17548_s0 + $0x80] sm:$0xff]  ;;  %v19051_v40 = vld [vmem:[#allocation311_spill] sm:$0xff]  ;;  %v19057_v39 = vld [vmem:[#allocation8_spill] sm:$0xff] }
 0x403   :  { %v2473_v31 = vsel %vm2466_vm8, %v2408_v13, %v19047_v12  ;;  %v2539_v60 = vsel %vm2531_vm9, %v2474_v29, %v12087_v43  ;;  %7262 = vmatmul.mubr.msk.f32.gmra.mrb[4].mxu0 %vm2666_vm11, %v2602_v35  ;;  %v1964_v34 = vpop.permute.xlu1 %1963  ;;  %v2280_v18 = vsel %vm2271_vm5, %v2215_v44, %v19048_v8  ;;  %v2346_v55 = vsel %vm2336_vm6, %v2281_v16, %v19049_v28  ;;  %v19050_v43 = vld [vmem:[#allocation118_spill] sm:$0xff]  ;;  %v19054_v57 = vld [vmem:[#allocation179_spill] sm:$0xff]  ;;  %v19058_v13 = vld [vmem:[#allocation9_spill] sm:$0xff] }
 0x404   :  { %v2538_v20 = vsel %vm2531_vm9, %v2473_v31, %v12089_v61  ;;  %v2604_v47 = vsel %vm2596_vm10, %v2539_v60, %v1964_v34  ;;  %v1962_v30 = vpop.permute.xlu0 %1961  ;;  %v2153_v9 = vsel %vm2141_vm3, %v8826_v56, %v19050_v43  ;;  %v2345_v63 = vsel %vm2336_vm6, %v2280_v18, %v19051_v40  ;;  %v8827_v61 = vld [vmem:[%s17548_s0 + $0x78] sm:$0xff]  ;;  %v19055_v33 = vld [vmem:[#allocation178_spill] sm:$0xff]  ;;  %v19059_v53 = vld [vmem:[#allocation312_spill] sm:$0xff] }
 0x405   :  { %v2411_v37 = vsel %vm2401_vm7, %v2346_v55, %v19052_v32  ;;  %v2603_v26 = vsel %vm2596_vm10, %v2538_v20, %v1962_v30  ;;  %v2152_v35 = vsel %vm2141_vm3, %v8827_v61, %v19053_v52  ;;  %v2218_v24 = vsel %vm2206_vm4, %v2153_v9, %v19054_v57  ;;  %v19061_v12 = vld [vmem:[#allocation313_spill] sm:$0xff]  ;;  %v19064_v55 = vld [vmem:[#allocation183_spill] sm:$0xff]  ;;  %v19066_v43 = vld [vmem:[#allocation184_spill] sm:$0xff] }
 0x406   :  { %v2410_v54 = vsel %vm2401_vm7, %v2345_v63, %v19055_v33  ;;  %v2476_v22 = vsel %vm2466_vm8, %v2411_v37, %v11808_v58  ;;  %7264 = vmatprep.mubr.msk.f32.mxu0 %vm2666_vm11, %v2603_v26  ;;  %v2217_v21 = vsel %vm2206_vm4, %v2152_v35, %v19056_v6  ;;  %v2283_v3 = vsel %vm2271_vm5, %v2218_v24, %v19057_v39  ;;  %v19062_v60 = vld [vmem:[#allocation181_spill] sm:$0xff]  ;;  %v19067_v40 = vld [vmem:[#allocation10_spill] sm:$0xff]  ;;  %v19068_v61 = vld [vmem:[#allocation11_spill] sm:$0xff] }
 0x407   :  { %v2475_v59 = vsel %vm2466_vm8, %v2410_v54, %v11810_v62  ;;  %v2541_v38 = vsel %vm2531_vm9, %v2476_v22, %v12095_v27  ;;  %7265 = vmatmul.mubr.msk.f32.gmra.mrb[6].mxu0 %vm2666_vm11, %v2604_v47  ;;  %v1968_v17 = vpop.permute.xlu1 %1967  ;;  %v2282_v58 = vsel %vm2271_vm5, %v2217_v21, %v19058_v13  ;;  %v2348_v29 = vsel %vm2336_vm6, %v2283_v3, %v19059_v53  ;;  %v8828_v62 = vld [vmem:[%s17548_s0 + $0x98] sm:$0xff]  ;;  %v19060_v27 = vld [vmem:[#allocation120_spill] sm:$0xff]  ;;  %v19065_v47 = vld [vmem:[#allocation182_spill] sm:$0xff] }
 0x408   :  { %v2540_v4 = vsel %vm2531_vm9, %v2475_v59, %v12097_v48  ;;  %v2606_v44 = vsel %vm2596_vm10, %v2541_v38, %v1968_v17  ;;  %v1966_v46 = vpop.permute.xlu0 %1965  ;;  %v2155_v16 = vsel %vm2141_vm3, %v8828_v62, %v19060_v27  ;;  %v2347_v31 = vsel %vm2336_vm6, %v2282_v58, %v19061_v12  ;;  %v8829_v48 = vld [vmem:[%s17548_s0 + $0x90] sm:$0xff]  ;;  %v19063_v18 = vld [vmem:[#allocation121_spill] sm:$0xff]  ;;  %v19069_v52 = vld [vmem:[#allocation314_spill] sm:$0xff] }
 0x409   :  { %v2413_v34 = vsel %vm2401_vm7, %v2348_v29, %v19062_v60  ;;  %v2605_v8 = vsel %vm2596_vm10, %v2540_v4, %v1966_v46  ;;  %v2154_v28 = vsel %vm2141_vm3, %v8829_v48, %v19063_v18  ;;  %v2220_v20 = vsel %vm2206_vm4, %v2155_v16, %v19064_v55  ;;  %v19071_v22 = vld [vmem:[#allocation315_spill] sm:$0xff]  ;;  %v19072_v21 = vld [vmem:[#allocation185_spill] sm:$0xff]  ;;  %v19075_v58 = vld [vmem:[#allocation186_spill] sm:$0xff] }
 0x40a   :  { %v2412_v30 = vsel %vm2401_vm7, %v2347_v31, %v19065_v47  ;;  %v2478_v56 = vsel %vm2466_vm8, %v2413_v34, %v11816_v19  ;;  %7267 = vmatprep.mubr.msk.f32.mxu0 %vm2666_vm11, %v2605_v8  ;;  %v2219_v9 = vsel %vm2206_vm4, %v2154_v28, %v19066_v43  ;;  %v2285_v63 = vsel %vm2271_vm5, %v2220_v20, %v19067_v40  ;;  %v19073_v59 = vld [vmem:[#allocation123_spill] sm:$0xff]  ;;  %v19076_v4 = vld [vmem:[#allocation188_spill] sm:$0xff]  ;;  %v19078_v31 = vld [vmem:[#allocation13_spill] sm:$0xff] }
 0x40b   :  { %v2477_v32 = vsel %vm2466_vm8, %v2412_v30, %v11818_v45  ;;  %v2543_v37 = vsel %vm2531_vm9, %v2478_v56, %v12103_v51  ;;  %7268 = vmatmul.mubr.msk.f32.gmra.mrb[8].mxu0 %vm2666_vm11, %v2606_v44  ;;  %v1972_v26 = vpop.permute.xlu1 %1971  ;;  %v2284_v19 = vsel %vm2271_vm5, %v2219_v9, %v19068_v61  ;;  %v2350_v35 = vsel %vm2336_vm6, %v2285_v63, %v19069_v52  ;;  %v8830_v45 = vld [vmem:[%s17548_s0 + $0xb0] sm:$0xff]  ;;  %v19070_v51 = vld [vmem:[#allocation122_spill] sm:$0xff]  ;;  %v19074_v17 = vld [vmem:[#allocation187_spill] sm:$0xff] }
 0x40c   :  { %v2542_v57 = vsel %vm2531_vm9, %v2477_v32, %v12105_v41  ;;  %v2608_v24 = vsel %vm2596_vm10, %v2543_v37, %v1972_v26  ;;  %v1970_v33 = vpop.permute.xlu0 %1969  ;;  %v2157_v54 = vsel %vm2141_vm3, %v8830_v45, %v19070_v51  ;;  %v2349_v6 = vsel %vm2336_vm6, %v2284_v19, %v19071_v22  ;;  %v8831_v41 = vld [vmem:[%s17548_s0 + $0xa8] sm:$0xff]  ;;  %v19077_v46 = vld [vmem:[#allocation12_spill] sm:$0xff]  ;;  %v19081_v55 = vld [vmem:[#allocation317_spill] sm:$0xff] }
 0x40d   :  { %v2415_v39 = vsel %vm2401_vm7, %v2350_v35, %v19072_v21  ;;  %v2607_v3 = vsel %vm2596_vm10, %v2542_v57, %v1970_v33  ;;  %v2156_v38 = vsel %vm2141_vm3, %v8831_v41, %v19073_v59  ;;  %v2222_v13 = vsel %vm2206_vm4, %v2157_v54, %v19074_v17  ;;  %v19079_v60 = vld [vmem:[#allocation316_spill] sm:$0xff]  ;;  %v19082_v47 = vld [vmem:[#allocation189_spill] sm:$0xff]  ;;  %v19084_v40 = vld [vmem:[#allocation191_spill] sm:$0xff] }
 0x40e   :  { %v2414_v53 = vsel %vm2401_vm7, %v2349_v6, %v19075_v58  ;;  %v2480_v29 = vsel %vm2466_vm8, %v2415_v39, %v11824_v50  ;;  %7270 = vmatprep.mubr.msk.f32.mxu0 %vm2666_vm11, %v2607_v3  ;;  %v2221_v44 = vsel %vm2206_vm4, %v2156_v38, %v19076_v4  ;;  %v2287_v62 = vsel %vm2271_vm5, %v2222_v13, %v19077_v46  ;;  %v19083_v43 = vld [vmem:[#allocation125_spill] sm:$0xff]  ;;  %v19085_v32 = vld [vmem:[#allocation190_spill] sm:$0xff]  ;;  %v19086_v61 = vld [vmem:[#allocation192_spill] sm:$0xff] }
 0x40f   :  { %v2479_v27 = vsel %vm2466_vm8, %v2414_v53, %v11826_v0  ;;  %v2545_v16 = vsel %vm2531_vm9, %v2480_v29, %v12111_v5  ;;  %7271 = vmatmul.mubr.msk.f32.gmra.mrb[10].mxu0 %vm2666_vm11, %v2608_v24  ;;  %v1976_v12 = vpop.permute.xlu1 %1975  ;;  %v2286_v50 = vsel %vm2271_vm5, %v2221_v44, %v19078_v31  ;;  %v2352_v34 = vsel %vm2336_vm6, %v2287_v62, %v19079_v60  ;;  %v8832_v0 = vld [vmem:[%s17548_s0 + $0xc8] sm:$0xff]  ;;  %v19080_v5 = vld [vmem:[#allocation124_spill] sm:$0xff]  ;;  %v19087_v52 = vld [vmem:[#allocation14_spill] sm:$0xff] }
 0x410   :  { %v2544_v8 = vsel %vm2531_vm9, %v2479_v27, %v12113_v10  ;;  %v2610_v48 = vsel %vm2596_vm10, %v2545_v16, %v1976_v12  ;;  %v1974_v18 = vpop.permute.xlu0 %1973  ;;  %v2159_v28 = vsel %vm2141_vm3, %v8832_v0, %v19080_v5  ;;  %v2351_v20 = vsel %vm2336_vm6, %v2286_v50, %v19081_v55  ;;  %v8833_v10 = vld [vmem:[%s17548_s0 + $0xc0] sm:$0xff]  ;;  %v19088_v45 = vld [vmem:[#allocation15_spill] sm:$0xff]  ;;  %v19092_v59 = vld [vmem:[#allocation193_spill] sm:$0xff] }
 0x411   :  { %v2417_v30 = vsel %vm2401_vm7, %v2352_v34, %v19082_v47  ;;  %v2609_v56 = vsel %vm2596_vm10, %v2544_v8, %v1974_v18  ;;  %v2158_v9 = vsel %vm2141_vm3, %v8833_v10, %v19083_v43  ;;  %v2224_v63 = vsel %vm2206_vm4, %v2159_v28, %v19084_v40  ;;  %v19089_v51 = vld [vmem:[#allocation318_spill] sm:$0xff]  ;;  %v19091_v3 = vld [vmem:[#allocation319_spill] sm:$0xff]  ;;  %v19096_v62 = vld [vmem:[#allocation196_spill] sm:$0xff] }
 0x412   :  { %v2416_v37 = vsel %vm2401_vm7, %v2351_v20, %v19085_v32  ;;  %v2482_v26 = vsel %vm2466_vm8, %v2417_v30, %v11832_v7  ;;  %7273 = vmatprep.mubr.msk.f32.mxu0 %vm2666_vm11, %v2609_v56  ;;  %v2223_v19 = vsel %vm2206_vm4, %v2158_v9, %v19086_v61  ;;  %v2289_v35 = vsel %vm2271_vm5, %v2224_v63, %v19087_v52  ;;  %v19093_v13 = vld [vmem:[#allocation127_spill] sm:$0xff]  ;;  %v19095_v4 = vld [vmem:[#allocation194_spill] sm:$0xff]  ;;  %v19097_v16 = vld [vmem:[#allocation16_spill] sm:$0xff] }
 0x413   :  { %v2481_v57 = vsel %vm2466_vm8, %v2416_v37, %v11834_v36  ;;  %v2547_v24 = vsel %vm2531_vm9, %v2482_v26, %v12119_v2  ;;  %7274 = vmatmul.mubr.msk.f32.gmra.mrb[12].mxu0 %vm2666_vm11, %v2610_v48  ;;  %v1980_v33 = vpop.permute.xlu1 %1979  ;;  %v2288_v7 = vsel %vm2271_vm5, %v2223_v19, %v19088_v45  ;;  %v2354_v54 = vsel %vm2336_vm6, %v2289_v35, %v19089_v51  ;;  %v8834_v36 = vld [vmem:[%s17548_s0 + $0xe0] sm:$0xff]  ;;  %v19094_v53 = vld [vmem:[#allocation195_spill] sm:$0xff]  ;;  %v19098_v34 = vld [vmem:[#allocation17_spill] sm:$0xff] }
 0x414   :  { %v2546_v22 = vsel %vm2531_vm9, %v2481_v57, %v12121_v1  ;;  %v2612_v6 = vsel %vm2596_vm10, %v2547_v24, %v1980_v33  ;;  %v1978_v21 = vpop.permute.xlu0 %1977  ;;  %v19090_v2 = vld [vmem:[#allocation126_spill] sm:$0xff]  ;;  %v2353_v41 = vsel %vm2336_vm6, %v2288_v7, %v19091_v3  ;;  %v2419_v38 = vsel %vm2401_vm7, %v2354_v54, %v19092_v59  ;;  %v8835_v1 = vld [vmem:[%s17548_s0 + $0xd8] sm:$0xff]  ;;  %v19099_v8 = vld [vmem:[#allocation320_spill] sm:$0xff] }
 0x415   :  { %v2161_v39 = vsel %vm2141_vm3, %v8834_v36, %v19090_v2  ;;  %v2611_v17 = vsel %vm2596_vm10, %v2546_v22, %v1978_v21  ;;  %v2160_v58 = vsel %vm2141_vm3, %v8835_v1, %v19093_v13  ;;  %v2418_v44 = vsel %vm2401_vm7, %v2353_v41, %v19095_v4  ;;  %v19101_v55 = vld [vmem:[#allocation321_spill] sm:$0xff]  ;;  %v19104_v9 = vld [vmem:[#allocation199_spill] sm:$0xff]  ;;  %v19105_v63 = vld [vmem:[#allocation198_spill] sm:$0xff] }
 0x416   :  { %v2226_v29 = vsel %vm2206_vm4, %v2161_v39, %v19094_v53  ;;  %v2484_v46 = vsel %vm2466_vm8, %v2419_v38, %v11840_v15  ;;  %7276 = vmatprep.mubr.msk.f32.mxu0 %vm2666_vm11, %v2611_v17  ;;  %v2225_v27 = vsel %vm2206_vm4, %v2160_v58, %v19096_v62  ;;  %v2483_v31 = vsel %vm2466_vm8, %v2418_v44, %v11842_v49  ;;  %v8836_v49 = vld [vmem:[%s17548_s0 + $0xf8] sm:$0xff]  ;;  %v19106_v26 = vld [vmem:[#allocation200_spill] sm:$0xff]  ;;  %v19107_v19 = vld [vmem:[#allocation18_spill] sm:$0xff] }
 0x417   :  { %v2291_v12 = vsel %vm2271_vm5, %v2226_v29, %v19097_v16  ;;  %v2549_v50 = vsel %vm2531_vm9, %v2484_v46, %v12127_v14  ;;  %7277 = vmatmul.mubr.msk.f32.gmra.mrb[14].mxu0 %vm2666_vm11, %v2612_v6  ;;  %v1984_v60 = vpop.permute.xlu1 %1983  ;;  %v2290_v15 = vsel %vm2271_vm5, %v2225_v27, %v19098_v34  ;;  %v2548_v18 = vsel %vm2531_vm9, %v2483_v31, %v12129_v11  ;;  %v19100_v14 = vld [vmem:[#allocation128_spill] sm:$0xff]  ;;  %v19102_v47 = vld [vmem:[#allocation197_spill] sm:$0xff]  ;;  %v19108_v35 = vld [vmem:[#allocation398_spill] sm:$0xff] }
 0x418   :  { %v2356_v48 = vsel %vm2336_vm6, %v2291_v12, %v19099_v8  ;;  %v2614_v0 = vsel %vm2596_vm10, %v2549_v50, %v1984_v60  ;;  %v1982_v5 = vpop.permute.xlu0 %1981  ;;  %v2163_v28 = vsel %vm2141_vm3, %v8836_v49, %v19100_v14  ;;  %v2355_v20 = vsel %vm2336_vm6, %v2290_v15, %v19101_v55  ;;  %v8837_v11 = vld [vmem:[%s17548_s0 + $0xf0] sm:$0xff]  ;;  %v19103_v10 = vld [vmem:[#allocation129_spill] sm:$0xff]  ;;  %v19109_v45 = vld [vmem:[#allocation19_spill] sm:$0xff] }
 0x419   :  { %v2421_v30 = vsel %vm2401_vm7, %v2356_v48, %v19102_v47  ;;  %v2613_v56 = vsel %vm2596_vm10, %v2548_v18, %v1982_v5  ;;  %v2162_v43 = vsel %vm2141_vm3, %v8837_v11, %v19103_v10  ;;  %v2228_v40 = vsel %vm2206_vm4, %v2163_v28, %v19104_v9  ;;  %v19110_v7 = vld [vmem:[#allocation322_spill] sm:$0xff]  ;;  %v19111_v54 = vld [vmem:[#allocation108_spill] sm:$0xff]  ;;  %v19113_v39 = vld [vmem:[#allocation323_spill] sm:$0xff] }
 0x41a   :  { %v2420_v32 = vsel %vm2401_vm7, %v2355_v20, %v19105_v63  ;;  %v2486_v37 = vsel %vm2466_vm8, %v2421_v30, %v11848_v42  ;;  %7279 = vmatprep.mubr.msk.f32.mxu0 %vm2666_vm11, %v2613_v56  ;;  %v2227_v61 = vsel %vm2206_vm4, %v2162_v43, %v19106_v26  ;;  %v2293_v52 = vsel %vm2271_vm5, %v2228_v40, %v19107_v19  ;;  %v8838_v36 = vld [vmem:[%s17548_s0 + $0x110] sm:$0xff]  ;;  %v19114_v41 = vld [vmem:[#allocation201_spill] sm:$0xff]  ;;  %v8839_v17 = vld [vmem:[%s17548_s0 + $0x108] sm:$0xff] }
 0x41b   :  { %v2485_v57 = vsel %vm2466_vm8, %v2420_v32, %v19108_v35  ;;  %v2551_v24 = vsel %vm2531_vm9, %v2486_v37, %v12135_v23  ;;  %7280 = vmatmul.mubr.msk.f32.gmra.mrb[16].mxu0 %vm2666_vm11, %v2614_v0  ;;  %v1988_v33 = vpop.permute.xlu1 %1987  ;;  %v2292_v42 = vsel %vm2271_vm5, %v2227_v61, %v19109_v45  ;;  %v2358_v51 = vsel %vm2336_vm6, %v2293_v52, %v19110_v7  ;;  %v19112_v23 = vld [vmem:[#allocation130_spill] sm:$0xff]  ;;  %v19115_v1 = vld [vmem:[#allocation131_spill] sm:$0xff]  ;;  %v19119_v62 = vld [vmem:[#allocation204_spill] sm:$0xff] }
 0x41c   :  { %v2550_v22 = vsel %vm2531_vm9, %v2485_v57, %v19111_v54  ;;  %v2616_v6 = vsel %vm2596_vm10, %v2551_v24, %v1988_v33  ;;  %v1986_v21 = vpop.permute.xlu0 %1985  ;;  %v2165_v2 = vsel %vm2141_vm3, %v8838_v36, %v19112_v23  ;;  %v2357_v3 = vsel %vm2336_vm6, %v2292_v42, %v19113_v39  ;;  %v19116_v58 = vld [vmem:[#allocation203_spill] sm:$0xff]  ;;  %v19117_v29 = vld [vmem:[#allocation202_spill] sm:$0xff]  ;;  %v19120_v16 = vld [vmem:[#allocation20_spill] sm:$0xff] }
 0x41d   :  { %v2423_v59 = vsel %vm2401_vm7, %v2358_v51, %v19114_v41  ;;  %v2615_v38 = vsel %vm2596_vm10, %v2550_v22, %v1986_v21  ;;  %v2164_v13 = vsel %vm2141_vm3, %v8839_v17, %v19115_v1  ;;  %v2230_v53 = vsel %vm2206_vm4, %v2165_v2, %v19116_v58  ;;  %v19118_v44 = vld [vmem:[#allocation399_spill] sm:$0xff]  ;;  %v19121_v31 = vld [vmem:[#allocation400_spill] sm:$0xff]  ;;  %v19122_v60 = vld [vmem:[#allocation110_spill] sm:$0xff] }
 0x41e   :  { %v2422_v4 = vsel %vm2401_vm7, %v2357_v3, %v19117_v29  ;;  %v2488_v46 = vsel %vm2466_vm8, %v2423_v59, %v19118_v44  ;;  %7282 = vmatprep.mubr.msk.f32.mxu0 %vm2666_vm11, %v2615_v38  ;;  %v2229_v27 = vsel %vm2206_vm4, %v2164_v13, %v19119_v62  ;;  %v2295_v12 = vsel %vm2271_vm5, %v2230_v53, %v19120_v16  ;;  %v19123_v8 = vld [vmem:[#allocation21_spill] sm:$0xff]  ;;  %v19124_v18 = vld [vmem:[#allocation324_spill] sm:$0xff]  ;;  %v8840_v55 = vld [vmem:[%s17548_s0 + $0x128] sm:$0xff] }
 0x41f   :  { %v2487_v50 = vsel %vm2466_vm8, %v2422_v4, %v19121_v31  ;;  %v2553_v34 = vsel %vm2531_vm9, %v2488_v46, %v19122_v60  ;;  %7283 = vmatmul.mubr.msk.f32.gmra.mrb[18].mxu0 %vm2666_vm11, %v2616_v6  ;;  %v1992_v15 = vpop.permute.xlu1 %1991  ;;  %v2294_v48 = vsel %vm2271_vm5, %v2229_v27, %v19123_v8  ;;  %v2360_v0 = vsel %vm2336_vm6, %v2295_v12, %v19124_v18  ;;  %v19125_v5 = vld [vmem:[#allocation409_spill] sm:$0xff]  ;;  %v19126_v20 = vld [vmem:[#allocation132_spill] sm:$0xff]  ;;  %v8841_v9 = vld [vmem:[%s17548_s0 + $0x120] sm:$0xff] }
 0x420   :  { %v2552_v49 = vsel %vm2531_vm9, %v2487_v50, %v19125_v5  ;;  %v2618_v14 = vsel %vm2596_vm10, %v2553_v34, %v1992_v15  ;;  %v1990_v28 = vpop.permute.xlu0 %1989  ;;  %v2167_v47 = vsel %vm2141_vm3, %v8840_v55, %v19126_v20  ;;  %v19127_v30 = vld [vmem:[#allocation325_spill] sm:$0xff]  ;;  %v19130_v32 = vld [vmem:[#allocation207_spill] sm:$0xff]  ;;  %v19131_v26 = vld [vmem:[#allocation206_spill] sm:$0xff] }
 0x421   :  { %v2359_v56 = vsel %vm2336_vm6, %v2294_v48, %v19127_v30  ;;  %v19128_v11 = vld [vmem:[#allocation205_spill] sm:$0xff]  ;;  %v2617_v43 = vsel %vm2596_vm10, %v2552_v49, %v1990_v28  ;;  %v2232_v37 = vsel %vm2206_vm4, %v2167_v47, %v19130_v32  ;;  %v19133_v35 = vld [vmem:[#allocation208_spill] sm:$0xff]  ;;  %v19134_v24 = vld [vmem:[#allocation22_spill] sm:$0xff] }
 0x422   :  { %v2425_v10 = vsel %vm2401_vm7, %v2360_v0, %v19128_v11  ;;  %v19129_v40 = vld [vmem:[#allocation133_spill] sm:$0xff]  ;;  %v2424_v61 = vsel %vm2401_vm7, %v2359_v56, %v19131_v26  ;;  %7285 = vmatprep.mubr.msk.f32.mxu0 %vm2666_vm11, %v2617_v43  ;;  %v2297_v33 = vsel %vm2271_vm5, %v2232_v37, %v19134_v24  ;;  %v19135_v45 = vld [vmem:[#allocation402_spill] sm:$0xff]  ;;  %v19137_v22 = vld [vmem:[#allocation23_spill] sm:$0xff] }
 0x423   :  { %v2166_v63 = vsel %vm2141_vm3, %v8841_v9, %v19129_v40  ;;  %v19132_v19 = vld [vmem:[#allocation401_spill] sm:$0xff]  ;;  %v2489_v42 = vsel %vm2466_vm8, %v2424_v61, %v19135_v45  ;;  %v19136_v7 = vld [vmem:[#allocation410_spill] sm:$0xff]  ;;  %7286 = vmatmul.mubr.msk.f32.gmra.mrb[20].mxu0 %vm2666_vm11, %v2618_v14  ;;  %v1996_v54 = vpop.permute.xlu1 %1995  ;;  %v19139_v23 = vld [vmem:[#allocation411_spill] sm:$0xff] }
 0x424   :  { %v2490_v52 = vsel %vm2466_vm8, %v2425_v10, %v19132_v19  ;;  %v2231_v57 = vsel %vm2206_vm4, %v2166_v63, %v19133_v35  ;;  %v19138_v21 = vld [vmem:[#allocation326_spill] sm:$0xff]  ;;  %v2554_v2 = vsel %vm2531_vm9, %v2489_v42, %v19139_v23  ;;  %v1994_v3 = vpop.permute.xlu0 %1993  ;;  %v19141_v17 = vld [vmem:[#allocation327_spill] sm:$0xff]  ;;  %v19142_v13 = vld [vmem:[#allocation209_spill] sm:$0xff] }
 0x425   :  { %v2555_v51 = vsel %vm2531_vm9, %v2490_v52, %v19136_v7  ;;  %v2296_v6 = vsel %vm2271_vm5, %v2231_v57, %v19137_v22  ;;  %v2362_v36 = vsel %vm2336_vm6, %v2297_v33, %v19138_v21  ;;  %v8842_v41 = vld [vmem:[%s17548_s0 + $0x140] sm:$0xff]  ;;  %v2619_v53 = vsel %vm2596_vm10, %v2554_v2, %v1994_v3  ;;  %v8843_v29 = vld [vmem:[%s17548_s0 + $0x138] sm:$0xff]  ;;  %v19143_v4 = vld [vmem:[#allocation136_spill] sm:$0xff] }
 0x426   :  { %v2620_v39 = vsel %vm2596_vm10, %v2555_v51, %v1996_v54  ;;  %v19140_v59 = vld [vmem:[#allocation134_spill] sm:$0xff]  ;;  %v2361_v1 = vsel %vm2336_vm6, %v2296_v6, %v19141_v17  ;;  %v2427_v58 = vsel %vm2401_vm7, %v2362_v36, %v19142_v13  ;;  %v2168_v44 = vsel %vm2141_vm3, %v8843_v29, %v19143_v4  ;;  %v19144_v46 = vld [vmem:[#allocation211_spill] sm:$0xff]  ;;  %v19146_v12 = vld [vmem:[#allocation25_spill] sm:$0xff]  ;;  %7288 = vmatprep.mubr.msk.f32.mxu0 %vm2666_vm11, %v2619_v53 }
 0x427   :  { %v2169_v38 = vsel %vm2141_vm3, %v8842_v41, %v19140_v59  ;;  %v19145_v27 = vld [vmem:[#allocation210_spill] sm:$0xff]  ;;  %v2492_v31 = vsel %vm2466_vm8, %v2427_v58, %v19146_v12  ;;  %v19147_v50 = vld [vmem:[#allocation212_spill] sm:$0xff]  ;;  %v19149_v8 = vld [vmem:[#allocation403_spill] sm:$0xff]  ;;  %7289 = vmatmul.mubr.msk.f32.gmra.mrb[22].mxu0 %vm2666_vm11, %v2620_v39  ;;  %v2000_v5 = vpop.permute.xlu1 %1999 }
 0x428   :  { %v2234_v62 = vsel %vm2206_vm4, %v2169_v38, %v19144_v46  ;;  %v2426_v16 = vsel %vm2401_vm7, %v2361_v1, %v19145_v27  ;;  %v2233_v60 = vsel %vm2206_vm4, %v2168_v44, %v19147_v50  ;;  %v19148_v34 = vld [vmem:[#allocation24_spill] sm:$0xff]  ;;  %v19150_v18 = vld [vmem:[#allocation135_spill] sm:$0xff]  ;;  %v1998_v56 = vpop.permute.xlu0 %1997  ;;  %v8844_v11 = vld [vmem:[%s17548_s0 + $0x158] sm:$0xff] }
 0x429   :  { %v2299_v15 = vsel %vm2271_vm5, %v2234_v62, %v19148_v34  ;;  %v2491_v48 = vsel %vm2466_vm8, %v2426_v16, %v19149_v8  ;;  %v2557_v0 = vsel %vm2531_vm9, %v2492_v31, %v19150_v18  ;;  %v19151_v49 = vld [vmem:[#allocation268_spill] sm:$0xff]  ;;  %v19154_v10 = vld [vmem:[#allocation138_spill] sm:$0xff]  ;;  %v19155_v9 = vld [vmem:[#allocation329_spill] sm:$0xff] }
 0x42a   :  { %v2298_v14 = vsel %vm2271_vm5, %v2233_v60, %v19151_v49  ;;  %v19152_v28 = vld [vmem:[#allocation328_spill] sm:$0xff]  ;;  %v2622_v30 = vsel %vm2596_vm10, %v2557_v0, %v2000_v5  ;;  %v2171_v43 = vsel %vm2141_vm3, %v8844_v11, %v19154_v10  ;;  %v19156_v63 = vld [vmem:[#allocation213_spill] sm:$0xff]  ;;  %v19158_v52 = vld [vmem:[#allocation215_spill] sm:$0xff] }
 0x42b   :  { %v2364_v55 = vsel %vm2336_vm6, %v2299_v15, %v19152_v28  ;;  %v19153_v20 = vld [vmem:[#allocation412_spill] sm:$0xff]  ;;  %v2363_v40 = vsel %vm2336_vm6, %v2298_v14, %v19155_v9  ;;  %v2236_v35 = vsel %vm2206_vm4, %v2171_v43, %v19158_v52  ;;  %v19159_v57 = vld [vmem:[#allocation214_spill] sm:$0xff]  ;;  %v19162_v51 = vld [vmem:[#allocation269_spill] sm:$0xff]  ;;  %v2004_v23 = vpop.permute.xlu1 %2003 }
 0x42c   :  { %v2556_v47 = vsel %vm2531_vm9, %v2491_v48, %v19153_v20  ;;  %v2429_v32 = vsel %vm2401_vm7, %v2364_v55, %v19156_v63  ;;  %v8845_v26 = vld [vmem:[%s17548_s0 + $0x150] sm:$0xff]  ;;  %v2428_v24 = vsel %vm2401_vm7, %v2363_v40, %v19159_v57  ;;  %v19160_v33 = vld [vmem:[#allocation26_spill] sm:$0xff]  ;;  %v2301_v54 = vsel %vm2271_vm5, %v2236_v35, %v19162_v51  ;;  %v19163_v22 = vld [vmem:[#allocation27_spill] sm:$0xff]  ;;  %v2002_v1 = vpop.permute.xlu0 %2001 }
 0x42d   :  { %v2621_v37 = vsel %vm2596_vm10, %v2556_v47, %v1998_v56  ;;  %v19157_v61 = vld [vmem:[#allocation140_spill] sm:$0xff]  ;;  %v2494_v45 = vsel %vm2466_vm8, %v2429_v32, %v19160_v33  ;;  %v2493_v6 = vsel %vm2466_vm8, %v2428_v24, %v19163_v22  ;;  %v19164_v21 = vld [vmem:[#allocation137_spill] sm:$0xff]  ;;  %v19165_v2 = vld [vmem:[#allocation270_spill] sm:$0xff] }
 0x42e   :  { %v2170_v19 = vsel %vm2141_vm3, %v8845_v26, %v19157_v61  ;;  %7291 = vmatprep.mubr.msk.f32.mxu0 %vm2666_vm11, %v2621_v37  ;;  %v19161_v42 = vld [vmem:[#allocation216_spill] sm:$0xff]  ;;  %v2559_v36 = vsel %vm2531_vm9, %v2494_v45, %v19164_v21  ;;  %v19166_v3 = vld [vmem:[#allocation330_spill] sm:$0xff]  ;;  %v19167_v59 = vld [vmem:[#allocation139_spill] sm:$0xff] }
 0x42f   :  { %v2235_v7 = vsel %vm2206_vm4, %v2170_v19, %v19161_v42  ;;  %7292 = vmatmul.mubr.msk.f32.gmra.mrb[24].mxu0 %vm2666_vm11, %v2622_v30  ;;  %v2366_v41 = vsel %vm2336_vm6, %v2301_v54, %v19166_v3  ;;  %v2558_v38 = vsel %vm2531_vm9, %v2493_v6, %v19167_v59  ;;  %v2624_v17 = vsel %vm2596_vm10, %v2559_v36, %v2004_v23  ;;  %v8846_v13 = vld [vmem:[%s17548_s0 + $0x170] sm:$0xff]  ;;  %v19168_v58 = vld [vmem:[#allocation142_spill] sm:$0xff]  ;;  %v19169_v29 = vld [vmem:[#allocation331_spill] sm:$0xff]  ;;  %v2008_v20 = vpop.permute.xlu1 %2007 }
 0x430   :  { %v2300_v39 = vsel %vm2271_vm5, %v2235_v7, %v19165_v2  ;;  %v2173_v53 = vsel %vm2141_vm3, %v8846_v13, %v19168_v58  ;;  %v19170_v44 = vld [vmem:[#allocation217_spill] sm:$0xff]  ;;  %v2623_v62 = vsel %vm2596_vm10, %v2558_v38, %v2002_v1  ;;  %v8847_v27 = vld [vmem:[%s17548_s0 + $0x168] sm:$0xff]  ;;  %v19171_v16 = vld [vmem:[#allocation144_spill] sm:$0xff]  ;;  %v2006_v40 = vpop.permute.xlu0 %2005 }
 0x431   :  { %v2365_v4 = vsel %vm2336_vm6, %v2300_v39, %v19169_v29  ;;  %v2431_v46 = vsel %vm2401_vm7, %v2366_v41, %v19170_v44  ;;  %v2172_v12 = vsel %vm2141_vm3, %v8847_v27, %v19171_v16  ;;  %v19172_v31 = vld [vmem:[#allocation219_spill] sm:$0xff]  ;;  %v19173_v60 = vld [vmem:[#allocation218_spill] sm:$0xff]  ;;  %v19174_v15 = vld [vmem:[#allocation28_spill] sm:$0xff]  ;;  %7294 = vmatprep.mubr.msk.f32.mxu0 %vm2666_vm11, %v2623_v62 }
 0x432   :  { %v2238_v50 = vsel %vm2206_vm4, %v2173_v53, %v19172_v31  ;;  %v2430_v34 = vsel %vm2401_vm7, %v2365_v4, %v19173_v60  ;;  %v2496_v8 = vsel %vm2466_vm8, %v2431_v46, %v19174_v15  ;;  %v19175_v48 = vld [vmem:[#allocation220_spill] sm:$0xff]  ;;  %v19176_v0 = vld [vmem:[#allocation271_spill] sm:$0xff]  ;;  %v19177_v49 = vld [vmem:[#allocation29_spill] sm:$0xff] }
 0x433   :  { %v2237_v18 = vsel %vm2206_vm4, %v2172_v12, %v19175_v48  ;;  %v2303_v5 = vsel %vm2271_vm5, %v2238_v50, %v19176_v0  ;;  %v2495_v14 = vsel %vm2466_vm8, %v2430_v34, %v19177_v49  ;;  %v19178_v28 = vld [vmem:[#allocation141_spill] sm:$0xff]  ;;  %7295 = vmatmul.mubr.msk.f32.gmra.mrb[26].mxu0 %vm2666_vm11, %v2624_v17  ;;  %v19179_v47 = vld [vmem:[#allocation272_spill] sm:$0xff]  ;;  %v19181_v10 = vld [vmem:[#allocation143_spill] sm:$0xff]  ;;  %v2012_v59 = vpop.permute.xlu1 %2011 }
 0x434   :  { %v2561_v55 = vsel %vm2531_vm9, %v2496_v8, %v19178_v28  ;;  %v2302_v30 = vsel %vm2271_vm5, %v2237_v18, %v19179_v47  ;;  %v19180_v56 = vld [vmem:[#allocation332_spill] sm:$0xff]  ;;  %v2560_v43 = vsel %vm2531_vm9, %v2495_v14, %v19181_v10  ;;  %v8848_v63 = vld [vmem:[%s17548_s0 + $0x1b8] sm:$0xff]  ;;  %v19182_v32 = vld [vmem:[#allocation146_spill] sm:$0xff]  ;;  %v2010_v4 = vpop.permute.xlu0 %2009 }
 0x435   :  { %v2368_v11 = vsel %vm2336_vm6, %v2303_v5, %v19180_v56  ;;  %v2626_v9 = vsel %vm2596_vm10, %v2561_v55, %v2008_v20  ;;  %v2175_v37 = vsel %vm2141_vm3, %v8848_v63, %v19182_v32  ;;  %v19183_v26 = vld [vmem:[#allocation333_spill] sm:$0xff]  ;;  %v2625_v35 = vsel %vm2596_vm10, %v2560_v43, %v2006_v40  ;;  %v8849_v57 = vld [vmem:[%s17548_s0 + $0x1b0] sm:$0xff]  ;;  %v19186_v45 = vld [vmem:[#allocation223_spill] sm:$0xff] }
 0x436   :  { %v2367_v61 = vsel %vm2336_vm6, %v2302_v30, %v19183_v26  ;;  %v19184_v19 = vld [vmem:[#allocation221_spill] sm:$0xff]  ;;  %v19185_v24 = vld [vmem:[#allocation148_spill] sm:$0xff]  ;;  %v2240_v42 = vsel %vm2206_vm4, %v2175_v37, %v19186_v45  ;;  %v19187_v7 = vld [vmem:[#allocation222_spill] sm:$0xff]  ;;  %7297 = vmatprep.mubr.msk.f32.mxu0 %vm2666_vm11, %v2625_v35 }
 0x437   :  { %v2433_v52 = vsel %vm2401_vm7, %v2368_v11, %v19184_v19  ;;  %v2174_v33 = vsel %vm2141_vm3, %v8849_v57, %v19185_v24  ;;  %v2432_v51 = vsel %vm2401_vm7, %v2367_v61, %v19187_v7  ;;  %v19188_v54 = vld [vmem:[#allocation30_spill] sm:$0xff]  ;;  %v19189_v6 = vld [vmem:[#allocation224_spill] sm:$0xff]  ;;  %v19190_v36 = vld [vmem:[#allocation273_spill] sm:$0xff]  ;;  %7298 = vmatmul.mubr.msk.f32.gmra.mrb[28].mxu0 %vm2666_vm11, %v2626_v9  ;;  %v2016_v10 = vpop.permute.xlu1 %2015 }
 0x438   :  { %v2498_v22 = vsel %vm2466_vm8, %v2433_v52, %v19188_v54  ;;  %v2239_v21 = vsel %vm2206_vm4, %v2174_v33, %v19189_v6  ;;  %v2305_v23 = vsel %vm2271_vm5, %v2240_v42, %v19190_v36  ;;  %v19191_v2 = vld [vmem:[#allocation31_spill] sm:$0xff]  ;;  %v19192_v3 = vld [vmem:[#allocation145_spill] sm:$0xff]  ;;  %v19193_v38 = vld [vmem:[#allocation274_spill] sm:$0xff]  ;;  %v2014_v61 = vpop.permute.xlu0 %2013 }
 0x439   :  { %v2497_v39 = vsel %vm2466_vm8, %v2432_v51, %v19191_v2  ;;  %v2563_v41 = vsel %vm2531_vm9, %v2498_v22, %v19192_v3  ;;  %v2304_v17 = vsel %vm2271_vm5, %v2239_v21, %v19193_v38  ;;  %v19194_v1 = vld [vmem:[#allocation334_spill] sm:$0xff]  ;;  %v19195_v58 = vld [vmem:[#allocation147_spill] sm:$0xff]  ;;  %v8850_v44 = vld [vmem:[%s17548_s0 + $0x1d0] sm:$0xff] }
 0x43a   :  { %v2370_v13 = vsel %vm2336_vm6, %v2305_v23, %v19194_v1  ;;  %v2562_v53 = vsel %vm2531_vm9, %v2497_v39, %v19195_v58  ;;  %v2628_v29 = vsel %vm2596_vm10, %v2563_v41, %v2012_v59  ;;  %v19196_v46 = vld [vmem:[#allocation150_spill] sm:$0xff]  ;;  %v19197_v27 = vld [vmem:[#allocation335_spill] sm:$0xff]  ;;  %v19198_v12 = vld [vmem:[#allocation225_spill] sm:$0xff] }
 0x43b   :  { %v2177_v62 = vsel %vm2141_vm3, %v8850_v44, %v19196_v46  ;;  %v2369_v16 = vsel %vm2336_vm6, %v2304_v17, %v19197_v27  ;;  %v2435_v31 = vsel %vm2401_vm7, %v2370_v13, %v19198_v12  ;;  %v2627_v50 = vsel %vm2596_vm10, %v2562_v53, %v2010_v4  ;;  %v8851_v60 = vld [vmem:[%s17548_s0 + $0x1c8] sm:$0xff]  ;;  %v19199_v34 = vld [vmem:[#allocation152_spill] sm:$0xff]  ;;  %v19201_v18 = vld [vmem:[#allocation226_spill] sm:$0xff]  ;;  %v2020_v58 = vpop.permute.xlu1 %2019 }
 0x43c   :  { %v2176_v15 = vsel %vm2141_vm3, %v8851_v60, %v19199_v34  ;;  %v19200_v8 = vld [vmem:[#allocation227_spill] sm:$0xff]  ;;  %v2434_v0 = vsel %vm2401_vm7, %v2369_v16, %v19201_v18  ;;  %v19202_v5 = vld [vmem:[#allocation32_spill] sm:$0xff]  ;;  %7300 = vmatprep.mubr.msk.f32.mxu0 %vm2666_vm11, %v2627_v50  ;;  %v19205_v47 = vld [vmem:[#allocation33_spill] sm:$0xff]  ;;  %v2018_v16 = vpop.permute.xlu0 %2017 }
 0x43d   :  { %v2242_v48 = vsel %vm2206_vm4, %v2177_v62, %v19200_v8  ;;  %v2500_v49 = vsel %vm2466_vm8, %v2435_v31, %v19202_v5  ;;  %v19203_v14 = vld [vmem:[#allocation228_spill] sm:$0xff]  ;;  %v19204_v55 = vld [vmem:[#allocation275_spill] sm:$0xff]  ;;  %v2499_v30 = vsel %vm2466_vm8, %v2434_v0, %v19205_v47  ;;  %v19206_v56 = vld [vmem:[#allocation149_spill] sm:$0xff]  ;;  %7301 = vmatmul.mubr.msk.f32.gmra.mrb[30].mxu0 %vm2666_vm11, %v2628_v29 }
 0x43e   :  { %v2241_v28 = vsel %vm2206_vm4, %v2176_v15, %v19203_v14  ;;  %v2307_v20 = vsel %vm2271_vm5, %v2242_v48, %v19204_v55  ;;  %v2565_v11 = vsel %vm2531_vm9, %v2500_v49, %v19206_v56  ;;  %v19207_v43 = vld [vmem:[#allocation276_spill] sm:$0xff]  ;;  %v19209_v32 = vld [vmem:[#allocation151_spill] sm:$0xff]  ;;  %v19210_v52 = vld [vmem:[#allocation34_spill] sm:$0xff] }
 0x43f   :  { %v2306_v9 = vsel %vm2271_vm5, %v2241_v28, %v19207_v43  ;;  %v19208_v40 = vld [vmem:[#allocation336_spill] sm:$0xff]  ;;  %v2564_v37 = vsel %vm2531_vm9, %v2499_v30, %v19209_v32  ;;  %v2630_v26 = vsel %vm2596_vm10, %v2565_v11, %v2016_v10  ;;  %v8852_v19 = vld [vmem:[%s17548_s0 + $0x1e8] sm:$0xff]  ;;  %v19211_v57 = vld [vmem:[#allocation337_spill] sm:$0xff]  ;;  %v2024_v32 = vpop.permute.xlu1 %2023 }
 0x440   :  { %v2372_v63 = vsel %vm2336_vm6, %v2307_v20, %v19208_v40  ;;  %v2179_v35 = vsel %vm2141_vm3, %v8852_v19, %v19210_v52  ;;  %v2371_v24 = vsel %vm2336_vm6, %v2306_v9, %v19211_v57  ;;  %v19212_v33 = vld [vmem:[#allocation229_spill] sm:$0xff]  ;;  %v2629_v42 = vsel %vm2596_vm10, %v2564_v37, %v2014_v61  ;;  %v8853_v7 = vld [vmem:[%s17548_s0 + $0x1e0] sm:$0xff]  ;;  %v19213_v51 = vld [vmem:[#allocation35_spill] sm:$0xff] }
 0x441   :  { %v2437_v45 = vsel %vm2401_vm7, %v2372_v63, %v19212_v33  ;;  %v2178_v54 = vsel %vm2141_vm3, %v8853_v7, %v19213_v51  ;;  %v19214_v22 = vld [vmem:[#allocation231_spill] sm:$0xff]  ;;  %v19215_v21 = vld [vmem:[#allocation230_spill] sm:$0xff]  ;;  %v19216_v23 = vld [vmem:[#allocation404_spill] sm:$0xff]  ;;  %7303 = vmatprep.mubr.msk.f32.mxu0 %vm2666_vm11, %v2629_v42 }
 0x442   :  { %v2244_v6 = vsel %vm2206_vm4, %v2179_v35, %v19214_v22  ;;  %v2436_v36 = vsel %vm2401_vm7, %v2371_v24, %v19215_v21  ;;  %v2502_v2 = vsel %vm2466_vm8, %v2437_v45, %v19216_v23  ;;  %v19217_v39 = vld [vmem:[#allocation232_spill] sm:$0xff]  ;;  %v19218_v41 = vld [vmem:[#allocation37_spill] sm:$0xff]  ;;  %7304 = vmatmul.mubr.msk.f32.gmra.mrb[32].mxu0 %vm2666_vm11, %v2630_v26  ;;  %v19221_v53 = vld [vmem:[#allocation278_spill] sm:$0xff]  ;;  %v2022_v24 = vpop.permute.xlu0 %2021 }
 0x443   :  { %v2243_v3 = vsel %vm2206_vm4, %v2178_v54, %v19217_v39  ;;  %v2309_v59 = vsel %vm2271_vm5, %v2244_v6, %v19218_v41  ;;  %v19219_v38 = vld [vmem:[#allocation405_spill] sm:$0xff]  ;;  %v19222_v4 = vld [vmem:[#allocation154_spill] sm:$0xff]  ;;  %v19225_v60 = vld [vmem:[#allocation339_spill] sm:$0xff] }
 0x444   :  { %v2501_v17 = vsel %vm2466_vm8, %v2436_v36, %v19219_v38  ;;  %v19220_v1 = vld [vmem:[#allocation413_spill] sm:$0xff]  ;;  %v2308_v29 = vsel %vm2271_vm5, %v2243_v3, %v19221_v53  ;;  %v2374_v44 = vsel %vm2336_vm6, %v2309_v59, %v19222_v4  ;;  %v19223_v46 = vld [vmem:[#allocation414_spill] sm:$0xff]  ;;  %v19227_v0 = vld [vmem:[#allocation39_spill] sm:$0xff] }
 0x445   :  { %v2567_v13 = vsel %vm2531_vm9, %v2502_v2, %v19220_v1  ;;  %v2566_v62 = vsel %vm2531_vm9, %v2501_v17, %v19223_v46  ;;  %v8854_v12 = vld [vmem:[%s17548_s0 + $0x200] sm:$0xff]  ;;  %v2373_v34 = vsel %vm2336_vm6, %v2308_v29, %v19225_v60  ;;  %v19226_v15 = vld [vmem:[#allocation369_spill] sm:$0xff]  ;;  %v19230_v20 = vld [vmem:[#allocation36_spill] sm:$0xff]  ;;  %v2028_v46 = vpop.permute.xlu1 %2027 }
 0x446   :  { %v2632_v27 = vsel %vm2596_vm10, %v2567_v13, %v2020_v58  ;;  %v19224_v31 = vld [vmem:[#allocation38_spill] sm:$0xff]  ;;  %v2439_v8 = vsel %vm2401_vm7, %v2374_v44, %v19226_v15  ;;  %v2631_v48 = vsel %vm2596_vm10, %v2566_v62, %v2018_v16  ;;  %v8855_v18 = vld [vmem:[%s17548_s0 + $0x1f8] sm:$0xff]  ;;  %v19232_v11 = vld [vmem:[#allocation279_spill] sm:$0xff] }
 0x447   :  { %v2181_v50 = vsel %vm2141_vm3, %v8854_v12, %v19224_v31  ;;  %v2180_v5 = vsel %vm2141_vm3, %v8855_v18, %v19227_v0  ;;  %v19228_v49 = vld [vmem:[#allocation233_spill] sm:$0xff]  ;;  %v19229_v28 = vld [vmem:[#allocation370_spill] sm:$0xff]  ;;  %v2504_v47 = vsel %vm2466_vm8, %v2439_v8, %v19230_v20  ;;  %7306 = vmatprep.mubr.msk.f32.mxu0 %vm2666_vm11, %v2631_v48  ;;  %v19235_v37 = vld [vmem:[#allocation280_spill] sm:$0xff] }
 0x448   :  { %v2246_v14 = vsel %vm2206_vm4, %v2181_v50, %v19228_v49  ;;  %v2438_v55 = vsel %vm2401_vm7, %v2373_v34, %v19229_v28  ;;  %v19231_v30 = vld [vmem:[#allocation234_spill] sm:$0xff]  ;;  %v19233_v43 = vld [vmem:[#allocation277_spill] sm:$0xff]  ;;  %7307 = vmatmul.mubr.msk.f32.gmra.mrb[34].mxu0 %vm2666_vm11, %v2632_v27  ;;  %v19236_v61 = vld [vmem:[#allocation340_spill] sm:$0xff]  ;;  %v2026_v34 = vpop.permute.xlu0 %2025 }
 0x449   :  { %v2245_v56 = vsel %vm2206_vm4, %v2180_v5, %v19231_v30  ;;  %v2311_v10 = vsel %vm2271_vm5, %v2246_v14, %v19232_v11  ;;  %v2503_v9 = vsel %vm2466_vm8, %v2438_v55, %v19233_v43  ;;  %v19234_v40 = vld [vmem:[#allocation153_spill] sm:$0xff]  ;;  %v19237_v52 = vld [vmem:[#allocation338_spill] sm:$0xff]  ;;  %v19240_v54 = vld [vmem:[#allocation371_spill] sm:$0xff] }
 0x44a   :  { %v2569_v63 = vsel %vm2531_vm9, %v2504_v47, %v19234_v40  ;;  %v2310_v26 = vsel %vm2271_vm5, %v2245_v56, %v19235_v37  ;;  %v2376_v19 = vsel %vm2336_vm6, %v2311_v10, %v19236_v61  ;;  %v2568_v35 = vsel %vm2531_vm9, %v2503_v9, %v19237_v52  ;;  %v8856_v33 = vld [vmem:[%s17548_s0 + $0x218] sm:$0xff]  ;;  %v8857_v21 = vld [vmem:[%s17548_s0 + $0x210] sm:$0xff]  ;;  %v19241_v36 = vld [vmem:[#allocation43_spill] sm:$0xff]  ;;  %v2032_v52 = vpop.permute.xlu1 %2031 }
 0x44b   :  { %v2634_v57 = vsel %vm2596_vm10, %v2569_v63, %v2024_v32  ;;  %v19238_v45 = vld [vmem:[#allocation41_spill] sm:$0xff]  ;;  %v2441_v22 = vsel %vm2401_vm7, %v2376_v19, %v19240_v54  ;;  %v2633_v6 = vsel %vm2596_vm10, %v2568_v35, %v2022_v24  ;;  %v2182_v23 = vsel %vm2141_vm3, %v8857_v21, %v19241_v36  ;;  %v19242_v2 = vld [vmem:[#allocation235_spill] sm:$0xff]  ;;  %v19243_v3 = vld [vmem:[#allocation372_spill] sm:$0xff] }
 0x44c   :  { %v2183_v42 = vsel %vm2141_vm3, %v8856_v33, %v19238_v45  ;;  %v19239_v7 = vld [vmem:[#allocation341_spill] sm:$0xff]  ;;  %v19244_v59 = vld [vmem:[#allocation406_spill] sm:$0xff]  ;;  %7309 = vmatprep.mubr.msk.f32.mxu0 %vm2666_vm11, %v2633_v6  ;;  %v19245_v17 = vld [vmem:[#allocation236_spill] sm:$0xff] }
 0x44d   :  { %v2375_v51 = vsel %vm2336_vm6, %v2310_v26, %v19239_v7  ;;  %v2248_v39 = vsel %vm2206_vm4, %v2183_v42, %v19242_v2  ;;  %v2506_v38 = vsel %vm2466_vm8, %v2441_v22, %v19244_v59  ;;  %v2247_v1 = vsel %vm2206_vm4, %v2182_v23, %v19245_v17  ;;  %v19246_v13 = vld [vmem:[#allocation44_spill] sm:$0xff]  ;;  %v19247_v53 = vld [vmem:[#allocation407_spill] sm:$0xff]  ;;  %7310 = vmatmul.mubr.msk.f32.gmra.mrb[36].mxu0 %vm2666_vm11, %v2634_v57  ;;  %v19249_v62 = vld [vmem:[#allocation45_spill] sm:$0xff] }
 0x44e   :  { %v2440_v41 = vsel %vm2401_vm7, %v2375_v51, %v19243_v3  ;;  %v2313_v58 = vsel %vm2271_vm5, %v2248_v39, %v19246_v13  ;;  %v19248_v4 = vld [vmem:[#allocation415_spill] sm:$0xff]  ;;  %v2312_v27 = vsel %vm2271_vm5, %v2247_v1, %v19249_v62  ;;  %v19250_v16 = vld [vmem:[#allocation40_spill] sm:$0xff]  ;;  %v19252_v8 = vld [vmem:[#allocation46_spill] sm:$0xff]  ;;  %v2030_v51 = vpop.permute.xlu0 %2029 }
 0x44f   :  { %v2505_v29 = vsel %vm2466_vm8, %v2440_v41, %v19247_v53  ;;  %v2571_v44 = vsel %vm2531_vm9, %v2506_v38, %v19248_v4  ;;  %v2378_v12 = vsel %vm2336_vm6, %v2313_v58, %v19250_v16  ;;  %v19251_v31 = vld [vmem:[#allocation416_spill] sm:$0xff]  ;;  %v19253_v18 = vld [vmem:[#allocation42_spill] sm:$0xff]  ;;  %v19254_v5 = vld [vmem:[#allocation237_spill] sm:$0xff] }
 0x450   :  { %v2570_v50 = vsel %vm2531_vm9, %v2505_v29, %v19251_v31  ;;  %v2636_v60 = vsel %vm2596_vm10, %v2571_v44, %v2028_v46  ;;  %v8858_v15 = vld [vmem:[%s17548_s0 + $0x230] sm:$0xff]  ;;  %v2377_v0 = vsel %vm2336_vm6, %v2312_v27, %v19253_v18  ;;  %v2443_v49 = vsel %vm2401_vm7, %v2378_v12, %v19254_v5  ;;  %v8859_v28 = vld [vmem:[%s17548_s0 + $0x228] sm:$0xff]  ;;  %v19256_v47 = vld [vmem:[#allocation238_spill] sm:$0xff]  ;;  %v2036_v31 = vpop.permute.xlu1 %2035 }
 0x451   :  { %v2185_v48 = vsel %vm2141_vm3, %v8858_v15, %v19252_v8  ;;  %v2635_v14 = vsel %vm2596_vm10, %v2570_v50, %v2026_v34  ;;  %v19255_v55 = vld [vmem:[#allocation48_spill] sm:$0xff]  ;;  %v19257_v56 = vld [vmem:[#allocation373_spill] sm:$0xff]  ;;  %v19259_v9 = vld [vmem:[#allocation239_spill] sm:$0xff] }
 0x452   :  { %v2184_v20 = vsel %vm2141_vm3, %v8859_v28, %v19255_v55  ;;  %v2250_v30 = vsel %vm2206_vm4, %v2185_v48, %v19256_v47  ;;  %v2442_v11 = vsel %vm2401_vm7, %v2377_v0, %v19257_v56  ;;  %v19258_v10 = vld [vmem:[#allocation49_spill] sm:$0xff]  ;;  %7312 = vmatprep.mubr.msk.f32.mxu0 %vm2666_vm11, %v2635_v14  ;;  %v19261_v37 = vld [vmem:[#allocation50_spill] sm:$0xff]  ;;  %v19262_v61 = vld [vmem:[#allocation155_spill] sm:$0xff]  ;;  %v2034_v0 = vpop.permute.xlu0 %2033 }
 0x453   :  { %v2508_v43 = vsel %vm2466_vm8, %v2443_v49, %v19258_v10  ;;  %v2249_v40 = vsel %vm2206_vm4, %v2184_v20, %v19259_v9  ;;  %v19260_v63 = vld [vmem:[#allocation281_spill] sm:$0xff]  ;;  %v2507_v26 = vsel %vm2466_vm8, %v2442_v11, %v19261_v37  ;;  %7313 = vmatmul.mubr.msk.f32.gmra.mrb[38].mxu0 %vm2666_vm11, %v2636_v60  ;;  %v19263_v35 = vld [vmem:[#allocation282_spill] sm:$0xff]  ;;  %v19265_v45 = vld [vmem:[#allocation47_spill] sm:$0xff] }
 0x454   :  { %v2315_v32 = vsel %vm2271_vm5, %v2250_v30, %v19260_v63  ;;  %v2573_v19 = vsel %vm2531_vm9, %v2508_v43, %v19262_v61  ;;  %v2314_v57 = vsel %vm2271_vm5, %v2249_v40, %v19263_v35  ;;  %v19264_v24 = vld [vmem:[#allocation342_spill] sm:$0xff]  ;;  %v2572_v42 = vsel %vm2531_vm9, %v2507_v26, %v19265_v45  ;;  %v8860_v54 = vld [vmem:[%s17548_s0 + $0x248] sm:$0xff]  ;;  %v19269_v41 = vld [vmem:[#allocation53_spill] sm:$0xff]  ;;  %v2040_v45 = vpop.permute.xlu1 %2039 }
 0x455   :  { %v2380_v33 = vsel %vm2336_vm6, %v2315_v32, %v19264_v24  ;;  %v2638_v7 = vsel %vm2596_vm10, %v2573_v19, %v2032_v52  ;;  %v19266_v22 = vld [vmem:[#allocation51_spill] sm:$0xff]  ;;  %v19268_v23 = vld [vmem:[#allocation374_spill] sm:$0xff]  ;;  %v2637_v39 = vsel %vm2596_vm10, %v2572_v42, %v2030_v51  ;;  %v19270_v38 = vld [vmem:[#allocation240_spill] sm:$0xff] }
 0x456   :  { %v2187_v6 = vsel %vm2141_vm3, %v8860_v54, %v19266_v22  ;;  %v19267_v21 = vld [vmem:[#allocation343_spill] sm:$0xff]  ;;  %v2445_v2 = vsel %vm2401_vm7, %v2380_v33, %v19268_v23  ;;  %v8861_v3 = vld [vmem:[%s17548_s0 + $0x240] sm:$0xff]  ;;  %7315 = vmatprep.mubr.msk.f32.mxu0 %vm2666_vm11, %v2637_v39  ;;  %v19273_v29 = vld [vmem:[#allocation241_spill] sm:$0xff] }
 0x457   :  { %v2379_v36 = vsel %vm2336_vm6, %v2314_v57, %v19267_v21  ;;  %v2186_v59 = vsel %vm2141_vm3, %v8861_v3, %v19269_v41  ;;  %v2252_v17 = vsel %vm2206_vm4, %v2187_v6, %v19270_v38  ;;  %v19271_v1 = vld [vmem:[#allocation375_spill] sm:$0xff]  ;;  %v19272_v58 = vld [vmem:[#allocation54_spill] sm:$0xff]  ;;  %v19276_v16 = vld [vmem:[#allocation156_spill] sm:$0xff]  ;;  %7316 = vmatmul.mubr.msk.f32.gmra.mrb[40].mxu0 %vm2666_vm11, %v2638_v7 }
 0x458   :  { %v2444_v13 = vsel %vm2401_vm7, %v2379_v36, %v19271_v1  ;;  %v2510_v53 = vsel %vm2466_vm8, %v2445_v2, %v19272_v58  ;;  %v2251_v4 = vsel %vm2206_vm4, %v2186_v59, %v19273_v29  ;;  %v19274_v44 = vld [vmem:[#allocation283_spill] sm:$0xff]  ;;  %v19277_v50 = vld [vmem:[#allocation284_spill] sm:$0xff]  ;;  %v8862_v5 = vld [vmem:[%s17548_s0 + $0x260] sm:$0xff]  ;;  %v2038_v36 = vpop.permute.xlu0 %2037 }
 0x459   :  { %v2317_v46 = vsel %vm2271_vm5, %v2252_v17, %v19274_v44  ;;  %v19275_v62 = vld [vmem:[#allocation55_spill] sm:$0xff]  ;;  %v2575_v12 = vsel %vm2531_vm9, %v2510_v53, %v19276_v16  ;;  %v2316_v60 = vsel %vm2271_vm5, %v2251_v4, %v19277_v50  ;;  %v19278_v34 = vld [vmem:[#allocation344_spill] sm:$0xff]  ;;  %v19281_v28 = vld [vmem:[#allocation345_spill] sm:$0xff] }
 0x45a   :  { %v2509_v27 = vsel %vm2466_vm8, %v2444_v13, %v19275_v62  ;;  %v2382_v15 = vsel %vm2336_vm6, %v2317_v46, %v19278_v34  ;;  %v19279_v8 = vld [vmem:[#allocation52_spill] sm:$0xff]  ;;  %v2640_v18 = vsel %vm2596_vm10, %v2575_v12, %v2036_v31  ;;  %v2381_v55 = vsel %vm2336_vm6, %v2316_v60, %v19281_v28  ;;  %v8863_v56 = vld [vmem:[%s17548_s0 + $0x258] sm:$0xff]  ;;  %v19283_v11 = vld [vmem:[#allocation58_spill] sm:$0xff] }
 0x45b   :  { %v2574_v48 = vsel %vm2531_vm9, %v2509_v27, %v19279_v8  ;;  %v19280_v49 = vld [vmem:[#allocation56_spill] sm:$0xff]  ;;  %v2188_v10 = vsel %vm2141_vm3, %v8863_v56, %v19283_v11  ;;  %v19284_v43 = vld [vmem:[#allocation242_spill] sm:$0xff]  ;;  %v19285_v40 = vld [vmem:[#allocation377_spill] sm:$0xff]  ;;  %v2044_v8 = vpop.permute.xlu1 %2043 }
 0x45c   :  { %v2189_v14 = vsel %vm2141_vm3, %v8862_v5, %v19280_v49  ;;  %v19282_v20 = vld [vmem:[#allocation376_spill] sm:$0xff]  ;;  %v2639_v30 = vsel %vm2596_vm10, %v2574_v48, %v2034_v0  ;;  %v2446_v63 = vsel %vm2401_vm7, %v2381_v55, %v19285_v40  ;;  %v19286_v32 = vld [vmem:[#allocation59_spill] sm:$0xff]  ;;  %v19288_v19 = vld [vmem:[#allocation285_spill] sm:$0xff]  ;;  %v2042_v55 = vpop.permute.xlu0 %2041 }
 0x45d   :  { %v2447_v47 = vsel %vm2401_vm7, %v2382_v15, %v19282_v20  ;;  %v2254_v9 = vsel %vm2206_vm4, %v2189_v14, %v19284_v43  ;;  %7318 = vmatprep.mubr.msk.f32.mxu0 %vm2666_vm11, %v2639_v30  ;;  %v19287_v26 = vld [vmem:[#allocation243_spill] sm:$0xff]  ;;  %v19289_v35 = vld [vmem:[#allocation60_spill] sm:$0xff]  ;;  %v19290_v24 = vld [vmem:[#allocation157_spill] sm:$0xff] }
 0x45e   :  { %v2512_v37 = vsel %vm2466_vm8, %v2447_v47, %v19286_v32  ;;  %v2253_v61 = vsel %vm2206_vm4, %v2188_v10, %v19287_v26  ;;  %v2319_v52 = vsel %vm2271_vm5, %v2254_v9, %v19288_v19  ;;  %v2511_v57 = vsel %vm2466_vm8, %v2446_v63, %v19289_v35  ;;  %7319 = vmatmul.mubr.msk.f32.gmra.mrb[42].mxu0 %vm2666_vm11, %v2640_v18  ;;  %v19291_v42 = vld [vmem:[#allocation286_spill] sm:$0xff]  ;;  %v19293_v22 = vld [vmem:[#allocation57_spill] sm:$0xff]  ;;  %v19295_v3 = vld [vmem:[#allocation347_spill] sm:$0xff] }
 0x45f   :  { %v2577_v33 = vsel %vm2531_vm9, %v2512_v37, %v19290_v24  ;;  %v2318_v7 = vsel %vm2271_vm5, %v2253_v61, %v19291_v42  ;;  %v19292_v51 = vld [vmem:[#allocation346_spill] sm:$0xff]  ;;  %v2576_v6 = vsel %vm2531_vm9, %v2511_v57, %v19293_v22  ;;  %v8864_v23 = vld [vmem:[%s17548_s0 + $0x278] sm:$0xff]  ;;  %v8865_v1 = vld [vmem:[%s17548_s0 + $0x270] sm:$0xff]  ;;  %v2048_v22 = vpop.permute.xlu1 %2047 }
 0x460   :  { %v2384_v54 = vsel %vm2336_vm6, %v2319_v52, %v19292_v51  ;;  %v2642_v21 = vsel %vm2596_vm10, %v2577_v33, %v2040_v45  ;;  %v19294_v2 = vld [vmem:[#allocation61_spill] sm:$0xff]  ;;  %v2383_v41 = vsel %vm2336_vm6, %v2318_v7, %v19295_v3  ;;  %v19296_v59 = vld [vmem:[#allocation378_spill] sm:$0xff]  ;;  %v2641_v17 = vsel %vm2596_vm10, %v2576_v6, %v2038_v36  ;;  %v19297_v13 = vld [vmem:[#allocation63_spill] sm:$0xff] }
 0x461   :  { %v2191_v39 = vsel %vm2141_vm3, %v8864_v23, %v19294_v2  ;;  %v2449_v38 = vsel %vm2401_vm7, %v2384_v54, %v19296_v59  ;;  %v2190_v58 = vsel %vm2141_vm3, %v8865_v1, %v19297_v13  ;;  %v19298_v53 = vld [vmem:[#allocation244_spill] sm:$0xff]  ;;  %v19299_v4 = vld [vmem:[#allocation379_spill] sm:$0xff]  ;;  %7321 = vmatprep.mubr.msk.f32.mxu0 %vm2666_vm11, %v2641_v17  ;;  %v19301_v27 = vld [vmem:[#allocation245_spill] sm:$0xff] }
 0x462   :  { %v2256_v29 = vsel %vm2206_vm4, %v2191_v39, %v19298_v53  ;;  %v2448_v44 = vsel %vm2401_vm7, %v2383_v41, %v19299_v4  ;;  %v19300_v46 = vld [vmem:[#allocation64_spill] sm:$0xff]  ;;  %v2255_v16 = vsel %vm2206_vm4, %v2190_v58, %v19301_v27  ;;  %v19302_v12 = vld [vmem:[#allocation287_spill] sm:$0xff]  ;;  %v19303_v50 = vld [vmem:[#allocation65_spill] sm:$0xff]  ;;  %7322 = vmatmul.mubr.msk.f32.gmra.mrb[44].mxu0 %vm2666_vm11, %v2642_v21  ;;  %v2046_v41 = vpop.permute.xlu0 %2045 }
 0x463   :  { %v2514_v62 = vsel %vm2466_vm8, %v2449_v38, %v19300_v46  ;;  %v2321_v31 = vsel %vm2271_vm5, %v2256_v29, %v19302_v12  ;;  %v2513_v60 = vsel %vm2466_vm8, %v2448_v44, %v19303_v50  ;;  %v19304_v34 = vld [vmem:[#allocation158_spill] sm:$0xff]  ;;  %v19305_v48 = vld [vmem:[#allocation288_spill] sm:$0xff]  ;;  %v19309_v56 = vld [vmem:[#allocation349_spill] sm:$0xff] }
 0x464   :  { %v2579_v15 = vsel %vm2531_vm9, %v2514_v62, %v19304_v34  ;;  %v2320_v18 = vsel %vm2271_vm5, %v2255_v16, %v19305_v48  ;;  %v19306_v0 = vld [vmem:[#allocation348_spill] sm:$0xff]  ;;  %v19307_v49 = vld [vmem:[#allocation62_spill] sm:$0xff]  ;;  %v8867_v40 = vld [vmem:[%s17548_s0 + $0x288] sm:$0xff] }
 0x465   :  { %v2386_v5 = vsel %vm2336_vm6, %v2321_v31, %v19306_v0  ;;  %v2578_v14 = vsel %vm2531_vm9, %v2513_v60, %v19307_v49  ;;  %v2644_v28 = vsel %vm2596_vm10, %v2579_v15, %v2044_v8  ;;  %v8866_v20 = vld [vmem:[%s17548_s0 + $0x290] sm:$0xff]  ;;  %v19308_v47 = vld [vmem:[#allocation66_spill] sm:$0xff]  ;;  %v2385_v11 = vsel %vm2336_vm6, %v2320_v18, %v19309_v56  ;;  %v19313_v61 = vld [vmem:[#allocation381_spill] sm:$0xff]  ;;  %v2052_v49 = vpop.permute.xlu1 %2051 }
 0x466   :  { %v2193_v30 = vsel %vm2141_vm3, %v8866_v20, %v19308_v47  ;;  %v19310_v10 = vld [vmem:[#allocation380_spill] sm:$0xff]  ;;  %v2643_v9 = vsel %vm2596_vm10, %v2578_v14, %v2042_v55  ;;  %v19312_v37 = vld [vmem:[#allocation246_spill] sm:$0xff]  ;;  %v2450_v19 = vsel %vm2401_vm7, %v2385_v11, %v19313_v61  ;;  %v19314_v52 = vld [vmem:[#allocation69_spill] sm:$0xff]  ;;  %v2050_v11 = vpop.permute.xlu0 %2049 }
 0x467   :  { %v2451_v43 = vsel %vm2401_vm7, %v2386_v5, %v19310_v10  ;;  %v19311_v63 = vld [vmem:[#allocation68_spill] sm:$0xff]  ;;  %v2258_v26 = vsel %vm2206_vm4, %v2193_v30, %v19312_v37  ;;  %7324 = vmatprep.mubr.msk.f32.mxu0 %vm2666_vm11, %v2643_v9  ;;  %v19315_v57 = vld [vmem:[#allocation247_spill] sm:$0xff]  ;;  %v19316_v33 = vld [vmem:[#allocation289_spill] sm:$0xff] }
 0x468   :  { %v2192_v32 = vsel %vm2141_vm3, %v8867_v40, %v19311_v63  ;;  %v2516_v35 = vsel %vm2466_vm8, %v2451_v43, %v19314_v52  ;;  %v2323_v45 = vsel %vm2271_vm5, %v2258_v26, %v19316_v33  ;;  %v19317_v42 = vld [vmem:[#allocation70_spill] sm:$0xff]  ;;  %v19318_v51 = vld [vmem:[#allocation159_spill] sm:$0xff]  ;;  %7325 = vmatmul.mubr.msk.f32.gmra.mrb[46].mxu0 %vm2666_vm11, %v2644_v28  ;;  %v19325_v44 = vld [vmem:[#allocation73_spill] sm:$0xff] }
 0x469   :  { %v2257_v24 = vsel %vm2206_vm4, %v2192_v32, %v19315_v57  ;;  %v2515_v7 = vsel %vm2466_vm8, %v2450_v19, %v19317_v42  ;;  %v2581_v54 = vsel %vm2531_vm9, %v2516_v35, %v19318_v51  ;;  %v19319_v6 = vld [vmem:[#allocation290_spill] sm:$0xff]  ;;  %v19321_v2 = vld [vmem:[#allocation67_spill] sm:$0xff]  ;;  %v19326_v62 = vld [vmem:[#allocation248_spill] sm:$0xff] }
 0x46a   :  { %v2322_v21 = vsel %vm2271_vm5, %v2257_v24, %v19319_v6  ;;  %v19320_v36 = vld [vmem:[#allocation350_spill] sm:$0xff]  ;;  %v2580_v39 = vsel %vm2531_vm9, %v2515_v7, %v19321_v2  ;;  %v2646_v3 = vsel %vm2596_vm10, %v2581_v54, %v2048_v22  ;;  %v8868_v59 = vld [vmem:[%s17548_s0 + $0x2a8] sm:$0xff]  ;;  %v19329_v60 = vld [vmem:[#allocation249_spill] sm:$0xff]  ;;  %v2056_v2 = vpop.permute.xlu1 %2055 }
 0x46b   :  { %v2388_v23 = vsel %vm2336_vm6, %v2323_v45, %v19320_v36  ;;  %v19322_v38 = vld [vmem:[#allocation71_spill] sm:$0xff]  ;;  %v19324_v58 = vld [vmem:[#allocation382_spill] sm:$0xff]  ;;  %v2645_v29 = vsel %vm2596_vm10, %v2580_v39, %v2046_v41  ;;  %v19332_v0 = vld [vmem:[#allocation160_spill] sm:$0xff] }
 0x46c   :  { %v2195_v17 = vsel %vm2141_vm3, %v8868_v59, %v19322_v38  ;;  %v19323_v1 = vld [vmem:[#allocation351_spill] sm:$0xff]  ;;  %v2453_v53 = vsel %vm2401_vm7, %v2388_v23, %v19324_v58  ;;  %v8869_v4 = vld [vmem:[%s17548_s0 + $0x2a0] sm:$0xff]  ;;  %7327 = vmatprep.mubr.msk.f32.mxu0 %vm2666_vm11, %v2645_v29  ;;  %v19333_v14 = vld [vmem:[#allocation292_spill] sm:$0xff] }
 0x46d   :  { %v2387_v13 = vsel %vm2336_vm6, %v2322_v21, %v19323_v1  ;;  %v2194_v46 = vsel %vm2141_vm3, %v8869_v4, %v19325_v44  ;;  %v2260_v27 = vsel %vm2206_vm4, %v2195_v17, %v19326_v62  ;;  %v19327_v16 = vld [vmem:[#allocation383_spill] sm:$0xff]  ;;  %v19328_v31 = vld [vmem:[#allocation74_spill] sm:$0xff]  ;;  %7328 = vmatmul.mubr.msk.f32.gmra.mrb[48].mxu0 %vm2666_vm11, %v2646_v3  ;;  %v19334_v55 = vld [vmem:[#allocation352_spill] sm:$0xff] }
 0x46e   :  { %v2452_v12 = vsel %vm2401_vm7, %v2387_v13, %v19327_v16  ;;  %v2518_v50 = vsel %vm2466_vm8, %v2453_v53, %v19328_v31  ;;  %v2259_v34 = vsel %vm2206_vm4, %v2194_v46, %v19329_v60  ;;  %v19330_v15 = vld [vmem:[#allocation291_spill] sm:$0xff]  ;;  %v19335_v47 = vld [vmem:[#allocation72_spill] sm:$0xff]  ;;  %v8870_v10 = vld [vmem:[%s17548_s0 + $0x2c0] sm:$0xff]  ;;  %v2054_v13 = vpop.permute.xlu0 %2053 }
 0x46f   :  { %v2325_v8 = vsel %vm2271_vm5, %v2260_v27, %v19330_v15  ;;  %v19331_v48 = vld [vmem:[#allocation75_spill] sm:$0xff]  ;;  %v2583_v5 = vsel %vm2531_vm9, %v2518_v50, %v19332_v0  ;;  %v2324_v28 = vsel %vm2271_vm5, %v2259_v34, %v19333_v14  ;;  %v19336_v43 = vld [vmem:[#allocation76_spill] sm:$0xff]  ;;  %v19337_v40 = vld [vmem:[#allocation353_spill] sm:$0xff] }
 0x470   :  { %v2517_v18 = vsel %vm2466_vm8, %v2452_v12, %v19331_v48  ;;  %v2390_v20 = vsel %vm2336_vm6, %v2325_v8, %v19334_v55  ;;  %v2648_v56 = vsel %vm2596_vm10, %v2583_v5, %v2052_v49  ;;  %v2197_v9 = vsel %vm2141_vm3, %v8870_v10, %v19336_v43  ;;  %v19338_v32 = vld [vmem:[#allocation384_spill] sm:$0xff]  ;;  %v8871_v61 = vld [vmem:[%s17548_s0 + $0x2b8] sm:$0xff]  ;;  %v19339_v19 = vld [vmem:[#allocation78_spill] sm:$0xff] }
 0x471   :  { %v2582_v30 = vsel %vm2531_vm9, %v2517_v18, %v19335_v47  ;;  %v2389_v63 = vsel %vm2336_vm6, %v2324_v28, %v19337_v40  ;;  %v2455_v37 = vsel %vm2401_vm7, %v2390_v20, %v19338_v32  ;;  %v2196_v52 = vsel %vm2141_vm3, %v8871_v61, %v19339_v19  ;;  %v19340_v35 = vld [vmem:[#allocation250_spill] sm:$0xff]  ;;  %v19341_v24 = vld [vmem:[#allocation385_spill] sm:$0xff]  ;;  %v19342_v45 = vld [vmem:[#allocation79_spill] sm:$0xff]  ;;  %v2060_v47 = vpop.permute.xlu1 %2059 }
 0x472   :  { %v2647_v26 = vsel %vm2596_vm10, %v2582_v30, %v2050_v11  ;;  %v2262_v57 = vsel %vm2206_vm4, %v2197_v9, %v19340_v35  ;;  %v2454_v33 = vsel %vm2401_vm7, %v2389_v63, %v19341_v24  ;;  %v2520_v42 = vsel %vm2466_vm8, %v2455_v37, %v19342_v45  ;;  %v19343_v7 = vld [vmem:[#allocation251_spill] sm:$0xff]  ;;  %v19344_v54 = vld [vmem:[#allocation293_spill] sm:$0xff]  ;;  %v19345_v6 = vld [vmem:[#allocation80_spill] sm:$0xff]  ;;  %v2058_v63 = vpop.permute.xlu0 %2057 }
 0x473   :  { %7330 = vmatprep.mubr.msk.f32.mxu0 %vm2666_vm11, %v2647_v26  ;;  %v2261_v51 = vsel %vm2206_vm4, %v2196_v52, %v19343_v7  ;;  %v2327_v22 = vsel %vm2271_vm5, %v2262_v57, %v19344_v54  ;;  %v2519_v21 = vsel %vm2466_vm8, %v2454_v33, %v19345_v6  ;;  %v19346_v36 = vld [vmem:[#allocation161_spill] sm:$0xff]  ;;  %v19347_v39 = vld [vmem:[#allocation294_spill] sm:$0xff]  ;;  %v19351_v4 = vld [vmem:[#allocation355_spill] sm:$0xff] }
 0x474   :  { %v2585_v23 = vsel %vm2531_vm9, %v2520_v42, %v19346_v36  ;;  %7331 = vmatmul.mubr.msk.f32.gmra.mrb[50].mxu0 %vm2666_vm11, %v2648_v56  ;;  %v2326_v3 = vsel %vm2271_vm5, %v2261_v51, %v19347_v39  ;;  %v19348_v41 = vld [vmem:[#allocation354_spill] sm:$0xff]  ;;  %v19349_v38 = vld [vmem:[#allocation77_spill] sm:$0xff]  ;;  %v8873_v16 = vld [vmem:[%s17548_s0 + $0x2d0] sm:$0xff] }
 0x475   :  { %v2392_v59 = vsel %vm2336_vm6, %v2327_v22, %v19348_v41  ;;  %v2584_v17 = vsel %vm2531_vm9, %v2519_v21, %v19349_v38  ;;  %v2650_v1 = vsel %vm2596_vm10, %v2585_v23, %v2056_v2  ;;  %v8872_v58 = vld [vmem:[%s17548_s0 + $0x2d8] sm:$0xff]  ;;  %v2391_v44 = vsel %vm2336_vm6, %v2326_v3, %v19351_v4  ;;  %v19352_v46 = vld [vmem:[#allocation386_spill] sm:$0xff]  ;;  %v19353_v12 = vld [vmem:[#allocation83_spill] sm:$0xff]  ;;  %v2064_v38 = vpop.permute.xlu1 %2063 }
 0x476   :  { %v19350_v53 = vld [vmem:[#allocation81_spill] sm:$0xff]  ;;  %v2457_v62 = vsel %vm2401_vm7, %v2392_v59, %v19352_v46  ;;  %v2649_v27 = vsel %vm2596_vm10, %v2584_v17, %v2054_v13  ;;  %v2198_v31 = vsel %vm2141_vm3, %v8873_v16, %v19353_v12  ;;  %v19354_v50 = vld [vmem:[#allocation252_spill] sm:$0xff]  ;;  %v19355_v34 = vld [vmem:[#allocation387_spill] sm:$0xff] }
 0x477   :  { %v2199_v29 = vsel %vm2141_vm3, %v8872_v58, %v19350_v53  ;;  %v2456_v15 = vsel %vm2401_vm7, %v2391_v44, %v19355_v34  ;;  %v19356_v8 = vld [vmem:[#allocation84_spill] sm:$0xff]  ;;  %7333 = vmatprep.mubr.msk.f32.mxu0 %vm2666_vm11, %v2649_v27  ;;  %v19357_v18 = vld [vmem:[#allocation253_spill] sm:$0xff]  ;;  %v19358_v5 = vld [vmem:[#allocation295_spill] sm:$0xff]  ;;  %v2062_v44 = vpop.permute.xlu0 %2061 }
 0x478   :  { %v2264_v60 = vsel %vm2206_vm4, %v2199_v29, %v19354_v50  ;;  %v2522_v48 = vsel %vm2466_vm8, %v2457_v62, %v19356_v8  ;;  %v2263_v0 = vsel %vm2206_vm4, %v2198_v31, %v19357_v18  ;;  %v19359_v14 = vld [vmem:[#allocation85_spill] sm:$0xff]  ;;  %v19360_v55 = vld [vmem:[#allocation162_spill] sm:$0xff]  ;;  %7334 = vmatmul.mubr.msk.f32.gmra.mrb[52].mxu0 %vm2666_vm11, %v2650_v1  ;;  %v19361_v30 = vld [vmem:[#allocation296_spill] sm:$0xff] }
 0x479   :  { %v2329_v49 = vsel %vm2271_vm5, %v2264_v60, %v19358_v5  ;;  %v2521_v28 = vsel %vm2466_vm8, %v2456_v15, %v19359_v14  ;;  %v2587_v20 = vsel %vm2531_vm9, %v2522_v48, %v19360_v55  ;;  %v2328_v56 = vsel %vm2271_vm5, %v2263_v0, %v19361_v30  ;;  %v19362_v11 = vld [vmem:[#allocation356_spill] sm:$0xff]  ;;  %v19363_v43 = vld [vmem:[#allocation82_spill] sm:$0xff]  ;;  %v19365_v61 = vld [vmem:[#allocation357_spill] sm:$0xff] }
 0x47a   :  { %v2394_v10 = vsel %vm2336_vm6, %v2329_v49, %v19362_v11  ;;  %v2586_v9 = vsel %vm2531_vm9, %v2521_v28, %v19363_v43  ;;  %v2652_v40 = vsel %vm2596_vm10, %v2587_v20, %v2060_v47  ;;  %v8874_v32 = vld [vmem:[%s17548_s0 + $0x2f0] sm:$0xff]  ;;  %v19364_v37 = vld [vmem:[#allocation86_spill] sm:$0xff]  ;;  %v2393_v19 = vsel %vm2336_vm6, %v2328_v56, %v19365_v61  ;;  %v8875_v24 = vld [vmem:[%s17548_s0 + $0x2e8] sm:$0xff]  ;;  %v2068_v43 = vpop.permute.xlu1 %2067 }
 0x47b   :  { %v2201_v26 = vsel %vm2141_vm3, %v8874_v32, %v19364_v37  ;;  %v19366_v52 = vld [vmem:[#allocation388_spill] sm:$0xff]  ;;  %v2651_v57 = vsel %vm2596_vm10, %v2586_v9, %v2058_v63  ;;  %v19368_v42 = vld [vmem:[#allocation254_spill] sm:$0xff]  ;;  %v19369_v51 = vld [vmem:[#allocation389_spill] sm:$0xff] }
 0x47c   :  { %v2459_v35 = vsel %vm2401_vm7, %v2394_v10, %v19366_v52  ;;  %v19367_v33 = vld [vmem:[#allocation88_spill] sm:$0xff]  ;;  %v2266_v7 = vsel %vm2206_vm4, %v2201_v26, %v19368_v42  ;;  %v2458_v54 = vsel %vm2401_vm7, %v2393_v19, %v19369_v51  ;;  %v19370_v22 = vld [vmem:[#allocation89_spill] sm:$0xff]  ;;  %7336 = vmatprep.mubr.msk.f32.mxu0 %vm2666_vm11, %v2651_v57  ;;  %v19371_v21 = vld [vmem:[#allocation255_spill] sm:$0xff]  ;;  %v2066_v19 = vpop.permute.xlu0 %2065 }
 0x47d   :  { %v2200_v45 = vsel %vm2141_vm3, %v8875_v24, %v19367_v33  ;;  %v2524_v6 = vsel %vm2466_vm8, %v2459_v35, %v19370_v22  ;;  %v19372_v23 = vld [vmem:[#allocation297_spill] sm:$0xff]  ;;  %v19373_v39 = vld [vmem:[#allocation90_spill] sm:$0xff]  ;;  %v19374_v41 = vld [vmem:[#allocation87_spill] sm:$0xff]  ;;  %7337 = vmatmul.mubr.msk.f32.gmra.mrb[54].mxu0 %vm2666_vm11, %v2652_v40 }
 0x47e   :  { %v2265_v36 = vsel %vm2206_vm4, %v2200_v45, %v19371_v21  ;;  %v2331_v2 = vsel %vm2271_vm5, %v2266_v7, %v19372_v23  ;;  %v2523_v3 = vsel %vm2466_vm8, %v2458_v54, %v19373_v39  ;;  %v2589_v59 = vsel %vm2531_vm9, %v2524_v6, %v19374_v41  ;;  %v19375_v17 = vld [vmem:[#allocation298_spill] sm:$0xff]  ;;  %v19376_v13 = vld [vmem:[#allocation163_spill] sm:$0xff]  ;;  %v19377_v53 = vld [vmem:[#allocation417_spill] sm:$0xff] }
 0x47f   :  { %v2330_v1 = vsel %vm2271_vm5, %v2265_v36, %v19375_v17  ;;  %v2396_v58 = vsel %vm2336_vm6, %v2331_v2, %v19376_v13  ;;  %v2588_v29 = vsel %vm2531_vm9, %v2523_v3, %v19377_v53  ;;  %v2654_v4 = vsel %vm2596_vm10, %v2589_v59, %v2064_v38  ;;  %v8876_v46 = vld [vmem:[%s17548_s0 + $0x308] sm:$0xff]  ;;  %v19379_v16 = vld [vmem:[#allocation358_spill] sm:$0xff]  ;;  %v19381_v15 = vld [vmem:[#allocation93_spill] sm:$0xff]  ;;  %v2072_v53 = vpop.permute.xlu1 %2071 }
 0x480   :  { %v19378_v62 = vld [vmem:[#allocation91_spill] sm:$0xff]  ;;  %v2395_v12 = vsel %vm2336_vm6, %v2330_v1, %v19379_v16  ;;  %v19380_v31 = vld [vmem:[#allocation390_spill] sm:$0xff]  ;;  %v2653_v60 = vsel %vm2596_vm10, %v2588_v29, %v2062_v44  ;;  %v19382_v48 = vld [vmem:[#allocation256_spill] sm:$0xff] }
 0x481   :  { %v2203_v27 = vsel %vm2141_vm3, %v8876_v46, %v19378_v62  ;;  %v2461_v50 = vsel %vm2401_vm7, %v2396_v58, %v19380_v31  ;;  %v8877_v34 = vld [vmem:[%s17548_s0 + $0x300] sm:$0xff]  ;;  %v19383_v0 = vld [vmem:[#allocation391_spill] sm:$0xff]  ;;  %7339 = vmatprep.mubr.msk.f32.mxu0 %vm2666_vm11, %v2653_v60  ;;  %v19385_v28 = vld [vmem:[#allocation257_spill] sm:$0xff] }
 0x482   :  { %v2202_v8 = vsel %vm2141_vm3, %v8877_v34, %v19381_v15  ;;  %v2268_v18 = vsel %vm2206_vm4, %v2203_v27, %v19382_v48  ;;  %v2460_v5 = vsel %vm2401_vm7, %v2395_v12, %v19383_v0  ;;  %v19384_v49 = vld [vmem:[#allocation94_spill] sm:$0xff]  ;;  %v19386_v20 = vld [vmem:[#allocation299_spill] sm:$0xff]  ;;  %v19388_v11 = vld [vmem:[#allocation92_spill] sm:$0xff]  ;;  %7340 = vmatmul.mubr.msk.f32.gmra.mrb[56].mxu0 %vm2666_vm11, %v2654_v4  ;;  %v2070_v12 = vpop.permute.xlu0 %2069 }
 0x483   :  { %v2526_v14 = vsel %vm2466_vm8, %v2461_v50, %v19384_v49  ;;  %v2267_v55 = vsel %vm2206_vm4, %v2202_v8, %v19385_v28  ;;  %v2333_v47 = vsel %vm2271_vm5, %v2268_v18, %v19386_v20  ;;  %v19387_v30 = vld [vmem:[#allocation95_spill] sm:$0xff]  ;;  %v19389_v9 = vld [vmem:[#allocation300_spill] sm:$0xff]  ;;  %v19391_v37 = vld [vmem:[#allocation418_spill] sm:$0xff]  ;;  %v2076_v28 = vpop.permute.xlu1 %2075 }
 0x484   :  { %v2525_v56 = vsel %vm2466_vm8, %v2460_v5, %v19387_v30  ;;  %v2591_v10 = vsel %vm2531_vm9, %v2526_v14, %v19388_v11  ;;  %v2332_v40 = vsel %vm2271_vm5, %v2267_v55, %v19389_v9  ;;  %v19390_v63 = vld [vmem:[#allocation164_spill] sm:$0xff]  ;;  %v8878_v52 = vld [vmem:[%s17548_s0 + $0x320] sm:$0xff]  ;;  %v19393_v24 = vld [vmem:[#allocation359_spill] sm:$0xff] }
 0x485   :  { %v2398_v32 = vsel %vm2336_vm6, %v2333_v47, %v19390_v63  ;;  %v2590_v26 = vsel %vm2531_vm9, %v2525_v56, %v19391_v37  ;;  %v2656_v61 = vsel %vm2596_vm10, %v2591_v10, %v2068_v43  ;;  %v19392_v35 = vld [vmem:[#allocation96_spill] sm:$0xff]  ;;  %v2397_v33 = vsel %vm2336_vm6, %v2332_v40, %v19393_v24  ;;  %v8879_v51 = vld [vmem:[%s17548_s0 + $0x318] sm:$0xff]  ;;  %v19395_v54 = vld [vmem:[#allocation98_spill] sm:$0xff] }
 0x486   :  { %v2205_v57 = vsel %vm2141_vm3, %v8878_v52, %v19392_v35  ;;  %v19394_v45 = vld [vmem:[#allocation392_spill] sm:$0xff]  ;;  %v2655_v7 = vsel %vm2596_vm10, %v2590_v26, %v2066_v19  ;;  %v2204_v22 = vsel %vm2141_vm3, %v8879_v51, %v19395_v54  ;;  %v19396_v6 = vld [vmem:[#allocation258_spill] sm:$0xff]  ;;  %v19397_v36 = vld [vmem:[#allocation393_spill] sm:$0xff]  ;;  %v2074_v30 = vpop.permute.xlu0 %2073  ;;  %vm6508_vm3 = vcmask 523264  }
 0x487   :  { %v2463_v42 = vsel %vm2401_vm7, %v2398_v32, %v19394_v45  ;;  %v2270_v21 = vsel %vm2206_vm4, %v2205_v57, %v19396_v6  ;;  %v2462_v23 = vsel %vm2401_vm7, %v2397_v33, %v19397_v36  ;;  %v19398_v2 = vld [vmem:[#allocation100_spill] sm:$0xff]  ;;  %7342 = vmatprep.mubr.msk.f32.mxu0 %vm2666_vm11, %v2655_v7  ;;  %v19399_v3 = vld [vmem:[#allocation259_spill] sm:$0xff]  ;;  %v19402_v13 = vld [vmem:[#allocation97_spill] sm:$0xff] }
 0x488   :  { %v2528_v39 = vsel %vm2466_vm8, %v2463_v42, %v19398_v2  ;;  %v2269_v41 = vsel %vm2206_vm4, %v2204_v22, %v19399_v3  ;;  %v19400_v59 = vld [vmem:[#allocation99_spill] sm:$0xff]  ;;  %v19401_v17 = vld [vmem:[#allocation408_spill] sm:$0xff]  ;;  %7343 = vmatmul.mubr.msk.f32.gmra.mrb[58].mxu0 %vm2666_vm11, %v2656_v61  ;;  %v19403_v29 = vld [vmem:[#allocation301_spill] sm:$0xff] }
 0x489   :  { %v2335_v38 = vsel %vm2271_vm5, %v2270_v21, %v19400_v59  ;;  %v2527_v1 = vsel %vm2466_vm8, %v2462_v23, %v19401_v17  ;;  %v2593_v58 = vsel %vm2531_vm9, %v2528_v39, %v19402_v13  ;;  %v2334_v4 = vsel %vm2271_vm5, %v2269_v41, %v19403_v29  ;;  %v19404_v44 = vld [vmem:[#allocation360_spill] sm:$0xff]  ;;  %v19405_v62 = vld [vmem:[#allocation105_spill] sm:$0xff]  ;;  %v19407_v60 = vld [vmem:[#allocation394_spill] sm:$0xff] }
 0x48a   :  { %v2400_v46 = vsel %vm2336_vm6, %v2335_v38, %v19404_v44  ;;  %v2592_v27 = vsel %vm2531_vm9, %v2527_v1, %v19405_v62  ;;  %v2658_v16 = vsel %vm2596_vm10, %v2593_v58, %v2072_v53  ;;  %v19406_v31 = vld [vmem:[#allocation361_spill] sm:$0xff]  ;;  %v19408_v8 = vld [vmem:[#allocation395_spill] sm:$0xff]  ;;  %v19409_v18 = vld [vmem:[#allocation104_spill] sm:$0xff]  ;;  %vm6574_vm5 = vcmask 588800  }
 0x48b   :  { %v2399_v50 = vsel %vm2336_vm6, %v2334_v4, %v19406_v31  ;;  %v2465_v34 = vsel %vm2401_vm7, %v2400_v46, %v19407_v60  ;;  %v2657_v15 = vsel %vm2596_vm10, %v2592_v27, %v2070_v12  ;;  %v19410_v5 = vld [vmem:[#allocation106_spill] sm:$0xff]  ;;  %v19411_v55 = vld [vmem:[#allocation107_spill] sm:$0xff] }
 0x48c   :  { %v2464_v48 = vsel %vm2401_vm7, %v2399_v50, %v19408_v8  ;;  %v2530_v0 = vsel %vm2466_vm8, %v2465_v34, %v19409_v18  ;;  %7345 = vmatprep.mubr.msk.f32.mxu0 %vm2666_vm11, %v2657_v15  ;;  %vm16456_vm7 = vmpackc.low %vm6574_vm5, %vm6574_vm5 }
 0x48d   :  { %v2529_v49 = vsel %vm2466_vm8, %v2464_v48, %v19410_v5  ;;  %v2595_v14 = vsel %vm2531_vm9, %v2530_v0, %v12367_v25  ;;  %7346 = vmatmul.mubr.msk.f32.gmra.mrb[60].mxu0 %vm2666_vm11, %v2658_v16 }
 0x48e   :  { %v2594_v20 = vsel %vm2531_vm9, %v2529_v49, %v19411_v55  ;;  %v2660_v47 = vsel %vm2596_vm10, %v2595_v14, %v2076_v28 }
 0x48f   :  { %v2659_v56 = vsel %vm2596_vm10, %v2594_v20, %v2074_v30 }
 0x490   :  { %7348 = vmatprep.mubr.msk.f32.mxu0 %vm2666_vm11, %v2659_v56 }
 0x491   :  { %7349 = vmatmul.mubr.msk.f32.gmra.mrb[62].mxu0 %vm2666_vm11, %v2660_v47 }
 0x4ce   :  { %v13556_v11 = vpop.f32.mrb[0].mxu0 }
 0x4cf   :  { %v3249_v25 = vsel %vm2206_vm4, %v13556_v11, 0.0  ;;  %v3382_v10 = vmul.f32 %v13556_v11, %v13556_v11  ;;  %v13562_v43 = vpop.f32.mrb[1].mxu0 }
 0x4d0   :  { %v3248_v9 = vsel %vm2206_vm4, %v13562_v43, 0.0  ;;  %v3381_v40 = vmul.f32 %v13562_v43, %v13562_v43 }
 0x4d1   :  { %v3446_v63 = vsel %vm2206_vm4, %v3382_v10, 0.0  ;;  %v3250_v32 = vadd.f32 %v3249_v25, %v3248_v9 }
 0x4d2   :  { %v3445_v37 = vsel %vm2206_vm4, %v3381_v40, 0.0  ;;  %v13570_v26 = vpop.f32.mrb[2].mxu0 }
 0x4d3   :  { %v3447_v61 = vadd.f32 %v3446_v63, %v3445_v37  ;;  %v13572_v19 = vpop.f32.mrb[3].mxu0  ;;  %v3384_v52 = vmul.f32 %v13570_v26, %v13570_v26  ;;  %v3253_v33 = vsel %vm2206_vm4, %v13570_v26, 0.0 }
 0x4d4   :  { %v3251_v35 = vsel %vm2206_vm4, %v13572_v19, 0.0  ;;  %v3383_v57 = vmul.f32 %v13572_v19, %v13572_v19 }
 0x4d5   :  { %v3252_v24 = vadd.f32 %v3251_v35, %v3250_v32  ;;  %v3450_v22 = vsel %vm2206_vm4, %v3384_v52, 0.0 }
 0x4d6   :  { %v3448_v45 = vsel %vm2206_vm4, %v3383_v57, 0.0  ;;  %v13583_v42 = vpop.f32.mrb[4].mxu0 }
 0x4d7   :  { %v3254_v7 = vadd.f32 %v3253_v33, %v3252_v24  ;;  %v3449_v51 = vadd.f32 %v3448_v45, %v3447_v61  ;;  %v13585_v54 = vpop.f32.mrb[5].mxu0  ;;  %v3386_v6 = vmul.f32 %v13583_v42, %v13583_v42  ;;  %v3257_v39 = vsel %vm2206_vm4, %v13583_v42, 0.0 }
 0x4d8   :  { %v3255_v21 = vsel %vm2206_vm4, %v13585_v54, 0.0  ;;  %v3385_v36 = vmul.f32 %v13585_v54, %v13585_v54 }
 0x4d9   :  { %v3451_v23 = vadd.f32 %v3450_v22, %v3449_v51  ;;  %v3256_v2 = vadd.f32 %v3255_v21, %v3254_v7  ;;  %v3454_v1 = vsel %vm2206_vm4, %v3386_v6, 0.0 }
 0x4da   :  { %v3452_v3 = vsel %vm2206_vm4, %v3385_v36, 0.0  ;;  %v13597_v41 = vpop.f32.mrb[6].mxu0 }
 0x4db   :  { %v3453_v59 = vadd.f32 %v3452_v3, %v3451_v23  ;;  %v13599_v38 = vpop.f32.mrb[7].mxu0  ;;  %v3258_v17 = vadd.f32 %v3257_v39, %v3256_v2  ;;  %v3388_v13 = vmul.f32 %v13597_v41, %v13597_v41  ;;  %v3261_v44 = vsel %vm2206_vm4, %v13597_v41, 0.0 }
 0x4dc   :  { %v3259_v58 = vsel %vm2206_vm4, %v13599_v38, 0.0  ;;  %v3387_v53 = vmul.f32 %v13599_v38, %v13599_v38 }
 0x4dd   :  { %v3260_v29 = vadd.f32 %v3259_v58, %v3258_v17  ;;  %v3455_v4 = vadd.f32 %v3454_v1, %v3453_v59  ;;  %v3458_v31 = vsel %vm2206_vm4, %v3388_v13, 0.0 }
 0x4de   :  { %v3456_v46 = vsel %vm2206_vm4, %v3387_v53, 0.0  ;;  %v13611_v62 = vpop.f32.mrb[8].mxu0 }
 0x4df   :  { %v3457_v27 = vadd.f32 %v3456_v46, %v3455_v4  ;;  %v13613_v16 = vpop.f32.mrb[9].mxu0  ;;  %v3262_v12 = vadd.f32 %v3261_v44, %v3260_v29  ;;  %v3390_v50 = vmul.f32 %v13611_v62, %v13611_v62  ;;  %v3265_v48 = vsel %vm2206_vm4, %v13611_v62, 0.0 }
 0x4e0   :  { %v3263_v60 = vsel %vm2206_vm4, %v13613_v16, 0.0  ;;  %v3389_v34 = vmul.f32 %v13613_v16, %v13613_v16 }
 0x4e1   :  { %v3264_v15 = vadd.f32 %v3263_v60, %v3262_v12  ;;  %v3459_v8 = vadd.f32 %v3458_v31, %v3457_v27  ;;  %v3462_v28 = vsel %vm2206_vm4, %v3390_v50, 0.0 }
 0x4e2   :  { %v3460_v18 = vsel %vm2206_vm4, %v3389_v34, 0.0  ;;  %v13625_v0 = vpop.f32.mrb[10].mxu0 }
 0x4e3   :  { %v3461_v5 = vadd.f32 %v3460_v18, %v3459_v8  ;;  %v13627_v49 = vpop.f32.mrb[11].mxu0  ;;  %v3266_v14 = vadd.f32 %v3265_v48, %v3264_v15  ;;  %v3392_v55 = vmul.f32 %v13625_v0, %v13625_v0  ;;  %v3269_v25 = vsel %vm2206_vm4, %v13625_v0, 0.0 }
 0x4e4   :  { %v3267_v20 = vsel %vm2206_vm4, %v13627_v49, 0.0  ;;  %v3391_v47 = vmul.f32 %v13627_v49, %v13627_v49 }
 0x4e5   :  { %v3268_v30 = vadd.f32 %v3267_v20, %v3266_v14  ;;  %v3463_v56 = vadd.f32 %v3462_v28, %v3461_v5  ;;  %v3466_v37 = vsel %vm2206_vm4, %v3392_v55, 0.0 }
 0x4e6   :  { %v3464_v10 = vsel %vm2206_vm4, %v3391_v47, 0.0  ;;  %v13639_v9 = vpop.f32.mrb[12].mxu0 }
 0x4e7   :  { %v3465_v40 = vadd.f32 %v3464_v10, %v3463_v56  ;;  %v13641_v63 = vpop.f32.mrb[13].mxu0  ;;  %v3270_v32 = vadd.f32 %v3269_v25, %v3268_v30  ;;  %v3394_v61 = vmul.f32 %v13639_v9, %v13639_v9  ;;  %v3273_v33 = vsel %vm2206_vm4, %v13639_v9, 0.0 }
 0x4e8   :  { %v3271_v52 = vsel %vm2206_vm4, %v13641_v63, 0.0  ;;  %v3393_v35 = vmul.f32 %v13641_v63, %v13641_v63 }
 0x4e9   :  { %v3272_v57 = vadd.f32 %v3271_v52, %v3270_v32  ;;  %v3467_v24 = vadd.f32 %v3466_v37, %v3465_v40  ;;  %v3470_v21 = vsel %vm2206_vm4, %v3394_v61, 0.0 }
 0x4ea   :  { %v3468_v45 = vsel %vm2206_vm4, %v3393_v35, 0.0  ;;  %v13653_v7 = vpop.f32.mrb[14].mxu0 }
 0x4eb   :  { %v3469_v51 = vadd.f32 %v3468_v45, %v3467_v24  ;;  %v13655_v22 = vpop.f32.mrb[15].mxu0  ;;  %v3274_v6 = vadd.f32 %v3273_v33, %v3272_v57  ;;  %v3396_v36 = vmul.f32 %v13653_v7, %v13653_v7  ;;  %v3277_v59 = vsel %vm2206_vm4, %v13653_v7, 0.0 }
 0x4ec   :  { %v3275_v23 = vsel %vm2206_vm4, %v13655_v22, 0.0  ;;  %v3395_v2 = vmul.f32 %v13655_v22, %v13655_v22 }
 0x4ed   :  { %v3276_v39 = vadd.f32 %v3275_v23, %v3274_v6  ;;  %v3471_v3 = vadd.f32 %v3470_v21, %v3469_v51  ;;  %v3474_v29 = vsel %vm2206_vm4, %v3396_v36, 0.0 }
 0x4ee   :  { %v3472_v17 = vsel %vm2206_vm4, %v3395_v2, 0.0  ;;  %v13667_v1 = vpop.f32.mrb[16].mxu0 }
 0x4ef   :  { %v3473_v13 = vadd.f32 %v3472_v17, %v3471_v3  ;;  %v13669_v58 = vpop.f32.mrb[17].mxu0  ;;  %v3278_v53 = vadd.f32 %v3277_v59, %v3276_v39  ;;  %v3398_v4 = vmul.f32 %v13667_v1, %v13667_v1  ;;  %v3281_v31 = vsel %vm2206_vm4, %v13667_v1, 0.0 }
 0x4f0   :  { %v3279_v44 = vsel %vm2206_vm4, %v13669_v58, 0.0  ;;  %v3397_v46 = vmul.f32 %v13669_v58, %v13669_v58 }
 0x4f1   :  { %v3280_v27 = vadd.f32 %v3279_v44, %v3278_v53  ;;  %v3475_v12 = vadd.f32 %v3474_v29, %v3473_v13  ;;  %v3478_v48 = vsel %vm2206_vm4, %v3398_v4, 0.0 }
 0x4f2   :  { %v3476_v50 = vsel %vm2206_vm4, %v3397_v46, 0.0  ;;  %v13681_v60 = vpop.f32.mrb[18].mxu0 }
 0x4f3   :  { %v3477_v34 = vadd.f32 %v3476_v50, %v3475_v12  ;;  %v13683_v15 = vpop.f32.mrb[19].mxu0  ;;  %v3282_v8 = vadd.f32 %v3281_v31, %v3280_v27  ;;  %v3400_v18 = vmul.f32 %v13681_v60, %v13681_v60  ;;  %v3285_v20 = vsel %vm2206_vm4, %v13681_v60, 0.0 }
 0x4f4   :  { %v3283_v5 = vsel %vm2206_vm4, %v13683_v15, 0.0  ;;  %v3399_v14 = vmul.f32 %v13683_v15, %v13683_v15 }
 0x4f5   :  { %v3284_v28 = vadd.f32 %v3283_v5, %v3282_v8  ;;  %v3479_v55 = vadd.f32 %v3478_v48, %v3477_v34  ;;  %v3482_v40 = vsel %vm2206_vm4, %v3400_v18, 0.0 }
 0x4f6   :  { %v3480_v47 = vsel %vm2206_vm4, %v3399_v14, 0.0  ;;  %v13695_v30 = vpop.f32.mrb[20].mxu0 }
 0x4f7   :  { %v3481_v56 = vadd.f32 %v3480_v47, %v3479_v55  ;;  %v13697_v25 = vpop.f32.mrb[21].mxu0  ;;  %v3286_v10 = vadd.f32 %v3285_v20, %v3284_v28  ;;  %v3402_v32 = vmul.f32 %v13695_v30, %v13695_v30  ;;  %v3289_v57 = vsel %vm2206_vm4, %v13695_v30, 0.0 }
 0x4f8   :  { %v3287_v37 = vsel %vm2206_vm4, %v13697_v25, 0.0  ;;  %v3401_v61 = vmul.f32 %v13697_v25, %v13697_v25 }
 0x4f9   :  { %v3288_v52 = vadd.f32 %v3287_v37, %v3286_v10  ;;  %v3483_v35 = vadd.f32 %v3482_v40, %v3481_v56  ;;  %v3486_v21 = vsel %vm2206_vm4, %v3402_v32, 0.0  ;;  %v9005_v40 = vmov 0.0  }
 0x4fa   :  { %v3484_v24 = vsel %vm2206_vm4, %v3401_v61, 0.0  ;;  %v13709_v33 = vpop.f32.mrb[22].mxu0  ;;  %3793 = vst.msk [vmem:[#allocation2] sm:$0xff] %vm2206_vm4, %v9005_v40  ;;  %3794 = vst.msk [vmem:[#allocation2 + $0x8] sm:$0xff] %vm2206_vm4, %v9005_v40 }
 0x4fb   :  { %v3485_v45 = vadd.f32 %v3484_v24, %v3483_v35  ;;  %v13711_v51 = vpop.f32.mrb[23].mxu0  ;;  %v3290_v6 = vadd.f32 %v3289_v57, %v3288_v52  ;;  %v3404_v36 = vmul.f32 %v13709_v33, %v13709_v33  ;;  %v3293_v59 = vsel %vm2206_vm4, %v13709_v33, 0.0  ;;  %3796 = vst.msk [vmem:[#allocation2 + $0x10] sm:$0x3] %vm3795_vm12, %v9005_v40  ;;  %3799 = vst.msk [vmem:[#allocation2 + $0x1c0] sm:$0x3] %vm3795_vm12, %v9005_v40 }
 0x4fc   :  { %v3291_v23 = vsel %vm2206_vm4, %v13711_v51, 0.0  ;;  %v3403_v2 = vmul.f32 %v13711_v51, %v13711_v51  ;;  %3797 = vst.msk [vmem:[#allocation2 + $0x1b0] sm:$0xff] %vm2206_vm4, %v9005_v40  ;;  %3798 = vst.msk [vmem:[#allocation2 + $0x1b8] sm:$0xff] %vm2206_vm4, %v9005_v40 }
 0x4fd   :  { %v3292_v39 = vadd.f32 %v3291_v23, %v3290_v6  ;;  %v3487_v3 = vadd.f32 %v3486_v21, %v3485_v45  ;;  %v3490_v46 = vsel %vm2206_vm4, %v3404_v36, 0.0  ;;  %3801 = vst.msk [vmem:[#allocation2 + $0x198] sm:$0xff] %vm2206_vm4, %v9005_v40  ;;  %3802 = vst.msk [vmem:[#allocation2 + $0x1a0] sm:$0xff] %vm2206_vm4, %v9005_v40 }
 0x4fe   :  { %v3488_v17 = vsel %vm2206_vm4, %v3403_v2, 0.0  ;;  %3803 = vst.msk [vmem:[#allocation2 + $0x1a8] sm:$0x3] %vm3795_vm12, %v9005_v40  ;;  %3806 = vst.msk [vmem:[#allocation2 + $0x358] sm:$0x3] %vm3795_vm12, %v9005_v40 }
 0x4ff   :  { %v3489_v53 = vadd.f32 %v3488_v17, %v3487_v3  ;;  %v3294_v44 = vadd.f32 %v3293_v59, %v3292_v39  ;;  %3804 = vst.msk [vmem:[#allocation2 + $0x348] sm:$0xff] %vm2206_vm4, %v9005_v40  ;;  %3805 = vst.msk [vmem:[#allocation2 + $0x350] sm:$0xff] %vm2206_vm4, %v9005_v40 }
 0x500   :  { %3808 = vst.msk [vmem:[#allocation2] sm:$0x1] %vm3807_vm13, %v9005_v40  ;;  %3844 = vst.msk [vmem:[#allocation2 + $0x11] sm:$0x1] %vm3807_vm13, %v9005_v40 }
 0x501   :  { %v3491_v50 = vadd.f32 %v3490_v46, %v3489_v53  ;;  %3809 = vst.msk [vmem:[#allocation2 + $0x18] sm:$0x1] %vm3807_vm13, %v9005_v40  ;;  %3810 = vst.msk [vmem:[#allocation2 + $0x30] sm:$0x1] %vm3807_vm13, %v9005_v40 }
 0x502   :  { %v13723_v13 = vpop.f32.mrb[24].mxu0  ;;  %3811 = vst.msk [vmem:[#allocation2 + $0x48] sm:$0x1] %vm3807_vm13, %v9005_v40  ;;  %3812 = vst.msk [vmem:[#allocation2 + $0x60] sm:$0x1] %vm3807_vm13, %v9005_v40 }
 0x503   :  { %v3406_v29 = vmul.f32 %v13723_v13, %v13723_v13  ;;  %v13727_v4 = vpop.f32.mrb[25].mxu0  ;;  %v3297_v34 = vsel %vm2206_vm4, %v13723_v13, 0.0  ;;  %3813 = vst.msk [vmem:[#allocation2 + $0x78] sm:$0x1] %vm3807_vm13, %v9005_v40  ;;  %3814 = vst.msk [vmem:[#allocation2 + $0x90] sm:$0x1] %vm3807_vm13, %v9005_v40 }
 0x504   :  { %v3295_v27 = vsel %vm2206_vm4, %v13727_v4, 0.0  ;;  %v3405_v12 = vmul.f32 %v13727_v4, %v13727_v4  ;;  %3815 = vst.msk [vmem:[#allocation2 + $0xa8] sm:$0x1] %vm3807_vm13, %v9005_v40  ;;  %3816 = vst.msk [vmem:[#allocation2 + $0xc0] sm:$0x1] %vm3807_vm13, %v9005_v40 }
 0x505   :  { %v3296_v31 = vadd.f32 %v3295_v27, %v3294_v44  ;;  %v3494_v18 = vsel %vm2206_vm4, %v3406_v29, 0.0  ;;  %3817 = vst.msk [vmem:[#allocation2 + $0xd8] sm:$0x1] %vm3807_vm13, %v9005_v40  ;;  %3818 = vst.msk [vmem:[#allocation2 + $0xf0] sm:$0x1] %vm3807_vm13, %v9005_v40 }
 0x506   :  { %v3492_v8 = vsel %vm2206_vm4, %v3405_v12, 0.0  ;;  %v13737_v48 = vpop.f32.mrb[26].mxu0  ;;  %3819 = vst.msk [vmem:[#allocation2 + $0x108] sm:$0x1] %vm3807_vm13, %v9005_v40  ;;  %3820 = vst.msk [vmem:[#allocation2 + $0x120] sm:$0x1] %vm3807_vm13, %v9005_v40 }
 0x507   :  { %v3493_v5 = vadd.f32 %v3492_v8, %v3491_v50  ;;  %v13742_v14 = vmul.f32 %v13737_v48, %v13737_v48  ;;  %v13744_v28 = vpop.f32.mrb[27].mxu0  ;;  %v3298_v55 = vadd.f32 %v3297_v34, %v3296_v31  ;;  %v13780_v32 = vsel %vm2206_vm4, %v13737_v48, 0.0  ;;  %3821 = vst.msk [vmem:[#allocation2 + $0x138] sm:$0x1] %vm3807_vm13, %v9005_v40  ;;  %3822 = vst.msk [vmem:[#allocation2 + $0x150] sm:$0x1] %vm3807_vm13, %v9005_v40 }
 0x508   :  { %v3299_v20 = vsel %vm2206_vm4, %v13744_v28, 0.0  ;;  %v3407_v47 = vmul.f32 %v13744_v28, %v13744_v28  ;;  %3823 = vst.msk [vmem:[#allocation2 + $0x168] sm:$0x1] %vm3807_vm13, %v9005_v40  ;;  %3824 = vst.msk [vmem:[#allocation2 + $0x180] sm:$0x1] %vm3807_vm13, %v9005_v40  ;;  %v3946_v12 = vld [vmem:[#allocation2 + $0x8] sm:$0xff] }
 0x509   :  { %v13750_v56 = vadd.f32 %v3299_v20, %v3298_v55  ;;  %v13752_v10 = vadd.f32 %v3494_v18, %v3493_v5  ;;  %3827 = vst.msk [vmem:[#allocation2 + $0x1c8] sm:$0x1] %vm3807_vm13, %v9005_v40  ;;  %3828 = vst.msk [vmem:[#allocation2 + $0x1e0] sm:$0x1] %vm3807_vm13, %v9005_v40  ;;  %v3498_v24 = vsel %vm2206_vm4, %v13742_v14, 0.0  ;;  %v3945_v34 = vld [vmem:[#allocation2] sm:$0xff] }
 0x50a   :  { %v13783_v37 = vsel %vm2206_vm4, %v3407_v47, 0.0  ;;  %v13785_v61 = vpop.f32.mrb[28].mxu0  ;;  %3829 = vst.msk [vmem:[#allocation2 + $0x1f8] sm:$0x1] %vm3807_vm13, %v9005_v40  ;;  %3830 = vst.msk [vmem:[#allocation2 + $0x210] sm:$0x1] %vm3807_vm13, %v9005_v40 }
 0x50b   :  { %3831 = vst.msk [vmem:[#allocation2 + $0x228] sm:$0x1] %vm3807_vm13, %v9005_v40  ;;  %3832 = vst.msk [vmem:[#allocation2 + $0x240] sm:$0x1] %vm3807_vm13, %v9005_v40  ;;  %v3497_v52 = vadd.f32 %v13783_v37, %v13752_v10  ;;  %v13933_v35 = vpop.f32.mrb[29].mxu0  ;;  %v3302_v57 = vadd.f32 %v13780_v32, %v13750_v56  ;;  %v3410_v45 = vmul.f32 %v13785_v61, %v13785_v61  ;;  %v3305_v2 = vsel %vm2206_vm4, %v13785_v61, 0.0 }
 0x50c   :  { %3833 = vst.msk [vmem:[#allocation2 + $0x258] sm:$0x1] %vm3807_vm13, %v9005_v40  ;;  %3834 = vst.msk [vmem:[#allocation2 + $0x270] sm:$0x1] %vm3807_vm13, %v9005_v40  ;;  %v3303_v6 = vsel %vm2206_vm4, %v13933_v35, 0.0  ;;  %v3409_v21 = vmul.f32 %v13933_v35, %v13933_v35  ;;  %v4150_v18 = vrot.slane %v3946_v12, 1 }
 0x50d   :  { %3835 = vst.msk [vmem:[#allocation2 + $0x288] sm:$0x1] %vm3807_vm13, %v9005_v40  ;;  %3836 = vst.msk [vmem:[#allocation2 + $0x2a0] sm:$0x1] %vm3807_vm13, %v9005_v40  ;;  %v3304_v36 = vadd.f32 %v3303_v6, %v3302_v57  ;;  %v3499_v23 = vadd.f32 %v3498_v24, %v3497_v52  ;;  %v3502_v44 = vsel %vm2206_vm4, %v3410_v45, 0.0  ;;  %v4149_v20 = vrot.slane %v3945_v34, 1 }
 0x50e   :  { %3837 = vst.msk [vmem:[#allocation2 + $0x2b8] sm:$0x1] %vm3807_vm13, %v9005_v40  ;;  %3838 = vst.msk [vmem:[#allocation2 + $0x2d0] sm:$0x1] %vm3807_vm13, %v9005_v40  ;;  %v3500_v39 = vsel %vm2206_vm4, %v3409_v21, 0.0 }
 0x50f   :  { %3839 = vst.msk [vmem:[#allocation2 + $0x2e8] sm:$0x1] %vm3807_vm13, %v9005_v40  ;;  %3840 = vst.msk [vmem:[#allocation2 + $0x300] sm:$0x1] %vm3807_vm13, %v9005_v40  ;;  %v3501_v59 = vadd.f32 %v3500_v39, %v3499_v23  ;;  %v3306_v29 = vadd.f32 %v3305_v2, %v3304_v36  ;;  %v3947_v8 = vld [vmem:[#allocation2 + $0x10] sm:$0x3]  ;;  %v4151_v24 = vsel %vm231_vm0, %v4149_v20, %v4150_v18 }
 0x510   :  { %3841 = vst.msk [vmem:[#allocation2 + $0x318] sm:$0x1] %vm3807_vm13, %v9005_v40  ;;  %3842 = vst.msk [vmem:[#allocation2 + $0x330] sm:$0x1] %vm3807_vm13, %v9005_v40  ;;  %v13948_v3 = vpop.f32.mrb[30].mxu0  ;;  %v4152_v47 = vrot.slane %v3947_v8, 1 }
 0x511   :  { %3845 = vst.msk [vmem:[#allocation2 + $0x29] sm:$0x1] %vm3807_vm13, %v9005_v40  ;;  %3846 = vst.msk [vmem:[#allocation2 + $0x41] sm:$0x1] %vm3807_vm13, %v9005_v40  ;;  %v3412_v17 = vmul.f32 %v13948_v3, %v13948_v3  ;;  %v13952_v53 = vpop.f32.mrb[31].mxu0  ;;  %v3503_v50 = vadd.f32 %v3502_v44, %v3501_v59  ;;  %v3309_v5 = vsel %vm2206_vm4, %v13948_v3, 0.0 }
 0x512   :  { %3847 = vst.msk [vmem:[#allocation2 + $0x59] sm:$0x1] %vm3807_vm13, %v9005_v40  ;;  %3848 = vst.msk [vmem:[#allocation2 + $0x71] sm:$0x1] %vm3807_vm13, %v9005_v40  ;;  %v3307_v46 = vsel %vm2206_vm4, %v13952_v53, 0.0  ;;  %v3411_v27 = vmul.f32 %v13952_v53, %v13952_v53  ;;  %v4153_v45 = vsel %vm231_vm0, %v4150_v18, %v4152_v47 }
 0x513   :  { %3849 = vst.msk [vmem:[#allocation2 + $0x89] sm:$0x1] %vm3807_vm13, %v9005_v40  ;;  %3850 = vst.msk [vmem:[#allocation2 + $0xa1] sm:$0x1] %vm3807_vm13, %v9005_v40  ;;  %v3308_v31 = vadd.f32 %v3307_v46, %v3306_v29  ;;  %v3506_v56 = vsel %vm2206_vm4, %v3412_v17, 0.0  ;;  %v7470_v36 = vpack.i.bf16 %v4153_v45, %v4151_v24 }
 0x514   :  { %3851 = vst.msk [vmem:[#allocation2 + $0xb9] sm:$0x1] %vm3807_vm13, %v9005_v40  ;;  %3852 = vst.msk [vmem:[#allocation2 + $0xd1] sm:$0x1] %vm3807_vm13, %v9005_v40  ;;  %v3504_v14 = vsel %vm2206_vm4, %v3411_v27, 0.0 }
 0x515   :  { %3853 = vst.msk [vmem:[#allocation2 + $0xe9] sm:$0x1] %vm3807_vm13, %v9005_v40  ;;  %3854 = vst.msk [vmem:[#allocation2 + $0x101] sm:$0x1] %vm3807_vm13, %v9005_v40  ;;  %v13962_v55 = vpop.f32.mrb[32].mxu0  ;;  %v3505_v10 = vadd.f32 %v3504_v14, %v3503_v50  ;;  %v3310_v37 = vadd.f32 %v3309_v5, %v3308_v31  ;;  %7471 = vrot.lane.b32.xlu0 %v7470_v36, %s8998_s17 }
 0x516   :  { %3855 = vst.msk [vmem:[#allocation2 + $0x119] sm:$0x1] %vm3807_vm13, %v9005_v40  ;;  %3856 = vst.msk [vmem:[#allocation2 + $0x131] sm:$0x1] %vm3807_vm13, %v9005_v40  ;;  %v13967_v32 = vpop.f32.mrb[33].mxu0  ;;  %v3313_v23 = vsel %vm2206_vm4, %v13962_v55, 0.0 }
 0x517   :  { %3857 = vst.msk [vmem:[#allocation2 + $0x149] sm:$0x1] %vm3807_vm13, %v9005_v40  ;;  %3858 = vst.msk [vmem:[#allocation2 + $0x161] sm:$0x1] %vm3807_vm13, %v9005_v40  ;;  %v3311_v52 = vsel %vm2206_vm4, %v13967_v32, 0.0  ;;  %v3413_v57 = vmul.f32 %v13967_v32, %v13967_v32  ;;  %v3507_v21 = vadd.f32 %v3506_v56, %v3505_v10 }
 0x518   :  { %3859 = vst.msk [vmem:[#allocation2 + $0x179] sm:$0x1] %vm3807_vm13, %v9005_v40  ;;  %3860 = vst.msk [vmem:[#allocation2 + $0x191] sm:$0x1] %vm3807_vm13, %v9005_v40  ;;  %v3312_v6 = vadd.f32 %v3311_v52, %v3310_v37 }
 0x519   :  { %3863 = vst.msk [vmem:[#allocation2 + $0x1d9] sm:$0x1] %vm3807_vm13, %v9005_v40  ;;  %3864 = vst.msk [vmem:[#allocation2 + $0x1f1] sm:$0x1] %vm3807_vm13, %v9005_v40  ;;  %v3508_v2 = vsel %vm2206_vm4, %v3413_v57, 0.0 }
 0x51a   :  { %3865 = vst.msk [vmem:[#allocation2 + $0x209] sm:$0x1] %vm3807_vm13, %v9005_v40  ;;  %3866 = vst.msk [vmem:[#allocation2 + $0x221] sm:$0x1] %vm3807_vm13, %v9005_v40  ;;  %v3509_v59 = vadd.f32 %v3508_v2, %v3507_v21  ;;  %v3314_v29 = vadd.f32 %v3313_v23, %v3312_v6 }
 0x51b   :  { %3867 = vst.msk [vmem:[#allocation2 + $0x239] sm:$0x1] %vm3807_vm13, %v9005_v40  ;;  %3868 = vst.msk [vmem:[#allocation2 + $0x251] sm:$0x1] %vm3807_vm13, %v9005_v40  ;;  %v13978_v39 = vpop.f32.mrb[34].mxu0 }
 0x51c   :  { %3869 = vst.msk [vmem:[#allocation2 + $0x269] sm:$0x1] %vm3807_vm13, %v9005_v40  ;;  %3870 = vst.msk [vmem:[#allocation2 + $0x281] sm:$0x1] %vm3807_vm13, %v9005_v40  ;;  %v13980_v17 = vpop.f32.mrb[35].mxu0  ;;  %v3416_v46 = vmul.f32 %v13978_v39, %v13978_v39  ;;  %v3317_v34 = vsel %vm2206_vm4, %v13978_v39, 0.0 }
 0x51d   :  { %3871 = vst.msk [vmem:[#allocation2 + $0x299] sm:$0x1] %vm3807_vm13, %v9005_v40  ;;  %3872 = vst.msk [vmem:[#allocation2 + $0x2b1] sm:$0x1] %vm3807_vm13, %v9005_v40  ;;  %v3315_v27 = vsel %vm2206_vm4, %v13980_v17, 0.0  ;;  %v3415_v12 = vmul.f32 %v13980_v17, %v13980_v17 }
 0x51e   :  { %3873 = vst.msk [vmem:[#allocation2 + $0x2c9] sm:$0x1] %vm3807_vm13, %v9005_v40  ;;  %3874 = vst.msk [vmem:[#allocation2 + $0x2e1] sm:$0x1] %vm3807_vm13, %v9005_v40  ;;  %v3316_v31 = vadd.f32 %v3315_v27, %v3314_v29  ;;  %v3514_v47 = vsel %vm2206_vm4, %v3416_v46, 0.0 }
 0x51f   :  { %3875 = vst.msk [vmem:[#allocation2 + $0x2f9] sm:$0x1] %vm3807_vm13, %v9005_v40  ;;  %3876 = vst.msk [vmem:[#allocation2 + $0x311] sm:$0x1] %vm3807_vm13, %v9005_v40  ;;  %v3512_v8 = vsel %vm2206_vm4, %v3415_v12, 0.0 }
 0x520   :  { %3877 = vst.msk [vmem:[#allocation2 + $0x329] sm:$0x1] %vm3807_vm13, %v9005_v40  ;;  %3878 = vst.msk [vmem:[#allocation2 + $0x341] sm:$0x1] %vm3807_vm13, %v9005_v40  ;;  %v13993_v18 = vpop.f32.mrb[36].mxu0  ;;  %v3318_v20 = vadd.f32 %v3317_v34, %v3316_v31 }
 0x521   :  { %3825 = vst.msk [vmem:[#allocation2 + $0x198] sm:$0x1] %vm3807_vm13, %v9005_v40  ;;  %3826 = vst.msk [vmem:[#allocation2 + $0x1b0] sm:$0x1] %vm3807_vm13, %v9005_v40  ;;  %v13995_v14 = vpop.f32.mrb[37].mxu0  ;;  %v3418_v56 = vmul.f32 %v13993_v18, %v13993_v18  ;;  %v3321_v57 = vsel %vm2206_vm4, %v13993_v18, 0.0 }
 0x522   :  { %3843 = vst.msk [vmem:[#allocation2 + $0x348] sm:$0x1] %vm3807_vm13, %v9005_v40  ;;  %3861 = vst.msk [vmem:[#allocation2 + $0x1a9] sm:$0x1] %vm3807_vm13, %v9005_v40  ;;  %v3319_v10 = vsel %vm2206_vm4, %v13995_v14, 0.0 }
 0x523   :  { %3862 = vst.msk [vmem:[#allocation2 + $0x1c1] sm:$0x1] %vm3807_vm13, %v9005_v40  ;;  %3879 = vst.msk [vmem:[#allocation2 + $0x359] sm:$0x1] %vm3807_vm13, %v9005_v40  ;;  %v3414_v40 = vmul.f32 %v13962_v55, %v13962_v55  ;;  %v3320_v37 = vadd.f32 %v3319_v10, %v3318_v20  ;;  %v3518_v23 = vsel %vm2206_vm4, %v3418_v56, 0.0 }
 0x525   :  { %v3510_v44 = vsel %vm2206_vm4, %v3414_v40, 0.0  ;;  %v3417_v40 = vmul.f32 %v13995_v14, %v13995_v14  ;;  %v3322_v36 = vadd.f32 %v3321_v57, %v3320_v37 }
 0x526   :  { %v3511_v50 = vadd.f32 %v3510_v44, %v3509_v59  ;;  %v14007_v45 = vpop.f32.mrb[38].mxu0 }
 0x527   :  { %v3516_v24 = vsel %vm2206_vm4, %v3417_v40, 0.0  ;;  %19412 = vst [vmem:[#allocation109_spill] sm:$0xff] %v14007_v45  ;;  %v14009_v21 = vpop.f32.mrb[39].mxu0  ;;  %v3420_v2 = vmul.f32 %v14007_v45, %v14007_v45  ;;  %v3325_v27 = vsel %vm2206_vm4, %v14007_v45, 0.0 }
 0x528   :  { %v3513_v5 = vadd.f32 %v3512_v8, %v3511_v50  ;;  %v3323_v59 = vsel %vm2206_vm4, %v14009_v21, 0.0  ;;  %v3419_v29 = vmul.f32 %v14009_v21, %v14009_v21 }
 0x529   :  { %v3324_v44 = vadd.f32 %v3323_v59, %v3322_v36 }
 0x52a   :  { %v3515_v52 = vadd.f32 %v3514_v47, %v3513_v5  ;;  %v3520_v12 = vsel %vm2206_vm4, %v3419_v29, 0.0  ;;  %v14021_v31 = vpop.f32.mrb[40].mxu0  ;;  %v3522_v5 = vsel %vm2206_vm4, %v3420_v2, 0.0 }
 0x52b   :  { %19413 = vst [vmem:[#allocation111_spill] sm:$0xff] %v14021_v31  ;;  %v14023_v34 = vpop.f32.mrb[41].mxu0  ;;  %v3326_v8 = vadd.f32 %v3325_v27, %v3324_v44  ;;  %v3422_v20 = vmul.f32 %v14021_v31, %v14021_v31  ;;  %v3329_v37 = vsel %vm2206_vm4, %v14021_v31, 0.0 }
 0x52c   :  { %v3517_v6 = vadd.f32 %v3516_v24, %v3515_v52  ;;  %19414 = vst [vmem:[#allocation112_spill] sm:$0xff] %v14023_v34  ;;  %v3327_v47 = vsel %vm2206_vm4, %v14023_v34, 0.0  ;;  %v3421_v56 = vmul.f32 %v14023_v34, %v14023_v34 }
 0x52d   :  { %v3328_v10 = vadd.f32 %v3327_v47, %v3326_v8 }
 0x52e   :  { %v3519_v46 = vadd.f32 %v3518_v23, %v3517_v6  ;;  %v3524_v52 = vsel %vm2206_vm4, %v3421_v56, 0.0  ;;  %v3526_v23 = vsel %vm2206_vm4, %v3422_v20, 0.0 }
 0x52f   :  { %v3330_v36 = vadd.f32 %v3329_v37, %v3328_v10 }
 0x530   :  { %v3521_v50 = vadd.f32 %v3520_v12, %v3519_v46 }
 0x531   :  { %v14035_v57 = vpop.f32.mrb[42].mxu0 }
 0x532   :  { %v3523_v40 = vadd.f32 %v3522_v5, %v3521_v50  ;;  %19415 = vst [vmem:[#allocation113_spill] sm:$0xff] %v14035_v57  ;;  %v14037_v6 = vpop.f32.mrb[43].mxu0  ;;  %v3424_v2 = vmul.f32 %v14035_v57, %v14035_v57  ;;  %v3333_v27 = vsel %vm2206_vm4, %v14035_v57, 0.0 }
 0x533   :  { %19416 = vst [vmem:[#allocation165_spill] sm:$0xff] %v14037_v6  ;;  %v3331_v59 = vsel %vm2206_vm4, %v14037_v6, 0.0  ;;  %v3423_v29 = vmul.f32 %v14037_v6, %v14037_v6 }
 0x534   :  { %v3525_v24 = vadd.f32 %v3524_v52, %v3523_v40  ;;  %v3332_v44 = vadd.f32 %v3331_v59, %v3330_v36  ;;  %v3530_v47 = vsel %vm2206_vm4, %v3424_v2, 0.0 }
 0x535   :  { %v3528_v12 = vsel %vm2206_vm4, %v3423_v29, 0.0  ;;  %v14049_v50 = vpop.f32.mrb[44].mxu0 }
 0x536   :  { %v3527_v46 = vadd.f32 %v3526_v23, %v3525_v24  ;;  %19417 = vst [vmem:[#allocation114_spill] sm:$0xff] %v14049_v50  ;;  %v14051_v5 = vpop.f32.mrb[45].mxu0  ;;  %v3334_v20 = vadd.f32 %v3333_v27, %v3332_v44  ;;  %v3426_v56 = vmul.f32 %v14049_v50, %v14049_v50  ;;  %v3337_v24 = vsel %vm2206_vm4, %v14049_v50, 0.0 }
 0x537   :  { %19418 = vst [vmem:[#allocation115_spill] sm:$0xff] %v14051_v5  ;;  %v3335_v10 = vsel %vm2206_vm4, %v14051_v5, 0.0  ;;  %v3425_v40 = vmul.f32 %v14051_v5, %v14051_v5 }
 0x538   :  { %v3529_v8 = vadd.f32 %v3528_v12, %v3527_v46  ;;  %v3336_v37 = vadd.f32 %v3335_v10, %v3334_v20  ;;  %v3534_v44 = vsel %vm2206_vm4, %v3426_v56, 0.0 }
 0x539   :  { %v3532_v36 = vsel %vm2206_vm4, %v3425_v40, 0.0 }
 0x53a   :  { %v3531_v52 = vadd.f32 %v3530_v47, %v3529_v8  ;;  %v3338_v29 = vadd.f32 %v3337_v24, %v3336_v37 }
 0x53b   :  { %v14063_v23 = vpop.f32.mrb[46].mxu0 }
 0x53c   :  { %19419 = vst [vmem:[#allocation101_spill] sm:$0xff] %v14063_v23  ;;  %v3533_v59 = vadd.f32 %v3532_v36, %v3531_v52  ;;  %v14065_v2 = vpop.f32.mrb[47].mxu0  ;;  %v3428_v46 = vmul.f32 %v14063_v23, %v14063_v23  ;;  %v3341_v47 = vsel %vm2206_vm4, %v14063_v23, 0.0 }
 0x53d   :  { %19420 = vst [vmem:[#allocation116_spill] sm:$0xff] %v14065_v2  ;;  %v3339_v27 = vsel %vm2206_vm4, %v14065_v2, 0.0  ;;  %v3427_v12 = vmul.f32 %v14065_v2, %v14065_v2 }
 0x53e   :  { %v3340_v8 = vadd.f32 %v3339_v27, %v3338_v29  ;;  %v3535_v20 = vadd.f32 %v3534_v44, %v3533_v59  ;;  %v3538_v24 = vsel %vm2206_vm4, %v3428_v46, 0.0 }
 0x53f   :  { %v3536_v10 = vsel %vm2206_vm4, %v3427_v12, 0.0 }
 0x540   :  { %v14077_v40 = vpop.f32.mrb[48].mxu0  ;;  %v3537_v37 = vadd.f32 %v3536_v10, %v3535_v20  ;;  %v3342_v52 = vadd.f32 %v3341_v47, %v3340_v8 }
 0x541   :  { %19421 = vst [vmem:[#allocation103_spill] sm:$0xff] %v14077_v40  ;;  %v14079_v56 = vpop.f32.mrb[49].mxu0  ;;  %v3430_v36 = vmul.f32 %v14077_v40, %v14077_v40  ;;  %v3345_v12 = vsel %vm2206_vm4, %v14077_v40, 0.0 }
 0x542   :  { %19422 = vst [vmem:[#allocation260_spill] sm:$0xff] %v14079_v56  ;;  %v3343_v29 = vsel %vm2206_vm4, %v14079_v56, 0.0  ;;  %v3429_v59 = vmul.f32 %v14079_v56, %v14079_v56  ;;  %v3539_v27 = vadd.f32 %v3538_v24, %v3537_v37 }
 0x543   :  { %v3344_v44 = vadd.f32 %v3343_v29, %v3342_v52  ;;  %v3542_v23 = vsel %vm2206_vm4, %v3430_v36, 0.0 }
 0x544   :  { %v3540_v20 = vsel %vm2206_vm4, %v3429_v59, 0.0 }
 0x545   :  { %v3541_v8 = vadd.f32 %v3540_v20, %v3539_v27  ;;  %v3346_v47 = vadd.f32 %v3345_v12, %v3344_v44 }
 0x547   :  { %v14091_v10 = vpop.f32.mrb[50].mxu0  ;;  %v3543_v29 = vadd.f32 %v3542_v23, %v3541_v8 }
 0x548   :  { %19423 = vst [vmem:[#allocation167_spill] sm:$0xff] %v14091_v10  ;;  %v14093_v46 = vpop.f32.mrb[51].mxu0  ;;  %v3432_v2 = vmul.f32 %v14091_v10, %v14091_v10  ;;  %v3349_v59 = vsel %vm2206_vm4, %v14091_v10, 0.0 }
 0x549   :  { %19424 = vst [vmem:[#allocation261_spill] sm:$0xff] %v14093_v46  ;;  %v3347_v52 = vsel %vm2206_vm4, %v14093_v46, 0.0  ;;  %v3431_v37 = vmul.f32 %v14093_v46, %v14093_v46 }
 0x54a   :  { %v3348_v24 = vadd.f32 %v3347_v52, %v3346_v47  ;;  %v3546_v40 = vsel %vm2206_vm4, %v3432_v2, 0.0 }
 0x54b   :  { %v3544_v27 = vsel %vm2206_vm4, %v3431_v37, 0.0  ;;  %v14105_v20 = vpop.f32.mrb[52].mxu0 }
 0x54c   :  { %19425 = vst [vmem:[#allocation302_spill] sm:$0xff] %v14105_v20  ;;  %v3545_v44 = vadd.f32 %v3544_v27, %v3543_v29  ;;  %v14107_v36 = vpop.f32.mrb[53].mxu0  ;;  %v3350_v12 = vadd.f32 %v3349_v59, %v3348_v24  ;;  %v3434_v56 = vmul.f32 %v14105_v20, %v14105_v20  ;;  %v3353_v37 = vsel %vm2206_vm4, %v14105_v20, 0.0 }
 0x54d   :  { %19426 = vst [vmem:[#allocation169_spill] sm:$0xff] %v14107_v36  ;;  %v3351_v47 = vsel %vm2206_vm4, %v14107_v36, 0.0  ;;  %v3433_v23 = vmul.f32 %v14107_v36, %v14107_v36 }
 0x54e   :  { %v3352_v8 = vadd.f32 %v3351_v47, %v3350_v12  ;;  %v3547_v52 = vadd.f32 %v3546_v40, %v3545_v44  ;;  %v3550_v10 = vsel %vm2206_vm4, %v3434_v56, 0.0 }
 0x54f   :  { %v3548_v29 = vsel %vm2206_vm4, %v3433_v23, 0.0 }
 0x550   :  { %v14119_v27 = vpop.f32.mrb[54].mxu0  ;;  %v3549_v24 = vadd.f32 %v3548_v29, %v3547_v52  ;;  %v3354_v59 = vadd.f32 %v3353_v37, %v3352_v8 }
 0x551   :  { %19427 = vst [vmem:[#allocation303_spill] sm:$0xff] %v14119_v27  ;;  %v14121_v2 = vpop.f32.mrb[55].mxu0  ;;  %v3436_v46 = vmul.f32 %v14119_v27, %v14119_v27  ;;  %v3357_v23 = vsel %vm2206_vm4, %v14119_v27, 0.0 }
 0x552   :  { %19428 = vst [vmem:[#allocation166_spill] sm:$0xff] %v14121_v2  ;;  %v3355_v12 = vsel %vm2206_vm4, %v14121_v2, 0.0  ;;  %v3435_v40 = vmul.f32 %v14121_v2, %v14121_v2  ;;  %v3551_v47 = vadd.f32 %v3550_v10, %v3549_v24 }
 0x553   :  { %v3356_v44 = vadd.f32 %v3355_v12, %v3354_v59  ;;  %v3554_v20 = vsel %vm2206_vm4, %v3436_v46, 0.0 }
 0x554   :  { %v3552_v52 = vsel %vm2206_vm4, %v3435_v40, 0.0 }
 0x555   :  { %v14133_v29 = vpop.f32.mrb[56].mxu0  ;;  %v3553_v8 = vadd.f32 %v3552_v52, %v3551_v47  ;;  %v3358_v37 = vadd.f32 %v3357_v23, %v3356_v44 }
 0x556   :  { %19429 = vst [vmem:[#allocation171_spill] sm:$0xff] %v14133_v29  ;;  %v14135_v56 = vpop.f32.mrb[57].mxu0  ;;  %v3438_v36 = vmul.f32 %v14133_v29, %v14133_v29  ;;  %v3361_v40 = vsel %vm2206_vm4, %v14133_v29, 0.0 }
 0x557   :  { %19430 = vst [vmem:[#allocation172_spill] sm:$0xff] %v14135_v56  ;;  %v3359_v59 = vsel %vm2206_vm4, %v14135_v56, 0.0  ;;  %v3437_v10 = vmul.f32 %v14135_v56, %v14135_v56  ;;  %v3555_v12 = vadd.f32 %v3554_v20, %v3553_v8 }
 0x558   :  { %v3360_v24 = vadd.f32 %v3359_v59, %v3358_v37  ;;  %v3558_v27 = vsel %vm2206_vm4, %v3438_v36, 0.0 }
 0x559   :  { %v3556_v47 = vsel %vm2206_vm4, %v3437_v10, 0.0 }
 0x55a   :  { %v3557_v44 = vadd.f32 %v3556_v47, %v3555_v12  ;;  %v3362_v23 = vadd.f32 %v3361_v40, %v3360_v24 }
 0x55b   :  { %v14147_v52 = vpop.f32.mrb[58].mxu0 }
 0x55c   :  { %19431 = vst [vmem:[#allocation102_spill] sm:$0xff] %v14147_v52  ;;  %v14149_v46 = vpop.f32.mrb[59].mxu0  ;;  %v3440_v2 = vmul.f32 %v14147_v52, %v14147_v52  ;;  %v3559_v59 = vadd.f32 %v3558_v27, %v3557_v44  ;;  %v3365_v10 = vsel %vm2206_vm4, %v14147_v52, 0.0 }
 0x55d   :  { %19432 = vst [vmem:[#allocation168_spill] sm:$0xff] %v14149_v46  ;;  %v3363_v37 = vsel %vm2206_vm4, %v14149_v46, 0.0  ;;  %v3439_v20 = vmul.f32 %v14149_v46, %v14149_v46 }
 0x55e   :  { %v3364_v8 = vadd.f32 %v3363_v37, %v3362_v23  ;;  %v3562_v29 = vsel %vm2206_vm4, %v3440_v2, 0.0 }
 0x55f   :  { %v3560_v12 = vsel %vm2206_vm4, %v3439_v20, 0.0 }
 0x560   :  { %v14161_v47 = vpop.f32.mrb[60].mxu0  ;;  %v3561_v24 = vadd.f32 %v3560_v12, %v3559_v59  ;;  %v3366_v40 = vadd.f32 %v3365_v10, %v3364_v8 }
 0x561   :  { %19433 = vst [vmem:[#allocation262_spill] sm:$0xff] %v14161_v47  ;;  %v14163_v36 = vpop.f32.mrb[61].mxu0  ;;  %v3442_v56 = vmul.f32 %v14161_v47, %v14161_v47  ;;  %v3369_v20 = vsel %vm2206_vm4, %v14161_v47, 0.0 }
 0x562   :  { %19434 = vst [vmem:[#allocation263_spill] sm:$0xff] %v14163_v36  ;;  %v3367_v23 = vsel %vm2206_vm4, %v14163_v36, 0.0  ;;  %v3441_v27 = vmul.f32 %v14163_v36, %v14163_v36  ;;  %v3563_v37 = vadd.f32 %v3562_v29, %v3561_v24 }
 0x563   :  { %v3368_v44 = vadd.f32 %v3367_v23, %v3366_v40  ;;  %v3566_v52 = vsel %vm2206_vm4, %v3442_v56, 0.0 }
 0x564   :  { %v3564_v59 = vsel %vm2206_vm4, %v3441_v27, 0.0  ;;  %v14175_v12 = vpop.f32.mrb[62].mxu0 }
 0x565   :  { %19435 = vst [vmem:[#allocation304_spill] sm:$0xff] %v14175_v12  ;;  %v3565_v8 = vadd.f32 %v3564_v59, %v3563_v37  ;;  %v3239_v2 = vpop.f32.mrb[63].mxu0  ;;  %v3370_v10 = vadd.f32 %v3369_v20, %v3368_v44  ;;  %v3444_v46 = vmul.f32 %v14175_v12, %v14175_v12  ;;  %v3373_v24 = vsel %vm2206_vm4, %v14175_v12, 0.0 }
 0x566   :  { %v3371_v50 = vsel %vm2206_vm4, %v3239_v2, 0.0  ;;  %v3443_v36 = vmul.f32 %v3239_v2, %v3239_v2 }
 0x567   :  { %v3372_v40 = vadd.f32 %v3371_v50, %v3370_v10  ;;  %v3567_v29 = vadd.f32 %v3566_v52, %v3565_v8  ;;  %v3570_v37 = vsel %vm2206_vm4, %v3444_v46, 0.0  ;;  %v3590_v46 = vlaneseq }
 0x568   :  { %v3568_v23 = vsel %vm2206_vm4, %v3443_v36, 0.0 }
 0x569   :  { %v3374_v27 = vadd.f32 %v3373_v24, %v3372_v40  ;;  %v3569_v47 = vadd.f32 %v3568_v23, %v3567_v29  ;;  %v3591_v24 = vshrl.u32 %v3590_v46, 7 }
 0x56b   :  { %v3375_v44 = vrot.slane %v3374_v27, 4  ;;  %v3571_v20 = vadd.f32 %v3570_v37, %v3569_v47  ;;  %v3582_v47 = vld [vmem:[%s17550_s2] sm:$0x1]  ;;  %v3592_v23 = vsub.s32 0, %v3591_v24  ;;  %s9006_s2 = smov 40  }
 0x56c   :  { %v19442_v24 = vld [vmem:[#allocation114_spill] sm:$0xff] }
 0x56d   :  { %v3376_v56 = vadd.f32 %v3375_v44, %v3374_v27  ;;  %v3572_v59 = vrot.slane %v3571_v20, 4 }
 0x56f   :  { %v3377_v5 = vrot.slane %v3376_v56, 2  ;;  %v3573_v57 = vadd.f32 %v3572_v59, %v3571_v20 }
 0x571   :  { %v3378_v6 = vadd.f32 %v3377_v5, %v3376_v56  ;;  %v3574_v31 = vrot.slane %v3573_v57, 2 }
 0x573   :  { %v3379_v34 = vrot.slane %v3378_v6, 1  ;;  %v3575_v50 = vadd.f32 %v3574_v31, %v3573_v57  ;;  %v3586_v31 = vld [vmem:[%s17551_s3] sm:$0x1]  ;;  %s9007_s3 = smov 48  }
 0x575   :  { %v3380_v52 = vadd.f32 %v3379_v34, %v3378_v6  ;;  %v3576_v8 = vrot.slane %v3575_v50, 1 }
 0x577   :  { %v3577_v10 = vadd.f32 %v3576_v8, %v3575_v50  ;;  %v3578_v12 = vmul.f32 0.001953125, %v3380_v52  ;;  %v19436_v52 = vld [vmem:[#allocation109_spill] sm:$0xff]  ;;  %v19437_v8 = vld [vmem:[#allocation112_spill] sm:$0xff] }
 0x579   :  { %v3579_v45 = vmul.f32 0.001953125, %v3577_v10  ;;  %v3580_v36 = vmul.f32 %v3578_v12, %v3578_v12  ;;  %v19438_v10 = vld [vmem:[#allocation111_spill] sm:$0xff] }
 0x57b   :  { %v3581_v40 = vsub.f32 %v3579_v45, %v3580_v36  ;;  %v19439_v36 = vld [vmem:[#allocation165_spill] sm:$0xff] }
 0x57d   :  { %v3583_v29 = vadd.f32 1e-05, %v3581_v40  ;;  %v19440_v40 = vld [vmem:[#allocation113_spill] sm:$0xff] }
 0x57f   :  { %8752 = vrsqrt.f32 %v3583_v29  ;;  %v19441_v29 = vld [vmem:[#allocation115_spill] sm:$0xff] }
 0x589   :  { %v8753_v5 = vpop.eup %8752 }
 0x58a   :  { %v3585_v27 = vmul.f32 %v8753_v5, %v3582_v47 }
 0x58c   :  { %v3587_v34 = vmul.f32 %v3585_v27, %v3578_v12  ;;  %v14191_v57 = vrot.slane %v3585_v27, %v3592_v23  ;;  %v19444_v27 = vld [vmem:[#allocation101_spill] sm:$0xff] }
 0x58e   :  { %v3588_v6 = vsub.f32 %v3586_v31, %v3587_v34  ;;  %v3657_v45 = vmul.f32 %v14191_v57, %v3239_v2  ;;  %v14196_v37 = vmul.f32 %v14191_v57, %v13562_v43  ;;  %v14200_v44 = vmul.f32 %v13556_v11, %v14191_v57  ;;  %v19445_v34 = vld [vmem:[#allocation260_spill] sm:$0xff] }
 0x58f   :  { %v14204_v20 = vmul.f32 %v14191_v57, %v13572_v19  ;;  %v14208_v12 = vmul.f32 %v13570_v26, %v14191_v57  ;;  %v14212_v56 = vmul.f32 %v14191_v57, %v13585_v54  ;;  %v14216_v43 = vmul.f32 %v13583_v42, %v14191_v57 }
 0x590   :  { %v14218_v2 = vrot.slane %v3588_v6, %v3592_v23  ;;  %v14222_v11 = vmul.f32 %v14191_v57, %v13599_v38  ;;  %v14226_v19 = vmul.f32 %v13597_v41, %v14191_v57  ;;  %v14230_v26 = vmul.f32 %v14191_v57, %v13613_v16  ;;  %v19443_v23 = vld [vmem:[#allocation116_spill] sm:$0xff] }
 0x591   :  { %v14234_v54 = vmul.f32 %v13611_v62, %v14191_v57  ;;  %v14238_v42 = vmul.f32 %v14191_v57, %v13627_v49  ;;  %v14242_v38 = vmul.f32 %v13625_v0, %v14191_v57  ;;  %v14246_v41 = vmul.f32 %v14191_v57, %v13641_v63 }
 0x592   :  { %v3727_v59 = vadd.f32 %v14218_v2, %v3657_v45  ;;  %v14251_v16 = vmul.f32 %v13639_v9, %v14191_v57  ;;  %v14255_v62 = vmul.f32 %v14191_v57, %v13655_v22  ;;  %v14259_v49 = vmul.f32 %v13653_v7, %v14191_v57  ;;  %v19446_v45 = vld [vmem:[#allocation103_spill] sm:$0xff] }
 0x593   :  { %v14263_v0 = vmul.f32 %v14191_v57, %v13669_v58  ;;  %v14267_v63 = vmul.f32 %v13667_v1, %v14191_v57  ;;  %v14271_v9 = vmul.f32 %v14191_v57, %v13683_v15  ;;  %v14275_v22 = vmul.f32 %v13681_v60, %v14191_v57 }
 0x594   :  { %v3791_v50 = vmax.f32 %v3727_v59, 0.0  ;;  %v14279_v7 = vmul.f32 %v14191_v57, %v13697_v25  ;;  %v14283_v58 = vmul.f32 %v13695_v30, %v14191_v57  ;;  %v14287_v1 = vmul.f32 %v14191_v57, %v13711_v51 }
 0x595   :  { %v14291_v15 = vmul.f32 %v13709_v33, %v14191_v57  ;;  %v14295_v60 = vmul.f32 %v14191_v57, %v13727_v4  ;;  %v14299_v25 = vmul.f32 %v13723_v13, %v14191_v57  ;;  %v14303_v30 = vmul.f32 %v14191_v57, %v13744_v28 }
 0x596   :  { %3943 = vst.msk [vmem:[#allocation2 + $0x331] sm:$0xff] %vm2206_vm4, %v3791_v50  ;;  %v14308_v51 = vmul.f32 %v13737_v48, %v14191_v57  ;;  %v14312_v33 = vmul.f32 %v14191_v57, %v13933_v35  ;;  %v14316_v4 = vmul.f32 %v13785_v61, %v14191_v57  ;;  %v14320_v13 = vmul.f32 %v14191_v57, %v13952_v53  ;;  %v19447_v50 = vld [vmem:[#allocation261_spill] sm:$0xff] }
 0x597   :  { %v14324_v28 = vmul.f32 %v13948_v3, %v14191_v57  ;;  %v14328_v48 = vmul.f32 %v14191_v57, %v13967_v32  ;;  %v14332_v35 = vmul.f32 %v13962_v55, %v14191_v57  ;;  %v14336_v61 = vmul.f32 %v14191_v57, %v13980_v17 }
 0x598   :  { %v14340_v53 = vmul.f32 %v13978_v39, %v14191_v57  ;;  %v14344_v3 = vmul.f32 %v14191_v57, %v13995_v14  ;;  %v14348_v32 = vmul.f32 %v13993_v18, %v14191_v57  ;;  %v14352_v55 = vmul.f32 %v14191_v57, %v14009_v21 }
 0x599   :  { %v14356_v17 = vmul.f32 %v19436_v52, %v14191_v57  ;;  %v14360_v39 = vmul.f32 %v14191_v57, %v19437_v8  ;;  %v14364_v14 = vmul.f32 %v19438_v10, %v14191_v57  ;;  %v14368_v18 = vmul.f32 %v14191_v57, %v19439_v36  ;;  %v19448_v8 = vld [vmem:[#allocation167_spill] sm:$0xff]  ;;  %v19450_v36 = vld [vmem:[#allocation169_spill] sm:$0xff] }
 0x59a   :  { %v14372_v21 = vmul.f32 %v19440_v40, %v14191_v57  ;;  %v14376_v46 = vmul.f32 %v14191_v57, %v19441_v29  ;;  %v14380_v47 = vmul.f32 %v19442_v24, %v14191_v57  ;;  %v14384_v5 = vmul.f32 %v14191_v57, %v19443_v23  ;;  %v19452_v29 = vld [vmem:[#allocation302_spill] sm:$0xff] }
 0x59b   :  { %v14388_v31 = vmul.f32 %v19444_v27, %v14191_v57  ;;  %v14392_v6 = vmul.f32 %v14191_v57, %v19445_v34  ;;  %v14396_v59 = vmul.f32 %v19446_v45, %v14191_v57  ;;  %v14400_v52 = vmul.f32 %v14191_v57, %v19447_v50  ;;  %v19454_v23 = vld [vmem:[#allocation166_spill] sm:$0xff]  ;;  %v19456_v34 = vld [vmem:[#allocation303_spill] sm:$0xff]  ;;  %v19458_v50 = vld [vmem:[#allocation172_spill] sm:$0xff] }
 0x59c   :  { %v14404_v10 = vmul.f32 %v19448_v8, %v14191_v57  ;;  %v14408_v40 = vmul.f32 %v14191_v57, %v19450_v36  ;;  %v14412_v24 = vmul.f32 %v19452_v29, %v14191_v57  ;;  %v14416_v27 = vmul.f32 %v14191_v57, %v19454_v23 }
 0x59d   :  { %v14420_v45 = vmul.f32 %v19456_v34, %v14191_v57  ;;  %v14424_v8 = vmul.f32 %v14191_v57, %v19458_v50 }
 0x59e   :  { %19449 = vst [vmem:[#allocation173_spill] sm:$0xff] %v14404_v10  ;;  %19451 = vst [vmem:[#allocation305_spill] sm:$0xff] %v14408_v40  ;;  %v19460_v10 = vld [vmem:[#allocation171_spill] sm:$0xff]  ;;  %v19461_v40 = vld [vmem:[#allocation168_spill] sm:$0xff] }
 0x59f   :  { %19453 = vst [vmem:[#allocation170_spill] sm:$0xff] %v14412_v24  ;;  %19455 = vst [vmem:[#allocation362_spill] sm:$0xff] %v14416_v27  ;;  %v14428_v36 = vmul.f32 %v19460_v10, %v14191_v57  ;;  %v14432_v29 = vmul.f32 %v14191_v57, %v19461_v40  ;;  %v19462_v24 = vld [vmem:[#allocation102_spill] sm:$0xff]  ;;  %v19463_v27 = vld [vmem:[#allocation263_spill] sm:$0xff]  ;;  %v14452_v40 = vadd.f32 %v14218_v2, %v14196_v37 }
 0x5a0   :  { %19457 = vst [vmem:[#allocation264_spill] sm:$0xff] %v14420_v45  ;;  %19459 = vst [vmem:[#allocation265_spill] sm:$0xff] %v14424_v8  ;;  %v14436_v23 = vmul.f32 %v19462_v24, %v14191_v57  ;;  %v14440_v34 = vmul.f32 %v14191_v57, %v19463_v27  ;;  %v19464_v45 = vld [vmem:[#allocation262_spill] sm:$0xff]  ;;  %v19465_v8 = vld [vmem:[#allocation304_spill] sm:$0xff]  ;;  %v14456_v24 = vadd.f32 %v14218_v2, %v14200_v44 }
 0x5a1   :  { %v14444_v50 = vmul.f32 %v19464_v45, %v14191_v57  ;;  %v14448_v10 = vmul.f32 %v19465_v8, %v14191_v57  ;;  %v14460_v27 = vadd.f32 %v14218_v2, %v14204_v20  ;;  %v14464_v45 = vadd.f32 %v14218_v2, %v14208_v12 }
 0x5a2   :  { %v14468_v57 = vadd.f32 %v14218_v2, %v14212_v56  ;;  %v14472_v37 = vadd.f32 %v14218_v2, %v14216_v43  ;;  %v14476_v44 = vadd.f32 %v14218_v2, %v14222_v11  ;;  %v14480_v20 = vadd.f32 %v14218_v2, %v14226_v19 }
 0x5a3   :  { %v14484_v12 = vadd.f32 %v14218_v2, %v14230_v26  ;;  %v14488_v56 = vadd.f32 %v14218_v2, %v14234_v54  ;;  %v14492_v43 = vadd.f32 %v14218_v2, %v14238_v42  ;;  %v14496_v11 = vadd.f32 %v14218_v2, %v14242_v38 }
 0x5a4   :  { %v14500_v19 = vadd.f32 %v14218_v2, %v14246_v41  ;;  %v14504_v26 = vadd.f32 %v14218_v2, %v14251_v16  ;;  %v14508_v54 = vadd.f32 %v14218_v2, %v14255_v62  ;;  %v14512_v42 = vadd.f32 %v14218_v2, %v14259_v49 }
 0x5a5   :  { %v14516_v38 = vadd.f32 %v14218_v2, %v14263_v0  ;;  %v14520_v41 = vadd.f32 %v14218_v2, %v14267_v63  ;;  %v14524_v16 = vadd.f32 %v14218_v2, %v14271_v9  ;;  %v14528_v62 = vadd.f32 %v14218_v2, %v14275_v22  ;;  %v19471_v8 = vld [vmem:[#allocation173_spill] sm:$0xff] }
 0x5a6   :  { %v14532_v49 = vadd.f32 %v14218_v2, %v14279_v7  ;;  %v14536_v0 = vadd.f32 %v14218_v2, %v14283_v58  ;;  %v14540_v63 = vadd.f32 %v14218_v2, %v14287_v1  ;;  %v14544_v9 = vadd.f32 %v14218_v2, %v14291_v15 }
 0x5a7   :  { %v14548_v22 = vadd.f32 %v14218_v2, %v14295_v60  ;;  %v14552_v7 = vadd.f32 %v14218_v2, %v14299_v25  ;;  %v14556_v58 = vadd.f32 %v14218_v2, %v14303_v30  ;;  %v14560_v1 = vadd.f32 %v14218_v2, %v14308_v51 }
 0x5a8   :  { %v14564_v15 = vadd.f32 %v14218_v2, %v14312_v33  ;;  %v14568_v60 = vadd.f32 %v14218_v2, %v14316_v4  ;;  %v14572_v25 = vadd.f32 %v14218_v2, %v14320_v13  ;;  %v14576_v30 = vadd.f32 %v14218_v2, %v14324_v28 }
 0x5a9   :  { %v14580_v51 = vadd.f32 %v14218_v2, %v14328_v48  ;;  %v14584_v33 = vadd.f32 %v14218_v2, %v14332_v35  ;;  %v14588_v4 = vadd.f32 %v14218_v2, %v14336_v61  ;;  %v14592_v13 = vadd.f32 %v14218_v2, %v14340_v53 }
 0x5aa   :  { %v14596_v28 = vadd.f32 %v14218_v2, %v14344_v3  ;;  %v14600_v48 = vadd.f32 %v14218_v2, %v14348_v32  ;;  %v14604_v35 = vadd.f32 %v14218_v2, %v14352_v55  ;;  %v14608_v61 = vadd.f32 %v14218_v2, %v14356_v17 }
 0x5ab   :  { %v14612_v53 = vadd.f32 %v14218_v2, %v14360_v39  ;;  %v14616_v3 = vadd.f32 %v14218_v2, %v14364_v14  ;;  %v14620_v32 = vadd.f32 %v14218_v2, %v14368_v18  ;;  %v14624_v55 = vadd.f32 %v14218_v2, %v14372_v21 }
 0x5ac   :  { %v14628_v17 = vadd.f32 %v14218_v2, %v14376_v46  ;;  %v14632_v39 = vadd.f32 %v14218_v2, %v14380_v47  ;;  %v14636_v14 = vadd.f32 %v14218_v2, %v14384_v5  ;;  %v14640_v18 = vadd.f32 %v14218_v2, %v14388_v31 }
 0x5ad   :  { %v14644_v21 = vadd.f32 %v14218_v2, %v14392_v6  ;;  %v14648_v46 = vadd.f32 %v14218_v2, %v14396_v59  ;;  %v14652_v47 = vadd.f32 %v14218_v2, %v14400_v52  ;;  %v14656_v5 = vadd.f32 %v14218_v2, %v19471_v8 }
 0x5ae   :  { %19466 = vst [vmem:[#allocation306_spill] sm:$0xff] %v14636_v14  ;;  %19467 = vst [vmem:[#allocation174_spill] sm:$0xff] %v14640_v18  ;;  %v19472_v14 = vld [vmem:[#allocation305_spill] sm:$0xff]  ;;  %v19473_v18 = vld [vmem:[#allocation170_spill] sm:$0xff] }
 0x5af   :  { %19468 = vst [vmem:[#allocation307_spill] sm:$0xff] %v14644_v21  ;;  %19469 = vst [vmem:[#allocation364_spill] sm:$0xff] %v14648_v46  ;;  %v14660_v31 = vadd.f32 %v14218_v2, %v19472_v14  ;;  %v14664_v6 = vadd.f32 %v14218_v2, %v19473_v18  ;;  %v19474_v21 = vld [vmem:[#allocation362_spill] sm:$0xff]  ;;  %v19475_v46 = vld [vmem:[#allocation264_spill] sm:$0xff]  ;;  %v14680_v14 = vadd.f32 %v14218_v2, %v14428_v36 }
 0x5b0   :  { %19470 = vst [vmem:[#allocation363_spill] sm:$0xff] %v14652_v47  ;;  %v14668_v59 = vadd.f32 %v14218_v2, %v19474_v21  ;;  %v14672_v52 = vadd.f32 %v14218_v2, %v19475_v46  ;;  %v19476_v47 = vld [vmem:[#allocation265_spill] sm:$0xff]  ;;  %v14684_v18 = vadd.f32 %v14218_v2, %v14432_v29  ;;  %v14688_v21 = vadd.f32 %v14218_v2, %v14436_v23 }
 0x5b1   :  { %v14676_v8 = vadd.f32 %v14218_v2, %v19476_v47  ;;  %19477 = vst [vmem:[#allocation366_spill] sm:$0xff] %v14680_v14  ;;  %v14692_v46 = vadd.f32 %v14218_v2, %v14440_v34  ;;  %v14696_v47 = vadd.f32 %v14218_v2, %v14444_v50  ;;  %v14700_v36 = vadd.f32 %v14218_v2, %v14448_v10 }
 0x5b2   :  { %19478 = vst [vmem:[#allocation365_spill] sm:$0xff] %v14684_v18  ;;  %19479 = vst [vmem:[#allocation266_spill] sm:$0xff] %v14688_v21  ;;  %v3731_v14 = vmax.f32 %v14460_v27, 0.0  ;;  %v3732_v29 = vmax.f32 %v14464_v45, 0.0  ;;  %v3729_v18 = vmax.f32 %v14452_v40, 0.0  ;;  %v3730_v23 = vmax.f32 %v14456_v24, 0.0 }
 0x5b3   :  { %19480 = vst [vmem:[#allocation267_spill] sm:$0xff] %v14696_v47  ;;  %v3733_v21 = vmax.f32 %v14468_v57, 0.0  ;;  %v3734_v34 = vmax.f32 %v14472_v37, 0.0  ;;  %v3735_v50 = vmax.f32 %v14476_v44, 0.0  ;;  %v3736_v47 = vmax.f32 %v14480_v20, 0.0 }
 0x5b4   :  { %3883 = vst.msk [vmem:[#allocation2 + $0x31] sm:$0xff] %vm2206_vm4, %v3731_v14  ;;  %v3737_v2 = vmax.f32 %v14484_v12, 0.0  ;;  %3884 = vst.msk [vmem:[#allocation2 + $0x39] sm:$0xff] %vm2206_vm4, %v3732_v29  ;;  %v3738_v10 = vmax.f32 %v14488_v56, 0.0  ;;  %v3739_v40 = vmax.f32 %v14492_v43, 0.0  ;;  %v3740_v24 = vmax.f32 %v14496_v11, 0.0 }
 0x5b5   :  { %v3741_v27 = vmax.f32 %v14500_v19, 0.0  ;;  %3881 = vst.msk [vmem:[#allocation2 + $0x19] sm:$0xff] %vm2206_vm4, %v3729_v18  ;;  %3882 = vst.msk [vmem:[#allocation2 + $0x21] sm:$0xff] %vm2206_vm4, %v3730_v23  ;;  %v3742_v45 = vmax.f32 %v14504_v26, 0.0  ;;  %v3743_v57 = vmax.f32 %v14508_v54, 0.0  ;;  %v3744_v37 = vmax.f32 %v14512_v42, 0.0 }
 0x5b6   :  { %3885 = vst.msk [vmem:[#allocation2 + $0x49] sm:$0xff] %vm2206_vm4, %v3733_v21  ;;  %v3745_v44 = vmax.f32 %v14516_v38, 0.0  ;;  %3886 = vst.msk [vmem:[#allocation2 + $0x51] sm:$0xff] %vm2206_vm4, %v3734_v34  ;;  %v3746_v20 = vmax.f32 %v14520_v41, 0.0  ;;  %v3747_v12 = vmax.f32 %v14524_v16, 0.0  ;;  %v3748_v56 = vmax.f32 %v14528_v62, 0.0 }
 0x5b7   :  { %3887 = vst.msk [vmem:[#allocation2 + $0x61] sm:$0xff] %vm2206_vm4, %v3735_v50  ;;  %3888 = vst.msk [vmem:[#allocation2 + $0x69] sm:$0xff] %vm2206_vm4, %v3736_v47  ;;  %v3749_v43 = vmax.f32 %v14532_v49, 0.0  ;;  %v3750_v11 = vmax.f32 %v14536_v0, 0.0  ;;  %v3751_v19 = vmax.f32 %v14540_v63, 0.0  ;;  %v3752_v26 = vmax.f32 %v14544_v9, 0.0 }
 0x5b8   :  { %3889 = vst.msk [vmem:[#allocation2 + $0x79] sm:$0xff] %vm2206_vm4, %v3737_v2  ;;  %3890 = vst.msk [vmem:[#allocation2 + $0x81] sm:$0xff] %vm2206_vm4, %v3738_v10  ;;  %v3753_v54 = vmax.f32 %v14548_v22, 0.0  ;;  %v3754_v42 = vmax.f32 %v14552_v7, 0.0  ;;  %v3755_v38 = vmax.f32 %v14556_v58, 0.0  ;;  %v3756_v41 = vmax.f32 %v14560_v1, 0.0 }
 0x5b9   :  { %3891 = vst.msk [vmem:[#allocation2 + $0x91] sm:$0xff] %vm2206_vm4, %v3739_v40  ;;  %3892 = vst.msk [vmem:[#allocation2 + $0x99] sm:$0xff] %vm2206_vm4, %v3740_v24  ;;  %v3757_v16 = vmax.f32 %v14564_v15, 0.0  ;;  %v3758_v62 = vmax.f32 %v14568_v60, 0.0  ;;  %v3759_v49 = vmax.f32 %v14572_v25, 0.0  ;;  %v3760_v0 = vmax.f32 %v14576_v30, 0.0 }
 0x5ba   :  { %3893 = vst.msk [vmem:[#allocation2 + $0xa9] sm:$0xff] %vm2206_vm4, %v3741_v27  ;;  %3894 = vst.msk [vmem:[#allocation2 + $0xb1] sm:$0xff] %vm2206_vm4, %v3742_v45  ;;  %v3761_v63 = vmax.f32 %v14580_v51, 0.0  ;;  %v3762_v22 = vmax.f32 %v14584_v33, 0.0  ;;  %v3763_v7 = vmax.f32 %v14588_v4, 0.0  ;;  %v3764_v58 = vmax.f32 %v14592_v13, 0.0 }
 0x5bb   :  { %3895 = vst.msk [vmem:[#allocation2 + $0xc1] sm:$0xff] %vm2206_vm4, %v3743_v57  ;;  %3896 = vst.msk [vmem:[#allocation2 + $0xc9] sm:$0xff] %vm2206_vm4, %v3744_v37  ;;  %v14760_v9 = vld [vmem:[#allocation2 + $0x30] sm:$0xff]  ;;  %v3765_v1 = vmax.f32 %v14596_v28, 0.0  ;;  %v14770_v15 = vld [vmem:[#allocation2 + $0x38] sm:$0xff]  ;;  %v3766_v30 = vmax.f32 %v14600_v48, 0.0 }
 0x5bc   :  { %3897 = vst.msk [vmem:[#allocation2 + $0xd9] sm:$0xff] %vm2206_vm4, %v3745_v44  ;;  %3898 = vst.msk [vmem:[#allocation2 + $0xe1] sm:$0xff] %vm2206_vm4, %v3746_v20  ;;  %v14772_v60 = vld [vmem:[#allocation2 + $0x40] sm:$0x3]  ;;  %v4159_v25 = vrot.slane %v14760_v9, 1  ;;  %v3767_v51 = vmax.f32 %v14604_v35, 0.0 }
 0x5bd   :  { %3899 = vst.msk [vmem:[#allocation2 + $0xf1] sm:$0xff] %vm2206_vm4, %v3747_v12  ;;  %3900 = vst.msk [vmem:[#allocation2 + $0xf9] sm:$0xff] %vm2206_vm4, %v3748_v56  ;;  %v4160_v33 = vrot.slane %v14770_v15, 1  ;;  %v4162_v4 = vrot.slane %v14772_v60, 1  ;;  %v3768_v13 = vmax.f32 %v14608_v61, 0.0  ;;  %v3769_v28 = vmax.f32 %v14612_v53, 0.0 }
 0x5be   :  { %3901 = vst.msk [vmem:[#allocation2 + $0x109] sm:$0xff] %vm2206_vm4, %v3749_v43  ;;  %3902 = vst.msk [vmem:[#allocation2 + $0x111] sm:$0xff] %vm2206_vm4, %v3750_v11  ;;  %v3770_v48 = vmax.f32 %v14616_v3, 0.0  ;;  %v3771_v35 = vmax.f32 %v14620_v32, 0.0  ;;  %v3772_v14 = vmax.f32 %v14624_v55, 0.0  ;;  %v3773_v18 = vmax.f32 %v14628_v17, 0.0 }
 0x5bf   :  { %3903 = vst.msk [vmem:[#allocation2 + $0x121] sm:$0xff] %vm2206_vm4, %v3751_v19  ;;  %3904 = vst.msk [vmem:[#allocation2 + $0x129] sm:$0xff] %vm2206_vm4, %v3752_v26  ;;  %v4161_v61 = vsel %vm231_vm0, %v4159_v25, %v4160_v33  ;;  %v4163_v53 = vsel %vm231_vm0, %v4160_v33, %v4162_v4  ;;  %v3774_v21 = vmax.f32 %v14632_v39, 0.0  ;;  %v19481_v47 = vld [vmem:[#allocation306_spill] sm:$0xff]  ;;  %v14799_v23 = vld [vmem:[#allocation2 + $0x18] sm:$0xff]  ;;  %v3780_v57 = vmax.f32 %v14656_v5, 0.0 }
 0x5c0   :  { %3905 = vst.msk [vmem:[#allocation2 + $0x139] sm:$0xff] %vm2206_vm4, %v3753_v54  ;;  %3906 = vst.msk [vmem:[#allocation2 + $0x141] sm:$0xff] %vm2206_vm4, %v3754_v42  ;;  %v3775_v29 = vmax.f32 %v19481_v47, 0.0  ;;  %v14801_v3 = vld [vmem:[#allocation2 + $0x28] sm:$0x3]  ;;  %v14805_v32 = vpack.i.bf16 %v4163_v53, %v4161_v61  ;;  %v19483_v55 = vld [vmem:[#allocation174_spill] sm:$0xff] }
 0x5c1   :  { %3907 = vst.msk [vmem:[#allocation2 + $0x151] sm:$0xff] %vm2206_vm4, %v3755_v38  ;;  %3908 = vst.msk [vmem:[#allocation2 + $0x159] sm:$0xff] %vm2206_vm4, %v3756_v41  ;;  %v3776_v17 = vmax.f32 %v19483_v55, 0.0  ;;  %v19484_v34 = vld [vmem:[#allocation307_spill] sm:$0xff]  ;;  %v19485_v2 = vld [vmem:[#allocation364_spill] sm:$0xff]  ;;  %v3781_v37 = vmax.f32 %v14660_v31, 0.0 }
 0x5c2   :  { %3909 = vst.msk [vmem:[#allocation2 + $0x169] sm:$0xff] %vm2206_vm4, %v3757_v16  ;;  %3910 = vst.msk [vmem:[#allocation2 + $0x171] sm:$0xff] %vm2206_vm4, %v3758_v62  ;;  %v3777_v50 = vmax.f32 %v19484_v34, 0.0  ;;  %v3778_v10 = vmax.f32 %v19485_v2, 0.0  ;;  %v14810_v40 = vld [vmem:[#allocation2 + $0x20] sm:$0xff]  ;;  %v14818_v24 = vld [vmem:[#allocation2 + $0x68] sm:$0xff]  ;;  %7481 = vrot.lane.b32.xlu0 %v14805_v32, %s8998_s17 }
 0x5c3   :  { %3911 = vst.msk [vmem:[#allocation2 + $0x181] sm:$0xff] %vm2206_vm4, %v3759_v49  ;;  %3912 = vst.msk [vmem:[#allocation2 + $0x189] sm:$0xff] %vm2206_vm4, %v3760_v0  ;;  %v14816_v39 = vld [vmem:[#allocation2 + $0x60] sm:$0xff]  ;;  %v19486_v27 = vld [vmem:[#allocation363_spill] sm:$0xff]  ;;  %v3782_v44 = vmax.f32 %v14664_v6, 0.0  ;;  %v3783_v12 = vmax.f32 %v14668_v59, 0.0 }
 0x5c4   :  { %3913 = vst.msk [vmem:[#allocation2 + $0x1c9] sm:$0xff] %vm2206_vm4, %v3761_v63  ;;  %3914 = vst.msk [vmem:[#allocation2 + $0x1d1] sm:$0xff] %vm2206_vm4, %v3762_v22  ;;  %v3779_v45 = vmax.f32 %v19486_v27, 0.0  ;;  %v14826_v20 = vld [vmem:[#allocation2 + $0x70] sm:$0x3]  ;;  %v3784_v56 = vmax.f32 %v14672_v52, 0.0 }
 0x5c5   :  { %3915 = vst.msk [vmem:[#allocation2 + $0x1e1] sm:$0xff] %vm2206_vm4, %v3763_v7  ;;  %3916 = vst.msk [vmem:[#allocation2 + $0x1e9] sm:$0xff] %vm2206_vm4, %v3764_v58  ;;  %v3785_v43 = vmax.f32 %v14676_v8, 0.0  ;;  %v19487_v5 = vld [vmem:[#allocation366_spill] sm:$0xff]  ;;  %v14837_v31 = vld [vmem:[#allocation2 + $0x48] sm:$0xff]  ;;  %v3789_v52 = vmax.f32 %v14692_v46, 0.0 }
 0x5c6   :  { %3917 = vst.msk [vmem:[#allocation2 + $0x1f9] sm:$0xff] %vm2206_vm4, %v3765_v1  ;;  %3918 = vst.msk [vmem:[#allocation2 + $0x201] sm:$0xff] %vm2206_vm4, %v3766_v30  ;;  %v3786_v11 = vmax.f32 %v19487_v5, 0.0  ;;  %v14839_v6 = vld [vmem:[#allocation2 + $0x50] sm:$0xff]  ;;  %v19488_v19 = vld [vmem:[#allocation365_spill] sm:$0xff]  ;;  %v3792_v41 = vmax.f32 %v14700_v36, 0.0 }
 0x5c7   :  { %3919 = vst.msk [vmem:[#allocation2 + $0x211] sm:$0xff] %vm2206_vm4, %v3767_v51  ;;  %3920 = vst.msk [vmem:[#allocation2 + $0x219] sm:$0xff] %vm2206_vm4, %v3768_v13  ;;  %v3787_v26 = vmax.f32 %v19488_v19, 0.0  ;;  %v19489_v54 = vld [vmem:[#allocation266_spill] sm:$0xff]  ;;  %v19490_v42 = vld [vmem:[#allocation267_spill] sm:$0xff]  ;;  %v4154_v16 = vrot.slane %v14799_v23, 1 }
 0x5c8   :  { %3921 = vst.msk [vmem:[#allocation2 + $0x229] sm:$0xff] %vm2206_vm4, %v3769_v28  ;;  %19482 = vst [vmem:[#allocation308_spill] sm:$0xff] %v14805_v32  ;;  %v3788_v59 = vmax.f32 %v19489_v54, 0.0  ;;  %v3790_v8 = vmax.f32 %v19490_v42, 0.0  ;;  %v14849_v38 = vld [vmem:[#allocation2 + $0x58] sm:$0x3] }
 0x5c9   :  { %3922 = vst.msk [vmem:[#allocation2 + $0x231] sm:$0xff] %vm2206_vm4, %v3770_v48  ;;  %3923 = vst.msk [vmem:[#allocation2 + $0x241] sm:$0xff] %vm2206_vm4, %v3771_v35  ;;  %v4155_v62 = vrot.slane %v14810_v40, 1  ;;  %v4157_v46 = vrot.slane %v14801_v3, 1  ;;  %v14859_v49 = vld [vmem:[#allocation2 + $0x90] sm:$0xff]  ;;  %v4169_v36 = vrot.slane %v14816_v39, 1 }
 0x5ca   :  { %3924 = vst.msk [vmem:[#allocation2 + $0x249] sm:$0xff] %vm2206_vm4, %v3772_v14  ;;  %3925 = vst.msk [vmem:[#allocation2 + $0x259] sm:$0xff] %vm2206_vm4, %v3773_v18  ;;  %v4170_v0 = vrot.slane %v14818_v24, 1  ;;  %v4172_v63 = vrot.slane %v14826_v20, 1  ;;  %v4164_v22 = vrot.slane %v14837_v31, 1  ;;  %v14869_v7 = vld [vmem:[#allocation2 + $0x98] sm:$0xff] }
 0x5cb   :  { %3926 = vst.msk [vmem:[#allocation2 + $0x261] sm:$0xff] %vm2206_vm4, %v3774_v21  ;;  %3927 = vst.msk [vmem:[#allocation2 + $0x271] sm:$0xff] %vm2206_vm4, %v3775_v29  ;;  %v4156_v58 = vsel %vm231_vm0, %v4154_v16, %v4155_v62  ;;  %v4158_v1 = vsel %vm231_vm0, %v4155_v62, %v4157_v46  ;;  %v4165_v25 = vrot.slane %v14839_v6, 1  ;;  %v4167_v30 = vrot.slane %v14849_v38, 1  ;;  %v14876_v51 = vld [vmem:[#allocation2 + $0xa0] sm:$0x3] }
 0x5cc   :  { %3928 = vst.msk [vmem:[#allocation2 + $0x279] sm:$0xff] %vm2206_vm4, %v3776_v17  ;;  %3929 = vst.msk [vmem:[#allocation2 + $0x289] sm:$0xff] %vm2206_vm4, %v3777_v50  ;;  %v14878_v33 = vld [vmem:[#allocation2 + $0x78] sm:$0xff]  ;;  %v14880_v4 = vld [vmem:[#allocation2 + $0x80] sm:$0xff]  ;;  %v14882_v13 = vpack.i.bf16 %v4158_v1, %v4156_v58  ;;  %v4171_v28 = vsel %vm231_vm0, %v4169_v36, %v4170_v0  ;;  %v4173_v48 = vsel %vm231_vm0, %v4170_v0, %v4172_v63  ;;  %v4179_v35 = vrot.slane %v14859_v49, 1 }
 0x5cd   :  { %3930 = vst.msk [vmem:[#allocation2 + $0x291] sm:$0xff] %vm2206_vm4, %v3778_v10  ;;  %3931 = vst.msk [vmem:[#allocation2 + $0x2a1] sm:$0xff] %vm2206_vm4, %v3779_v45  ;;  %v14887_v14 = vld [vmem:[#allocation2 + $0x88] sm:$0x3]  ;;  %v14889_v18 = vld [vmem:[#allocation2 + $0xc0] sm:$0xff]  ;;  %v14893_v53 = vpack.i.bf16 %v4173_v48, %v4171_v28  ;;  %v4166_v21 = vsel %vm231_vm0, %v4164_v22, %v4165_v25  ;;  %v4168_v47 = vsel %vm231_vm0, %v4165_v25, %v4167_v30  ;;  %v4180_v29 = vrot.slane %v14869_v7, 1 }
 0x5ce   :  { %3932 = vst.msk [vmem:[#allocation2 + $0x2a9] sm:$0xff] %vm2206_vm4, %v3780_v57  ;;  %3933 = vst.msk [vmem:[#allocation2 + $0x2b9] sm:$0xff] %vm2206_vm4, %v3781_v37  ;;  %v14891_v61 = vld [vmem:[#allocation2 + $0xc8] sm:$0xff]  ;;  %v14898_v55 = vld [vmem:[#allocation2 + $0xd0] sm:$0x3]  ;;  %7476 = vrot.lane.b32.xlu1 %v14882_v13, %s8998_s17  ;;  %v14904_v34 = vpack.i.bf16 %v4168_v47, %v4166_v21  ;;  %v4182_v50 = vrot.slane %v14876_v51, 1 }
 0x5cf   :  { %3934 = vst.msk [vmem:[#allocation2 + $0x2c1] sm:$0xff] %vm2206_vm4, %v3782_v44  ;;  %3935 = vst.msk [vmem:[#allocation2 + $0x2d1] sm:$0xff] %vm2206_vm4, %v3783_v12  ;;  %v14900_v17 = vld [vmem:[#allocation2 + $0xa8] sm:$0xff]  ;;  %v4174_v2 = vrot.slane %v14878_v33, 1  ;;  %v4175_v10 = vrot.slane %v14880_v4, 1  ;;  %v14909_v27 = vld [vmem:[#allocation2 + $0xb0] sm:$0xff]  ;;  %7491 = vrot.lane.b32.xlu0 %v14893_v53, %s8998_s17  ;;  %v4181_v57 = vsel %vm231_vm0, %v4179_v35, %v4180_v29 }
 0x5d0   :  { %3936 = vst.msk [vmem:[#allocation2 + $0x2d9] sm:$0xff] %vm2206_vm4, %v3784_v56  ;;  %3937 = vst.msk [vmem:[#allocation2 + $0x2e9] sm:$0xff] %vm2206_vm4, %v3785_v43  ;;  %v14911_v45 = vld [vmem:[#allocation2 + $0x1b0] sm:$0xff]  ;;  %v4177_v37 = vrot.slane %v14887_v14, 1  ;;  %v4189_v44 = vrot.slane %v14889_v18, 1  ;;  %v4190_v12 = vrot.slane %v14891_v61, 1  ;;  %v4183_v5 = vsel %vm231_vm0, %v4180_v29, %v4182_v50 }
 0x5d1   :  { %3938 = vst.msk [vmem:[#allocation2 + $0x2f1] sm:$0xff] %vm2206_vm4, %v3786_v11  ;;  %3939 = vst.msk [vmem:[#allocation2 + $0x301] sm:$0xff] %vm2206_vm4, %v3787_v26  ;;  %v14919_v56 = vld [vmem:[#allocation2 + $0xb8] sm:$0x3]  ;;  %v14921_v43 = vld [vmem:[#allocation2 + $0xf0] sm:$0xff]  ;;  %v4176_v11 = vsel %vm231_vm0, %v4174_v2, %v4175_v10  ;;  %v4192_v19 = vrot.slane %v14898_v55, 1 }
 0x5d2   :  { %3940 = vst.msk [vmem:[#allocation2 + $0x309] sm:$0xff] %vm2206_vm4, %v3788_v59  ;;  %3941 = vst.msk [vmem:[#allocation2 + $0x319] sm:$0xff] %vm2206_vm4, %v3789_v52  ;;  %v4184_v26 = vrot.slane %v14900_v17, 1  ;;  %v14927_v54 = vld [vmem:[#allocation2 + $0xf8] sm:$0xff]  ;;  %v14929_v59 = vld [vmem:[#allocation2 + $0x100] sm:$0x3]  ;;  %v14931_v52 = vpack.i.bf16 %v4183_v5, %v4181_v57  ;;  %v4178_v42 = vsel %vm231_vm0, %v4175_v10, %v4177_v37  ;;  %7486 = vrot.lane.b32.xlu1 %v14904_v34, %s8998_s17 }
 0x5d3   :  { %3942 = vst.msk [vmem:[#allocation2 + $0x321] sm:$0xff] %vm2206_vm4, %v3790_v8  ;;  %3944 = vst.msk [vmem:[#allocation2 + $0x339] sm:$0xff] %vm2206_vm4, %v3792_v41  ;;  %v4185_v8 = vrot.slane %v14909_v27, 1  ;;  %v14935_v41 = vld [vmem:[#allocation2 + $0xd8] sm:$0xff]  ;;  %v14937_v16 = vld [vmem:[#allocation2 + $0xe0] sm:$0xff]  ;;  %v4229_v46 = vrot.slane %v14911_v45, 1  ;;  %v4191_v36 = vsel %vm231_vm0, %v4189_v44, %v4190_v12  ;;  %v4193_v0 = vsel %vm231_vm0, %v4190_v12, %v4192_v19 }
 0x5d4   :  { %19491 = vst [vmem:[#allocation117_spill] sm:$0xff] %v14882_v13  ;;  %19492 = vst [vmem:[#allocation309_spill] sm:$0xff] %v14893_v53  ;;  %v14939_v62 = vld [vmem:[#allocation2 + $0xe8] sm:$0x3]  ;;  %v4187_v63 = vrot.slane %v14919_v56, 1  ;;  %v4199_v22 = vrot.slane %v14921_v43, 1  ;;  %7501 = vrot.lane.b32.xlu0 %v14931_v52, %s8998_s17  ;;  %v14952_v1 = vpack.i.bf16 %v4178_v42, %v4176_v11  ;;  %v14969_v57 = vpack.i.bf16 %v4193_v0, %v4191_v36 }
 0x5d5   :  { %19493 = vst [vmem:[#allocation367_spill] sm:$0xff] %v14904_v34  ;;  %19494 = vst [vmem:[#allocation175_spill] sm:$0xff] %v14911_v45  ;;  %v14948_v58 = vld [vmem:[#allocation2 + $0x120] sm:$0xff]  ;;  %v4186_v25 = vsel %vm231_vm0, %v4184_v26, %v4185_v8  ;;  %v4200_v30 = vrot.slane %v14927_v54, 1  ;;  %v4202_v28 = vrot.slane %v14929_v59, 1  ;;  %v14957_v48 = vld [vmem:[#allocation2 + $0x128] sm:$0xff] }
 0x5d6   :  { %19495 = vst [vmem:[#allocation368_spill] sm:$0xff] %v14931_v52  ;;  %19496 = vst [vmem:[#allocation396_spill] sm:$0xff] %v14952_v1  ;;  %v14959_v35 = vld [vmem:[#allocation2 + $0x1b8] sm:$0xff]  ;;  %v14961_v21 = vld [vmem:[#allocation2 + $0x1c0] sm:$0x3]  ;;  %v4188_v47 = vsel %vm231_vm0, %v4185_v8, %v4187_v63  ;;  %v4194_v29 = vrot.slane %v14935_v41, 1  ;;  %7496 = vrot.lane.b32.xlu1 %v14952_v1, %s8998_s17 }
 0x5d7   :  { %19497 = vst [vmem:[#allocation176_spill] sm:$0xff] %v14959_v35  ;;  %19498 = vst [vmem:[#allocation7_spill] sm:$0xff] %v14961_v21  ;;  %v4195_v50 = vrot.slane %v14937_v16, 1  ;;  %v4197_v2 = vrot.slane %v14939_v62, 1  ;;  %v14967_v10 = vld [vmem:[#allocation2 + $0x130] sm:$0x3]  ;;  %v4201_v37 = vsel %vm231_vm0, %v4199_v22, %v4200_v30  ;;  %v4203_v44 = vsel %vm231_vm0, %v4200_v30, %v4202_v28 }
 0x5d8   :  { %19499 = vst [vmem:[#allocation397_spill] sm:$0xff] %v14969_v57  ;;  %v4209_v12 = vrot.slane %v14948_v58, 1  ;;  %v14974_v5 = vld [vmem:[#allocation2 + $0x108] sm:$0xff]  ;;  %v14976_v11 = vld [vmem:[#allocation2 + $0x110] sm:$0xff]  ;;  %v4210_v19 = vrot.slane %v14957_v48, 1  ;;  %v14985_v8 = vld [vmem:[#allocation2 + $0x158] sm:$0xff]  ;;  %7511 = vrot.lane.b32.xlu0 %v14969_v57, %s8998_s17  ;;  %v14990_v0 = vpack.i.bf16 %v4188_v47, %v4186_v25  ;;  %v14992_v63 = vpack.i.bf16 %v4203_v44, %v4201_v37 }
 0x5d9   :  { %v14981_v26 = vld [vmem:[#allocation2 + $0x118] sm:$0x3]  ;;  %v14983_v42 = vld [vmem:[#allocation2 + $0x150] sm:$0xff]  ;;  %19501 = vst [vmem:[#allocation310_spill] sm:$0xff] %v14985_v8  ;;  %v4230_v36 = vrot.slane %v14959_v35, 1  ;;  %v4212_v22 = vrot.slane %v14967_v10, 1  ;;  %v4196_v1 = vsel %vm231_vm0, %v4194_v29, %v4195_v50  ;;  %v4198_v32 = vsel %vm231_vm0, %v4195_v50, %v4197_v2 }
 0x5da   :  { %19500 = vst [vmem:[#allocation6_spill] sm:$0xff] %v14983_v42  ;;  %19502 = vst [vmem:[#allocation118_spill] sm:$0xff] %v14990_v0  ;;  %v14995_v30 = vld [vmem:[#allocation2 + $0x160] sm:$0x3]  ;;  %v14997_v28 = vld [vmem:[#allocation2 + $0x138] sm:$0xff]  ;;  %v4232_v53 = vrot.slane %v14961_v21, 1  ;;  %v4211_v37 = vsel %vm231_vm0, %v4209_v12, %v4210_v19  ;;  %7506 = vrot.lane.b32.xlu1 %v14990_v0, %s8998_s17 }
 0x5db   :  { %19503 = vst [vmem:[#allocation311_spill] sm:$0xff] %v14992_v63  ;;  %19504 = vst [vmem:[#allocation177_spill] sm:$0xff] %v14995_v30  ;;  %v14999_v52 = vld [vmem:[#allocation2 + $0x140] sm:$0xff]  ;;  %v4204_v57 = vrot.slane %v14974_v5, 1  ;;  %v4205_v25 = vrot.slane %v14976_v11, 1  ;;  %v4207_v44 = vrot.slane %v14981_v26, 1  ;;  %v4213_v29 = vsel %vm231_vm0, %v4210_v19, %v4212_v22 }
 0x5dc   :  { %19505 = vst [vmem:[#allocation119_spill] sm:$0xff] %v14997_v28  ;;  %19506 = vst [vmem:[#allocation179_spill] sm:$0xff] %v14999_v52  ;;  %v15006_v47 = vld [vmem:[#allocation2 + $0x148] sm:$0x3]  ;;  %v4219_v34 = vrot.slane %v14983_v42, 1  ;;  %v4220_v13 = vrot.slane %v14985_v8, 1  ;;  %7521 = vrot.lane.b32.xlu0 %v14992_v63, %s8998_s17  ;;  %v15025_v8 = vpack.i.bf16 %v4198_v32, %v4196_v1  ;;  %v4231_v0 = vsel %vm231_vm0, %v4229_v46, %v4230_v36 }
 0x5dd   :  { %19507 = vst [vmem:[#allocation178_spill] sm:$0xff] %v15006_v47  ;;  %v4222_v50 = vrot.slane %v14995_v30, 1  ;;  %v4214_v2 = vrot.slane %v14997_v28, 1  ;;  %v4215_v21 = vrot.slane %v14999_v52, 1  ;;  %v4217_v12 = vrot.slane %v15006_v47, 1  ;;  %v15021_v35 = vld [vmem:[#allocation2 + $0x168] sm:$0xff] }
 0x5de   :  { %v15023_v45 = vld [vmem:[#allocation2 + $0x170] sm:$0xff]  ;;  %19508 = vst [vmem:[#allocation180_spill] sm:$0xff] %v15025_v8  ;;  %v4233_v19 = vsel %vm231_vm0, %v4230_v36, %v4232_v53  ;;  %v15029_v22 = vld [vmem:[#allocation2 + $0x178] sm:$0x3]  ;;  %v15031_v28 = vld [vmem:[#allocation2 + $0x1e0] sm:$0xff]  ;;  %v15035_v30 = vpack.i.bf16 %v4213_v29, %v4211_v37  ;;  %v4206_v63 = vsel %vm231_vm0, %v4204_v57, %v4205_v25  ;;  %v4208_v47 = vsel %vm231_vm0, %v4205_v25, %v4207_v44 }
 0x5df   :  { %19509 = vst [vmem:[#allocation8_spill] sm:$0xff] %v15029_v22  ;;  %19510 = vst [vmem:[#allocation9_spill] sm:$0xff] %v15031_v28  ;;  %v15033_v52 = vld [vmem:[#allocation2 + $0x1e8] sm:$0xff]  ;;  %v4221_v42 = vsel %vm231_vm0, %v4219_v34, %v4220_v13  ;;  %v15040_v32 = vld [vmem:[#allocation2 + $0x1f0] sm:$0x3]  ;;  %7516 = vrot.lane.b32.xlu1 %v15025_v8, %s8998_s17  ;;  %v4223_v53 = vsel %vm231_vm0, %v4220_v13, %v4222_v50  ;;  %v4216_v46 = vsel %vm231_vm0, %v4214_v2, %v4215_v21 }
 0x5e0   :  { %19511 = vst [vmem:[#allocation312_spill] sm:$0xff] %v15033_v52  ;;  %19512 = vst [vmem:[#allocation120_spill] sm:$0xff] %v15035_v30  ;;  %v4224_v1 = vrot.slane %v15021_v35, 1  ;;  %v4225_v36 = vrot.slane %v15023_v45, 1  ;;  %7531 = vrot.lane.b32.xlu0 %v15035_v30, %s8998_s17  ;;  %v4218_v57 = vsel %vm231_vm0, %v4215_v21, %v4217_v12  ;;  %v4227_v34 = vrot.slane %v15029_v22, 1  ;;  %v15057_v29 = vld [vmem:[#allocation2 + $0x1c8] sm:$0xff] }
 0x5e1   :  { %19513 = vst [vmem:[#allocation313_spill] sm:$0xff] %v15040_v32  ;;  %v4239_v25 = vrot.slane %v15031_v28, 1  ;;  %v4240_v37 = vrot.slane %v15033_v52, 1  ;;  %v15054_v44 = vpack.i.bf16 %v4208_v47, %v4206_v63  ;;  %v4242_v13 = vrot.slane %v15040_v32, 1  ;;  %19515 = vst [vmem:[#allocation121_spill] sm:$0xff] %v15057_v29  ;;  %v15059_v50 = vld [vmem:[#allocation2 + $0x1d0] sm:$0xff] }
 0x5e2   :  { %19516 = vst [vmem:[#allocation183_spill] sm:$0xff] %v15059_v50  ;;  %v15061_v2 = vpack.i.bf16 %v4223_v53, %v4221_v42  ;;  %v15063_v8 = vld [vmem:[#allocation2 + $0x1d8] sm:$0x3]  ;;  %v15065_v30 = vld [vmem:[#allocation2 + $0x210] sm:$0xff]  ;;  %v15071_v12 = vpack.i.bf16 %v4218_v57, %v4216_v46  ;;  %v7550_v63 = vpack.i.bf16 %v4233_v19, %v4231_v0  ;;  %v4226_v47 = vsel %vm231_vm0, %v4224_v1, %v4225_v36  ;;  %v15074_v32 = vld [vmem:[#allocation2 + $0x220] sm:$0x3] }
 0x5e3   :  { %19514 = vst [vmem:[#allocation181_spill] sm:$0xff] %v15054_v44  ;;  %19518 = vst [vmem:[#allocation184_spill] sm:$0xff] %v15063_v8  ;;  %v15067_v21 = vld [vmem:[#allocation2 + $0x218] sm:$0xff]  ;;  %7526 = vrot.lane.b32.xlu1 %v15054_v44, %s8998_s17  ;;  %v4228_v42 = vsel %vm231_vm0, %v4225_v36, %v4227_v34  ;;  %v4241_v53 = vsel %vm231_vm0, %v4239_v25, %v4240_v37  ;;  %v4234_v52 = vrot.slane %v15057_v29, 1  ;;  %v4235_v28 = vrot.slane %v15059_v50, 1  ;;  %v15095_v34 = vld [vmem:[#allocation2 + $0x240] sm:$0xff] }
 0x5e4   :  { %19517 = vst [vmem:[#allocation182_spill] sm:$0xff] %v15061_v2  ;;  %19519 = vst [vmem:[#allocation10_spill] sm:$0xff] %v15065_v30  ;;  %7541 = vrot.lane.b32.xlu0 %v15061_v2, %s8998_s17  ;;  %v4243_v44 = vsel %vm231_vm0, %v4240_v37, %v4242_v13  ;;  %v4237_v46 = vrot.slane %v15063_v8, 1  ;;  %v4249_v0 = vrot.slane %v15065_v30, 1  ;;  %v4250_v19 = vrot.slane %v15067_v21, 1  ;;  %v15086_v1 = vld [vmem:[#allocation2 + $0x1f8] sm:$0xff] }
 0x5e5   :  { %19520 = vst [vmem:[#allocation11_spill] sm:$0xff] %v15067_v21  ;;  %19521 = vst [vmem:[#allocation314_spill] sm:$0xff] %v15071_v12  ;;  %v4252_v57 = vrot.slane %v15074_v32, 1  ;;  %v15089_v2 = vld [vmem:[#allocation2 + $0x200] sm:$0xff]  ;;  %v15091_v36 = vld [vmem:[#allocation2 + $0x208] sm:$0x3]  ;;  %v15102_v13 = vpack.i.bf16 %v4228_v42, %v4226_v47  ;;  %v15104_v21 = vpack.i.bf16 %v4243_v44, %v4241_v53 }
 0x5e6   :  { %19522 = vst [vmem:[#allocation122_spill] sm:$0xff] %v15074_v32  ;;  %19523 = vst [vmem:[#allocation315_spill] sm:$0xff] %v15086_v1  ;;  %v15097_v25 = vld [vmem:[#allocation2 + $0x248] sm:$0xff]  ;;  %v15099_v37 = vld [vmem:[#allocation2 + $0x250] sm:$0x3]  ;;  %v4236_v32 = vsel %vm231_vm0, %v4234_v52, %v4235_v28  ;;  %v4244_v30 = vrot.slane %v15086_v1, 1  ;;  %v4238_v8 = vsel %vm231_vm0, %v4235_v28, %v4237_v46 }
 0x5e7   :  { %19524 = vst [vmem:[#allocation185_spill] sm:$0xff] %v15089_v2  ;;  %19525 = vst [vmem:[#allocation123_spill] sm:$0xff] %v15091_v36  ;;  %7536 = vrot.lane.b32.xlu1 %v15071_v12, %s8998_s17  ;;  %v4251_v12 = vsel %vm231_vm0, %v4249_v0, %v4250_v19  ;;  %v4245_v50 = vrot.slane %v15089_v2, 1  ;;  %v4247_v29 = vrot.slane %v15091_v36, 1  ;;  %v4253_v22 = vsel %vm231_vm0, %v4250_v19, %v4252_v57  ;;  %v15116_v42 = vld [vmem:[#allocation2 + $0x228] sm:$0xff]  ;;  %v15120_v52 = vld [vmem:[#allocation2 + $0x230] sm:$0xff] }
 0x5e8   :  { %19526 = vst [vmem:[#allocation187_spill] sm:$0xff] %v15095_v34  ;;  %19527 = vst [vmem:[#allocation186_spill] sm:$0xff] %v15097_v25  ;;  %7551 = vrot.lane.b32.xlu0 %v7550_v63, %s8998_s17  ;;  %v4259_v63 = vrot.slane %v15095_v34, 1  ;;  %v4260_v47 = vrot.slane %v15097_v25, 1  ;;  %v4262_v44 = vrot.slane %v15099_v37, 1  ;;  %v15126_v53 = vpack.i.bf16 %v4238_v8, %v4236_v32  ;;  %v15128_v46 = vld [vmem:[#allocation2 + $0x270] sm:$0xff] }
 0x5e9   :  { %19528 = vst [vmem:[#allocation188_spill] sm:$0xff] %v15099_v37  ;;  %19529 = vst [vmem:[#allocation12_spill] sm:$0xff] %v15102_v13  ;;  %v15122_v28 = vld [vmem:[#allocation2 + $0x238] sm:$0x3]  ;;  %v15132_v19 = vld [vmem:[#allocation2 + $0x280] sm:$0x3]  ;;  %v15134_v57 = vpack.i.bf16 %v4253_v22, %v4251_v12  ;;  %v4246_v37 = vsel %vm231_vm0, %v4244_v30, %v4245_v50 }
 0x5ea   :  { %19530 = vst [vmem:[#allocation13_spill] sm:$0xff] %v15104_v21  ;;  %19531 = vst [vmem:[#allocation316_spill] sm:$0xff] %v15116_v42  ;;  %v15130_v0 = vld [vmem:[#allocation2 + $0x278] sm:$0xff]  ;;  %v4254_v25 = vrot.slane %v15116_v42, 1  ;;  %v4261_v34 = vsel %vm231_vm0, %v4259_v63, %v4260_v47  ;;  %v4255_v8 = vrot.slane %v15120_v52, 1  ;;  %v4257_v32 = vrot.slane %v15122_v28, 1 }
 0x5eb   :  { %7546 = vrot.lane.b32.xlu1 %v15102_v13, %s8998_s17  ;;  %19532 = vst [vmem:[#allocation124_spill] sm:$0xff] %v15120_v52  ;;  %19533 = vst [vmem:[#allocation317_spill] sm:$0xff] %v15122_v28  ;;  %v4248_v13 = vsel %vm231_vm0, %v4245_v50, %v4247_v29  ;;  %v15143_v36 = vld [vmem:[#allocation2 + $0x258] sm:$0xff]  ;;  %v15145_v2 = vld [vmem:[#allocation2 + $0x260] sm:$0xff]  ;;  %v4269_v30 = vrot.slane %v15128_v46, 1  ;;  %v4270_v29 = vrot.slane %v15130_v0, 1 }
 0x5ec   :  { %7561 = vrot.lane.b32.xlu0 %v15104_v21, %s8998_s17  ;;  %19534 = vst [vmem:[#allocation189_spill] sm:$0xff] %v15126_v53  ;;  %19535 = vst [vmem:[#allocation125_spill] sm:$0xff] %v15128_v46  ;;  %v4263_v21 = vsel %vm231_vm0, %v4260_v47, %v4262_v44  ;;  %v15147_v22 = vld [vmem:[#allocation2 + $0x268] sm:$0x3]  ;;  %v4272_v50 = vrot.slane %v15132_v19, 1  ;;  %v15154_v12 = vld [vmem:[#allocation2 + $0x2a0] sm:$0xff]  ;;  %v15160_v47 = vpack.i.bf16 %v4248_v13, %v4246_v37 }
 0x5ed   :  { %19536 = vst [vmem:[#allocation191_spill] sm:$0xff] %v15130_v0  ;;  %19537 = vst [vmem:[#allocation190_spill] sm:$0xff] %v15132_v19  ;;  %v15156_v63 = vld [vmem:[#allocation2 + $0x2a8] sm:$0xff]  ;;  %v15162_v44 = vld [vmem:[#allocation2 + $0x2b0] sm:$0x3]  ;;  %v15164_v28 = vpack.i.bf16 %v4263_v21, %v4261_v34  ;;  %v4265_v46 = vrot.slane %v15145_v2, 1  ;;  %v4256_v42 = vsel %vm231_vm0, %v4254_v25, %v4255_v8  ;;  %v4271_v34 = vsel %vm231_vm0, %v4269_v30, %v4270_v29 }
 0x5ee   :  { %19538 = vst [vmem:[#allocation192_spill] sm:$0xff] %v15134_v57  ;;  %19539 = vst [vmem:[#allocation14_spill] sm:$0xff] %v15143_v36  ;;  %v4267_v0 = vrot.slane %v15147_v22, 1  ;;  %v15169_v19 = vld [vmem:[#allocation2 + $0x288] sm:$0xff]  ;;  %v15171_v52 = vld [vmem:[#allocation2 + $0x290] sm:$0xff]  ;;  %v4279_v37 = vrot.slane %v15154_v12, 1 }
 0x5ef   :  { %19540 = vst [vmem:[#allocation15_spill] sm:$0xff] %v15145_v2  ;;  %19541 = vst [vmem:[#allocation318_spill] sm:$0xff] %v15147_v22  ;;  %7556 = vrot.lane.b32.xlu1 %v15126_v53, %s8998_s17  ;;  %v4264_v53 = vrot.slane %v15143_v36, 1  ;;  %v4280_v13 = vrot.slane %v15156_v63, 1  ;;  %v15177_v21 = vld [vmem:[#allocation2 + $0x298] sm:$0x3]  ;;  %v4273_v22 = vsel %vm231_vm0, %v4270_v29, %v4272_v50 }
 0x5f0   :  { %19542 = vst [vmem:[#allocation126_spill] sm:$0xff] %v15154_v12  ;;  %19543 = vst [vmem:[#allocation319_spill] sm:$0xff] %v15156_v63  ;;  %7571 = vrot.lane.b32.xlu0 %v15134_v57, %s8998_s17  ;;  %v4258_v57 = vsel %vm231_vm0, %v4255_v8, %v4257_v32  ;;  %v4282_v2 = vrot.slane %v15162_v44, 1  ;;  %v4274_v25 = vrot.slane %v15169_v19, 1  ;;  %v4275_v8 = vrot.slane %v15171_v52, 1  ;;  %v15188_v32 = vld [vmem:[#allocation2 + $0x2d0] sm:$0xff] }
 0x5f1   :  { %19544 = vst [vmem:[#allocation193_spill] sm:$0xff] %v15160_v47  ;;  %19545 = vst [vmem:[#allocation127_spill] sm:$0xff] %v15162_v44  ;;  %v15190_v63 = vld [vmem:[#allocation2 + $0x2d8] sm:$0xff]  ;;  %v15192_v12 = vld [vmem:[#allocation2 + $0x2e0] sm:$0x3]  ;;  %v4266_v30 = vsel %vm231_vm0, %v4264_v53, %v4265_v46  ;;  %v4268_v29 = vsel %vm231_vm0, %v4265_v46, %v4267_v0  ;;  %v4277_v50 = vrot.slane %v15177_v21, 1 }
 0x5f2   :  { %19546 = vst [vmem:[#allocation195_spill] sm:$0xff] %v15164_v28  ;;  %19547 = vst [vmem:[#allocation194_spill] sm:$0xff] %v15169_v19  ;;  %v15199_v44 = vld [vmem:[#allocation2 + $0x2b8] sm:$0xff]  ;;  %v15204_v19 = vld [vmem:[#allocation2 + $0x2c0] sm:$0xff]  ;;  %v4289_v53 = vrot.slane %v15188_v32, 1  ;;  %v4290_v46 = vrot.slane %v15190_v63, 1 }
 0x5f3   :  { %19548 = vst [vmem:[#allocation196_spill] sm:$0xff] %v15171_v52  ;;  %19549 = vst [vmem:[#allocation16_spill] sm:$0xff] %v15177_v21  ;;  %7566 = vrot.lane.b32.xlu1 %v15160_v47, %s8998_s17  ;;  %v15194_v47 = vpack.i.bf16 %v4258_v57, %v4256_v42  ;;  %v4281_v52 = vsel %vm231_vm0, %v4279_v37, %v4280_v13  ;;  %v15206_v36 = vld [vmem:[#allocation2 + $0x2c8] sm:$0x3]  ;;  %v15208_v1 = vld [vmem:[#allocation2 + $0x300] sm:$0xff]  ;;  %v4283_v42 = vsel %vm231_vm0, %v4280_v13, %v4282_v2 }
 0x5f4   :  { %7581 = vrot.lane.b32.xlu0 %v15164_v28, %s8998_s17  ;;  %19550 = vst [vmem:[#allocation17_spill] sm:$0xff] %v15188_v32  ;;  %19551 = vst [vmem:[#allocation320_spill] sm:$0xff] %v15190_v63  ;;  %v15201_v28 = vpack.i.bf16 %v4273_v22, %v4271_v34  ;;  %v4292_v0 = vrot.slane %v15192_v12, 1  ;;  %v15216_v57 = vld [vmem:[#allocation2 + $0x308] sm:$0xff]  ;;  %v15218_v22 = vld [vmem:[#allocation2 + $0x310] sm:$0x3]  ;;  %v15222_v37 = vpack.i.bf16 %v4268_v29, %v4266_v30 }
 0x5f5   :  { %19552 = vst [vmem:[#allocation128_spill] sm:$0xff] %v15192_v12  ;;  %19553 = vst [vmem:[#allocation321_spill] sm:$0xff] %v15194_v47  ;;  %v4276_v34 = vsel %vm231_vm0, %v4274_v25, %v4275_v8  ;;  %v4284_v2 = vrot.slane %v15199_v44, 1  ;;  %v4285_v13 = vrot.slane %v15204_v19, 1  ;;  %v4287_v63 = vrot.slane %v15206_v36, 1  ;;  %v15234_v30 = vld [vmem:[#allocation2 + $0x2e8] sm:$0xff] }
 0x5f6   :  { %19554 = vst [vmem:[#allocation197_spill] sm:$0xff] %v15199_v44  ;;  %19555 = vst [vmem:[#allocation129_spill] sm:$0xff] %v15201_v28  ;;  %v15229_v12 = vpack.i.bf16 %v4283_v42, %v4281_v52  ;;  %v4299_v32 = vrot.slane %v15208_v1, 1  ;;  %v4300_v21 = vrot.slane %v15216_v57, 1  ;;  %v15236_v29 = vld [vmem:[#allocation2 + $0x2f0] sm:$0xff]  ;;  %v4291_v25 = vsel %vm231_vm0, %v4289_v53, %v4290_v46  ;;  %v8880_v42 = vld [vmem:[#allocation2] sm:$0xff] }
 0x5f7   :  { %19556 = vst [vmem:[#allocation199_spill] sm:$0xff] %v15204_v19  ;;  %19557 = vst [vmem:[#allocation198_spill] sm:$0xff] %v15206_v36  ;;  %7576 = vrot.lane.b32.xlu1 %v15194_v47, %s8998_s17  ;;  %v4278_v47 = vsel %vm231_vm0, %v4275_v8, %v4277_v50  ;;  %v4293_v8 = vsel %vm231_vm0, %v4290_v46, %v4292_v0  ;;  %v15242_v50 = vld [vmem:[#allocation2 + $0x2f8] sm:$0x3]  ;;  %v8882_v36 = vld [vmem:[#allocation2 + $0x10] sm:$0x3]  ;;  %v4286_v44 = vsel %vm231_vm0, %v4284_v2, %v4285_v13 }
 0x5f8   :  { %19558 = vst [vmem:[#allocation200_spill] sm:$0xff] %v15208_v1  ;;  %19559 = vst [vmem:[#allocation18_spill] sm:$0xff] %v15216_v57  ;;  %7591 = vrot.lane.b32.xlu0 %v15201_v28, %s8998_s17  ;;  %v4302_v28 = vrot.slane %v15218_v22, 1  ;;  %v15246_v52 = vpack.i.bf16 %v4278_v47, %v4276_v34  ;;  %v8881_v57 = vld [vmem:[#allocation2 + $0x8] sm:$0xff]  ;;  %v4504_v19 = vrot.slane %v8882_v36, 2  ;;  %v4294_v53 = vrot.slane %v15234_v30, 1 }
 0x5f9   :  { %19560 = vst [vmem:[#allocation398_spill] sm:$0xff] %v15218_v22  ;;  %19561 = vst [vmem:[#allocation19_spill] sm:$0xff] %v15222_v37  ;;  %v4501_v22 = vrot.slane %v8880_v42, 2  ;;  %v4502_v1 = vrot.slane %v8881_v57, 2  ;;  %v4295_v46 = vrot.slane %v15236_v29, 1  ;;  %v15252_v0 = vpack.i.bf16 %v4293_v8, %v4291_v25  ;;  %v15257_v42 = vld [vmem:[#allocation2 + $0x318] sm:$0xff] }
 0x5fa   :  { %19562 = vst [vmem:[#allocation322_spill] sm:$0xff] %v15229_v12  ;;  %19563 = vst [vmem:[#allocation108_spill] sm:$0xff] %v15246_v52  ;;  %v4303_v47 = vsel %vm231_vm0, %v4300_v21, %v4302_v28  ;;  %v4297_v34 = vrot.slane %v15242_v50, 1  ;;  %v15259_v57 = vld [vmem:[#allocation2 + $0x320] sm:$0xff]  ;;  %v15263_v36 = vld [vmem:[#allocation2 + $0x328] sm:$0x3] }
 0x5fb   :  { %7586 = vrot.lane.b32.xlu1 %v15222_v37, %s8998_s17  ;;  %v4288_v37 = vsel %vm231_vm0, %v4285_v13, %v4287_v63  ;;  %19564 = vst [vmem:[#allocation130_spill] sm:$0xff] %v15252_v0  ;;  %v4505_v28 = vsel %vm584_vm1, %v4502_v1, %v4504_v19  ;;  %v4296_v2 = vsel %vm231_vm0, %v4294_v53, %v4295_v46  ;;  %v4304_v13 = vrot.slane %v15257_v42, 1 }
 0x5fc   :  { %7601 = vrot.lane.b32.xlu0 %v15229_v12, %s8998_s17  ;;  %v4301_v12 = vsel %vm231_vm0, %v4299_v32, %v4300_v21  ;;  %v15267_v63 = vpack.i.bf16 %v4288_v37, %v4286_v44  ;;  %v4503_v32 = vsel %vm584_vm1, %v4501_v22, %v4502_v1  ;;  %v4305_v25 = vrot.slane %v15259_v57, 1 }
 0x5fd   :  { %v15271_v21 = vpack.i.bf16 %v4303_v47, %v4301_v12  ;;  %v4298_v8 = vsel %vm231_vm0, %v4295_v46, %v4297_v34  ;;  %v4512_v44 = vrot.slane %v14770_v15, 2  ;;  %v4514_v1 = vrot.slane %v14772_v60, 2 }
 0x5fe   :  { %v4506_v19 = vrot.slane %v14799_v23, 2  ;;  %v4507_v12 = vrot.slane %v14810_v40, 2  ;;  %v4509_v22 = vrot.slane %v14801_v3, 2  ;;  %v7630_v37 = vpack.i.bf16 %v4505_v28, %v4503_v32 }
 0x5ff   :  { %7596 = vrot.lane.b32.xlu1 %v15246_v52, %s8998_s17  ;;  %19565 = vst [vmem:[#allocation323_spill] sm:$0xff] %v15271_v21  ;;  %v4307_v52 = vrot.slane %v15263_v36, 1  ;;  %v4521_v53 = vrot.slane %v14816_v39, 2  ;;  %v4524_v15 = vrot.slane %v14826_v20, 2  ;;  %v15291_v46 = vpack.i.bf16 %v4298_v8, %v4296_v2 }
 0x600   :  { %7611 = vrot.lane.b32.xlu0 %v15252_v0, %s8998_s17  ;;  %v4511_v0 = vrot.slane %v14760_v9, 2  ;;  %v4522_v9 = vrot.slane %v14818_v24, 2  ;;  %v4306_v60 = vsel %vm231_vm0, %v4304_v13, %v4305_v25  ;;  %v4515_v3 = vsel %vm584_vm1, %v4512_v44, %v4514_v1 }
 0x601   :  { %19566 = vst [vmem:[#allocation201_spill] sm:$0xff] %v15291_v46  ;;  %v4308_v23 = vsel %vm231_vm0, %v4305_v25, %v4307_v52  ;;  %v4508_v47 = vsel %vm584_vm1, %v4506_v19, %v4507_v12  ;;  %v4510_v39 = vsel %vm584_vm1, %v4507_v12, %v4509_v22  ;;  %v4516_v24 = vrot.slane %v14837_v31, 2 }
 0x602   :  { %v4513_v40 = vsel %vm584_vm1, %v4511_v0, %v4512_v44  ;;  %v4523_v20 = vsel %vm584_vm1, %v4521_v53, %v4522_v9  ;;  %v4525_v34 = vsel %vm584_vm1, %v4522_v9, %v4524_v15  ;;  %v4517_v52 = vrot.slane %v14839_v6, 2 }
 0x603   :  { %7606 = vrot.lane.b32.xlu1 %v15267_v63, %s8998_s17  ;;  %v4519_v0 = vrot.slane %v14849_v38, 2  ;;  %v15307_v32 = vpack.i.bf16 %v4308_v23, %v4306_v60  ;;  %v4531_v28 = vrot.slane %v14859_v49, 2  ;;  %v4532_v2 = vrot.slane %v14869_v7, 2 }
 0x604   :  { %7621 = vrot.lane.b32.xlu0 %v15271_v21, %s8998_s17  ;;  %v15311_v13 = vpack.i.bf16 %v4515_v3, %v4513_v40  ;;  %v4534_v31 = vrot.slane %v14876_v51, 2  ;;  %v15316_v25 = vpack.i.bf16 %v4510_v39, %v4508_v47  ;;  %v15318_v8 = vpack.i.bf16 %v4525_v34, %v4523_v20  ;;  %v19617_v21 = vld [vmem:[#allocation16_spill] sm:$0xff] }
 0x605   :  { %19567 = vst [vmem:[#allocation131_spill] sm:$0xff] %v15307_v32  ;;  %v4518_v6 = vsel %vm584_vm1, %v4516_v24, %v4517_v52  ;;  %v4520_v38 = vsel %vm584_vm1, %v4517_v52, %v4519_v0  ;;  %v4526_v49 = vrot.slane %v14878_v33, 2  ;;  %v4527_v7 = vrot.slane %v14880_v4, 2 }
 0x606   :  { %v4533_v51 = vsel %vm584_vm1, %v4531_v28, %v4532_v2  ;;  %v4529_v44 = vrot.slane %v14887_v14, 2  ;;  %v4541_v1 = vrot.slane %v14889_v18, 2  ;;  %v4542_v19 = vrot.slane %v14891_v61, 2  ;;  %v19572_v28 = vld [vmem:[#allocation6_spill] sm:$0xff] }
 0x607   :  { %7616 = vrot.lane.b32.xlu1 %v15291_v46, %s8998_s17  ;;  %v4535_v12 = vsel %vm584_vm1, %v4532_v2, %v4534_v31  ;;  %v4544_v22 = vrot.slane %v14898_v55, 2  ;;  %v4537_v53 = vrot.slane %v14909_v27, 2  ;;  %v4539_v33 = vrot.slane %v14919_v56, 2  ;;  %v19573_v31 = vld [vmem:[#allocation310_spill] sm:$0xff] }
 0x608   :  { %7631 = vrot.lane.b32.xlu0 %v7630_v37, %s9000_s9  ;;  %v4536_v37 = vrot.slane %v14900_v17, 2  ;;  %v4551_v4 = vrot.slane %v14921_v43, 2  ;;  %v4552_v14 = vrot.slane %v14927_v54, 2  ;;  %v4554_v18 = vrot.slane %v14929_v59, 2 }
 0x609   :  { %v15342_v61 = vpack.i.bf16 %v4520_v38, %v4518_v6  ;;  %v15344_v55 = vpack.i.bf16 %v4535_v12, %v4533_v51  ;;  %v4528_v17 = vsel %vm584_vm1, %v4526_v49, %v4527_v7  ;;  %v4530_v27 = vsel %vm584_vm1, %v4527_v7, %v4529_v44  ;;  %v19574_v38 = vld [vmem:[#allocation177_spill] sm:$0xff]  ;;  %v19575_v7 = vld [vmem:[#allocation119_spill] sm:$0xff] }
 0x60a   :  { %v4543_v9 = vsel %vm584_vm1, %v4541_v1, %v4542_v19  ;;  %v4545_v56 = vsel %vm584_vm1, %v4542_v19, %v4544_v22  ;;  %v4538_v15 = vsel %vm584_vm1, %v4536_v37, %v4537_v53  ;;  %v4540_v43 = vsel %vm584_vm1, %v4537_v53, %v4539_v33  ;;  %v19576_v44 = vld [vmem:[#allocation179_spill] sm:$0xff]  ;;  %v19577_v19 = vld [vmem:[#allocation178_spill] sm:$0xff]  ;;  %v19579_v22 = vld [vmem:[#allocation176_spill] sm:$0xff] }
 0x60b   :  { %7626 = vrot.lane.b32.xlu1 %v15307_v32, %s8998_s17  ;;  %19568 = vst [vmem:[#allocation203_spill] sm:$0xff] %v15344_v55  ;;  %v4546_v54 = vrot.slane %v14935_v41, 2  ;;  %v4547_v59 = vrot.slane %v14937_v16, 2  ;;  %v4549_v60 = vrot.slane %v14939_v62, 2  ;;  %v4553_v23 = vsel %vm584_vm1, %v4551_v4, %v4552_v14  ;;  %s9008_s17 = smov 56  }
 0x60c   :  { %7641 = vrot.lane.b32.xlu0 %v15311_v13, %s9000_s9  ;;  %v4555_v40 = vsel %vm584_vm1, %v4552_v14, %v4554_v18  ;;  %v4561_v3 = vrot.slane %v14948_v58, 2  ;;  %v4562_v47 = vrot.slane %v14957_v48, 2  ;;  %v15363_v39 = vpack.i.bf16 %v4530_v27, %v4528_v17 }
 0x60d   :  { %v4564_v24 = vrot.slane %v14967_v10, 2  ;;  %v15366_v41 = vpack.i.bf16 %v4545_v56, %v4543_v9  ;;  %v15370_v16 = vpack.i.bf16 %v4540_v43, %v4538_v15  ;;  %v15372_v62 = vpack.i.bf16 %v4555_v40, %v4553_v23  ;;  %v19582_v40 = vld [vmem:[#allocation9_spill] sm:$0xff] }
 0x60e   :  { %19569 = vst [vmem:[#allocation202_spill] sm:$0xff] %v15363_v39  ;;  %v4548_v20 = vsel %vm584_vm1, %v4546_v54, %v4547_v59  ;;  %v4550_v58 = vsel %vm584_vm1, %v4547_v59, %v4549_v60  ;;  %v4563_v48 = vsel %vm584_vm1, %v4561_v3, %v4562_v47  ;;  %v4556_v10 = vrot.slane %v14974_v5, 2  ;;  %v19578_v5 = vld [vmem:[#allocation175_spill] sm:$0xff]  ;;  %v19581_v60 = vld [vmem:[#allocation8_spill] sm:$0xff] }
 0x60f   :  { %7636 = vrot.lane.b32.xlu1 %v15316_v25, %s9000_s9  ;;  %19570 = vst [vmem:[#allocation399_spill] sm:$0xff] %v15366_v41  ;;  %19571 = vst [vmem:[#allocation204_spill] sm:$0xff] %v15370_v16  ;;  %v4557_v34 = vrot.slane %v14976_v11, 2  ;;  %v4565_v52 = vsel %vm584_vm1, %v4562_v47, %v4564_v24  ;;  %v4559_v0 = vrot.slane %v14981_v26, 2  ;;  %v4571_v2 = vrot.slane %v19572_v28, 2  ;;  %v19580_v26 = vld [vmem:[#allocation7_spill] sm:$0xff] }
 0x610   :  { %7651 = vrot.lane.b32.xlu0 %v15318_v8, %s9000_s9  ;;  %v4572_v6 = vrot.slane %v19573_v31, 2  ;;  %v4574_v49 = vrot.slane %v19574_v38, 2  ;;  %v4566_v51 = vrot.slane %v19575_v7, 2  ;;  %v4567_v1 = vrot.slane %v19576_v44, 2  ;;  %v19583_v47 = vld [vmem:[#allocation312_spill] sm:$0xff]  ;;  %v19589_v44 = vld [vmem:[#allocation10_spill] sm:$0xff] }
 0x611   :  { %v4569_v12 = vrot.slane %v19577_v19, 2  ;;  %v4581_v11 = vrot.slane %v19578_v5, 2  ;;  %v4582_v37 = vrot.slane %v19579_v22, 2  ;;  %v4584_v53 = vrot.slane %v19580_v26, 2  ;;  %v19588_v7 = vld [vmem:[#allocation184_spill] sm:$0xff]  ;;  %v19590_v19 = vld [vmem:[#allocation11_spill] sm:$0xff] }
 0x612   :  { %v15396_v33 = vpack.i.bf16 %v4550_v58, %v4548_v20  ;;  %v15398_v4 = vpack.i.bf16 %v4565_v52, %v4563_v48  ;;  %v4558_v14 = vsel %vm584_vm1, %v4556_v10, %v4557_v34  ;;  %v4560_v18 = vsel %vm584_vm1, %v4557_v34, %v4559_v0  ;;  %v19584_v58 = vld [vmem:[#allocation313_spill] sm:$0xff] }
 0x613   :  { %7646 = vrot.lane.b32.xlu1 %v15342_v61, %s9000_s9  ;;  %v4573_v17 = vsel %vm584_vm1, %v4571_v2, %v4572_v6  ;;  %v4575_v27 = vsel %vm584_vm1, %v4572_v6, %v4574_v49  ;;  %v4568_v9 = vsel %vm584_vm1, %v4566_v51, %v4567_v1  ;;  %v4570_v56 = vsel %vm584_vm1, %v4567_v1, %v4569_v12  ;;  %v19586_v2 = vld [vmem:[#allocation121_spill] sm:$0xff]  ;;  %v19587_v6 = vld [vmem:[#allocation183_spill] sm:$0xff] }
 0x614   :  { %7661 = vrot.lane.b32.xlu0 %v15344_v55, %s9000_s9  ;;  %v4576_v15 = vrot.slane %v15021_v35, 2  ;;  %v4583_v43 = vsel %vm584_vm1, %v4581_v11, %v4582_v37  ;;  %v4585_v54 = vsel %vm584_vm1, %v4582_v37, %v4584_v53  ;;  %v4577_v59 = vrot.slane %v15023_v45, 2  ;;  %v19591_v11 = vld [vmem:[#allocation122_spill] sm:$0xff]  ;;  %v19592_v37 = vld [vmem:[#allocation315_spill] sm:$0xff]  ;;  %v19593_v53 = vld [vmem:[#allocation185_spill] sm:$0xff] }
 0x615   :  { %v4579_v23 = vrot.slane %v19581_v60, 2  ;;  %v4591_v3 = vrot.slane %v19582_v40, 2  ;;  %v4592_v24 = vrot.slane %v19583_v47, 2  ;;  %v15417_v20 = vpack.i.bf16 %v4560_v18, %v4558_v14  ;;  %v19594_v18 = vld [vmem:[#allocation123_spill] sm:$0xff]  ;;  %v19598_v40 = vld [vmem:[#allocation186_spill] sm:$0xff]  ;;  %v19599_v47 = vld [vmem:[#allocation188_spill] sm:$0xff] }
 0x616   :  { %v4594_v48 = vrot.slane %v19584_v58, 2  ;;  %v15420_v10 = vpack.i.bf16 %v4575_v27, %v4573_v17  ;;  %v15422_v34 = vpack.i.bf16 %v4570_v56, %v4568_v9  ;;  %v7710_v52 = vpack.i.bf16 %v4585_v54, %v4583_v43  ;;  %v19597_v60 = vld [vmem:[#allocation187_spill] sm:$0xff]  ;;  %v19600_v58 = vld [vmem:[#allocation316_spill] sm:$0xff] }
 0x617   :  { %7656 = vrot.lane.b32.xlu1 %v15363_v39, %s9000_s9  ;;  %v4578_v0 = vsel %vm584_vm1, %v4576_v15, %v4577_v59  ;;  %v4580_v28 = vsel %vm584_vm1, %v4577_v59, %v4579_v23  ;;  %v4586_v31 = vrot.slane %v19586_v2, 2  ;;  %v4587_v38 = vrot.slane %v19587_v6, 2  ;;  %v3994_v39 = vld [vmem:[#allocation2 + $0x188] sm:$0xff] }
 0x618   :  { %7671 = vrot.lane.b32.xlu0 %v15366_v41, %s9000_s9  ;;  %19585 = vst [vmem:[#allocation20_spill] sm:$0xff] %v15420_v10  ;;  %v4593_v49 = vsel %vm584_vm1, %v4591_v3, %v4592_v24  ;;  %v4589_v51 = vrot.slane %v19588_v7, 2  ;;  %v4601_v1 = vrot.slane %v19589_v44, 2  ;;  %v4602_v12 = vrot.slane %v19590_v19, 2  ;;  %v19620_v41 = vld [vmem:[#allocation320_spill] sm:$0xff] }
 0x619   :  { %v4595_v5 = vsel %vm584_vm1, %v4592_v24, %v4594_v48  ;;  %v4604_v22 = vrot.slane %v19591_v11, 2  ;;  %v4596_v26 = vrot.slane %v19592_v37, 2  ;;  %v4597_v14 = vrot.slane %v19593_v53, 2 }
 0x61a   :  { %v4599_v17 = vrot.slane %v19594_v18, 2  ;;  %v15444_v27 = vpack.i.bf16 %v4580_v28, %v4578_v0  ;;  %v15446_v9 = vpack.i.bf16 %v4595_v5, %v4593_v49  ;;  %v4588_v56 = vsel %vm584_vm1, %v4586_v31, %v4587_v38  ;;  %v19602_v31 = vld [vmem:[#allocation317_spill] sm:$0xff] }
 0x61b   :  { %7666 = vrot.lane.b32.xlu1 %v15370_v16, %s9000_s9  ;;  %v4590_v15 = vsel %vm584_vm1, %v4587_v38, %v4589_v51  ;;  %v4603_v43 = vsel %vm584_vm1, %v4601_v1, %v4602_v12  ;;  %v4605_v54 = vsel %vm584_vm1, %v4602_v12, %v4604_v22  ;;  %v4598_v59 = vsel %vm584_vm1, %v4596_v26, %v4597_v14  ;;  %v19603_v49 = vld [vmem:[#allocation125_spill] sm:$0xff]  ;;  %v19604_v51 = vld [vmem:[#allocation191_spill] sm:$0xff]  ;;  %v19607_v12 = vld [vmem:[#allocation190_spill] sm:$0xff] }
 0x61c   :  { %7681 = vrot.lane.b32.xlu0 %v15372_v62, %s9000_s9  ;;  %19595 = vst [vmem:[#allocation400_spill] sm:$0xff] %v15444_v27  ;;  %19596 = vst [vmem:[#allocation110_spill] sm:$0xff] %v15446_v9  ;;  %v4611_v23 = vrot.slane %v19597_v60, 2  ;;  %v4612_v3 = vrot.slane %v19598_v40, 2  ;;  %v4614_v24 = vrot.slane %v19599_v47, 2  ;;  %v4606_v48 = vrot.slane %v19600_v58, 2 }
 0x61d   :  { %v4600_v28 = vsel %vm584_vm1, %v4597_v14, %v4599_v17  ;;  %v4609_v38 = vrot.slane %v19602_v31, 2  ;;  %v4621_v7 = vrot.slane %v19603_v49, 2  ;;  %v4622_v44 = vrot.slane %v19604_v51, 2  ;;  %v19612_v47 = vld [vmem:[#allocation126_spill] sm:$0xff] }
 0x61e   :  { %v15466_v1 = vpack.i.bf16 %v4590_v15, %v4588_v56  ;;  %v15468_v19 = vpack.i.bf16 %v4605_v54, %v4603_v43  ;;  %v4624_v5 = vrot.slane %v19607_v12, 2  ;;  %v15471_v11 = vpack.i.bf16 %v4600_v28, %v4598_v59  ;;  %v19609_v56 = vld [vmem:[#allocation14_spill] sm:$0xff]  ;;  %v19610_v43 = vld [vmem:[#allocation15_spill] sm:$0xff] }
 0x61f   :  { %7676 = vrot.lane.b32.xlu1 %v15396_v33, %s9000_s9  ;;  %v4613_v22 = vsel %vm584_vm1, %v4611_v23, %v4612_v3  ;;  %v4615_v26 = vsel %vm584_vm1, %v4612_v3, %v4614_v24  ;;  %v4623_v17 = vsel %vm584_vm1, %v4621_v7, %v4622_v44  ;;  %v4616_v15 = vrot.slane %v19609_v56, 2  ;;  %v19611_v59 = vld [vmem:[#allocation318_spill] sm:$0xff]  ;;  %v19613_v24 = vld [vmem:[#allocation319_spill] sm:$0xff]  ;;  %v19616_v7 = vld [vmem:[#allocation196_spill] sm:$0xff] }
 0x620   :  { %7691 = vrot.lane.b32.xlu0 %v15398_v4, %s9000_s9  ;;  %19605 = vst [vmem:[#allocation21_spill] sm:$0xff] %v15466_v1  ;;  %19606 = vst [vmem:[#allocation324_spill] sm:$0xff] %v15468_v19  ;;  %v4617_v54 = vrot.slane %v19610_v43, 2  ;;  %v4619_v23 = vrot.slane %v19611_v59, 2  ;;  %v4631_v3 = vrot.slane %v19612_v47, 2  ;;  %v19614_v28 = vld [vmem:[#allocation127_spill] sm:$0xff]  ;;  %v4625_v12 = vsel %vm584_vm1, %v4622_v44, %v4624_v5 }
 0x621   :  { %19608 = vst [vmem:[#allocation409_spill] sm:$0xff] %v15471_v11  ;;  %v4634_v31 = vrot.slane %v19614_v28, 2  ;;  %v4627_v32 = vrot.slane %v19616_v7, 2  ;;  %v4629_v46 = vrot.slane %v19617_v21, 2  ;;  %v4642_v59 = vrot.slane %v19620_v41, 2  ;;  %v19622_v44 = vld [vmem:[#allocation128_spill] sm:$0xff] }
 0x622   :  { %v4618_v28 = vsel %vm584_vm1, %v4616_v15, %v4617_v54  ;;  %v4644_v5 = vrot.slane %v19622_v44, 2  ;;  %v4620_v21 = vsel %vm584_vm1, %v4617_v54, %v4619_v23  ;;  %v15512_v15 = vpop.permute.xlu0 %7471  ;;  %v19628_v23 = vld [vmem:[#allocation200_spill] sm:$0xff] }
 0x623   :  { %7686 = vrot.lane.b32.xlu1 %v15417_v20, %s9000_s9  ;;  %19625 = vst [vmem:[#allocation133_spill] sm:$0xff] %v15512_v15 }
 0x624   :  { %7701 = vrot.lane.b32.xlu0 %v15420_v10, %s9000_s9  ;;  %v19626_v10 = vld [vmem:[#allocation199_spill] sm:$0xff]  ;;  %v4645_v54 = vsel %vm584_vm1, %v4642_v59, %v4644_v5 }
 0x627   :  { %7696 = vrot.lane.b32.xlu1 %v15422_v34, %s9000_s9 }
 0x628   :  { %7711 = vrot.lane.b32.xlu0 %v7710_v52, %s9000_s9  ;;  %v19601_v52 = vld [vmem:[#allocation124_spill] sm:$0xff] }
 0x629   :  { %v4607_v0 = vrot.slane %v19601_v52, 2 }
 0x62b   :  { %7706 = vrot.lane.b32.xlu1 %v15444_v27, %s9000_s9  ;;  %v4608_v14 = vsel %vm584_vm1, %v4606_v48, %v4607_v0  ;;  %v4610_v18 = vsel %vm584_vm1, %v4607_v0, %v4609_v38  ;;  %v4632_v48 = vrot.slane %v19613_v24, 2  ;;  %v19615_v0 = vld [vmem:[#allocation194_spill] sm:$0xff]  ;;  %v15504_v27 = vpack.i.bf16 %v4625_v12, %v4623_v17 }
 0x62c   :  { %7721 = vrot.lane.b32.xlu0 %v15446_v9, %s9000_s9  ;;  %v4626_v38 = vrot.slane %v19615_v0, 2  ;;  %v15492_v9 = vpack.i.bf16 %v4615_v26, %v4613_v22  ;;  %v15498_v16 = vpack.i.bf16 %v4610_v18, %v4608_v14  ;;  %v4630_v14 = vsel %vm584_vm1, %v4627_v32, %v4629_v46  ;;  %v19624_v18 = vld [vmem:[#allocation197_spill] sm:$0xff]  ;;  %v19627_v17 = vld [vmem:[#allocation198_spill] sm:$0xff] }
 0x62d   :  { %19623 = vst [vmem:[#allocation205_spill] sm:$0xff] %v15504_v27  ;;  %v4633_v22 = vsel %vm584_vm1, %v4631_v3, %v4632_v48  ;;  %v4635_v26 = vsel %vm584_vm1, %v4632_v48, %v4634_v31  ;;  %v4639_v12 = vrot.slane %v19627_v17, 2  ;;  %v4651_v46 = vrot.slane %v19628_v23, 2  ;;  %v19630_v48 = vld [vmem:[#allocation398_spill] sm:$0xff] }
 0x62e   :  { %19618 = vst [vmem:[#allocation132_spill] sm:$0xff] %v15492_v9  ;;  %19621 = vst [vmem:[#allocation325_spill] sm:$0xff] %v15498_v16  ;;  %v4628_v55 = vsel %vm584_vm1, %v4626_v38, %v4627_v32  ;;  %v19629_v32 = vld [vmem:[#allocation18_spill] sm:$0xff]  ;;  %v4654_v31 = vrot.slane %v19630_v48, 2  ;;  %v15525_v38 = vpack.i.bf16 %v4620_v21, %v4618_v28 }
 0x62f   :  { %7716 = vrot.lane.b32.xlu1 %v15466_v1, %s9000_s9  ;;  %v19619_v1 = vld [vmem:[#allocation17_spill] sm:$0xff]  ;;  %v4652_v3 = vrot.slane %v19629_v32, 2  ;;  %v15529_v15 = vpack.i.bf16 %v4630_v14, %v4628_v55  ;;  %v3993_v17 = vld [vmem:[#allocation2 + $0x180] sm:$0xff] }
 0x630   :  { %7731 = vrot.lane.b32.xlu0 %v15468_v19, %s9000_s9  ;;  %v4641_v19 = vrot.slane %v19619_v1, 2  ;;  %19631 = vst [vmem:[#allocation207_spill] sm:$0xff] %v15525_v38  ;;  %v5051_v14 = vrot.slane %v3993_v17, 1 }
 0x631   :  { %19633 = vst [vmem:[#allocation401_spill] sm:$0xff] %v15529_v15  ;;  %v4653_v55 = vsel %vm584_vm1, %v4651_v46, %v4652_v3  ;;  %v4655_v21 = vsel %vm584_vm1, %v4652_v3, %v4654_v31  ;;  %v4656_v3 = vrot.slane %v15257_v42, 2  ;;  %v4657_v31 = vrot.slane %v15259_v57, 2 }
 0x632   :  { %v4643_v44 = vsel %vm584_vm1, %v4641_v19, %v4642_v59  ;;  %v15527_v19 = vpack.i.bf16 %v4635_v26, %v4633_v22  ;;  %v4646_v22 = vrot.slane %v15234_v30, 2  ;;  %v4647_v26 = vrot.slane %v15236_v29, 2 }
 0x633   :  { %7726 = vrot.lane.b32.xlu1 %v15471_v11, %s9000_s9  ;;  %v4636_v11 = vrot.slane %v19624_v18, 2  ;;  %v15533_v59 = vpack.i.bf16 %v4645_v54, %v4643_v44  ;;  %v5052_v44 = vrot.slane %v3994_v39, 1 }
 0x634   :  { %7741 = vrot.lane.b32.xlu0 %v15492_v9, %s9000_s9  ;;  %v4637_v9 = vrot.slane %v19626_v10, 2  ;;  %19632 = vst [vmem:[#allocation206_spill] sm:$0xff] %v15527_v19  ;;  %v15539_v28 = vpop.permute.xlu0 %7481  ;;  %v4648_v46 = vsel %vm584_vm1, %v4646_v22, %v4647_v26 }
 0x635   :  { %19634 = vst [vmem:[#allocation208_spill] sm:$0xff] %v15533_v59 }
 0x636   :  { %v4638_v5 = vsel %vm584_vm1, %v4636_v11, %v4637_v9  ;;  %v4649_v11 = vrot.slane %v15242_v50, 2  ;;  %v5053_v50 = vsel %vm231_vm0, %v5051_v14, %v5052_v44 }
 0x637   :  { %7736 = vrot.lane.b32.xlu1 %v15498_v16, %s9000_s9  ;;  %v3995_v16 = vld [vmem:[#allocation2 + $0x190] sm:$0x3] }
 0x638   :  { %7751 = vrot.lane.b32.xlu0 %v15504_v27, %s9000_s9  ;;  %v4640_v27 = vsel %vm584_vm1, %v4637_v9, %v4639_v12  ;;  %v5054_v54 = vrot.slane %v3995_v16, 1  ;;  %v15552_v12 = vpack.i.bf16 %v4655_v21, %v4653_v55  ;;  %v15567_v55 = vpack.i.bf16 %v3994_v39, %v3993_v17 }
 0x639   :  { %v15548_v9 = vpack.i.bf16 %v4640_v27, %v4638_v5  ;;  %v4650_v27 = vsel %vm584_vm1, %v4647_v26, %v4649_v11  ;;  %v4659_v5 = vrot.slane %v15263_v36, 2  ;;  %v5253_v26 = vrot.slane %v3993_v17, 2 }
 0x63a   :  { %19636 = vst [vmem:[#allocation402_spill] sm:$0xff] %v15552_v12  ;;  %v15575_v14 = vpack.i.bf16 %v4650_v27, %v4648_v46 }
 0x63b   :  { %7746 = vrot.lane.b32.xlu1 %v15525_v38, %s9000_s9  ;;  %19635 = vst [vmem:[#allocation22_spill] sm:$0xff] %v15548_v9  ;;  %v5055_v38 = vsel %vm231_vm0, %v5052_v44, %v5054_v54  ;;  %v15577_v44 = vld [vmem:[#allocation2 + $0x18] sm:$0xff]  ;;  %v15579_v54 = vld [vmem:[#allocation2 + $0x20] sm:$0xff] }
 0x63c   :  { %7761 = vrot.lane.b32.xlu0 %v15527_v19, %s9000_s9  ;;  %v15571_v21 = vpack.i.bf16 %v5055_v38, %v5053_v50  ;;  %19640 = vst [vmem:[#allocation411_spill] sm:$0xff] %v15575_v14  ;;  %19641 = vst [vmem:[#allocation134_spill] sm:$0xff] %v15577_v44  ;;  %v7790_v36 = vpack.i.bf16 %v15579_v54, %v15577_v44  ;;  %v5254_v38 = vrot.slane %v3994_v39, 2  ;;  %v5256_v50 = vrot.slane %v3995_v16, 2  ;;  %v15602_v39 = vld [vmem:[#allocation2 + $0x50] sm:$0xff] }
 0x63d   :  { %19642 = vst [vmem:[#allocation327_spill] sm:$0xff] %v15579_v54  ;;  %19649 = vst [vmem:[#allocation24_spill] sm:$0xff] %v15602_v39  ;;  %v15751_v54 = vld [vmem:[#allocation2 + $0x150] sm:$0xff] }
 0x63e   :  { %v5255_v46 = vsel %vm584_vm1, %v5253_v26, %v5254_v38  ;;  %v5257_v27 = vsel %vm584_vm1, %v5254_v38, %v5256_v50  ;;  %v15624_v38 = vld [vmem:[#allocation2 + $0x78] sm:$0xff]  ;;  %v15626_v50 = vld [vmem:[#allocation2 + $0x80] sm:$0xff]  ;;  %19688 = vst [vmem:[#allocation222_spill] sm:$0xff] %v15751_v54 }
 0x63f   :  { %7756 = vrot.lane.b32.xlu1 %v15529_v15, %s9000_s9  ;;  %v15596_v15 = vpack.i.bf16 %v5257_v27, %v5255_v46  ;;  %19654 = vst [vmem:[#allocation412_spill] sm:$0xff] %v15624_v38  ;;  %19655 = vst [vmem:[#allocation138_spill] sm:$0xff] %v15626_v50  ;;  %v15630_v46 = vpack.i.bf16 %v15626_v50, %v15624_v38  ;;  %v15648_v38 = vld [vmem:[#allocation2 + $0xa8] sm:$0xff]  ;;  %v15650_v50 = vld [vmem:[#allocation2 + $0xb0] sm:$0xff] }
 0x640   :  { %7771 = vrot.lane.b32.xlu0 %v15533_v59, %s9000_s9  ;;  %v15556_v48 = vpop.permute.xlu1 %7476  ;;  %v4658_v59 = vsel %vm584_vm1, %v4656_v3, %v4657_v31  ;;  %19660 = vst [vmem:[#allocation214_spill] sm:$0xff] %v15648_v38  ;;  %19661 = vst [vmem:[#allocation26_spill] sm:$0xff] %v15650_v50 }
 0x641   :  { %19637 = vst [vmem:[#allocation410_spill] sm:$0xff] %v15556_v48  ;;  %v15561_v19 = vpop.permute.xlu0 %7491  ;;  %19646 = vst [vmem:[#allocation210_spill] sm:$0xff] %v15596_v15 }
 0x642   :  { %19638 = vst [vmem:[#allocation23_spill] sm:$0xff] %v15561_v19 }
 0x643   :  { %7766 = vrot.lane.b32.xlu1 %v15548_v9, %s9000_s9 }
 0x644   :  { %7781 = vrot.lane.b32.xlu0 %v15552_v12, %s9000_s9  ;;  %v15573_v22 = vpop.permute.xlu1 %7486  ;;  %v4660_v12 = vsel %vm584_vm1, %v4657_v31, %v4659_v5  ;;  %v15600_v31 = vld [vmem:[#allocation2 + $0x48] sm:$0xff]  ;;  %v15616_v5 = vld [vmem:[#allocation2 + $0x38] sm:$0xff] }
 0x645   :  { %19639 = vst [vmem:[#allocation326_spill] sm:$0xff] %v15573_v22  ;;  %v15594_v17 = vpack.i.bf16 %v4660_v12, %v4658_v59  ;;  %19648 = vst [vmem:[#allocation212_spill] sm:$0xff] %v15600_v31  ;;  %v15606_v16 = vpack.i.bf16 %v15602_v39, %v15600_v31  ;;  %v15614_v12 = vld [vmem:[#allocation2 + $0x30] sm:$0xff]  ;;  %v15753_v22 = vld [vmem:[#allocation2 + $0x158] sm:$0xff] }
 0x646   :  { %v15583_v11 = vpop.permute.xlu0 %7501  ;;  %19651 = vst [vmem:[#allocation135_spill] sm:$0xff] %v15614_v12  ;;  %19652 = vst [vmem:[#allocation268_spill] sm:$0xff] %v15616_v5  ;;  %v15662_v31 = vld [vmem:[#allocation2 + $0x90] sm:$0xff] }
 0x647   :  { %19643 = vst [vmem:[#allocation209_spill] sm:$0xff] %v15583_v11  ;;  %7776 = vrot.lane.b32.xlu1 %v15575_v14, %s9000_s9  ;;  %19645 = vst [vmem:[#allocation211_spill] sm:$0xff] %v15594_v17  ;;  %v15640_v14 = vld [vmem:[#allocation2 + $0x68] sm:$0xff]  ;;  %v4048_v11 = vld [vmem:[#allocation2 + $0x338] sm:$0xff] }
 0x648   :  { %7791 = vrot.lane.b32.xlu0 %v7790_v36, %s9002_s14  ;;  %v15592_v9 = vpop.permute.xlu1 %7496  ;;  %v15620_v36 = vpack.i.bf16 %v15616_v5, %v15614_v12  ;;  %19658 = vst [vmem:[#allocation140_spill] sm:$0xff] %v15640_v14  ;;  %19664 = vst [vmem:[#allocation27_spill] sm:$0xff] %v15662_v31 }
 0x649   :  { %19644 = vst [vmem:[#allocation136_spill] sm:$0xff] %v15592_v9  ;;  %19689 = vst [vmem:[#allocation30_spill] sm:$0xff] %v15753_v22 }
 0x64a   :  { %v15598_v3 = vpop.permute.xlu0 %7511 }
 0x64b   :  { %19647 = vst [vmem:[#allocation25_spill] sm:$0xff] %v15598_v3  ;;  %7786 = vrot.lane.b32.xlu1 %v15594_v17, %s9000_s9  ;;  %v15638_v17 = vld [vmem:[#allocation2 + $0x60] sm:$0xff]  ;;  %v15664_v3 = vld [vmem:[#allocation2 + $0x98] sm:$0xff]  ;;  %s9009_s9 = smov 64  }
 0x64c   :  { %7801 = vrot.lane.b32.xlu0 %v15606_v16, %s9002_s14  ;;  %v15612_v59 = vpop.permute.xlu1 %7506  ;;  %19657 = vst [vmem:[#allocation213_spill] sm:$0xff] %v15638_v17  ;;  %v15644_v15 = vpack.i.bf16 %v15640_v14, %v15638_v17  ;;  %19665 = vst [vmem:[#allocation137_spill] sm:$0xff] %v15664_v3 }
 0x64d   :  { %19650 = vst [vmem:[#allocation403_spill] sm:$0xff] %v15612_v59  ;;  %v15654_v59 = vpack.i.bf16 %v15650_v50, %v15648_v38  ;;  %v15672_v38 = vld [vmem:[#allocation2 + $0xd8] sm:$0xff]  ;;  %v15674_v50 = vld [vmem:[#allocation2 + $0xe0] sm:$0xff] }
 0x64e   :  { %v15622_v26 = vpop.permute.xlu0 %7521  ;;  %19667 = vst [vmem:[#allocation330_spill] sm:$0xff] %v15672_v38  ;;  %19668 = vst [vmem:[#allocation139_spill] sm:$0xff] %v15674_v50  ;;  %v15678_v9 = vpack.i.bf16 %v15674_v50, %v15672_v38  ;;  %v15696_v38 = vld [vmem:[#allocation2 + $0x108] sm:$0xff]  ;;  %v15698_v50 = vld [vmem:[#allocation2 + $0x110] sm:$0xff] }
 0x64f   :  { %19653 = vst [vmem:[#allocation328_spill] sm:$0xff] %v15622_v26  ;;  %7796 = vrot.lane.b32.xlu1 %v15620_v36, %s9002_s14  ;;  %19662 = vst [vmem:[#allocation216_spill] sm:$0xff] %v15654_v59  ;;  %v15702_v14 = vpack.i.bf16 %v15698_v50, %v15696_v38 }
 0x650   :  { %7811 = vrot.lane.b32.xlu0 %v15630_v46, %s9002_s14  ;;  %19669 = vst [vmem:[#allocation142_spill] sm:$0xff] %v15678_v9  ;;  %19675 = vst [vmem:[#allocation28_spill] sm:$0xff] %v15696_v38  ;;  %v15720_v38 = vld [vmem:[#allocation2 + $0x138] sm:$0xff] }
 0x651   :  { %v15636_v27 = vpop.permute.xlu1 %7516  ;;  %19676 = vst [vmem:[#allocation220_spill] sm:$0xff] %v15698_v50  ;;  %19681 = vst [vmem:[#allocation332_spill] sm:$0xff] %v15720_v38  ;;  %v15722_v50 = vld [vmem:[#allocation2 + $0x140] sm:$0xff] }
 0x652   :  { %19656 = vst [vmem:[#allocation329_spill] sm:$0xff] %v15636_v27  ;;  %v15646_v26 = vpop.permute.xlu0 %7531  ;;  %19682 = vst [vmem:[#allocation143_spill] sm:$0xff] %v15722_v50 }
 0x653   :  { %19659 = vst [vmem:[#allocation215_spill] sm:$0xff] %v15646_v26  ;;  %7806 = vrot.lane.b32.xlu1 %v15644_v15, %s9002_s14  ;;  %v15668_v26 = vpack.i.bf16 %v15664_v3, %v15662_v31  ;;  %v15686_v31 = vld [vmem:[#allocation2 + $0xc0] sm:$0xff]  ;;  %v15688_v3 = vld [vmem:[#allocation2 + $0xc8] sm:$0xff] }
 0x654   :  { %7821 = vrot.lane.b32.xlu0 %v15654_v59, %s9002_s14  ;;  %19671 = vst [vmem:[#allocation217_spill] sm:$0xff] %v15686_v31  ;;  %19672 = vst [vmem:[#allocation144_spill] sm:$0xff] %v15688_v3 }
 0x655   :  { %v15660_v27 = vpop.permute.xlu1 %7526 }
 0x656   :  { %19663 = vst [vmem:[#allocation269_spill] sm:$0xff] %v15660_v27  ;;  %v15670_v39 = vpop.permute.xlu0 %7541 }
 0x657   :  { %19666 = vst [vmem:[#allocation270_spill] sm:$0xff] %v15670_v39  ;;  %7816 = vrot.lane.b32.xlu1 %v15668_v26, %s9002_s14  ;;  %v15692_v39 = vpack.i.bf16 %v15688_v3, %v15686_v31  ;;  %v15712_v31 = vld [vmem:[#allocation2 + $0xf8] sm:$0xff] }
 0x658   :  { %7831 = vrot.lane.b32.xlu0 %v15678_v9, %s9002_s14  ;;  %19679 = vst [vmem:[#allocation141_spill] sm:$0xff] %v15712_v31 }
 0x659   :  { %v15684_v27 = vpop.permute.xlu1 %7536  ;;  %19673 = vst [vmem:[#allocation219_spill] sm:$0xff] %v15692_v39 }
 0x65a   :  { %19670 = vst [vmem:[#allocation331_spill] sm:$0xff] %v15684_v27  ;;  %v15694_v17 = vpop.permute.xlu0 %7551  ;;  %v15710_v27 = vld [vmem:[#allocation2 + $0xf0] sm:$0xff] }
 0x65b   :  { %19674 = vst [vmem:[#allocation218_spill] sm:$0xff] %v15694_v17  ;;  %7826 = vrot.lane.b32.xlu1 %v15692_v39, %s9002_s14  ;;  %19678 = vst [vmem:[#allocation29_spill] sm:$0xff] %v15710_v27  ;;  %v15716_v17 = vpack.i.bf16 %v15712_v31, %v15710_v27  ;;  %v15726_v39 = vpack.i.bf16 %v15722_v50, %v15720_v38  ;;  %v15734_v27 = vld [vmem:[#allocation2 + $0x120] sm:$0xff]  ;;  %v15736_v31 = vld [vmem:[#allocation2 + $0x128] sm:$0xff]  ;;  %v7860_v38 = vpack.i.bf16 %v15023_v45, %v15021_v35 }
 0x65c   :  { %7841 = vrot.lane.b32.xlu0 %v15702_v14, %s9002_s14  ;;  %19684 = vst [vmem:[#allocation333_spill] sm:$0xff] %v15734_v27  ;;  %19685 = vst [vmem:[#allocation221_spill] sm:$0xff] %v15736_v31  ;;  %v4047_v50 = vld [vmem:[#allocation2 + $0x330] sm:$0xff]  ;;  %v7870_v45 = vpack.i.bf16 %v19587_v6, %v19586_v2  ;;  %v7880_v2 = vpack.i.bf16 %v19593_v53, %v19592_v37 }
 0x65d   :  { %v15708_v9 = vpop.permute.xlu1 %7546  ;;  %v15763_v35 = vpack.i.bf16 %v4048_v11, %v4047_v50 }
 0x65e   :  { %19677 = vst [vmem:[#allocation271_spill] sm:$0xff] %v15708_v9  ;;  %v15718_v3 = vpop.permute.xlu0 %7561 }
 0x65f   :  { %19680 = vst [vmem:[#allocation272_spill] sm:$0xff] %v15718_v3  ;;  %7836 = vrot.lane.b32.xlu1 %v15716_v17, %s9002_s14  ;;  %v15740_v3 = vpack.i.bf16 %v15736_v31, %v15734_v27  ;;  %v15757_v27 = vpack.i.bf16 %v15753_v22, %v15751_v54  ;;  %19691 = vst [vmem:[#allocation273_spill] sm:$0xff] %v15763_v35  ;;  %v5258_v22 = vrot.slane %v4047_v50, 2 }
 0x660   :  { %7851 = vrot.lane.b32.xlu0 %v15726_v39, %s9002_s14 }
 0x661   :  { %v15732_v9 = vpop.permute.xlu1 %7556 }
 0x662   :  { %19683 = vst [vmem:[#allocation146_spill] sm:$0xff] %v15732_v9  ;;  %v15742_v44 = vpop.permute.xlu0 %7571 }
 0x663   :  { %19686 = vst [vmem:[#allocation148_spill] sm:$0xff] %v15742_v44  ;;  %7846 = vrot.lane.b32.xlu1 %v15740_v3, %s9002_s14  ;;  %v4049_v44 = vld [vmem:[#allocation2 + $0x340] sm:$0x3] }
 0x664   :  { %7861 = vrot.lane.b32.xlu0 %v7860_v38, %s9002_s14  ;;  %v5056_v38 = vrot.slane %v4047_v50, 1  ;;  %v5059_v12 = vrot.slane %v4049_v44, 1  ;;  %v8911_v50 = vld [vmem:[#allocation2 + $0x1e0] sm:$0xff] }
 0x665   :  { %v15749_v9 = vpop.permute.xlu1 %7566 }
 0x666   :  { %19687 = vst [vmem:[#allocation223_spill] sm:$0xff] %v15749_v9  ;;  %v15759_v31 = vpop.permute.xlu0 %7581  ;;  %v5057_v9 = vrot.slane %v4048_v11, 1 }
 0x667   :  { %19690 = vst [vmem:[#allocation224_spill] sm:$0xff] %v15759_v31  ;;  %7856 = vrot.lane.b32.xlu1 %v15757_v27, %s9002_s14  ;;  %v5259_v31 = vrot.slane %v4048_v11, 2  ;;  %v8914_v11 = vld [vmem:[#allocation2 + $0x218] sm:$0xff] }
 0x668   :  { %7871 = vrot.lane.b32.xlu0 %v7870_v45, %s9002_s14  ;;  %v5058_v54 = vsel %vm231_vm0, %v5056_v38, %v5057_v9  ;;  %v5060_v6 = vsel %vm231_vm0, %v5057_v9, %v5059_v12  ;;  %v5261_v45 = vrot.slane %v4049_v44, 2  ;;  %v7890_v9 = vpack.i.bf16 %v19601_v52, %v19600_v58  ;;  %v8913_v44 = vld [vmem:[#allocation2 + $0x210] sm:$0xff] }
 0x669   :  { %v15768_v5 = vpop.permute.xlu1 %7576  ;;  %v15778_v59 = vpack.i.bf16 %v5060_v6, %v5058_v54  ;;  %v7895_v52 = vpack.i.bf16 %v19598_v40, %v19597_v60  ;;  %v7915_v40 = vpack.i.bf16 %v19613_v24, %v19612_v47 }
 0x66a   :  { %19692 = vst [vmem:[#allocation31_spill] sm:$0xff] %v15768_v5  ;;  %v15771_v19 = vpop.permute.xlu0 %7591  ;;  %v5260_v5 = vsel %vm584_vm1, %v5258_v22, %v5259_v31  ;;  %v5262_v37 = vsel %vm584_vm1, %v5259_v31, %v5261_v45  ;;  %v7900_v31 = vpack.i.bf16 %v19610_v43, %v19609_v56  ;;  %v7905_v43 = vpack.i.bf16 %v19604_v51, %v19603_v49 }
 0x66b   :  { %19693 = vst [vmem:[#allocation145_spill] sm:$0xff] %v15771_v19  ;;  %7866 = vrot.lane.b32.xlu1 %v15567_v55, %s9002_s14  ;;  %19694 = vst [vmem:[#allocation274_spill] sm:$0xff] %v15778_v59  ;;  %v8912_v19 = vld [vmem:[#allocation2 + $0x1e8] sm:$0xff]  ;;  %v15791_v54 = vpack.i.bf16 %v5262_v37, %v5260_v5  ;;  %v7920_v45 = vpack.i.bf16 %v19626_v10, %v19624_v18  ;;  %v7925_v10 = vpack.i.bf16 %v19620_v41, %v19619_v1  ;;  %v19708_v41 = vld [vmem:[#allocation117_spill] sm:$0xff] }
 0x66c   :  { %7881 = vrot.lane.b32.xlu0 %v7880_v2, %s9002_s14  ;;  %v15784_v48 = vpack.i.bf16 %v8912_v19, %v8911_v50  ;;  %v15798_v19 = vpack.i.bf16 %v8914_v11, %v8913_v44  ;;  %v7910_v2 = vpack.i.bf16 %v19616_v7, %v19615_v0  ;;  %v7930_v7 = vpack.i.bf16 %v15236_v29, %v15234_v30  ;;  %v19713_v50 = vld [vmem:[#allocation396_spill] sm:$0xff]  ;;  %v19715_v44 = vld [vmem:[#allocation309_spill] sm:$0xff]  ;;  %v19716_v11 = vld [vmem:[#allocation118_spill] sm:$0xff] }
 0x66d   :  { %v15782_v38 = vpop.permute.xlu1 %7586  ;;  %19697 = vst [vmem:[#allocation150_spill] sm:$0xff] %v15791_v54  ;;  %v7940_v18 = vpack.i.bf16 %v15259_v57, %v15257_v42  ;;  %v7935_v30 = vpack.i.bf16 %v19629_v32, %v19628_v23  ;;  %v19710_v42 = vld [vmem:[#allocation367_spill] sm:$0xff]  ;;  %v19712_v32 = vld [vmem:[#allocation308_spill] sm:$0xff] }
 0x66e   :  { %19695 = vst [vmem:[#allocation334_spill] sm:$0xff] %v15782_v38  ;;  %v15787_v53 = vpop.permute.xlu0 %7601  ;;  %19699 = vst [vmem:[#allocation225_spill] sm:$0xff] %v15798_v19  ;;  %v19728_v38 = vld [vmem:[#allocation314_spill] sm:$0xff] }
 0x66f   :  { %19696 = vst [vmem:[#allocation147_spill] sm:$0xff] %v15787_v53  ;;  %7876 = vrot.lane.b32.xlu1 %v15784_v48, %s9002_s14 }
 0x670   :  { %7891 = vrot.lane.b32.xlu0 %v7890_v9, %s9002_s14 }
 0x671   :  { %v15796_v22 = vpop.permute.xlu1 %7596 }
 0x672   :  { %19698 = vst [vmem:[#allocation335_spill] sm:$0xff] %v15796_v22  ;;  %v15800_v12 = vpop.permute.xlu0 %7611  ;;  %v19736_v22 = vld [vmem:[#allocation189_spill] sm:$0xff] }
 0x673   :  { %19700 = vst [vmem:[#allocation152_spill] sm:$0xff] %v15800_v12  ;;  %7886 = vrot.lane.b32.xlu1 %v15798_v19, %s9002_s14  ;;  %v19732_v12 = vld [vmem:[#allocation12_spill] sm:$0xff]  ;;  %v19851_v19 = vld [vmem:[#allocation330_spill] sm:$0xff] }
 0x674   :  { %7901 = vrot.lane.b32.xlu0 %v7900_v31, %s9002_s14 }
 0x675   :  { %v15807_v58 = vpop.permute.xlu1 %7606 }
 0x676   :  { %19701 = vst [vmem:[#allocation227_spill] sm:$0xff] %v15807_v58  ;;  %v15811_v5 = vpop.permute.xlu0 %7621 }
 0x677   :  { %19702 = vst [vmem:[#allocation226_spill] sm:$0xff] %v15811_v5  ;;  %7896 = vrot.lane.b32.xlu1 %v7895_v52, %s9002_s14 }
 0x678   :  { %7911 = vrot.lane.b32.xlu0 %v7910_v2, %s9002_s14  ;;  %v19719_v2 = vld [vmem:[#allocation368_spill] sm:$0xff] }
 0x679   :  { %v15817_v56 = vpop.permute.xlu1 %7616 }
 0x67a   :  { %19703 = vst [vmem:[#allocation32_spill] sm:$0xff] %v15817_v56  ;;  %v15821_v6 = vpop.permute.xlu0 %7631  ;;  %v19731_v56 = vld [vmem:[#allocation120_spill] sm:$0xff] }
 0x67b   :  { %7906 = vrot.lane.b32.xlu1 %v7905_v43, %s9002_s14  ;;  %v19720_v43 = vld [vmem:[#allocation180_spill] sm:$0xff] }
 0x67c   :  { %7921 = vrot.lane.b32.xlu0 %v7920_v45, %s9002_s14 }
 0x67d   :  { %v15827_v60 = vpop.permute.xlu1 %7626 }
 0x67e   :  { %19704 = vst [vmem:[#allocation228_spill] sm:$0xff] %v15827_v60  ;;  %v15831_v0 = vpop.permute.xlu0 %7641 }
 0x67f   :  { %7916 = vrot.lane.b32.xlu1 %v7915_v40, %s9002_s14 }
 0x680   :  { %7931 = vrot.lane.b32.xlu0 %v7930_v7, %s9002_s14  ;;  %v19723_v7 = vld [vmem:[#allocation397_spill] sm:$0xff] }
 0x681   :  { %v15837_v49 = vpop.permute.xlu1 %7636 }
 0x682   :  { %v15841_v51 = vpop.permute.xlu0 %7651 }
 0x683   :  { %19705 = vst [vmem:[#allocation275_spill] sm:$0xff] %v15841_v51  ;;  %7926 = vrot.lane.b32.xlu1 %v7925_v10, %s9002_s14  ;;  %v19724_v10 = vld [vmem:[#allocation181_spill] sm:$0xff] }
 0x684   :  { %7941 = vrot.lane.b32.xlu0 %v7940_v18, %s9002_s14 }
 0x685   :  { %v15847_v47 = vpop.permute.xlu1 %7646 }
 0x686   :  { %19706 = vst [vmem:[#allocation33_spill] sm:$0xff] %v15847_v47  ;;  %v15851_v29 = vpop.permute.xlu0 %7661 }
 0x687   :  { %19707 = vst [vmem:[#allocation149_spill] sm:$0xff] %v15851_v29  ;;  %7936 = vrot.lane.b32.xlu1 %v7935_v30, %s9002_s14 }
 0x688   :  { %7951 = vrot.lane.b32.xlu0 %v19708_v41, %s9004_s1  ;;  %v19727_v41 = vld [vmem:[#allocation311_spill] sm:$0xff] }
 0x689   :  { %v15856_v1 = vpop.permute.xlu1 %7656 }
 0x68a   :  { %19709 = vst [vmem:[#allocation276_spill] sm:$0xff] %v15856_v1  ;;  %v15858_v24 = vpop.permute.xlu0 %7671 }
 0x68b   :  { %7946 = vrot.lane.b32.xlu1 %v15763_v35, %s9002_s14  ;;  %v19743_v35 = vld [vmem:[#allocation321_spill] sm:$0xff] }
 0x68c   :  { %7961 = vrot.lane.b32.xlu0 %v19710_v42, %s9004_s1 }
 0x68d   :  { %v15864_v57 = vpop.permute.xlu1 %7666 }
 0x68e   :  { %19711 = vst [vmem:[#allocation336_spill] sm:$0xff] %v15864_v57  ;;  %v15866_v23 = vpop.permute.xlu0 %7681  ;;  %v19751_v57 = vld [vmem:[#allocation108_spill] sm:$0xff] }
 0x68f   :  { %7956 = vrot.lane.b32.xlu1 %v19712_v32, %s9004_s1 }
 0x690   :  { %7971 = vrot.lane.b32.xlu0 %v19713_v50, %s9004_s1 }
 0x691   :  { %v15872_v37 = vpop.permute.xlu1 %7676 }
 0x692   :  { %v15874_v9 = vpop.permute.xlu0 %7691 }
 0x693   :  { %19714 = vst [vmem:[#allocation151_spill] sm:$0xff] %v15874_v9  ;;  %7966 = vrot.lane.b32.xlu1 %v19715_v44, %s9004_s1 }
 0x694   :  { %7981 = vrot.lane.b32.xlu0 %v19716_v11, %s9004_s1 }
 0x695   :  { %v15880_v31 = vpop.permute.xlu1 %7686 }
 0x696   :  { %19717 = vst [vmem:[#allocation34_spill] sm:$0xff] %v15880_v31  ;;  %v15882_v52 = vpop.permute.xlu0 %7701 }
 0x697   :  { %19718 = vst [vmem:[#allocation337_spill] sm:$0xff] %v15882_v52  ;;  %7976 = vrot.lane.b32.xlu1 %v19719_v2, %s9004_s1 }
 0x698   :  { %7991 = vrot.lane.b32.xlu0 %v19720_v43, %s9004_s1 }
 0x699   :  { %v15888_v45 = vpop.permute.xlu1 %7696 }
 0x69a   :  { %19721 = vst [vmem:[#allocation229_spill] sm:$0xff] %v15888_v45  ;;  %v15890_v40 = vpop.permute.xlu0 %7711 }
 0x69b   :  { %19722 = vst [vmem:[#allocation35_spill] sm:$0xff] %v15890_v40  ;;  %7986 = vrot.lane.b32.xlu1 %v19723_v7, %s9004_s1 }
 0x69c   :  { %8001 = vrot.lane.b32.xlu0 %v19724_v10, %s9004_s1 }
 0x69d   :  { %v15896_v18 = vpop.permute.xlu1 %7706 }
 0x69e   :  { %19725 = vst [vmem:[#allocation231_spill] sm:$0xff] %v15896_v18  ;;  %v15898_v30 = vpop.permute.xlu0 %7721  ;;  %v19747_v18 = vld [vmem:[#allocation19_spill] sm:$0xff] }
 0x69f   :  { %19726 = vst [vmem:[#allocation230_spill] sm:$0xff] %v15898_v30  ;;  %7996 = vrot.lane.b32.xlu1 %v19727_v41, %s9004_s1  ;;  %v19735_v30 = vld [vmem:[#allocation182_spill] sm:$0xff] }
 0x6a0   :  { %8011 = vrot.lane.b32.xlu0 %v19728_v38, %s9004_s1 }
 0x6a1   :  { %v15904_v60 = vpop.permute.xlu1 %7716 }
 0x6a2   :  { %19729 = vst [vmem:[#allocation404_spill] sm:$0xff] %v15904_v60  ;;  %v15906_v5 = vpop.permute.xlu0 %7731 }
 0x6a3   :  { %19730 = vst [vmem:[#allocation232_spill] sm:$0xff] %v15906_v5  ;;  %8006 = vrot.lane.b32.xlu1 %v19731_v56, %s9004_s1  ;;  %v19739_v5 = vld [vmem:[#allocation193_spill] sm:$0xff] }
 0x6a4   :  { %8021 = vrot.lane.b32.xlu0 %v19732_v12, %s9004_s1 }
 0x6a5   :  { %v15912_v58 = vpop.permute.xlu1 %7726 }
 0x6a6   :  { %19733 = vst [vmem:[#allocation37_spill] sm:$0xff] %v15912_v58  ;;  %v15914_v53 = vpop.permute.xlu0 %7741 }
 0x6a7   :  { %19734 = vst [vmem:[#allocation405_spill] sm:$0xff] %v15914_v53  ;;  %8016 = vrot.lane.b32.xlu1 %v19735_v30, %s9004_s1  ;;  %v19742_v53 = vld [vmem:[#allocation13_spill] sm:$0xff] }
 0x6a8   :  { %8031 = vrot.lane.b32.xlu0 %v19736_v22, %s9004_s1 }
 0x6a9   :  { %v15920_v54 = vpop.permute.xlu1 %7736 }
 0x6aa   :  { %19737 = vst [vmem:[#allocation413_spill] sm:$0xff] %v15920_v54  ;;  %v15922_v60 = vpop.permute.xlu0 %7751 }
 0x6ab   :  { %19738 = vst [vmem:[#allocation278_spill] sm:$0xff] %v15922_v60  ;;  %8026 = vrot.lane.b32.xlu1 %v15571_v21, %s9004_s1  ;;  %v19746_v60 = vld [vmem:[#allocation192_spill] sm:$0xff] }
 0x6ac   :  { %8041 = vrot.lane.b32.xlu0 %v19739_v5, %s9004_s1 }
 0x6ad   :  { %v15928_v59 = vpop.permute.xlu1 %7746 }
 0x6ae   :  { %19740 = vst [vmem:[#allocation154_spill] sm:$0xff] %v15928_v59  ;;  %v15930_v58 = vpop.permute.xlu0 %7761 }
 0x6af   :  { %19741 = vst [vmem:[#allocation414_spill] sm:$0xff] %v15930_v58  ;;  %8036 = vrot.lane.b32.xlu1 %v19742_v53, %s9004_s1  ;;  %v19750_v58 = vld [vmem:[#allocation195_spill] sm:$0xff] }
 0x6b0   :  { %8051 = vrot.lane.b32.xlu0 %v19743_v35, %s9004_s1  ;;  %v19807_v35 = vld [vmem:[#allocation326_spill] sm:$0xff] }
 0x6b1   :  { %v15936_v22 = vpop.permute.xlu1 %7756 }
 0x6b2   :  { %19744 = vst [vmem:[#allocation38_spill] sm:$0xff] %v15936_v22  ;;  %v15938_v54 = vpop.permute.xlu0 %7771 }
 0x6b3   :  { %19745 = vst [vmem:[#allocation339_spill] sm:$0xff] %v15938_v54  ;;  %8046 = vrot.lane.b32.xlu1 %v19746_v60, %s9004_s1  ;;  %v19753_v54 = vld [vmem:[#allocation129_spill] sm:$0xff] }
 0x6b4   :  { %8061 = vrot.lane.b32.xlu0 %v19747_v18, %s9004_s1 }
 0x6b5   :  { %v15944_v40 = vpop.permute.xlu1 %7766 }
 0x6b6   :  { %19748 = vst [vmem:[#allocation369_spill] sm:$0xff] %v15944_v40  ;;  %v15946_v59 = vpop.permute.xlu0 %7781 }
 0x6b7   :  { %19749 = vst [vmem:[#allocation39_spill] sm:$0xff] %v15946_v59  ;;  %8056 = vrot.lane.b32.xlu1 %v19750_v58, %s9004_s1  ;;  %v19756_v59 = vld [vmem:[#allocation322_spill] sm:$0xff] }
 0x6b8   :  { %8071 = vrot.lane.b32.xlu0 %v19751_v57, %s9004_s1 }
 0x6b9   :  { %v15952_v52 = vpop.permute.xlu1 %7776 }
 0x6ba   :  { %19752 = vst [vmem:[#allocation233_spill] sm:$0xff] %v15952_v52  ;;  %v15954_v22 = vpop.permute.xlu0 %7791 }
 0x6bb   :  { %8066 = vrot.lane.b32.xlu1 %v19753_v54, %s9004_s1  ;;  %v19758_v54 = vld [vmem:[#allocation130_spill] sm:$0xff] }
 0x6bc   :  { %8081 = vrot.lane.b32.xlu0 %v15267_v63, %s9004_s1 }
 0x6bd   :  { %v15960_v18 = vpop.permute.xlu1 %7786 }
 0x6be   :  { %19754 = vst [vmem:[#allocation370_spill] sm:$0xff] %v15960_v18  ;;  %v15962_v40 = vpop.permute.xlu0 %7801 }
 0x6bf   :  { %19755 = vst [vmem:[#allocation36_spill] sm:$0xff] %v15962_v40  ;;  %8076 = vrot.lane.b32.xlu1 %v19756_v59, %s9004_s1  ;;  %v19867_v40 = vld [vmem:[#allocation30_spill] sm:$0xff] }
 0x6c0   :  { %8091 = vrot.lane.b32.xlu0 %v15396_v33, %s9006_s2 }
 0x6c1   :  { %v15968_v52 = vpop.permute.xlu1 %7796 }
 0x6c2   :  { %v15970_v57 = vpop.permute.xlu0 %7811 }
 0x6c3   :  { %19757 = vst [vmem:[#allocation234_spill] sm:$0xff] %v15970_v57  ;;  %8086 = vrot.lane.b32.xlu1 %v19758_v54, %s9004_s1  ;;  %v7489_v57 = vunpack.i.h.bf16 %v19807_v35  ;;  %v19853_v54 = vld [vmem:[#allocation219_spill] sm:$0xff] }
 0x6c4   :  { %8101 = vrot.lane.b32.xlu0 %v15716_v17, %s9007_s3 }
 0x6c5   :  { %v15976_v18 = vpop.permute.xlu1 %7806 }
 0x6c6   :  { %19759 = vst [vmem:[#allocation279_spill] sm:$0xff] %v15976_v18  ;;  %v15978_v29 = vpop.permute.xlu0 %7821  ;;  %v16300_v18 = vld [vmem:[#allocation2 + $0x1f8] sm:$0xff] }
 0x6c7   :  { %19760 = vst [vmem:[#allocation277_spill] sm:$0xff] %v15978_v29  ;;  %8096 = vrot.lane.b32.xlu1 %v15316_v25, %s9006_s2 }
 0x6c8   :  { %8111 = vrot.lane.b32.xlu0 %v19727_v41, %s9008_s17 }
 0x6c9   :  { %v15984_v58 = vpop.permute.xlu1 %7816 }
 0x6ca   :  { %19761 = vst [vmem:[#allocation153_spill] sm:$0xff] %v15984_v58  ;;  %v15986_v1 = vpop.permute.xlu0 %7831 }
 0x6cb   :  { %8106 = vrot.lane.b32.xlu1 %v15620_v36, %s9007_s3 }
 0x6cc   :  { %8121 = vrot.lane.b32.xlu0 %v15372_v62, %s9009_s9 }
 0x6cd   :  { %v15992_v17 = vpop.permute.xlu1 %7826 }
 0x6ce   :  { %19762 = vst [vmem:[#allocation280_spill] sm:$0xff] %v15992_v17  ;;  %v15994_v29 = vpop.permute.xlu0 %7841 }
 0x6cf   :  { %8116 = vrot.lane.b32.xlu1 %v19712_v32, %s9008_s17 }
 0x6d0   :  { %8131 = vrot.lane.b32.xlu0 %v15372_v62, %s9006_s2 }
 0x6d1   :  { %v16000_v25 = vpop.permute.xlu1 %7836 }
 0x6d2   :  { %v16002_v41 = vpop.permute.xlu0 %7851 }
 0x6d3   :  { %19763 = vst [vmem:[#allocation340_spill] sm:$0xff] %v16002_v41  ;;  %8126 = vrot.lane.b32.xlu1 %v15311_v13, %s9009_s9 }
 0x6d4   :  { %8141 = vrot.lane.b32.xlu0 %v15702_v14, %s9007_s3 }
 0x6d5   :  { %v16008_v36 = vpop.permute.xlu1 %7846 }
 0x6d6   :  { %19764 = vst [vmem:[#allocation338_spill] sm:$0xff] %v16008_v36  ;;  %v16010_v17 = vpop.permute.xlu0 %7861  ;;  %v19854_v36 = vld [vmem:[#allocation221_spill] sm:$0xff] }
 0x6d7   :  { %19765 = vst [vmem:[#allocation41_spill] sm:$0xff] %v16010_v17  ;;  %8136 = vrot.lane.b32.xlu1 %v15311_v13, %s9006_s2 }
 0x6d8   :  { %8151 = vrot.lane.b32.xlu0 %v19724_v10, %s9008_s17 }
 0x6d9   :  { %v16016_v62 = vpop.permute.xlu1 %7856 }
 0x6da   :  { %19766 = vst [vmem:[#allocation341_spill] sm:$0xff] %v16016_v62  ;;  %v16018_v32 = vpop.permute.xlu0 %7871 }
 0x6db   :  { %19767 = vst [vmem:[#allocation371_spill] sm:$0xff] %v16018_v32  ;;  %8146 = vrot.lane.b32.xlu1 %v15606_v16, %s9007_s3 }
 0x6dc   :  { %8161 = vrot.lane.b32.xlu0 %v15417_v20, %s9009_s9 }
 0x6dd   :  { %v16024_v14 = vpop.permute.xlu1 %7866 }
 0x6de   :  { %19768 = vst [vmem:[#allocation43_spill] sm:$0xff] %v16024_v14  ;;  %v16026_v58 = vpop.permute.xlu0 %7881  ;;  %v19799_v14 = vld [vmem:[#allocation410_spill] sm:$0xff] }
 0x6df   :  { %19769 = vst [vmem:[#allocation235_spill] sm:$0xff] %v16026_v58  ;;  %8156 = vrot.lane.b32.xlu1 %v19710_v42, %s9008_s17 }
 0x6e0   :  { %8171 = vrot.lane.b32.xlu0 %v15417_v20, %s9006_s2 }
 0x6e1   :  { %v16032_v13 = vpop.permute.xlu1 %7876 }
 0x6e2   :  { %19770 = vst [vmem:[#allocation372_spill] sm:$0xff] %v16032_v13  ;;  %v16034_v10 = vpop.permute.xlu0 %7891 }
 0x6e3   :  { %19771 = vst [vmem:[#allocation406_spill] sm:$0xff] %v16034_v10  ;;  %8166 = vrot.lane.b32.xlu1 %v15342_v61, %s9009_s9 }
 0x6e4   :  { %8181 = vrot.lane.b32.xlu0 %v15740_v3, %s9007_s3 }
 0x6e5   :  { %v16040_v16 = vpop.permute.xlu1 %7886 }
 0x6e6   :  { %19772 = vst [vmem:[#allocation236_spill] sm:$0xff] %v16040_v16  ;;  %v16042_v32 = vpop.permute.xlu0 %7901 }
 0x6e7   :  { %19773 = vst [vmem:[#allocation44_spill] sm:$0xff] %v16042_v32  ;;  %8176 = vrot.lane.b32.xlu1 %v15342_v61, %s9006_s2 }
 0x6e8   :  { %8191 = vrot.lane.b32.xlu0 %v19731_v56, %s9008_s17 }
 0x6e9   :  { %v16048_v20 = vpop.permute.xlu1 %7896 }
 0x6ea   :  { %19774 = vst [vmem:[#allocation407_spill] sm:$0xff] %v16048_v20  ;;  %v16050_v42 = vpop.permute.xlu0 %7911  ;;  %v19790_v20 = vld [vmem:[#allocation20_spill] sm:$0xff] }
 0x6eb   :  { %19775 = vst [vmem:[#allocation415_spill] sm:$0xff] %v16050_v42  ;;  %8186 = vrot.lane.b32.xlu1 %v15644_v15, %s9007_s3  ;;  %v7484_v42 = vunpack.i.h.bf16 %v15539_v28 }
 0x6ec   :  { %8201 = vrot.lane.b32.xlu0 %v15398_v4, %s9009_s9 }
 0x6ed   :  { %v16056_v3 = vpop.permute.xlu1 %7906 }
 0x6ee   :  { %19776 = vst [vmem:[#allocation45_spill] sm:$0xff] %v16056_v3  ;;  %v16058_v10 = vpop.permute.xlu0 %7921 }
 0x6ef   :  { %19777 = vst [vmem:[#allocation40_spill] sm:$0xff] %v16058_v10  ;;  %8196 = vrot.lane.b32.xlu1 %v19715_v44, %s9008_s17 }
 0x6f0   :  { %8211 = vrot.lane.b32.xlu0 %v15398_v4, %s9006_s2 }
 0x6f1   :  { %v16064_v61 = vpop.permute.xlu1 %7916 }
 0x6f2   :  { %19778 = vst [vmem:[#allocation416_spill] sm:$0xff] %v16064_v61  ;;  %v16066_v56 = vpop.permute.xlu0 %7931 }
 0x6f3   :  { %19779 = vst [vmem:[#allocation46_spill] sm:$0xff] %v16066_v56  ;;  %8206 = vrot.lane.b32.xlu1 %v15318_v8, %s9009_s9  ;;  %v16132_v56 = vld [vmem:[#allocation2 + $0x168] sm:$0xff] }
 0x6f4   :  { %8221 = vrot.lane.b32.xlu0 %v15726_v39, %s9007_s3 }
 0x6f5   :  { %v16072_v15 = vpop.permute.xlu1 %7926 }
 0x6f6   :  { %19780 = vst [vmem:[#allocation42_spill] sm:$0xff] %v16072_v15  ;;  %v16074_v3 = vpop.permute.xlu0 %7941  ;;  %v19793_v15 = vld [vmem:[#allocation203_spill] sm:$0xff] }
 0x6f7   :  { %19781 = vst [vmem:[#allocation237_spill] sm:$0xff] %v16074_v3  ;;  %8216 = vrot.lane.b32.xlu1 %v15318_v8, %s9006_s2  ;;  %v19786_v3 = vld [vmem:[#allocation202_spill] sm:$0xff] }
 0x6f8   :  { %8231 = vrot.lane.b32.xlu0 %v19728_v38, %s9008_s17 }
 0x6f9   :  { %v16080_v4 = vpop.permute.xlu1 %7936 }
 0x6fa   :  { %19782 = vst [vmem:[#allocation48_spill] sm:$0xff] %v16080_v4  ;;  %v16082_v44 = vpop.permute.xlu0 %7951 }
 0x6fb   :  { %8226 = vrot.lane.b32.xlu1 %v15630_v46, %s9007_s3 }
 0x6fc   :  { %8241 = vrot.lane.b32.xlu0 %v15422_v34, %s9009_s9 }
 0x6fd   :  { %v16088_v39 = vpop.permute.xlu1 %7946 }
 0x6fe   :  { %19783 = vst [vmem:[#allocation238_spill] sm:$0xff] %v16088_v39  ;;  %v16090_v32 = vpop.permute.xlu0 %7961 }
 0x6ff   :  { %19784 = vst [vmem:[#allocation373_spill] sm:$0xff] %v16090_v32  ;;  %8236 = vrot.lane.b32.xlu1 %v19713_v50, %s9008_s17 }
 0x700   :  { %8251 = vrot.lane.b32.xlu0 %v15422_v34, %s9006_s2 }
 0x701   :  { %v16096_v8 = vpop.permute.xlu1 %7956 }
 0x702   :  { %v16098_v38 = vpop.permute.xlu0 %7971 }
 0x703   :  { %19785 = vst [vmem:[#allocation49_spill] sm:$0xff] %v16098_v38  ;;  %8246 = vrot.lane.b32.xlu1 %v19786_v3, %s9009_s9  ;;  %v19806_v38 = vld [vmem:[#allocation135_spill] sm:$0xff] }
 0x704   :  { %8261 = vrot.lane.b32.xlu0 %v15757_v27, %s9007_s3 }
 0x705   :  { %v16104_v46 = vpop.permute.xlu1 %7966 }
 0x706   :  { %19787 = vst [vmem:[#allocation239_spill] sm:$0xff] %v16104_v46  ;;  %v16106_v39 = vpop.permute.xlu0 %7981  ;;  %v19845_v46 = vld [vmem:[#allocation141_spill] sm:$0xff] }
 0x707   :  { %19788 = vst [vmem:[#allocation281_spill] sm:$0xff] %v16106_v39  ;;  %8256 = vrot.lane.b32.xlu1 %v19786_v3, %s9006_s2  ;;  %v7479_v39 = vunpack.i.h.bf16 %v19799_v14 }
 0x708   :  { %8271 = vrot.lane.b32.xlu0 %v19735_v30, %s9008_s17 }
 0x709   :  { %v16112_v34 = vpop.permute.xlu1 %7976 }
 0x70a   :  { %19789 = vst [vmem:[#allocation50_spill] sm:$0xff] %v16112_v34  ;;  %v16114_v50 = vpop.permute.xlu0 %7991 }
 0x70b   :  { %8266 = vrot.lane.b32.xlu1 %v15668_v26, %s9007_s3  ;;  %v16134_v26 = vld [vmem:[#allocation2 + $0x170] sm:$0xff] }
 0x70c   :  { %8281 = vrot.lane.b32.xlu0 %v19790_v20, %s9009_s9  ;;  %v8300_v16 = vpack.i.bf16 %v16134_v26, %v16132_v56 }
 0x70d   :  { %v16120_v27 = vpop.permute.xlu1 %7986 }
 0x70e   :  { %19791 = vst [vmem:[#allocation155_spill] sm:$0xff] %v16120_v27  ;;  %v16122_v4 = vpop.permute.xlu0 %8001 }
 0x70f   :  { %8276 = vrot.lane.b32.xlu1 %v19719_v2, %s9008_s17 }
 0x710   :  { %8291 = vrot.lane.b32.xlu0 %v19790_v20, %s9006_s2  ;;  %v19796_v20 = vld [vmem:[#allocation133_spill] sm:$0xff] }
 0x711   :  { %v16128_v30 = vpop.permute.xlu1 %7996  ;;  %v7474_v10 = vunpack.i.h.bf16 %v19796_v20  ;;  %v7473_v61 = vunpack.i.l.bf16 %v19796_v20  ;;  %v8917_v20 = vld [vmem:[#allocation2 + $0x8] sm:$0xff] }
 0x712   :  { %v16130_v3 = vpop.permute.xlu0 %8011 }
 0x713   :  { %19792 = vst [vmem:[#allocation282_spill] sm:$0xff] %v16130_v3  ;;  %8286 = vrot.lane.b32.xlu1 %v19793_v15, %s9009_s9  ;;  %v16166_v62 = vsel %vm2206_vm4, %v8917_v20, %v7474_v10  ;;  %v19809_v10 = vld [vmem:[#allocation327_spill] sm:$0xff] }
 0x714   :  { %8301 = vrot.lane.b32.xlu0 %v8300_v16, %s9007_s3  ;;  %v7483_v16 = vunpack.i.l.bf16 %v15539_v28  ;;  %v16186_v20 = vsel %vm2206_vm4, %v19809_v10, %v7479_v39 }
 0x715   :  { %v16141_v2 = vpop.permute.xlu1 %8006 }
 0x716   :  { %19794 = vst [vmem:[#allocation342_spill] sm:$0xff] %v16141_v2  ;;  %v16143_v58 = vpop.permute.xlu0 %8021  ;;  %v19852_v2 = vld [vmem:[#allocation270_spill] sm:$0xff] }
 0x717   :  { %19795 = vst [vmem:[#allocation47_spill] sm:$0xff] %v16143_v58  ;;  %8296 = vrot.lane.b32.xlu1 %v19793_v15, %s9006_s2  ;;  %v19800_v58 = vld [vmem:[#allocation216_spill] sm:$0xff]  ;;  %v7478_v15 = vunpack.i.l.bf16 %v19799_v14  ;;  %v7544_v47 = vunpack.i.h.bf16 %v19852_v2 }
 0x718   :  { %8311 = vrot.lane.b32.xlu0 %v19732_v12, %s9008_s17  ;;  %v19801_v12 = vld [vmem:[#allocation23_spill] sm:$0xff] }
 0x719   :  { %v16150_v13 = vpop.permute.xlu1 %8016  ;;  %v7494_v17 = vunpack.i.h.bf16 %v19801_v12  ;;  %v7493_v34 = vunpack.i.l.bf16 %v19801_v12  ;;  %v16179_v12 = vsel %vm2206_vm4, %v19806_v38, %v7483_v16  ;;  %v19812_v16 = vld [vmem:[#allocation140_spill] sm:$0xff] }
 0x71a   :  { %19797 = vst [vmem:[#allocation51_spill] sm:$0xff] %v16150_v13  ;;  %v16155_v27 = vpop.permute.xlu0 %8031  ;;  %v19802_v13 = vld [vmem:[#allocation400_spill] sm:$0xff] }
 0x71b   :  { %19798 = vst [vmem:[#allocation343_spill] sm:$0xff] %v16155_v27  ;;  %8306 = vrot.lane.b32.xlu1 %v19800_v58, %s9007_s3  ;;  %v8918_v27 = vld [vmem:[#allocation2] sm:$0xff]  ;;  %v19804_v58 = vld [vmem:[#allocation268_spill] sm:$0xff] }
 0x71c   :  { %8321 = vrot.lane.b32.xlu0 %v19802_v13, %s9009_s9  ;;  %v16171_v45 = vsel %vm2206_vm4, %v8918_v27, %v7473_v61  ;;  %v16175_v14 = vsel %vm2206_vm4, %v19804_v58, %v7484_v42  ;;  %v19810_v61 = vld [vmem:[#allocation209_spill] sm:$0xff]  ;;  %v19811_v42 = vld [vmem:[#allocation134_spill] sm:$0xff]  ;;  %v16199_v58 = vsel %vm2206_vm4, %v19812_v16, %v7494_v17 }
 0x71d   :  { %v16168_v28 = vpop.permute.xlu1 %8026  ;;  %19805 = vst [vmem:[#allocation53_spill] sm:$0xff] %v16175_v14  ;;  %v7504_v27 = vunpack.i.h.bf16 %v19810_v61  ;;  %v7503_v51 = vunpack.i.l.bf16 %v19810_v61  ;;  %v16195_v38 = vsel %vm2206_vm4, %v19811_v42, %v7478_v15  ;;  %19813 = vst [vmem:[#allocation375_spill] sm:$0xff] %v16199_v58  ;;  %v19820_v42 = vld [vmem:[#allocation25_spill] sm:$0xff] }
 0x71e   :  { %19803 = vst [vmem:[#allocation374_spill] sm:$0xff] %v16168_v28  ;;  %v16182_v3 = vpop.permute.xlu0 %8041  ;;  %v7488_v28 = vunpack.i.l.bf16 %v19807_v35  ;;  %v19816_v35 = vld [vmem:[#allocation136_spill] sm:$0xff]  ;;  %v7514_v17 = vunpack.i.h.bf16 %v19820_v42  ;;  %v7513_v16 = vunpack.i.l.bf16 %v19820_v42  ;;  %v19830_v42 = vld [vmem:[#allocation138_spill] sm:$0xff] }
 0x71f   :  { %19808 = vst [vmem:[#allocation240_spill] sm:$0xff] %v16182_v3  ;;  %8316 = vrot.lane.b32.xlu1 %v19716_v11, %s9008_s17  ;;  %v19814_v3 = vld [vmem:[#allocation213_spill] sm:$0xff]  ;;  %v7499_v10 = vunpack.i.h.bf16 %v19816_v35  ;;  %v19818_v11 = vld [vmem:[#allocation24_spill] sm:$0xff]  ;;  %v7498_v15 = vunpack.i.l.bf16 %v19816_v35 }
 0x720   :  { %v16203_v39 = vsel %vm2206_vm4, %v19814_v3, %v7493_v34  ;;  %8331 = vrot.lane.b32.xlu0 %v19802_v13, %s9006_s2  ;;  %v16212_v41 = vsel %vm2206_vm4, %v19818_v11, %v7489_v57  ;;  %v19822_v34 = vld [vmem:[#allocation212_spill] sm:$0xff]  ;;  %v19824_v13 = vld [vmem:[#allocation137_spill] sm:$0xff]  ;;  %v19829_v11 = vld [vmem:[#allocation403_spill] sm:$0xff] }
 0x721   :  { %19815 = vst [vmem:[#allocation54_spill] sm:$0xff] %v16203_v39  ;;  %v16208_v61 = vpop.permute.xlu1 %8036  ;;  %19819 = vst [vmem:[#allocation283_spill] sm:$0xff] %v16212_v41  ;;  %v16221_v3 = vsel %vm2206_vm4, %v19822_v34, %v7488_v28  ;;  %v16225_v39 = vsel %vm2206_vm4, %v19824_v13, %v7504_v27  ;;  %v19828_v35 = vld [vmem:[#allocation204_spill] sm:$0xff]  ;;  %v7509_v9 = vunpack.i.h.bf16 %v19829_v11  ;;  %v16238_v28 = vsel %vm2206_vm4, %v19830_v42, %v7499_v10 }
 0x722   :  { %19817 = vst [vmem:[#allocation241_spill] sm:$0xff] %v16208_v61  ;;  %v16217_v58 = vpop.permute.xlu0 %8051  ;;  %19823 = vst [vmem:[#allocation156_spill] sm:$0xff] %v16221_v3  ;;  %v19826_v61 = vld [vmem:[#allocation27_spill] sm:$0xff]  ;;  %v7508_v34 = vunpack.i.l.bf16 %v19829_v11  ;;  %v19832_v27 = vld [vmem:[#allocation328_spill] sm:$0xff] }
 0x723   :  { %19821 = vst [vmem:[#allocation55_spill] sm:$0xff] %v16217_v58  ;;  %19825 = vst [vmem:[#allocation284_spill] sm:$0xff] %v16225_v39  ;;  %v16229_v57 = vsel %vm2206_vm4, %v19826_v61, %v7503_v51  ;;  %8326 = vrot.lane.b32.xlu1 %v19828_v35, %s9009_s9  ;;  %v7524_v13 = vunpack.i.h.bf16 %v19832_v27  ;;  %v7523_v58 = vunpack.i.l.bf16 %v19832_v27  ;;  %v19834_v61 = vld [vmem:[#allocation412_spill] sm:$0xff]  ;;  %v16259_v11 = vld [vmem:[#allocation2 + $0x2a0] sm:$0xff] }
 0x724   :  { %19827 = vst [vmem:[#allocation344_spill] sm:$0xff] %v16229_v57  ;;  %8341 = vrot.lane.b32.xlu0 %v15567_v55, %s9007_s3  ;;  %19831 = vst [vmem:[#allocation52_spill] sm:$0xff] %v16238_v28  ;;  %v16247_v39 = vsel %vm2206_vm4, %v19834_v61, %v7498_v15  ;;  %v19836_v57 = vld [vmem:[#allocation144_spill] sm:$0xff]  ;;  %v19837_v55 = vld [vmem:[#allocation217_spill] sm:$0xff] }
 0x725   :  { %v16243_v51 = vpop.permute.xlu1 %8046  ;;  %19835 = vst [vmem:[#allocation345_spill] sm:$0xff] %v16247_v39  ;;  %v16251_v41 = vsel %vm2206_vm4, %v19836_v57, %v7514_v17  ;;  %v16255_v10 = vsel %vm2206_vm4, %v19837_v55, %v7513_v16  ;;  %v16261_v28 = vld [vmem:[#allocation2 + $0x2a8] sm:$0xff]  ;;  %v19840_v17 = vld [vmem:[#allocation26_spill] sm:$0xff] }
 0x726   :  { %19833 = vst [vmem:[#allocation56_spill] sm:$0xff] %v16243_v51  ;;  %v16257_v42 = vpop.permute.xlu0 %8061  ;;  %v19839_v51 = vld [vmem:[#allocation329_spill] sm:$0xff]  ;;  %v16271_v16 = vsel %vm2206_vm4, %v19840_v17, %v7509_v9  ;;  %v19842_v57 = vld [vmem:[#allocation215_spill] sm:$0xff]  ;;  %v19843_v39 = vld [vmem:[#allocation214_spill] sm:$0xff] }
 0x727   :  { %19838 = vst [vmem:[#allocation376_spill] sm:$0xff] %v16257_v42  ;;  %v7519_v15 = vunpack.i.h.bf16 %v19839_v51  ;;  %v7518_v61 = vunpack.i.l.bf16 %v19839_v51  ;;  %8336 = vrot.lane.b32.xlu1 %v19828_v35, %s9006_s2  ;;  %19841 = vst [vmem:[#allocation58_spill] sm:$0xff] %v16271_v16  ;;  %v7534_v55 = vunpack.i.h.bf16 %v19842_v57  ;;  %v7533_v42 = vunpack.i.l.bf16 %v19842_v57  ;;  %v19846_v35 = vld [vmem:[#allocation29_spill] sm:$0xff]  ;;  %v16293_v57 = vld [vmem:[#allocation2 + $0x2c0] sm:$0xff] }
 0x728   :  { %8351 = vrot.lane.b32.xlu0 %v15571_v21, %s9008_s17  ;;  %v16279_v27 = vsel %vm2206_vm4, %v19843_v39, %v7508_v34  ;;  %v16283_v51 = vsel %vm2206_vm4, %v19845_v46, %v7524_v13  ;;  %v16287_v60 = vsel %vm2206_vm4, %v19846_v35, %v7523_v58  ;;  %v16291_v17 = vld [vmem:[#allocation2 + $0x2b8] sm:$0xff]  ;;  %v3997_v46 = vld [vmem:[#allocation2 + $0x1a0] sm:$0xff]  ;;  %v3998_v13 = vld [vmem:[#allocation2 + $0x1a8] sm:$0x3] }
 0x729   :  { %19844 = vst [vmem:[#allocation242_spill] sm:$0xff] %v16279_v27  ;;  %v16289_v9 = vpop.permute.xlu1 %8056  ;;  %v19848_v16 = vld [vmem:[#allocation269_spill] sm:$0xff]  ;;  %v16302_v58 = vld [vmem:[#allocation2 + $0x200] sm:$0xff]  ;;  %v16312_v21 = vsel %vm2206_vm4, %v19851_v19, %v7518_v61  ;;  %v16320_v31 = vsel %vm2206_vm4, %v19854_v36, %v7534_v55  ;;  %v16328_v19 = vld [vmem:[#allocation2 + $0x2d0] sm:$0xff]  ;;  %v5656_v36 = vrot.slane %v3998_v13, 1 }
 0x72a   :  { %19847 = vst [vmem:[#allocation377_spill] sm:$0xff] %v16289_v9  ;;  %v7529_v39 = vunpack.i.h.bf16 %v19848_v16  ;;  %v16298_v34 = vpop.permute.xlu0 %8071  ;;  %v3996_v27 = vld [vmem:[#allocation2 + $0x198] sm:$0xff]  ;;  %v19850_v9 = vld [vmem:[#allocation139_spill] sm:$0xff]  ;;  %19855 = vst [vmem:[#allocation243_spill] sm:$0xff] %v16320_v31 }
 0x72b   :  { %19849 = vst [vmem:[#allocation59_spill] sm:$0xff] %v16298_v34  ;;  %v16308_v3 = vsel %vm2206_vm4, %v19850_v9, %v7519_v15  ;;  %v7528_v34 = vunpack.i.l.bf16 %v19848_v16  ;;  %8346 = vrot.lane.b32.xlu1 %v19853_v54, %s9007_s3  ;;  %v19856_v35 = vld [vmem:[#allocation333_spill] sm:$0xff]  ;;  %v19858_v15 = vld [vmem:[#allocation210_spill] sm:$0xff]  ;;  %19859 = vst [vmem:[#allocation60_spill] sm:$0xff] %v16328_v19  ;;  %v5654_v54 = vrot.slane %v3997_v46, 1  ;;  %v5653_v32 = vrot.slane %v3996_v27, 1 }
 0x72c   :  { %v16324_v14 = vsel %vm2206_vm4, %v19856_v35, %v7533_v42  ;;  %8361 = vrot.lane.b32.xlu0 %v19858_v15, %s9009_s9  ;;  %v16330_v61 = vld [vmem:[#allocation2 + $0x2d8] sm:$0xff]  ;;  %v19862_v55 = vld [vmem:[#allocation220_spill] sm:$0xff]  ;;  %v7543_v42 = vunpack.i.l.bf16 %v19852_v2  ;;  %v16349_v16 = vsel %vm2206_vm4, %v19867_v40, %v7544_v47  ;;  %v8380_v47 = vpack.i.bf16 %v3997_v46, %v3996_v27 }
 0x72d   :  { %19857 = vst [vmem:[#allocation285_spill] sm:$0xff] %v16324_v14  ;;  %19860 = vst [vmem:[#allocation157_spill] sm:$0xff] %v16330_v61  ;;  %v16334_v9 = vpop.permute.xlu1 %8066  ;;  %v16338_v31 = vsel %vm2206_vm4, %v19862_v55, %v7529_v39  ;;  %v19865_v14 = vld [vmem:[#allocation28_spill] sm:$0xff]  ;;  %v19871_v39 = vld [vmem:[#allocation331_spill] sm:$0xff] }
 0x72e   :  { %19861 = vst [vmem:[#allocation286_spill] sm:$0xff] %v16334_v9  ;;  %19863 = vst [vmem:[#allocation346_spill] sm:$0xff] %v16338_v31  ;;  %v16341_v35 = vpop.permute.xlu0 %8081  ;;  %v16345_v5 = vsel %vm2206_vm4, %v19865_v14, %v7528_v34  ;;  %v16353_v9 = vld [vmem:[#allocation2 + $0x2e8] sm:$0xff]  ;;  %v16355_v19 = vld [vmem:[#allocation2 + $0x2f0] sm:$0xff]  ;;  %v7539_v55 = vunpack.i.h.bf16 %v19871_v39  ;;  %v5856_v14 = vrot.slane %v3997_v46, 2  ;;  %v5855_v34 = vrot.slane %v3996_v27, 2 }
 0x72f   :  { %19864 = vst [vmem:[#allocation57_spill] sm:$0xff] %v16341_v35  ;;  %19866 = vst [vmem:[#allocation61_spill] sm:$0xff] %v16345_v5  ;;  %8356 = vrot.lane.b32.xlu1 %v19723_v7, %s9008_s17  ;;  %v7538_v35 = vunpack.i.l.bf16 %v19871_v39  ;;  %v5655_v7 = vsel %vm231_vm0, %v5653_v32, %v5654_v54  ;;  %v5858_v31 = vrot.slane %v3998_v13, 2  ;;  %v19873_v5 = vld [vmem:[#allocation222_spill] sm:$0xff]  ;;  %v16375_v46 = vld [vmem:[#allocation2 + $0x230] sm:$0xff] }
 0x730   :  { %19868 = vst [vmem:[#allocation347_spill] sm:$0xff] %v16349_v16  ;;  %19869 = vst [vmem:[#allocation378_spill] sm:$0xff] %v16353_v9  ;;  %8371 = vrot.lane.b32.xlu0 %v19858_v15, %s9006_s2  ;;  %v5657_v16 = vsel %vm231_vm0, %v5654_v54, %v5656_v36  ;;  %v16369_v2 = vsel %vm2206_vm4, %v19873_v5, %v7543_v42  ;;  %v19875_v9 = vld [vmem:[#allocation218_spill] sm:$0xff]  ;;  %v16373_v15 = vld [vmem:[#allocation2 + $0x228] sm:$0xff]  ;;  %v7633_v42 = vunpack.i.l.bf16 %v15821_v6 }
 0x731   :  { %19870 = vst [vmem:[#allocation63_spill] sm:$0xff] %v16355_v19  ;;  %v16363_v40 = vpop.permute.xlu1 %8076  ;;  %19874 = vst [vmem:[#allocation379_spill] sm:$0xff] %v16369_v2  ;;  %v7554_v19 = vunpack.i.h.bf16 %v19875_v9  ;;  %v7553_v39 = vunpack.i.l.bf16 %v19875_v9  ;;  %v19878_v32 = vld [vmem:[#allocation399_spill] sm:$0xff]  ;;  %v19881_v5 = vld [vmem:[#allocation332_spill] sm:$0xff]  ;;  %v8390_v9 = vpack.i.bf16 %v5657_v16, %v5655_v7  ;;  %v5857_v27 = vsel %vm584_vm1, %v5855_v34, %v5856_v14 }
 0x732   :  { %19872 = vst [vmem:[#allocation244_spill] sm:$0xff] %v16363_v40  ;;  %v8092_v61 = vpop.permute.xlu0 %8091  ;;  %19876 = vst [vmem:[#allocation64_spill] sm:$0xff] %v16373_v15  ;;  %v19879_v13 = vld [vmem:[#allocation143_spill] sm:$0xff]  ;;  %v16387_v36 = vsel %vm2206_vm4, %v19881_v5, %v7538_v35  ;;  %v7673_v40 = vunpack.i.l.bf16 %v15858_v24  ;;  %v5859_v15 = vsel %vm584_vm1, %v5856_v14, %v5858_v31  ;;  %v7674_v16 = vunpack.i.h.bf16 %v15858_v24  ;;  %v16403_v7 = vld [vmem:[#allocation2 + $0x300] sm:$0xff] }
 0x733   :  { %19877 = vst [vmem:[#allocation245_spill] sm:$0xff] %v16375_v46  ;;  %8366 = vrot.lane.b32.xlu1 %v19878_v32, %s9009_s9  ;;  %v16383_v54 = vsel %vm2206_vm4, %v19879_v13, %v7539_v55  ;;  %19882 = vst [vmem:[#allocation65_spill] sm:$0xff] %v16387_v36  ;;  %v8931_v46 = vld [vmem:[#allocation2 + $0x1b8] sm:$0xff]  ;;  %v8932_v13 = vld [vmem:[#allocation2 + $0x1b0] sm:$0xff]  ;;  %v7833_v34 = vunpack.i.l.bf16 %v15986_v1  ;;  %v8400_v31 = vpack.i.bf16 %v5859_v15, %v5857_v27  ;;  %v7794_v15 = vunpack.i.h.bf16 %v15954_v22 }
 0x734   :  { %19880 = vst [vmem:[#allocation287_spill] sm:$0xff] %v16383_v54  ;;  %8381 = vrot.lane.b32.xlu0 %v8380_v47, %s9007_s3  ;;  %v16397_v55 = vsel %vm2206_vm4, %v8931_v46, %v7554_v19  ;;  %v16400_v35 = vsel %vm2206_vm4, %v8932_v13, %v7553_v39  ;;  %19886 = vst [vmem:[#allocation62_spill] sm:$0xff] %v16403_v7  ;;  %v16405_v5 = vld [vmem:[#allocation2 + $0x308] sm:$0xff]  ;;  %v16413_v19 = vld [vmem:[#allocation2 + $0x240] sm:$0xff]  ;;  %v7634_v46 = vunpack.i.h.bf16 %v15821_v6  ;;  %v7834_v13 = vunpack.i.h.bf16 %v15986_v1 }
 0x735   :  { %v16392_v2 = vpop.permute.xlu1 %8086  ;;  %19884 = vst [vmem:[#allocation288_spill] sm:$0xff] %v16397_v55  ;;  %19885 = vst [vmem:[#allocation348_spill] sm:$0xff] %v16400_v35  ;;  %v16415_v39 = vld [vmem:[#allocation2 + $0x248] sm:$0xff]  ;;  %v6121_v14 = vsel %vm2336_vm6, %v16171_v45, %v7633_v42  ;;  %v7994_v55 = vunpack.i.h.bf16 %v16114_v50  ;;  %v7993_v35 = vunpack.i.l.bf16 %v16114_v50  ;;  %v6138_v6 = vsel %vm2336_vm6, %v16251_v41, %v7674_v16  ;;  %v19889_v45 = vld [vmem:[#allocation142_spill] sm:$0xff] }
 0x736   :  { %19883 = vst [vmem:[#allocation158_spill] sm:$0xff] %v16392_v2  ;;  %v8102_v47 = vpop.permute.xlu0 %8101  ;;  %19887 = vst [vmem:[#allocation66_spill] sm:$0xff] %v16405_v5  ;;  %v19888_v2 = vld [vmem:[#allocation271_spill] sm:$0xff]  ;;  %v8094_v7 = vunpack.i.h.bf16 %v8092_v61  ;;  %v8093_v1 = vunpack.i.l.bf16 %v8092_v61  ;;  %v6202_v50 = vsel %vm2466_vm8, %v6138_v6, %v7834_v13  ;;  %v7793_v41 = vunpack.i.l.bf16 %v15954_v22  ;;  %v19890_v13 = vld [vmem:[#allocation401_spill] sm:$0xff] }
 0x737   :  { %8376 = vrot.lane.b32.xlu1 %v19878_v32, %s9006_s2  ;;  %v6137_v32 = vsel %vm2336_vm6, %v16255_v10, %v7673_v40  ;;  %v8104_v27 = vunpack.i.h.bf16 %v8102_v47  ;;  %v6266_v16 = vsel %vm2596_vm10, %v6202_v50, %v7994_v55  ;;  %v7954_v55 = vunpack.i.h.bf16 %v16082_v44 }
 0x738   :  { %8391 = vrot.lane.b32.xlu0 %v8390_v9, %s9008_s17  ;;  %v8103_v9 = vunpack.i.l.bf16 %v8102_v47  ;;  %v6201_v10 = vsel %vm2466_vm8, %v6137_v32, %v7833_v34 }
 0x739   :  { %v8097_v24 = vpop.permute.xlu1 %8096  ;;  %v6265_v61 = vsel %vm2596_vm10, %v6201_v10, %v7993_v35 }
 0x73a   :  { %v8112_v5 = vpop.permute.xlu0 %8111  ;;  %v6330_v47 = vsel %vm6313_vm14, %v6265_v61, %v8093_v1  ;;  %v8099_v6 = vunpack.i.h.bf16 %v8097_v24  ;;  %v8098_v1 = vunpack.i.l.bf16 %v8097_v24  ;;  %v6185_v24 = vsel %vm2466_vm8, %v6121_v14, %v7793_v41 }
 0x73b   :  { %8386 = vrot.lane.b32.xlu1 %v19889_v45, %s9007_s3  ;;  %v8114_v40 = vunpack.i.h.bf16 %v8112_v5  ;;  %v8113_v42 = vunpack.i.l.bf16 %v8112_v5  ;;  %v6331_v45 = vsel %vm6313_vm14, %v6266_v16, %v8094_v7  ;;  %v6395_v22 = vsel %vm6378_vm15, %v6330_v47, %v8103_v9 }
 0x73c   :  { %8401 = vrot.lane.b32.xlu0 %v8400_v31, %s9009_s9  ;;  %v6396_v35 = vsel %vm6378_vm15, %v6331_v45, %v8104_v27  ;;  %v7953_v31 = vunpack.i.l.bf16 %v16082_v44  ;;  %v6122_v44 = vsel %vm2336_vm6, %v16166_v62, %v7634_v46  ;;  %v19893_v45 = vld [vmem:[#allocation272_spill] sm:$0xff] }
 0x73d   :  { %v8107_v54 = vpop.permute.xlu1 %8106  ;;  %v6460_v7 = vsel %vm6443_vm2, %v6395_v22, %v8113_v42  ;;  %v6461_v32 = vsel %vm6443_vm2, %v6396_v35, %v8114_v40  ;;  %v6186_v61 = vsel %vm2466_vm8, %v6122_v44, %v7794_v15  ;;  %v7563_v14 = vunpack.i.l.bf16 %v19893_v45 }
 0x73e   :  { %v8122_v36 = vpop.permute.xlu0 %8121  ;;  %v8109_v10 = vunpack.i.h.bf16 %v8107_v54  ;;  %v8108_v50 = vunpack.i.l.bf16 %v8107_v54  ;;  %v6250_v62 = vsel %vm2596_vm10, %v6186_v61, %v7954_v55  ;;  %v19894_v54 = vpack.i.bf16 %v16261_v28, %v16259_v11 }
 0x73f   :  { %8396 = vrot.lane.b32.xlu1 %v19720_v43, %s9008_s17  ;;  %v8124_v5 = vunpack.i.h.bf16 %v8122_v36  ;;  %v8123_v34 = vunpack.i.l.bf16 %v8122_v36  ;;  %v7679_v28 = vunpack.i.h.bf16 %v15872_v37  ;;  %v7678_v11 = vunpack.i.l.bf16 %v15872_v37 }
 0x740   :  { %8411 = vrot.lane.b32.xlu0 %v19890_v13, %s9006_s2  ;;  %v7638_v37 = vunpack.i.l.bf16 %v15837_v49  ;;  %v7999_v44 = vunpack.i.h.bf16 %v16128_v30 }
 0x741   :  { %v8117_v43 = vpop.permute.xlu1 %8116  ;;  %v6525_v36 = vsel %vm6508_vm3, %v6460_v7, %v8123_v34  ;;  %v6526_v9 = vsel %vm6508_vm3, %v6461_v32, %v8124_v5  ;;  %v7564_v5 = vunpack.i.h.bf16 %v19893_v45  ;;  %v6249_v34 = vsel %vm2596_vm10, %v6185_v24, %v7953_v31  ;;  %v19895_v7 = vld [vmem:[#allocation21_spill] sm:$0xff] }
 0x742   :  { %v16462_v42 = vpop.permute.xlu0 %8131  ;;  %v7359_v40 = vpack.c.bf16 %v6526_v9, %v6525_v36  ;;  %v8119_v16 = vunpack.i.h.bf16 %v8117_v43  ;;  %v8118_v47 = vunpack.i.l.bf16 %v8117_v43  ;;  %v6314_v46 = vsel %vm6313_vm14, %v6249_v34, %v8098_v1 }
 0x743   :  { %8406 = vrot.lane.b32.xlu1 %v15396_v33, %s9009_s9  ;;  %v6315_v33 = vsel %vm6313_vm14, %v6250_v62, %v8099_v6  ;;  %v6379_v41 = vsel %vm6378_vm15, %v6314_v46, %v8108_v50  ;;  %v7839_v6 = vunpack.i.h.bf16 %v16000_v25  ;;  %v7838_v43 = vunpack.i.l.bf16 %v16000_v25 }
 0x744   :  { %8421 = vrot.lane.b32.xlu0 %v19894_v54, %s9007_s3  ;;  %7361 = vmatprep.subr.msk.bf16.mxu1 %vm16456_vm7, %v7359_v40  ;;  %v6380_v22 = vsel %vm6378_vm15, %v6315_v33, %v8109_v10  ;;  %v6444_v32 = vsel %vm6443_vm2, %v6379_v41, %v8118_v47  ;;  %v7998_v10 = vunpack.i.l.bf16 %v16128_v30  ;;  %v19896_v24 = vunpack.i.h.bf16 %v19888_v2  ;;  %v19898_v33 = vld [vmem:[#allocation206_spill] sm:$0xff] }
 0x745   :  { %v8127_v15 = vpop.permute.xlu1 %8126  ;;  %v6445_v1 = vsel %vm6443_vm2, %v6380_v22, %v8119_v16  ;;  %v8134_v16 = vunpack.i.h.bf16 %v16462_v42  ;;  %v8133_v47 = vunpack.i.l.bf16 %v16462_v42  ;;  %v6139_v34 = vsel %vm2336_vm6, %v16312_v21, %v7678_v11 }
 0x746   :  { %v8129_v35 = vunpack.i.h.bf16 %v8127_v15  ;;  %v8128_v55 = vunpack.i.l.bf16 %v8127_v15  ;;  %v8142_v31 = vpop.permute.xlu0 %8141  ;;  %v16503_v25 = vsel %vm2206_vm4, %v16134_v26, %v19896_v24  ;;  %v6140_v62 = vsel %vm2336_vm6, %v16308_v3, %v7679_v28  ;;  %v6573_v3 = vld [vmem:[%s17552_s4] sm:$0xff] }
 0x747   :  { %8416 = vrot.lane.b32.xlu1 %v19895_v7, %s9006_s2  ;;  %v8144_v54 = vunpack.i.h.bf16 %v8142_v31  ;;  %v8143_v26 = vunpack.i.l.bf16 %v8142_v31  ;;  %v7639_v21 = vunpack.i.h.bf16 %v15837_v49  ;;  %7209 = vmatprep.mubr.msk.f32.mxu1 %vm6574_vm5, %v6573_v3 }
 0x748   :  { %8431 = vrot.lane.b32.xlu0 %v19756_v59, %s9008_s17  ;;  %v6509_v36 = vsel %vm6508_vm3, %v6444_v32, %v8128_v55  ;;  %v6510_v9 = vsel %vm6508_vm3, %v6445_v1, %v8129_v35  ;;  %v19897_v59 = vunpack.i.l.bf16 %v19888_v2  ;;  %v6204_v2 = vsel %vm2466_vm8, %v6140_v62, %v7839_v6 }
 0x749   :  { %v16497_v50 = vpop.permute.xlu1 %8136  ;;  %v7362_v40 = vpack.c.bf16 %v6510_v9, %v6509_v36  ;;  %v6268_v41 = vsel %vm2596_vm10, %v6204_v2, %v7999_v44  ;;  %v7799_v35 = vunpack.i.h.bf16 %v15968_v52  ;;  %v7798_v55 = vunpack.i.l.bf16 %v15968_v52  ;;  %v8938_v2 = vld [vmem:[#allocation2 + $0x1e0] sm:$0xff] }
 0x74a   :  { %v16509_v61 = vsel %vm2206_vm4, %v16132_v56, %v19897_v59  ;;  %v8152_v30 = vpop.permute.xlu0 %8151  ;;  %v6203_v56 = vsel %vm2466_vm8, %v6139_v34, %v7838_v43  ;;  %v6333_v31 = vsel %vm6313_vm14, %v6268_v41, %v8134_v16  ;;  %v7959_v1 = vunpack.i.h.bf16 %v16096_v8 }
 0x74b   :  { %8426 = vrot.lane.b32.xlu1 %v15784_v48, %s9007_s3  ;;  %7364 = vmatpush3.bf16.xpose.msk.msra.mxu1 %vm16456_vm7, %v7362_v40  ;;  %v8154_v42 = vunpack.i.h.bf16 %v8152_v30  ;;  %v8153_v46 = vunpack.i.l.bf16 %v8152_v30  ;;  %v6123_v48 = vsel %vm2336_vm6, %v16195_v38, %v7638_v37  ;;  %v6267_v15 = vsel %vm2596_vm10, %v6203_v56, %v7998_v10 }
 0x74c   :  { %8441 = vrot.lane.b32.xlu0 %v19898_v33, %s9009_s9  ;;  %v6332_v28 = vsel %vm6313_vm14, %v6267_v15, %v8133_v47  ;;  %v6398_v38 = vsel %vm6378_vm15, %v6333_v31, %v8144_v54  ;;  %v7958_v6 = vunpack.i.l.bf16 %v16096_v8  ;;  %v8139_v36 = vunpack.i.h.bf16 %v16497_v50 }
 0x74d   :  { %v8147_v22 = vpop.permute.xlu1 %8146  ;;  %v6397_v49 = vsel %vm6378_vm15, %v6332_v28, %v8143_v26  ;;  %v6463_v43 = vsel %vm6443_vm2, %v6398_v38, %v8154_v42  ;;  %v8138_v9 = vunpack.i.l.bf16 %v16497_v50  ;;  %v6124_v10 = vsel %vm2336_vm6, %v16186_v20, %v7639_v21  ;;  %v19899_v50 = vld [vmem:[#allocation110_spill] sm:$0xff]  ;;  %v8937_v26 = vld [vmem:[#allocation2 + $0x1e8] sm:$0xff] }
 0x74e   :  { %v8162_v11 = vpop.permute.xlu0 %8161  ;;  %v6462_v52 = vsel %vm6443_vm2, %v6397_v49, %v8153_v46  ;;  %v8149_v8 = vunpack.i.h.bf16 %v8147_v22  ;;  %v8148_v40 = vunpack.i.l.bf16 %v8147_v22  ;;  %v6187_v16 = vsel %vm2466_vm8, %v6123_v48, %v7798_v55 }
 0x74f   :  { %8436 = vrot.lane.b32.xlu1 %v19742_v53, %s9008_s17  ;;  %v8164_v7 = vunpack.i.h.bf16 %v8162_v11  ;;  %v8163_v32 = vunpack.i.l.bf16 %v8162_v11  ;;  %v6188_v47 = vsel %vm2466_vm8, %v6124_v10, %v7799_v35  ;;  %v6251_v62 = vsel %vm2596_vm10, %v6187_v16, %v7958_v6  ;;  %v16603_v6 = vld [vmem:[#allocation2 + $0x320] sm:$0xff] }
 0x750   :  { %8451 = vrot.lane.b32.xlu0 %v19898_v33, %s9006_s2  ;;  %v6252_v54 = vsel %vm2596_vm10, %v6188_v47, %v7959_v1  ;;  %v19900_v20 = vpack.i.bf16 %v16293_v57, %v16291_v17  ;;  %v16571_v56 = vsel %vm2206_vm4, %v8937_v26, %v7564_v5  ;;  %v16576_v42 = vsel %vm2206_vm4, %v8938_v2, %v7563_v14  ;;  %v16601_v1 = vld [vmem:[#allocation2 + $0x318] sm:$0xff] }
 0x751   :  { %v8157_v37 = vpop.permute.xlu1 %8156  ;;  %v6527_v53 = vsel %vm6508_vm3, %v6462_v52, %v8163_v32  ;;  %v6528_v44 = vsel %vm6508_vm3, %v6463_v43, %v8164_v7  ;;  %v6316_v46 = vsel %vm6313_vm14, %v6251_v62, %v8138_v9  ;;  %v6317_v17 = vsel %vm6313_vm14, %v6252_v54, %v8139_v36 }
 0x752   :  { %v16554_v24 = vpop.permute.xlu0 %8171  ;;  %v7365_v59 = vpack.c.bf16 %v6528_v44, %v6527_v53  ;;  %v8159_v30 = vunpack.i.h.bf16 %v8157_v37  ;;  %v8158_v34 = vunpack.i.l.bf16 %v8157_v37  ;;  %v6381_v33 = vsel %vm6378_vm15, %v6316_v46, %v8148_v40 }
 0x753   :  { %8446 = vrot.lane.b32.xlu1 %v19899_v50, %s9009_s9  ;;  %v6382_v3 = vsel %vm6378_vm15, %v6317_v17, %v8149_v8  ;;  %v7684_v5 = vunpack.i.h.bf16 %v15866_v23  ;;  %v7683_v41 = vunpack.i.l.bf16 %v15866_v23  ;;  %v7844_v22 = vunpack.i.h.bf16 %v15994_v29 }
 0x754   :  { %8461 = vrot.lane.b32.xlu0 %v19900_v20, %s9007_s3  ;;  %7367 = vmatprep.subr.msk.bf16.mxu1 %vm16456_vm7, %v7365_v59  ;;  %v6446_v45 = vsel %vm6443_vm2, %v6381_v33, %v8158_v34  ;;  %v6447_v14 = vsel %vm6443_vm2, %v6382_v3, %v8159_v30  ;;  %v7843_v35 = vunpack.i.l.bf16 %v15994_v29  ;;  %v7643_v23 = vunpack.i.l.bf16 %v15831_v0  ;;  %v19905_v20 = vld [vmem:[#allocation373_spill] sm:$0xff] }
 0x755   :  { %v8167_v57 = vpop.permute.xlu1 %8166  ;;  %v8004_v28 = vunpack.i.h.bf16 %v16122_v4  ;;  %v8003_v11 = vunpack.i.l.bf16 %v16122_v4  ;;  %v8174_v7 = vunpack.i.h.bf16 %v16554_v24  ;;  %v8173_v29 = vunpack.i.l.bf16 %v16554_v24  ;;  %v19903_v24 = vld [vmem:[#allocation36_spill] sm:$0xff] }
 0x756   :  { %v8169_v21 = vunpack.i.h.bf16 %v8167_v57  ;;  %v8168_v48 = vunpack.i.l.bf16 %v8167_v57  ;;  %v8182_v15 = vpop.permute.xlu0 %8181  ;;  %v6141_v52 = vsel %vm2336_vm6, %v16287_v60, %v7683_v41  ;;  %v6142_v4 = vsel %vm2336_vm6, %v16283_v51, %v7684_v5  ;;  %v19902_v60 = vld [vmem:[#allocation22_spill] sm:$0xff] }
 0x757   :  { %8456 = vrot.lane.b32.xlu1 %v19899_v50, %s9006_s2  ;;  %v8184_v43 = vunpack.i.h.bf16 %v8182_v15  ;;  %v8183_v36 = vunpack.i.l.bf16 %v8182_v15  ;;  %v19901_v9 = vpack.i.bf16 %v16302_v58, %v16300_v18  ;;  %v6205_v37 = vsel %vm2466_vm8, %v6141_v52, %v7843_v35  ;;  %v19906_v15 = vld [vmem:[#allocation53_spill] sm:$0xff]  ;;  %v19910_v52 = vld [vmem:[#allocation60_spill] sm:$0xff] }
 0x758   :  { %v6511_v55 = vsel %vm6508_vm3, %v6446_v45, %v8168_v48  ;;  %v6512_v31 = vsel %vm6508_vm3, %v6447_v14, %v8169_v21  ;;  %8471 = vrot.lane.b32.xlu0 %v15267_v63, %s9008_s17  ;;  %v8630_v63 = vpack.i.bf16 %v16603_v6, %v16601_v1  ;;  %v6206_v53 = vsel %vm2466_vm8, %v6142_v4, %v7844_v22 }
 0x759   :  { %v16597_v49 = vpop.permute.xlu1 %8176  ;;  %v7368_v38 = vpack.c.bf16 %v6512_v31, %v6511_v55  ;;  %v7644_v51 = vunpack.i.h.bf16 %v15831_v0  ;;  %v6125_v8 = vsel %vm2336_vm6, %v16179_v12, %v7643_v23  ;;  %v6269_v18 = vsel %vm2596_vm10, %v6205_v37, %v8003_v11  ;;  %v19904_v12 = vld [vmem:[#allocation193_spill] sm:$0xff]  ;;  %v19908_v11 = vld [vmem:[#allocation146_spill] sm:$0xff] }
 0x75a   :  { %v8192_v32 = vpop.permute.xlu0 %8191  ;;  %v6270_v58 = vsel %vm2596_vm10, %v6206_v53, %v8004_v28  ;;  %v7804_v59 = vunpack.i.h.bf16 %v19903_v24  ;;  %v7803_v16 = vunpack.i.l.bf16 %v19903_v24  ;;  %v6334_v47 = vsel %vm6313_vm14, %v6269_v18, %v8173_v29  ;;  %v19907_v28 = vld [vmem:[#allocation409_spill] sm:$0xff]  ;;  %v16666_v53 = vld [vmem:[#allocation2 + $0x260] sm:$0xff] }
 0x75b   :  { %8466 = vrot.lane.b32.xlu1 %v19901_v9, %s9007_s3  ;;  %7370 = vmatpush3.bf16.xpose.msk.msra.mxu1 %vm16456_vm7, %v7368_v38  ;;  %v8194_v44 = vunpack.i.h.bf16 %v8192_v32  ;;  %v8193_v10 = vunpack.i.l.bf16 %v8192_v32  ;;  %v6335_v30 = vsel %vm6313_vm14, %v6270_v58, %v8174_v7  ;;  %v6399_v50 = vsel %vm6378_vm15, %v6334_v47, %v8183_v36  ;;  %v19909_v32 = vld [vmem:[#allocation157_spill] sm:$0xff]  ;;  %v19912_v58 = vld [vmem:[#allocation34_spill] sm:$0xff] }
 0x75c   :  { %8481 = vrot.lane.b32.xlu0 %v19902_v60, %s9009_s9  ;;  %v6400_v0 = vsel %vm6378_vm15, %v6335_v30, %v8184_v43  ;;  %v7964_v26 = vunpack.i.h.bf16 %v19905_v20  ;;  %v7963_v2 = vunpack.i.l.bf16 %v19905_v20  ;;  %v8179_v57 = vunpack.i.h.bf16 %v16597_v49  ;;  %v16664_v37 = vld [vmem:[#allocation2 + $0x258] sm:$0xff]  ;;  %v19913_v47 = vld [vmem:[#allocation338_spill] sm:$0xff] }
 0x75d   :  { %v8187_v40 = vpop.permute.xlu1 %8186  ;;  %v6464_v46 = vsel %vm6443_vm2, %v6399_v50, %v8193_v10  ;;  %v6465_v17 = vsel %vm6443_vm2, %v6400_v0, %v8194_v44  ;;  %v8178_v33 = vunpack.i.l.bf16 %v16597_v49  ;;  %v6126_v5 = vsel %vm2336_vm6, %v19906_v15, %v7644_v51  ;;  %v19916_v20 = vld [vmem:[#allocation342_spill] sm:$0xff]  ;;  %v19917_v15 = vld [vmem:[#allocation61_spill] sm:$0xff] }
 0x75e   :  { %v8202_v34 = vpop.permute.xlu0 %8201  ;;  %v8189_v41 = vunpack.i.h.bf16 %v8187_v40  ;;  %v8188_v45 = vunpack.i.l.bf16 %v8187_v40  ;;  %v6189_v35 = vsel %vm2466_vm8, %v6125_v8, %v7803_v16  ;;  %v6190_v55 = vsel %vm2466_vm8, %v6126_v5, %v7804_v59 }
 0x75f   :  { %8476 = vrot.lane.b32.xlu1 %v19904_v12, %s9008_s17  ;;  %v8204_v62 = vunpack.i.h.bf16 %v8202_v34  ;;  %v8203_v54 = vunpack.i.l.bf16 %v8202_v34  ;;  %v7559_v49 = vunpack.i.h.bf16 %v19908_v11  ;;  %v7558_v38 = vunpack.i.l.bf16 %v19908_v11  ;;  %v19914_v12 = vld [vmem:[#allocation130_spill] sm:$0xff] }
 0x760   :  { %8491 = vrot.lane.b32.xlu0 %v19902_v60, %s9006_s2  ;;  %v6253_v7 = vsel %vm2596_vm10, %v6189_v35, %v7963_v2  ;;  %v6254_v29 = vsel %vm2596_vm10, %v6190_v55, %v7964_v26  ;;  %v19911_v4 = vpack.i.bf16 %v19909_v32, %v19910_v52  ;;  %v8635_v44 = vpack.i.bf16 %v16666_v53, %v16664_v37  ;;  %v19919_v55 = vld [vmem:[#allocation225_spill] sm:$0xff]  ;;  %v19978_v53 = vld [vmem:[#allocation284_spill] sm:$0xff] }
 0x761   :  { %v8197_v3 = vpop.permute.xlu1 %8196  ;;  %v6529_v21 = vsel %vm6508_vm3, %v6464_v46, %v8203_v54  ;;  %v6530_v48 = vsel %vm6508_vm3, %v6465_v17, %v8204_v62  ;;  %v6318_v43 = vsel %vm6313_vm14, %v6253_v7, %v8178_v33  ;;  %v6319_v36 = vsel %vm6313_vm14, %v6254_v29, %v8179_v57  ;;  %v19915_v62 = vld [vmem:[#allocation33_spill] sm:$0xff]  ;;  %v8943_v57 = vld [vmem:[#allocation2 + $0x1d0] sm:$0xff] }
 0x762   :  { %v16646_v14 = vpop.permute.xlu0 %8211  ;;  %v7371_v22 = vpack.c.bf16 %v6530_v48, %v6529_v21  ;;  %v8199_v31 = vunpack.i.h.bf16 %v8197_v3  ;;  %v8198_v23 = vunpack.i.l.bf16 %v8197_v3  ;;  %v6383_v10 = vsel %vm6378_vm15, %v6318_v43, %v8188_v45  ;;  %v19921_v29 = vld [vmem:[#allocation156_spill] sm:$0xff] }
 0x763   :  { %8486 = vrot.lane.b32.xlu1 %v19907_v28, %s9009_s9  ;;  %v6384_v60 = vsel %vm6378_vm15, %v6319_v36, %v8189_v41  ;;  %v7689_v40 = vunpack.i.h.bf16 %v19912_v58  ;;  %v7688_v24 = vunpack.i.l.bf16 %v19912_v58  ;;  %v7849_v30 = vunpack.i.h.bf16 %v19913_v47  ;;  %v19918_v41 = vld [vmem:[#allocation346_spill] sm:$0xff]  ;;  %v19922_v36 = vld [vmem:[#allocation279_spill] sm:$0xff] }
 0x764   :  { %8501 = vrot.lane.b32.xlu0 %v19911_v4, %s9007_s3  ;;  %7373 = vmatprep.subr.msk.bf16.mxu1 %vm16456_vm7, %v7371_v22  ;;  %v6448_v59 = vsel %vm6443_vm2, %v6383_v10, %v8198_v23  ;;  %v6449_v16 = vsel %vm6443_vm2, %v6384_v60, %v8199_v31  ;;  %v7848_v34 = vunpack.i.l.bf16 %v19913_v47  ;;  %v7648_v54 = vunpack.i.l.bf16 %v19915_v62 }
 0x765   :  { %v8207_v9 = vpop.permute.xlu1 %8206  ;;  %v8009_v26 = vunpack.i.h.bf16 %v19916_v20  ;;  %v8008_v2 = vunpack.i.l.bf16 %v19916_v20  ;;  %v16688_v33 = vsel %vm2206_vm4, %v8943_v57, %v7559_v49  ;;  %v8214_v3 = vunpack.i.h.bf16 %v16646_v14  ;;  %v19920_v49 = vld [vmem:[#allocation208_spill] sm:$0xff] }
 0x766   :  { %v8209_v51 = vunpack.i.h.bf16 %v8207_v9  ;;  %v8208_v8 = vunpack.i.l.bf16 %v8207_v9  ;;  %v8222_v18 = vpop.permute.xlu0 %8221  ;;  %v8213_v21 = vunpack.i.l.bf16 %v16646_v14  ;;  %v6143_v5 = vsel %vm2336_vm6, %v19917_v15, %v7688_v24 }
 0x767   :  { %8496 = vrot.lane.b32.xlu1 %v19907_v28, %s9006_s2  ;;  %v6144_v45 = vsel %vm2336_vm6, %v19918_v41, %v7689_v40  ;;  %v8224_v22 = vunpack.i.h.bf16 %v8222_v18  ;;  %v8223_v35 = vunpack.i.l.bf16 %v8222_v18  ;;  %v6207_v31 = vsel %vm2466_vm8, %v6143_v5, %v7848_v34  ;;  %v19923_v40 = vld [vmem:[#allocation192_spill] sm:$0xff] }
 0x768   :  { %v6513_v50 = vsel %vm6508_vm3, %v6448_v59, %v8208_v8  ;;  %v6514_v0 = vsel %vm6508_vm3, %v6449_v16, %v8209_v51  ;;  %8511 = vrot.lane.b32.xlu0 %v19914_v12, %s9008_s17  ;;  %v6208_v23 = vsel %vm2466_vm8, %v6144_v45, %v7849_v30  ;;  %v7649_v7 = vunpack.i.h.bf16 %v19915_v62  ;;  %v19924_v16 = vld [vmem:[#allocation239_spill] sm:$0xff] }
 0x769   :  { %v8217_v46 = vpop.permute.xlu1 %8216  ;;  %v7374_v17 = vpack.c.bf16 %v6514_v0, %v6513_v50  ;;  %v6127_v32 = vsel %vm2336_vm6, %v19921_v29, %v7648_v54  ;;  %v6271_v52 = vsel %vm2596_vm10, %v6207_v31, %v8008_v2  ;;  %v6272_v4 = vsel %vm2596_vm10, %v6208_v23, %v8009_v26  ;;  %v19925_v26 = vld [vmem:[#allocation283_spill] sm:$0xff]  ;;  %v19928_v23 = vld [vmem:[#allocation378_spill] sm:$0xff] }
 0x76a   :  { %v8232_v48 = vpop.permute.xlu0 %8231  ;;  %v7809_v9 = vunpack.i.h.bf16 %v19922_v36  ;;  %v7808_v10 = vunpack.i.l.bf16 %v19922_v36  ;;  %v6337_v60 = vsel %vm6313_vm14, %v6272_v4, %v8214_v3  ;;  %v6336_v51 = vsel %vm6313_vm14, %v6271_v52, %v8213_v21  ;;  %v8944_v45 = vld [vmem:[#allocation2 + $0x1c8] sm:$0xff] }
 0x76b   :  { %8506 = vrot.lane.b32.xlu1 %v19919_v55, %s9007_s3  ;;  %7376 = vmatpush3.bf16.xpose.msk.msra.mxu1 %vm16456_vm7, %v7374_v17  ;;  %v8234_v14 = vunpack.i.h.bf16 %v8232_v48  ;;  %v8233_v28 = vunpack.i.l.bf16 %v8232_v48  ;;  %v6401_v18 = vsel %vm6378_vm15, %v6336_v51, %v8223_v35  ;;  %v6402_v58 = vsel %vm6378_vm15, %v6337_v60, %v8224_v22  ;;  %v19927_v31 = vld [vmem:[#allocation63_spill] sm:$0xff]  ;;  %v19931_v60 = vld [vmem:[#allocation340_spill] sm:$0xff] }
 0x76c   :  { %8521 = vrot.lane.b32.xlu0 %v19920_v49, %s9009_s9  ;;  %v7969_v47 = vunpack.i.h.bf16 %v19924_v16  ;;  %v7968_v30 = vunpack.i.l.bf16 %v19924_v16  ;;  %v8219_v0 = vunpack.i.h.bf16 %v8217_v46  ;;  %v8218_v12 = vunpack.i.l.bf16 %v8217_v46  ;;  %v19926_v46 = vld [vmem:[#allocation324_spill] sm:$0xff]  ;;  %v19930_v4 = vld [vmem:[#allocation151_spill] sm:$0xff]  ;;  %v19934_v16 = vld [vmem:[#allocation282_spill] sm:$0xff] }
 0x76d   :  { %v8227_v43 = vpop.permute.xlu1 %8226  ;;  %v6466_v34 = vsel %vm6443_vm2, %v6401_v18, %v8233_v28  ;;  %v6467_v50 = vsel %vm6443_vm2, %v6402_v58, %v8234_v14  ;;  %v6128_v2 = vsel %vm2336_vm6, %v19925_v26, %v7649_v7  ;;  %v6191_v48 = vsel %vm2466_vm8, %v6127_v32, %v7808_v10 }
 0x76e   :  { %v8242_v8 = vpop.permute.xlu0 %8241  ;;  %v8229_v17 = vunpack.i.h.bf16 %v8227_v43  ;;  %v8228_v57 = vunpack.i.l.bf16 %v8227_v43  ;;  %v6192_v15 = vsel %vm2466_vm8, %v6128_v2, %v7809_v9  ;;  %v16736_v22 = vsel %vm2206_vm4, %v8944_v45, %v7558_v38  ;;  %v19935_v2 = vld [vmem:[#allocation285_spill] sm:$0xff] }
 0x76f   :  { %8516 = vrot.lane.b32.xlu1 %v19923_v40, %s9008_s17  ;;  %v8244_v24 = vunpack.i.h.bf16 %v8242_v8  ;;  %v8243_v59 = vunpack.i.l.bf16 %v8242_v8  ;;  %v6255_v35 = vsel %vm2596_vm10, %v6191_v48, %v7968_v30  ;;  %v6256_v55 = vsel %vm2596_vm10, %v6192_v15, %v7969_v47  ;;  %v19932_v40 = vld [vmem:[#allocation201_spill] sm:$0xff] }
 0x770   :  { %8531 = vrot.lane.b32.xlu0 %v19920_v49, %s9006_s2  ;;  %v19929_v14 = vpack.i.bf16 %v19927_v31, %v19928_v23  ;;  %v6320_v28 = vsel %vm6313_vm14, %v6255_v35, %v8218_v12  ;;  %v6321_v49 = vsel %vm6313_vm14, %v6256_v55, %v8219_v0  ;;  %v7694_v43 = vunpack.i.h.bf16 %v19930_v4  ;;  %v19940_v31 = vld [vmem:[#allocation411_spill] sm:$0xff] }
 0x771   :  { %v8237_v62 = vpop.permute.xlu1 %8236  ;;  %v6531_v54 = vsel %vm6508_vm3, %v6466_v34, %v8243_v59  ;;  %v6532_v20 = vsel %vm6508_vm3, %v6467_v50, %v8244_v24  ;;  %v6385_v38 = vsel %vm6378_vm15, %v6320_v28, %v8228_v57  ;;  %v6386_v7 = vsel %vm6378_vm15, %v6321_v49, %v8229_v17  ;;  %v19933_v24 = vld [vmem:[#allocation275_spill] sm:$0xff] }
 0x772   :  { %v16727_v3 = vpop.permute.xlu0 %8251  ;;  %v7377_v21 = vpack.c.bf16 %v6532_v20, %v6531_v54  ;;  %v8239_v5 = vunpack.i.h.bf16 %v8237_v62  ;;  %v8238_v41 = vunpack.i.l.bf16 %v8237_v62  ;;  %v7693_v36 = vunpack.i.l.bf16 %v19930_v4  ;;  %v16769_v54 = vld [vmem:[#allocation2 + $0x270] sm:$0xff]  ;;  %v16771_v20 = vld [vmem:[#allocation2 + $0x278] sm:$0xff]  ;;  %v19936_v57 = vld [vmem:[#allocation243_spill] sm:$0xff] }
 0x773   :  { %8526 = vrot.lane.b32.xlu1 %v19926_v46, %s9009_s9  ;;  %v7854_v51 = vunpack.i.h.bf16 %v19931_v60  ;;  %v7853_v8 = vunpack.i.l.bf16 %v19931_v60  ;;  %v7653_v59 = vunpack.i.l.bf16 %v19933_v24  ;;  %v8014_v47 = vunpack.i.h.bf16 %v19934_v16 }
 0x774   :  { %8541 = vrot.lane.b32.xlu0 %v19929_v14, %s9007_s3  ;;  %7379 = vmatprep.subr.msk.bf16.mxu1 %vm16456_vm7, %v7377_v21  ;;  %v6450_v9 = vsel %vm6443_vm2, %v6385_v38, %v8238_v41  ;;  %v6451_v10 = vsel %vm6443_vm2, %v6386_v7, %v8239_v5  ;;  %v8013_v30 = vunpack.i.l.bf16 %v19934_v16  ;;  %v8254_v0 = vunpack.i.h.bf16 %v16727_v3  ;;  %v19937_v5 = vld [vmem:[#allocation245_spill] sm:$0xff]  ;;  %v19938_v41 = vld [vmem:[#allocation64_spill] sm:$0xff]  ;;  %v19941_v14 = vld [vmem:[#allocation54_spill] sm:$0xff] }
 0x775   :  { %v8247_v11 = vpop.permute.xlu1 %8246  ;;  %v8253_v12 = vunpack.i.l.bf16 %v16727_v3  ;;  %v8680_v26 = vpack.i.bf16 %v16771_v20, %v16769_v54  ;;  %v6145_v17 = vsel %vm2336_vm6, %v19935_v2, %v7693_v36  ;;  %v6146_v21 = vsel %vm2336_vm6, %v19936_v57, %v7694_v43  ;;  %v19942_v7 = vld [vmem:[#allocation234_spill] sm:$0xff] }
 0x776   :  { %v8249_v29 = vunpack.i.h.bf16 %v8247_v11  ;;  %v8248_v32 = vunpack.i.l.bf16 %v8247_v11  ;;  %v8262_v52 = vpop.permute.xlu0 %8261  ;;  %v19939_v3 = vpack.i.bf16 %v19937_v5, %v19938_v41  ;;  %v6210_v45 = vsel %vm2466_vm8, %v6146_v21, %v7854_v51  ;;  %v19947_v41 = vld [vmem:[#allocation145_spill] sm:$0xff] }
 0x777   :  { %8536 = vrot.lane.b32.xlu1 %v19926_v46, %s9006_s2  ;;  %v8264_v48 = vunpack.i.h.bf16 %v8262_v52  ;;  %v8263_v15 = vunpack.i.l.bf16 %v8262_v52  ;;  %v6209_v46 = vsel %vm2466_vm8, %v6145_v17, %v7853_v8  ;;  %v7654_v23 = vunpack.i.h.bf16 %v19933_v24  ;;  %v19944_v8 = vld [vmem:[#allocation49_spill] sm:$0xff] }
 0x778   :  { %v6515_v18 = vsel %vm6508_vm3, %v6450_v9, %v8248_v32  ;;  %v6516_v58 = vsel %vm6508_vm3, %v6451_v10, %v8249_v29  ;;  %8551 = vrot.lane.b32.xlu0 %v19932_v40, %s9008_s17  ;;  %v6129_v28 = vsel %vm2336_vm6, %v19941_v14, %v7653_v59  ;;  %v6273_v49 = vsel %vm2596_vm10, %v6209_v46, %v8013_v30  ;;  %v19943_v10 = vld [vmem:[#allocation321_spill] sm:$0xff] }
 0x779   :  { %v16765_v34 = vpop.permute.xlu1 %8256  ;;  %v7380_v50 = vpack.c.bf16 %v6516_v58, %v6515_v18  ;;  %v6274_v11 = vsel %vm2596_vm10, %v6210_v45, %v8014_v47  ;;  %v7814_v29 = vunpack.i.h.bf16 %v19942_v7  ;;  %v7813_v32 = vunpack.i.l.bf16 %v19942_v7 }
 0x77a   :  { %v8272_v62 = vpop.permute.xlu0 %8271  ;;  %v6338_v52 = vsel %vm6313_vm14, %v6273_v49, %v8253_v12  ;;  %v6339_v4 = vsel %vm6313_vm14, %v6274_v11, %v8254_v0  ;;  %v7974_v18 = vunpack.i.h.bf16 %v19944_v8  ;;  %v7973_v58 = vunpack.i.l.bf16 %v19944_v8  ;;  %v19945_v12 = vld [vmem:[#allocation375_spill] sm:$0xff] }
 0x77b   :  { %8546 = vrot.lane.b32.xlu1 %v19939_v3, %s9007_s3  ;;  %7382 = vmatpush3.bf16.xpose.msk.msra.mxu1 %vm16456_vm7, %v7380_v50  ;;  %v8274_v35 = vunpack.i.h.bf16 %v8272_v62  ;;  %v8273_v55 = vunpack.i.l.bf16 %v8272_v62  ;;  %v6403_v36 = vsel %vm6378_vm15, %v6338_v52, %v8263_v15  ;;  %v6404_v9 = vsel %vm6378_vm15, %v6339_v4, %v8264_v48 }
 0x77c   :  { %8561 = vrot.lane.b32.xlu0 %v19940_v31, %s9009_s9  ;;  %v8259_v16 = vunpack.i.h.bf16 %v16765_v34  ;;  %v8258_v47 = vunpack.i.l.bf16 %v16765_v34  ;;  %v6130_v62 = vsel %vm2336_vm6, %v19945_v12, %v7654_v23  ;;  %v6193_v48 = vsel %vm2466_vm8, %v6129_v28, %v7813_v32  ;;  %v19946_v34 = vld [vmem:[#allocation325_spill] sm:$0xff] }
 0x77d   :  { %v8267_v38 = vpop.permute.xlu1 %8266  ;;  %v6468_v24 = vsel %vm6443_vm2, %v6403_v36, %v8273_v55  ;;  %v6469_v59 = vsel %vm6443_vm2, %v6404_v9, %v8274_v35  ;;  %v7594_v3 = vunpack.i.h.bf16 %v19947_v41  ;;  %v6257_v46 = vsel %vm2596_vm10, %v6193_v48, %v7973_v58  ;;  %v19949_v36 = vld [vmem:[#allocation341_spill] sm:$0xff] }
 0x77e   :  { %v8282_v43 = vpop.permute.xlu0 %8281  ;;  %v8269_v2 = vunpack.i.h.bf16 %v8267_v38  ;;  %v8268_v17 = vunpack.i.l.bf16 %v8267_v38  ;;  %v7593_v35 = vunpack.i.l.bf16 %v19947_v41  ;;  %v6322_v55 = vsel %vm6313_vm14, %v6257_v46, %v8258_v47  ;;  %v19958_v46 = vld [vmem:[#allocation195_spill] sm:$0xff] }
 0x77f   :  { %8556 = vrot.lane.b32.xlu1 %v19943_v10, %s9008_s17  ;;  %v8284_v60 = vunpack.i.h.bf16 %v8282_v43  ;;  %v8283_v51 = vunpack.i.l.bf16 %v8282_v43  ;;  %v7859_v9 = vunpack.i.h.bf16 %v19949_v36  ;;  %v7858_v10 = vunpack.i.l.bf16 %v19949_v36 }
 0x780   :  { %8571 = vrot.lane.b32.xlu0 %v19932_v40, %s9004_s1  ;;  %v6194_v40 = vsel %vm2466_vm8, %v6130_v62, %v7814_v29  ;;  %v6387_v28 = vsel %vm6378_vm15, %v6322_v55, %v8268_v17  ;;  %v19948_v29 = vld [vmem:[#allocation229_spill] sm:$0xff]  ;;  %v19950_v8 = vpack.i.bf16 %v16415_v39, %v16413_v19 }
 0x781   :  { %v8277_v30 = vpop.permute.xlu1 %8276  ;;  %v6533_v50 = vsel %vm6508_vm3, %v6468_v24, %v8283_v51  ;;  %v6534_v0 = vsel %vm6508_vm3, %v6469_v59, %v8284_v60  ;;  %v6258_v45 = vsel %vm2596_vm10, %v6194_v40, %v7974_v18  ;;  %v7699_v32 = vunpack.i.h.bf16 %v19948_v29  ;;  %v19951_v18 = vld [vmem:[#allocation276_spill] sm:$0xff]  ;;  %v19952_v24 = vld [vmem:[#allocation51_spill] sm:$0xff]  ;;  %v19953_v39 = vld [vmem:[#allocation65_spill] sm:$0xff] }
 0x782   :  { %v7383_v57 = vpack.c.bf16 %v6534_v0, %v6533_v50  ;;  %v8292_v21 = vpop.permute.xlu0 %8291  ;;  %v8279_v15 = vunpack.i.h.bf16 %v8277_v30  ;;  %v8278_v5 = vunpack.i.l.bf16 %v8277_v30  ;;  %v6323_v23 = vsel %vm6313_vm14, %v6258_v45, %v8259_v16  ;;  %v19955_v40 = vld [vmem:[#allocation66_spill] sm:$0xff] }
 0x783   :  { %8566 = vrot.lane.b32.xlu1 %v19946_v34, %s9009_s9  ;;  %v6388_v49 = vsel %vm6378_vm15, %v6323_v23, %v8269_v2  ;;  %v7698_v52 = vunpack.i.l.bf16 %v19948_v29  ;;  %v7658_v58 = vunpack.i.l.bf16 %v19951_v18  ;;  %v8019_v59 = vunpack.i.h.bf16 %v19952_v24  ;;  %v19954_v2 = vld [vmem:[#allocation287_spill] sm:$0xff] }
 0x784   :  { %8581 = vrot.lane.b32.xlu0 %v19946_v34, %s9006_s2  ;;  %7385 = vmatprep.subr.msk.bf16.mxu1 %vm16456_vm7, %v7383_v57  ;;  %v6452_v4 = vsel %vm6443_vm2, %v6387_v28, %v8278_v5  ;;  %v6453_v43 = vsel %vm6443_vm2, %v6388_v49, %v8279_v15  ;;  %v8018_v16 = vunpack.i.l.bf16 %v19952_v24  ;;  %v16849_v30 = vsel %vm2206_vm4, %v16771_v20, %v7594_v3  ;;  %v19956_v15 = vld [vmem:[#allocation62_spill] sm:$0xff]  ;;  %v19960_v49 = vld [vmem:[#allocation153_spill] sm:$0xff] }
 0x785   :  { %v8287_v14 = vpop.permute.xlu1 %8286  ;;  %v16853_v50 = vsel %vm2206_vm4, %v16769_v54, %v7593_v35  ;;  %v8294_v0 = vunpack.i.h.bf16 %v8292_v21  ;;  %v8293_v12 = vunpack.i.l.bf16 %v8292_v21  ;;  %v6147_v62 = vsel %vm2336_vm6, %v19953_v39, %v7698_v52  ;;  %v19959_v35 = vld [vmem:[#allocation345_spill] sm:$0xff] }
 0x786   :  { %v8289_v11 = vunpack.i.h.bf16 %v8287_v14  ;;  %v8288_v38 = vunpack.i.l.bf16 %v8287_v14  ;;  %v8302_v7 = vpop.permute.xlu0 %8301  ;;  %v6148_v17 = vsel %vm2336_vm6, %v19954_v2, %v7699_v32  ;;  %v19957_v5 = vpack.i.bf16 %v19955_v40, %v19956_v15 }
 0x787   :  { %8576 = vrot.lane.b32.xlu1 %v19940_v31, %s9006_s2  ;;  %v8304_v57 = vunpack.i.h.bf16 %v8302_v7  ;;  %v8303_v48 = vunpack.i.l.bf16 %v8302_v7  ;;  %v6211_v34 = vsel %vm2466_vm8, %v6147_v62, %v7858_v10  ;;  %v6212_v21 = vsel %vm2466_vm8, %v6148_v17, %v7859_v9  ;;  %v19962_v10 = vld [vmem:[#allocation50_spill] sm:$0xff] }
 0x788   :  { %v6517_v60 = vsel %vm6508_vm3, %v6452_v4, %v8288_v38  ;;  %v6518_v51 = vsel %vm6508_vm3, %v6453_v43, %v8289_v11  ;;  %8591 = vrot.lane.b32.xlu0 %v19950_v8, %s9007_s3  ;;  %v7659_v45 = vunpack.i.h.bf16 %v19951_v18  ;;  %v6131_v55 = vsel %vm2336_vm6, %v19959_v35, %v7658_v58  ;;  %v19961_v43 = vld [vmem:[#allocation323_spill] sm:$0xff]  ;;  %v19963_v58 = vld [vmem:[#allocation132_spill] sm:$0xff] }
 0x789   :  { %v7386_v31 = vpack.c.bf16 %v6518_v51, %v6517_v60  ;;  %v8297_v47 = vpop.permute.xlu1 %8296  ;;  %v6275_v23 = vsel %vm2596_vm10, %v6211_v34, %v8018_v16  ;;  %v6276_v14 = vsel %vm2596_vm10, %v6212_v21, %v8019_v59  ;;  %v7819_v11 = vunpack.i.h.bf16 %v19960_v49  ;;  %v19966_v21 = vld [vmem:[#allocation149_spill] sm:$0xff]  ;;  %v16905_v35 = vld [vmem:[#allocation2 + $0x288] sm:$0xff] }
 0x78a   :  { %v8312_v19 = vpop.permute.xlu0 %8311  ;;  %v7818_v38 = vunpack.i.l.bf16 %v19960_v49  ;;  %v6341_v7 = vsel %vm6313_vm14, %v6276_v14, %v8294_v0  ;;  %v6340_v29 = vsel %vm6313_vm14, %v6275_v23, %v8293_v12  ;;  %v7979_v60 = vunpack.i.h.bf16 %v19962_v10  ;;  %v19964_v12 = vld [vmem:[#allocation52_spill] sm:$0xff] }
 0x78b   :  { %8586 = vrot.lane.b32.xlu1 %v19957_v5, %s9007_s3  ;;  %7388 = vmatpush3.bf16.xpose.msk.msra.mxu1 %vm16456_vm7, %v7386_v31  ;;  %v8314_v41 = vunpack.i.h.bf16 %v8312_v19  ;;  %v8313_v3 = vunpack.i.l.bf16 %v8312_v19  ;;  %v6405_v52 = vsel %vm6378_vm15, %v6340_v29, %v8303_v48  ;;  %v6406_v4 = vsel %vm6378_vm15, %v6341_v7, %v8304_v57  ;;  %v19967_v7 = vld [vmem:[#allocation337_spill] sm:$0xff] }
 0x78c   :  { %8601 = vrot.lane.b32.xlu0 %v19958_v46, %s9008_s17  ;;  %v7978_v51 = vunpack.i.l.bf16 %v19962_v10  ;;  %v8299_v24 = vunpack.i.h.bf16 %v8297_v47  ;;  %v8298_v59 = vunpack.i.l.bf16 %v8297_v47  ;;  %v6132_v19 = vsel %vm2336_vm6, %v19964_v12, %v7659_v45  ;;  %v19965_v47 = vld [vmem:[#allocation402_spill] sm:$0xff] }
 0x78d   :  { %v8307_v28 = vpop.permute.xlu1 %8306  ;;  %v6470_v8 = vsel %vm6443_vm2, %v6405_v52, %v8313_v3  ;;  %v6471_v18 = vsel %vm6443_vm2, %v6406_v4, %v8314_v41  ;;  %v6195_v57 = vsel %vm2466_vm8, %v6131_v55, %v7818_v38  ;;  %v6196_v48 = vsel %vm2466_vm8, %v6132_v19, %v7819_v11  ;;  %v16907_v55 = vld [vmem:[#allocation2 + $0x290] sm:$0xff] }
 0x78e   :  { %v8322_v32 = vpop.permute.xlu0 %8321  ;;  %v8309_v39 = vunpack.i.h.bf16 %v8307_v28  ;;  %v8308_v62 = vunpack.i.l.bf16 %v8307_v28  ;;  %v6259_v5 = vsel %vm2596_vm10, %v6195_v57, %v7978_v51  ;;  %v6260_v34 = vsel %vm2596_vm10, %v6196_v48, %v7979_v60  ;;  %v19972_v57 = vld [vmem:[#allocation347_spill] sm:$0xff] }
 0x78f   :  { %8596 = vrot.lane.b32.xlu1 %v19961_v43, %s9008_s17  ;;  %v8324_v36 = vunpack.i.h.bf16 %v8322_v32  ;;  %v8323_v9 = vunpack.i.l.bf16 %v8322_v32  ;;  %v7663_v41 = vunpack.i.l.bf16 %v19966_v21  ;;  %v6324_v3 = vsel %vm6313_vm14, %v6259_v5, %v8298_v59  ;;  %v19974_v5 = vld [vmem:[#allocation336_spill] sm:$0xff] }
 0x790   :  { %8611 = vrot.lane.b32.xlu0 %v19963_v58, %s9009_s9  ;;  %v6325_v46 = vsel %vm6313_vm14, %v6260_v34, %v8299_v24  ;;  %v8725_v23 = vpack.i.bf16 %v16907_v55, %v16905_v35  ;;  %v6389_v14 = vsel %vm6378_vm15, %v6324_v3, %v8308_v62  ;;  %v7704_v29 = vunpack.i.h.bf16 %v19967_v7  ;;  %v19971_v62 = vld [vmem:[#allocation379_spill] sm:$0xff] }
 0x791   :  { %v8317_v16 = vpop.permute.xlu1 %8316  ;;  %v6535_v31 = vsel %vm6508_vm3, %v6470_v8, %v8323_v9  ;;  %v6536_v0 = vsel %vm6508_vm3, %v6471_v18, %v8324_v36  ;;  %v6390_v28 = vsel %vm6378_vm15, %v6325_v46, %v8309_v39  ;;  %v7703_v32 = vunpack.i.l.bf16 %v19967_v7  ;;  %v19968_v36 = vld [vmem:[#allocation41_spill] sm:$0xff]  ;;  %v19969_v8 = vld [vmem:[#allocation47_spill] sm:$0xff] }
 0x792   :  { %v7389_v2 = vpack.c.bf16 %v6536_v0, %v6535_v31  ;;  %v8332_v17 = vpop.permute.xlu0 %8331  ;;  %v8319_v40 = vunpack.i.h.bf16 %v8317_v16  ;;  %v8318_v15 = vunpack.i.l.bf16 %v8317_v16  ;;  %v7864_v9 = vunpack.i.h.bf16 %v19968_v36  ;;  %v19970_v31 = vld [vmem:[#allocation344_spill] sm:$0xff]  ;;  %v19975_v46 = vld [vmem:[#allocation277_spill] sm:$0xff] }
 0x793   :  { %8606 = vrot.lane.b32.xlu1 %v19965_v47, %s9009_s9  ;;  %v7863_v10 = vunpack.i.l.bf16 %v19968_v36  ;;  %v8024_v18 = vunpack.i.h.bf16 %v19969_v8  ;;  %v8023_v24 = vunpack.i.l.bf16 %v19969_v8  ;;  %v6133_v0 = vsel %vm2336_vm6, %v19970_v31, %v7663_v41 }
 0x794   :  { %8621 = vrot.lane.b32.xlu0 %v19965_v47, %s9006_s2  ;;  %7391 = vmatprep.subr.msk.bf16.mxu1 %vm16456_vm7, %v7389_v2  ;;  %v6454_v52 = vsel %vm6443_vm2, %v6389_v14, %v8318_v15  ;;  %v6455_v4 = vsel %vm6443_vm2, %v6390_v28, %v8319_v40  ;;  %v8334_v12 = vunpack.i.h.bf16 %v8332_v17  ;;  %v8333_v19 = vunpack.i.l.bf16 %v8332_v17  ;;  %v19973_v47 = vld [vmem:[#allocation131_spill] sm:$0xff] }
 0x795   :  { %v8327_v45 = vpop.permute.xlu1 %8326  ;;  %v6149_v2 = vsel %vm2336_vm6, %v19971_v62, %v7703_v32  ;;  %v6150_v1 = vsel %vm2336_vm6, %v19972_v57, %v7704_v29  ;;  %v7669_v34 = vunpack.i.h.bf16 %v19974_v5  ;;  %v7823_v14 = vunpack.i.l.bf16 %v19975_v46 }
 0x796   :  { %v8329_v49 = vunpack.i.h.bf16 %v8327_v45  ;;  %v8328_v11 = vunpack.i.l.bf16 %v8327_v45  ;;  %v8342_v38 = vpop.permute.xlu0 %8341  ;;  %v6213_v48 = vsel %vm2466_vm8, %v6149_v2, %v7863_v10  ;;  %v6214_v40 = vsel %vm2466_vm8, %v6150_v1, %v7864_v9  ;;  %v19980_v1 = vld [vmem:[#allocation242_spill] sm:$0xff] }
 0x797   :  { %8616 = vrot.lane.b32.xlu1 %v19961_v43, %s9004_s1  ;;  %v7664_v43 = vunpack.i.h.bf16 %v19966_v21  ;;  %v8344_v6 = vunpack.i.h.bf16 %v8342_v38  ;;  %v7668_v21 = vunpack.i.l.bf16 %v19974_v5  ;;  %v6277_v41 = vsel %vm2596_vm10, %v6213_v48, %v8023_v24 }
 0x798   :  { %v6519_v60 = vsel %vm6508_vm3, %v6454_v52, %v8328_v11  ;;  %v6520_v51 = vsel %vm6508_vm3, %v6455_v4, %v8329_v49  ;;  %8631 = vrot.lane.b32.xlu0 %v8630_v63, %s9007_s3  ;;  %v8343_v63 = vunpack.i.l.bf16 %v8342_v38  ;;  %v7824_v45 = vunpack.i.h.bf16 %v19975_v46  ;;  %v19976_v52 = vld [vmem:[#allocation281_spill] sm:$0xff] }
 0x799   :  { %v7392_v59 = vpack.c.bf16 %v6520_v51, %v6519_v60  ;;  %v8337_v16 = vpop.permute.xlu1 %8336  ;;  %v6342_v28 = vsel %vm6313_vm14, %v6277_v41, %v8333_v19  ;;  %v7984_v4 = vunpack.i.h.bf16 %v19976_v52  ;;  %v7983_v36 = vunpack.i.l.bf16 %v19976_v52  ;;  %v19977_v60 = vld [vmem:[#allocation211_spill] sm:$0xff] }
 0x79a   :  { %v8352_v39 = vpop.permute.xlu0 %8351  ;;  %v6407_v38 = vsel %vm6378_vm15, %v6342_v28, %v8343_v63  ;;  %v8339_v51 = vunpack.i.h.bf16 %v8337_v16  ;;  %v8338_v8 = vunpack.i.l.bf16 %v8337_v16  ;;  %v19979_v16 = vld [vmem:[#allocation19_spill] sm:$0xff] }
 0x79b   :  { %8626 = vrot.lane.b32.xlu1 %v19963_v58, %s9006_s2  ;;  %7394 = vmatpush3.bf16.xpose.msk.msra.mxu1 %vm16456_vm7, %v7392_v59  ;;  %v8354_v17 = vunpack.i.h.bf16 %v8352_v39  ;;  %v8353_v15 = vunpack.i.l.bf16 %v8352_v39  ;;  %v6278_v58 = vsel %vm2596_vm10, %v6214_v40, %v8024_v18  ;;  %v6197_v39 = vsel %vm2466_vm8, %v6133_v0, %v7823_v14  ;;  %v19981_v0 = vld [vmem:[#allocation58_spill] sm:$0xff]  ;;  %v19982_v40 = vld [vmem:[#allocation35_spill] sm:$0xff] }
 0x79c   :  { %8641 = vrot.lane.b32.xlu0 %v19973_v47, %s9008_s17  ;;  %v6343_v49 = vsel %vm6313_vm14, %v6278_v58, %v8334_v12  ;;  %v6261_v63 = vsel %vm2596_vm10, %v6197_v39, %v7983_v36  ;;  %v16982_v48 = vsel %vm2336_vm6, %v19981_v0, %v7669_v34  ;;  %v19986_v36 = vld [vmem:[#allocation374_spill] sm:$0xff] }
 0x79d   :  { %v8347_v3 = vpop.permute.xlu1 %8346  ;;  %v6408_v7 = vsel %vm6378_vm15, %v6343_v49, %v8344_v6  ;;  %v6472_v9 = vsel %vm6443_vm2, %v6407_v38, %v8353_v15  ;;  %v6135_v6 = vsel %vm2336_vm6, %v19980_v1, %v7668_v21  ;;  %v6326_v15 = vsel %vm6313_vm14, %v6261_v63, %v8338_v8  ;;  %v19985_v38 = vld [vmem:[#allocation43_spill] sm:$0xff] }
 0x79e   :  { %v8362_v11 = vpop.permute.xlu0 %8361  ;;  %v6473_v10 = vsel %vm6443_vm2, %v6408_v7, %v8354_v17  ;;  %v8349_v59 = vunpack.i.h.bf16 %v8347_v3  ;;  %v8348_v31 = vunpack.i.l.bf16 %v8347_v3  ;;  %v7713_v17 = vunpack.i.l.bf16 %v19982_v40 }
 0x79f   :  { %8636 = vrot.lane.b32.xlu1 %v8635_v44, %s9007_s3  ;;  %v8364_v29 = vunpack.i.h.bf16 %v8362_v11  ;;  %v8363_v32 = vunpack.i.l.bf16 %v8362_v11  ;;  %v6134_v44 = vsel %vm2336_vm6, %v19978_v53, %v7664_v43  ;;  %v19984_v11 = vld [vmem:[#allocation207_spill] sm:$0xff]  ;;  %v7869_v7 = vunpack.i.h.bf16 %v19985_v38 }
 0x7a0   :  { %8651 = vrot.lane.b32.xlu0 %v19977_v60, %s9009_s9  ;;  %v6198_v62 = vsel %vm2466_vm8, %v6134_v44, %v7824_v45  ;;  %v6391_v41 = vsel %vm6378_vm15, %v6326_v15, %v8348_v31  ;;  %v19983_v45 = vld [vmem:[#allocation231_spill] sm:$0xff] }
 0x7a1   :  { %v8357_v18 = vpop.permute.xlu1 %8356  ;;  %v6537_v24 = vsel %vm6508_vm3, %v6472_v9, %v8363_v32  ;;  %v6538_v37 = vsel %vm6508_vm3, %v6473_v10, %v8364_v29  ;;  %v6262_v43 = vsel %vm2596_vm10, %v6198_v62, %v7984_v4  ;;  %v7709_v14 = vunpack.i.h.bf16 %v19983_v45 }
 0x7a2   :  { %v7395_v12 = vpack.c.bf16 %v6538_v37, %v6537_v24  ;;  %v8372_v19 = vpop.permute.xlu0 %8371  ;;  %v8359_v2 = vunpack.i.h.bf16 %v8357_v18  ;;  %v8358_v57 = vunpack.i.l.bf16 %v8357_v18  ;;  %v6327_v5 = vsel %vm6313_vm14, %v6262_v43, %v8339_v51  ;;  %v19987_v18 = vld [vmem:[#allocation348_spill] sm:$0xff] }
 0x7a3   :  { %8646 = vrot.lane.b32.xlu1 %v19979_v16, %s9008_s17  ;;  %v6392_v58 = vsel %vm6378_vm15, %v6327_v5, %v8349_v59  ;;  %v7708_v28 = vunpack.i.l.bf16 %v19983_v45  ;;  %v7868_v29 = vunpack.i.l.bf16 %v19985_v38  ;;  %v7714_v4 = vunpack.i.h.bf16 %v19982_v40  ;;  %v19988_v37 = vld [vmem:[#allocation280_spill] sm:$0xff] }
 0x7a4   :  { %8661 = vrot.lane.b32.xlu0 %v19973_v47, %s9004_s1  ;;  %7397 = vmatprep.subr.msk.bf16.mxu1 %vm16456_vm7, %v7395_v12  ;;  %v6456_v34 = vsel %vm6443_vm2, %v6391_v41, %v8358_v57  ;;  %v6457_v49 = vsel %vm6443_vm2, %v6392_v58, %v8359_v2  ;;  %v8029_v9 = vunpack.i.h.bf16 %v19986_v36  ;;  %v8028_v10 = vunpack.i.l.bf16 %v19986_v36 }
 0x7a5   :  { %v8367_v21 = vpop.permute.xlu1 %8366  ;;  %v17008_v24 = vsel %vm2336_vm6, %v19987_v18, %v7713_v17  ;;  %v7828_v53 = vunpack.i.l.bf16 %v19988_v37  ;;  %v8374_v44 = vunpack.i.h.bf16 %v8372_v19  ;;  %v8373_v59 = vunpack.i.l.bf16 %v8372_v19  ;;  %v4052_v18 = vld [vmem:[#allocation2 + $0x358] sm:$0x3] }
 0x7a6   :  { %v8369_v3 = vunpack.i.h.bf16 %v8367_v21  ;;  %v8368_v47 = vunpack.i.l.bf16 %v8367_v21  ;;  %v8382_v46 = vpop.permute.xlu0 %8381  ;;  %v6151_v12 = vsel %vm2336_vm6, %v16509_v61, %v7708_v28  ;;  %v6152_v39 = vsel %vm2336_vm6, %v16503_v25, %v7709_v14  ;;  %v19989_v25 = vld [vmem:[#allocation278_spill] sm:$0xff]  ;;  %v19992_v28 = vld [vmem:[#allocation129_spill] sm:$0xff] }
 0x7a7   :  { %8656 = vrot.lane.b32.xlu1 %v19984_v11, %s9009_s9  ;;  %v8384_v62 = vunpack.i.h.bf16 %v8382_v46  ;;  %v8383_v2 = vunpack.i.l.bf16 %v8382_v46  ;;  %v6215_v57 = vsel %vm2466_vm8, %v6151_v12, %v7868_v29  ;;  %v6216_v16 = vsel %vm2466_vm8, %v6152_v39, %v7869_v7  ;;  %v17047_v29 = vld [vmem:[#allocation2 + $0x350] sm:$0xff]  ;;  %v19995_v39 = vld [vmem:[#allocation59_spill] sm:$0xff] }
 0x7a8   :  { %v6521_v32 = vsel %vm6508_vm3, %v6456_v34, %v8368_v47  ;;  %v6522_v52 = vsel %vm6508_vm3, %v6457_v49, %v8369_v3  ;;  %8671 = vrot.lane.b32.xlu0 %v19984_v11, %s9006_s2  ;;  %v7754_v61 = vunpack.i.h.bf16 %v19989_v25  ;;  %v7753_v63 = vunpack.i.l.bf16 %v19989_v25  ;;  %v19991_v47 = vld [vmem:[#allocation155_spill] sm:$0xff] }
 0x7a9   :  { %v7398_v51 = vpack.c.bf16 %v6522_v52, %v6521_v32  ;;  %v17004_v8 = vpop.permute.xlu1 %8376  ;;  %v6280_v43 = vsel %vm2596_vm10, %v6216_v16, %v8029_v9  ;;  %v7829_v17 = vunpack.i.h.bf16 %v19988_v37  ;;  %v6199_v15 = vsel %vm2466_vm8, %v6135_v6, %v7828_v53  ;;  %v19993_v37 = vld [vmem:[#allocation415_spill] sm:$0xff] }
 0x7aa   :  { %v8392_v31 = vpop.permute.xlu0 %8391  ;;  %v6345_v5 = vsel %vm6313_vm14, %v6280_v43, %v8374_v44  ;;  %v7989_v46 = vunpack.i.h.bf16 %v19991_v47  ;;  %v7988_v45 = vunpack.i.l.bf16 %v19991_v47  ;;  %v8379_v34 = vunpack.i.h.bf16 %v17004_v8 }
 0x7ab   :  { %8666 = vrot.lane.b32.xlu1 %v19977_v60, %s9006_s2  ;;  %7400 = vmatpush3.bf16.xpose.msk.msra.mxu1 %vm16456_vm7, %v7398_v51  ;;  %v8394_v19 = vunpack.i.h.bf16 %v8392_v31  ;;  %v8393_v1 = vunpack.i.l.bf16 %v8392_v31  ;;  %v6279_v60 = vsel %vm2596_vm10, %v6215_v57, %v8028_v10  ;;  %v6410_v20 = vsel %vm6378_vm15, %v6345_v5, %v8384_v62  ;;  %v4050_v51 = vld [vmem:[#allocation2 + $0x348] sm:$0xff]  ;;  %v19994_v31 = vld [vmem:[#allocation274_spill] sm:$0xff] }
 0x7ac   :  { %8681 = vrot.lane.b32.xlu0 %v8680_v26, %s9007_s3  ;;  %v6344_v21 = vsel %vm6313_vm14, %v6279_v60, %v8373_v59  ;;  %v19990_v26 = vld [vmem:[#allocation273_spill] sm:$0xff]  ;;  %v8378_v49 = vunpack.i.l.bf16 %v17004_v8  ;;  %v6200_v32 = vsel %vm2466_vm8, %v16982_v48, %v7829_v17  ;;  %v7914_v53 = vunpack.i.h.bf16 %v19993_v37 }
 0x7ad   :  { %v8387_v0 = vpop.permute.xlu1 %8386  ;;  %v6409_v54 = vsel %vm6378_vm15, %v6344_v21, %v8383_v2  ;;  %v6475_v14 = vsel %vm6443_vm2, %v6410_v20, %v8394_v19  ;;  %v7913_v8 = vunpack.i.l.bf16 %v19993_v37  ;;  %v6263_v12 = vsel %vm2596_vm10, %v6199_v15, %v7988_v45  ;;  %v19996_v2 = vld [vmem:[#allocation205_spill] sm:$0xff] }
 0x7ae   :  { %v8402_v41 = vpop.permute.xlu0 %8401  ;;  %v6474_v6 = vsel %vm6443_vm2, %v6409_v54, %v8393_v1  ;;  %v8389_v52 = vunpack.i.h.bf16 %v8387_v0  ;;  %v8388_v36 = vunpack.i.l.bf16 %v8387_v0  ;;  %v6264_v48 = vsel %vm2596_vm10, %v6200_v32, %v7989_v46 }
 0x7af   :  { %8676 = vrot.lane.b32.xlu1 %v19990_v26, %s9007_s3  ;;  %v8404_v58 = vunpack.i.h.bf16 %v8402_v41  ;;  %v8403_v3 = vunpack.i.l.bf16 %v8402_v41  ;;  %v8074_v62 = vunpack.i.h.bf16 %v19995_v39  ;;  %v5659_v57 = vrot.slane %v17047_v29, 1  ;;  %v19997_v26 = vld [vmem:[#allocation150_spill] sm:$0xff] }
 0x7b0   :  { %8691 = vrot.lane.b32.xlu0 %v19992_v28, %s9008_s17  ;;  %v6328_v16 = vsel %vm6313_vm14, %v6263_v12, %v8378_v49  ;;  %v6329_v19 = vsel %vm6313_vm14, %v6264_v48, %v8379_v34  ;;  %v5658_v60 = vrot.slane %v4050_v51, 1  ;;  %v5661_v43 = vrot.slane %v4052_v18, 1 }
 0x7b1   :  { %v8397_v11 = vpop.permute.xlu1 %8396  ;;  %v6539_v38 = vsel %vm6508_vm3, %v6474_v6, %v8403_v3  ;;  %v6540_v7 = vsel %vm6508_vm3, %v6475_v14, %v8404_v58  ;;  %v6393_v0 = vsel %vm6378_vm15, %v6328_v16, %v8388_v36  ;;  %v6394_v17 = vsel %vm6378_vm15, %v6329_v19, %v8389_v52  ;;  %v19998_v52 = vld [vmem:[#allocation371_spill] sm:$0xff] }
 0x7b2   :  { %v7401_v9 = vpack.c.bf16 %v6540_v7, %v6539_v38  ;;  %v17051_v10 = vpop.permute.xlu0 %8411  ;;  %v8399_v44 = vunpack.i.h.bf16 %v8397_v11  ;;  %v8398_v59 = vunpack.i.l.bf16 %v8397_v11  ;;  %v8073_v41 = vunpack.i.l.bf16 %v19995_v39 }
 0x7b3   :  { %8686 = vrot.lane.b32.xlu1 %v19994_v31, %s9008_s17  ;;  %v5861_v58 = vrot.slane %v17047_v29, 2  ;;  %v8720_v46 = vpack.i.bf16 %v17047_v29, %v4050_v51  ;;  %v5860_v45 = vrot.slane %v4050_v51, 2  ;;  %v5660_v28 = vsel %vm231_vm0, %v5658_v60, %v5659_v57 }
 0x7b4   :  { %8701 = vrot.lane.b32.xlu0 %v19996_v2, %s9009_s9  ;;  %7403 = vmatprep.subr.msk.bf16.mxu1 %vm16456_vm7, %v7401_v9  ;;  %v6458_v54 = vsel %vm6443_vm2, %v6393_v0, %v8398_v59  ;;  %v6459_v20 = vsel %vm6443_vm2, %v6394_v17, %v8399_v44  ;;  %v5662_v34 = vsel %vm231_vm0, %v5659_v57, %v5661_v43  ;;  %v5863_v49 = vrot.slane %v4052_v18, 2 }
 0x7b5   :  { %v8407_v1 = vpop.permute.xlu1 %8406  ;;  %v6169_v11 = vsel %vm2336_vm6, %v16853_v50, %v7753_v63  ;;  %v6170_v38 = vsel %vm2336_vm6, %v16849_v30, %v7754_v61  ;;  %v8414_v7 = vunpack.i.h.bf16 %v17051_v10  ;;  %v8413_v29 = vunpack.i.l.bf16 %v17051_v10 }
 0x7b6   :  { %v8409_v15 = vunpack.i.h.bf16 %v8407_v1  ;;  %v8408_v5 = vunpack.i.l.bf16 %v8407_v1  ;;  %v8422_v21 = vpop.permute.xlu0 %8421  ;;  %v7874_v36 = vunpack.i.h.bf16 %v19998_v52  ;;  %v6233_v9 = vsel %vm2466_vm8, %v6169_v11, %v7913_v8 }
 0x7b7   :  { %8696 = vrot.lane.b32.xlu1 %v19997_v26, %s9009_s9  ;;  %v8424_v51 = vunpack.i.h.bf16 %v8422_v21  ;;  %v8423_v18 = vunpack.i.l.bf16 %v8422_v21  ;;  %v6234_v50 = vsel %vm2466_vm8, %v6170_v38, %v7914_v53  ;;  %v8730_v61 = vpack.i.bf16 %v5662_v34, %v5660_v28 }
 0x7b8   :  { %v6523_v3 = vsel %vm6508_vm3, %v6458_v54, %v8408_v5  ;;  %v6524_v47 = vsel %vm6508_vm3, %v6459_v20, %v8409_v15  ;;  %8711 = vrot.lane.b32.xlu0 %v19997_v26, %s9006_s2  ;;  %v6297_v63 = vsel %vm2596_vm10, %v6233_v9, %v8073_v41  ;;  %v6298_v10 = vsel %vm2596_vm10, %v6234_v50, %v8074_v62  ;;  %v20000_v41 = vld [vmem:[#allocation288_spill] sm:$0xff] }
 0x7b9   :  { %v7404_v6 = vpack.c.bf16 %v6524_v47, %v6523_v3  ;;  %v17080_v14 = vpop.permute.xlu1 %8416  ;;  %v5862_v8 = vsel %vm584_vm1, %v5860_v45, %v5861_v58  ;;  %v5864_v44 = vsel %vm584_vm1, %v5861_v58, %v5863_v49  ;;  %v7873_v59 = vunpack.i.l.bf16 %v19998_v52  ;;  %v8949_v47 = vld [vmem:[%s17552_s4] sm:$0xff] }
 0x7ba   :  { %v8432_v32 = vpop.permute.xlu0 %8431  ;;  %v6362_v53 = vsel %vm6313_vm14, %v6297_v63, %v8413_v29  ;;  %v6363_v48 = vsel %vm6313_vm14, %v6298_v10, %v8414_v7  ;;  %v8740_v0 = vpack.i.bf16 %v5864_v44, %v5862_v8  ;;  %v8419_v17 = vunpack.i.h.bf16 %v17080_v14  ;;  %v20005_v8 = vld [vmem:[#allocation404_spill] sm:$0xff] }
 0x7bb   :  { %8706 = vrot.lane.b32.xlu1 %v19994_v31, %s9004_s1  ;;  %7406 = vmatpush3.bf16.xpose.msk.msra.mxu1 %vm16456_vm7, %v7404_v6  ;;  %v8434_v30 = vunpack.i.h.bf16 %v8432_v32  ;;  %v8433_v25 = vunpack.i.l.bf16 %v8432_v32  ;;  %v19999_v31 = vld [vmem:[#allocation343_spill] sm:$0xff]  ;;  %v6427_v57 = vsel %vm6378_vm15, %v6362_v53, %v8423_v18  ;;  %v6428_v16 = vsel %vm6378_vm15, %v6363_v48, %v8424_v51 }
 0x7bc   :  { %8721 = vrot.lane.b32.xlu0 %v8720_v46, %s9007_s3  ;;  %v8034_v12 = vunpack.i.h.bf16 %v19999_v31  ;;  %v8033_v1 = vunpack.i.l.bf16 %v19999_v31  ;;  %v8418_v15 = vunpack.i.l.bf16 %v17080_v14  ;;  %v6154_v54 = vsel %vm2336_vm6, %v20000_v41, %v7714_v4 }
 0x7bd   :  { %v8427_v37 = vpop.permute.xlu1 %8426  ;;  %v6492_v60 = vsel %vm6443_vm2, %v6427_v57, %v8433_v25  ;;  %v6493_v43 = vsel %vm6443_vm2, %v6428_v16, %v8434_v30  ;;  %v6217_v46 = vsel %vm2466_vm8, %v17008_v24, %v7873_v59  ;;  %v6218_v45 = vsel %vm2466_vm8, %v6154_v54, %v7874_v36  ;;  %v20001_v24 = vld [vmem:[#allocation335_spill] sm:$0xff]  ;;  %v20002_v36 = vld [vmem:[#allocation38_spill] sm:$0xff]  ;;  %v20003_v30 = vld [vmem:[#allocation108_spill] sm:$0xff] }
 0x7be   :  { %v8442_v39 = vpop.permute.xlu0 %8441  ;;  %v8429_v20 = vunpack.i.h.bf16 %v8427_v37  ;;  %v8428_v26 = vunpack.i.l.bf16 %v8427_v37  ;;  %v6281_v4 = vsel %vm2596_vm10, %v6217_v46, %v8033_v1  ;;  %v6282_v14 = vsel %vm2596_vm10, %v6218_v45, %v8034_v12  ;;  %v20004_v25 = vld [vmem:[#allocation416_spill] sm:$0xff] }
 0x7bf   :  { %8716 = vrot.lane.b32.xlu1 %v19996_v2, %s9006_s2  ;;  %v8444_v62 = vunpack.i.h.bf16 %v8442_v39  ;;  %v8443_v19 = vunpack.i.l.bf16 %v8442_v39  ;;  %v7599_v28 = vunpack.i.h.bf16 %v20001_v24  ;;  %v7598_v34 = vunpack.i.l.bf16 %v20001_v24  ;;  %v20006_v59 = vld [vmem:[#allocation244_spill] sm:$0xff] }
 0x7c0   :  { %8731 = vrot.lane.b32.xlu0 %v8730_v61, %s9008_s17  ;;  %v6346_v49 = vsel %vm6313_vm14, %v6281_v4, %v8418_v15  ;;  %v6347_v11 = vsel %vm6313_vm14, %v6282_v14, %v8419_v17  ;;  %v7759_v9 = vunpack.i.h.bf16 %v20002_v36  ;;  %v7758_v51 = vunpack.i.l.bf16 %v20002_v36 }
 0x7c1   :  { %v8437_v5 = vpop.permute.xlu1 %8436  ;;  %v6557_v21 = vsel %vm6508_vm3, %v6492_v60, %v8443_v19  ;;  %v6558_v2 = vsel %vm6508_vm3, %v6493_v43, %v8444_v62  ;;  %v6411_v38 = vsel %vm6378_vm15, %v6346_v49, %v8428_v26  ;;  %v6412_v7 = vsel %vm6378_vm15, %v6347_v11, %v8429_v20 }
 0x7c2   :  { %v7407_v58 = vpack.c.bf16 %v6558_v2, %v6557_v21  ;;  %v8452_v3 = vpop.permute.xlu0 %8451  ;;  %7210 = vmatmul.mubr.msk.f32.vlgmr.msra.gmra.mrb[0].mxu1 %vm6574_vm5, %v8949_v47  ;;  %v8439_v6 = vunpack.i.h.bf16 %v8437_v5  ;;  %v8438_v40 = vunpack.i.l.bf16 %v8437_v5  ;;  %v7919_v61 = vunpack.i.h.bf16 %v20004_v25 }
 0x7c3   :  { %8726 = vrot.lane.b32.xlu1 %v8725_v23, %s9007_s3  ;;  %7243 = vmatprep.mubr.msk.f32.mxu1 %vm6574_vm5, %v8949_v47  ;;  %v7918_v63 = vunpack.i.l.bf16 %v20004_v25  ;;  %v7718_v44 = vunpack.i.l.bf16 %v20005_v8  ;;  %v8079_v31 = vunpack.i.h.bf16 %v20006_v59  ;;  %v8078_v12 = vunpack.i.l.bf16 %v20006_v59 }
 0x7c4   :  { %8741 = vrot.lane.b32.xlu0 %v8740_v0, %s9009_s9  ;;  %7409 = vmatprep.subr.msk.bf16.mxu1 %vm16456_vm7, %v7407_v58  ;;  %v6476_v18 = vsel %vm6443_vm2, %v6411_v38, %v8438_v40  ;;  %v6477_v50 = vsel %vm6443_vm2, %v6412_v7, %v8439_v6  ;;  %v6108_v39 = vsel %vm2206_vm4, %v16907_v55, %v7599_v28  ;;  %v8454_v16 = vunpack.i.h.bf16 %v8452_v3  ;;  %v20008_v40 = vld [vmem:[#allocation241_spill] sm:$0xff] }
 0x7c5   :  { %v8447_v23 = vpop.permute.xlu1 %8446  ;;  %v6107_v57 = vsel %vm2206_vm4, %v16905_v35, %v7598_v34  ;;  %v8453_v62 = vunpack.i.l.bf16 %v8452_v3  ;;  %v6172_v60 = vsel %vm2336_vm6, %v6108_v39, %v7759_v9  ;;  %v7719_v5 = vunpack.i.h.bf16 %v20005_v8 }
 0x7c6   :  { %v8449_v29 = vunpack.i.h.bf16 %v8447_v23  ;;  %v8448_v32 = vunpack.i.l.bf16 %v8447_v23  ;;  %v8462_v52 = vpop.permute.xlu0 %8461  ;;  %v6171_v1 = vsel %vm2336_vm6, %v6107_v57, %v7758_v51  ;;  %v6236_v17 = vsel %vm2466_vm8, %v6172_v60, %v7919_v61 }
 0x7c7   :  { %8736 = vrot.lane.b32.xlu1 %v20003_v30, %s9008_s17  ;;  %v8464_v43 = vunpack.i.h.bf16 %v8462_v52  ;;  %v8463_v0 = vunpack.i.l.bf16 %v8462_v52  ;;  %v6235_v55 = vsel %vm2466_vm8, %v6171_v1, %v7918_v63  ;;  %v6155_v21 = vsel %vm2336_vm6, %v16736_v22, %v7718_v44  ;;  %v20009_v30 = vld [vmem:[#allocation223_spill] sm:$0xff] }
 0x7c8   :  { %v6541_v10 = vsel %vm6508_vm3, %v6476_v18, %v8448_v32  ;;  %v6542_v37 = vsel %vm6508_vm3, %v6477_v50, %v8449_v29  ;;  %v6299_v2 = vsel %vm2596_vm10, %v6235_v55, %v8078_v12  ;;  %v6300_v41 = vsel %vm2596_vm10, %v6236_v17, %v8079_v31 }
 0x7c9   :  { %v7410_v53 = vpack.c.bf16 %v6542_v37, %v6541_v10  ;;  %v8457_v48 = vpop.permute.xlu1 %8456  ;;  %v6365_v58 = vsel %vm6313_vm14, %v6300_v41, %v8454_v16  ;;  %v6364_v3 = vsel %vm6313_vm14, %v6299_v2, %v8453_v62  ;;  %v8039_v4 = vunpack.i.h.bf16 %v20008_v40  ;;  %v20011_v16 = vld [vmem:[#allocation414_spill] sm:$0xff] }
 0x7ca   :  { %v8472_v19 = vpop.permute.xlu0 %8471  ;;  %v6429_v46 = vsel %vm6378_vm15, %v6364_v3, %v8463_v0  ;;  %v6430_v45 = vsel %vm6378_vm15, %v6365_v58, %v8464_v43  ;;  %v8038_v14 = vunpack.i.l.bf16 %v20008_v40  ;;  %v8459_v34 = vunpack.i.h.bf16 %v8457_v48  ;;  %v20012_v43 = vld [vmem:[#allocation40_spill] sm:$0xff]  ;;  %v8951_v58 = vld [vmem:[#allocation2 + $0x2a0] sm:$0xff] }
 0x7cb   :  { %8746 = vrot.lane.b32.xlu1 %v19890_v13, %s9009_s9  ;;  %7412 = vmatpush3.bf16.xpose.msk.msra.mxu1 %vm16456_vm7, %v7410_v53  ;;  %v8474_v35 = vunpack.i.h.bf16 %v8472_v19  ;;  %v8473_v15 = vunpack.i.l.bf16 %v8472_v19  ;;  %v20007_v13 = vld [vmem:[#allocation372_spill] sm:$0xff]  ;;  %v8458_v49 = vunpack.i.l.bf16 %v8457_v48  ;;  %v6156_v7 = vsel %vm2336_vm6, %v16688_v33, %v7719_v5  ;;  %v20010_v33 = vld [vmem:[#allocation147_spill] sm:$0xff] }
 0x7cc   :  { %v7879_v20 = vunpack.i.h.bf16 %v20007_v13  ;;  %v7878_v26 = vunpack.i.l.bf16 %v20007_v13  ;;  %v7569_v25 = vunpack.i.h.bf16 %v20009_v30  ;;  %v7568_v61 = vunpack.i.l.bf16 %v20009_v30 }
 0x7cd   :  { %v8467_v54 = vpop.permute.xlu1 %8466  ;;  %v6494_v24 = vsel %vm6443_vm2, %v6429_v46, %v8473_v15  ;;  %v6495_v28 = vsel %vm6443_vm2, %v6430_v45, %v8474_v35  ;;  %v7604_v37 = vunpack.i.h.bf16 %v20010_v33  ;;  %v7603_v8 = vunpack.i.l.bf16 %v20010_v33  ;;  %v20013_v15 = vld [vmem:[#allocation230_spill] sm:$0xff] }
 0x7ce   :  { %v8482_v47 = vpop.permute.xlu0 %8481  ;;  %v8469_v29 = vunpack.i.h.bf16 %v8467_v54  ;;  %v8468_v32 = vunpack.i.l.bf16 %v8467_v54  ;;  %v6219_v9 = vsel %vm2466_vm8, %v6155_v21, %v7878_v26  ;;  %v6220_v51 = vsel %vm2466_vm8, %v6156_v7, %v7879_v20  ;;  %v20014_v21 = vld [vmem:[#allocation57_spill] sm:$0xff]  ;;  %v8950_v20 = vld [vmem:[#allocation2 + $0x2a8] sm:$0xff] }
 0x7cf   :  { %v8484_v6 = vunpack.i.h.bf16 %v8482_v47  ;;  %v8483_v22 = vunpack.i.l.bf16 %v8482_v47  ;;  %v6283_v63 = vsel %vm2596_vm10, %v6219_v9, %v8038_v14  ;;  %v6284_v10 = vsel %vm2596_vm10, %v6220_v51, %v8039_v4 }
 0x7d0   :  { %v6348_v44 = vsel %vm6313_vm14, %v6283_v63, %v8458_v49  ;;  %v6349_v59 = vsel %vm6313_vm14, %v6284_v10, %v8459_v34  ;;  %v7764_v62 = vunpack.i.h.bf16 %v20011_v16  ;;  %v7763_v19 = vunpack.i.l.bf16 %v20011_v16  ;;  %v20016_v10 = vld [vmem:[#allocation240_spill] sm:$0xff] }
 0x7d1   :  { %v8477_v11 = vpop.permute.xlu1 %8476  ;;  %v6559_v23 = vsel %vm6508_vm3, %v6494_v24, %v8483_v22  ;;  %v6560_v38 = vsel %vm6508_vm3, %v6495_v28, %v8484_v6  ;;  %v6413_v12 = vsel %vm6378_vm15, %v6348_v44, %v8468_v32  ;;  %v6414_v53 = vsel %vm6378_vm15, %v6349_v59, %v8469_v29  ;;  %v20015_v29 = vld [vmem:[#allocation235_spill] sm:$0xff] }
 0x7d2   :  { %v7413_v52 = vpack.c.bf16 %v6560_v38, %v6559_v23  ;;  %v8492_v36 = vpop.permute.xlu0 %8491  ;;  %v8479_v18 = vunpack.i.h.bf16 %v8477_v11  ;;  %v8478_v50 = vunpack.i.l.bf16 %v8477_v11  ;;  %v7924_v0 = vunpack.i.h.bf16 %v20012_v43 }
 0x7d3   :  { %v7923_v55 = vunpack.i.l.bf16 %v20012_v43  ;;  %v7723_v5 = vunpack.i.l.bf16 %v20013_v15  ;;  %v8084_v2 = vunpack.i.h.bf16 %v20014_v21  ;;  %v8083_v41 = vunpack.i.l.bf16 %v20014_v21  ;;  %v20017_v21 = vld [vmem:[#allocation227_spill] sm:$0xff] }
 0x7d4   :  { %7415 = vmatprep.subr.msk.bf16.mxu1 %vm16456_vm7, %v7413_v52  ;;  %v6478_v1 = vsel %vm6443_vm2, %v6413_v12, %v8478_v50  ;;  %v6479_v60 = vsel %vm6443_vm2, %v6414_v53, %v8479_v18  ;;  %v6110_v26 = vsel %vm2206_vm4, %v8950_v20, %v7604_v37  ;;  %v6109_v3 = vsel %vm2206_vm4, %v8951_v58, %v7603_v8 }
 0x7d5   :  { %v8487_v31 = vpop.permute.xlu1 %8486  ;;  %v8494_v47 = vunpack.i.h.bf16 %v8492_v36  ;;  %v8493_v46 = vunpack.i.l.bf16 %v8492_v36  ;;  %v6173_v6 = vsel %vm2336_vm6, %v6109_v3, %v7763_v19  ;;  %v6174_v22 = vsel %vm2336_vm6, %v6110_v26, %v7764_v62  ;;  %v20018_v3 = vld [vmem:[#allocation369_spill] sm:$0xff] }
 0x7d6   :  { %v8489_v48 = vunpack.i.h.bf16 %v8487_v31  ;;  %v8488_v39 = vunpack.i.l.bf16 %v8487_v31  ;;  %v8502_v57 = vpop.permute.xlu0 %8501  ;;  %v6237_v14 = vsel %vm2466_vm8, %v6173_v6, %v7923_v55  ;;  %v6238_v24 = vsel %vm2466_vm8, %v6174_v22, %v7924_v0  ;;  %v8952_v55 = vld [vmem:[#allocation2 + $0x200] sm:$0xff] }
 0x7d7   :  { %v8504_v40 = vunpack.i.h.bf16 %v8502_v57  ;;  %v8503_v4 = vunpack.i.l.bf16 %v8502_v57  ;;  %v7724_v49 = vunpack.i.h.bf16 %v20013_v15  ;;  %v6157_v11 = vsel %vm2336_vm6, %v16576_v42, %v7723_v5  ;;  %v20019_v22 = vld [vmem:[#allocation42_spill] sm:$0xff] }
 0x7d8   :  { %v6543_v17 = vsel %vm6508_vm3, %v6478_v1, %v8488_v39  ;;  %v6544_v35 = vsel %vm6508_vm3, %v6479_v60, %v8489_v48  ;;  %v6301_v23 = vsel %vm2596_vm10, %v6237_v14, %v8083_v41  ;;  %v6302_v38 = vsel %vm2596_vm10, %v6238_v24, %v8084_v2 }
 0x7d9   :  { %v7416_v54 = vpack.c.bf16 %v6544_v35, %v6543_v17  ;;  %v8497_v13 = vpop.permute.xlu1 %8496  ;;  %v7884_v32 = vunpack.i.h.bf16 %v20015_v29  ;;  %v7883_v52 = vunpack.i.l.bf16 %v20015_v29  ;;  %v6366_v36 = vsel %vm6313_vm14, %v6301_v23, %v8493_v46  ;;  %v8953_v35 = vld [vmem:[#allocation2 + $0x1f8] sm:$0xff]  ;;  %v8954_v29 = vld [vmem:[#allocation2 + $0x2c0] sm:$0xff] }
 0x7da   :  { %v8512_v45 = vpop.permute.xlu0 %8511  ;;  %v6367_v9 = vsel %vm6313_vm14, %v6302_v38, %v8494_v47  ;;  %v6431_v18 = vsel %vm6378_vm15, %v6366_v36, %v8503_v4  ;;  %v8044_v33 = vunpack.i.h.bf16 %v20016_v10  ;;  %v8043_v37 = vunpack.i.l.bf16 %v20016_v10 }
 0x7db   :  { %7418 = vmatpush3.bf16.xpose.msk.msra.mxu1 %vm16456_vm7, %v7416_v54  ;;  %v8514_v28 = vunpack.i.h.bf16 %v8512_v45  ;;  %v8513_v34 = vunpack.i.l.bf16 %v8512_v45  ;;  %v6432_v50 = vsel %vm6378_vm15, %v6367_v9, %v8504_v40  ;;  %v8499_v59 = vunpack.i.h.bf16 %v8497_v13 }
 0x7dc   :  { %v8498_v31 = vunpack.i.l.bf16 %v8497_v13  ;;  %v6158_v39 = vsel %vm2336_vm6, %v16571_v56, %v7724_v49  ;;  %v6221_v1 = vsel %vm2466_vm8, %v6157_v11, %v7883_v52  ;;  %v17250_v17 = vsel %vm2206_vm4, %v8952_v55, %v7569_v25  ;;  %v20021_v49 = vld [vmem:[#allocation158_spill] sm:$0xff]  ;;  %v8955_v52 = vld [vmem:[#allocation2 + $0x2b8] sm:$0xff] }
 0x7dd   :  { %v8507_v7 = vpop.permute.xlu1 %8506  ;;  %v6496_v8 = vsel %vm6443_vm2, %v6431_v18, %v8513_v34  ;;  %v6497_v44 = vsel %vm6443_vm2, %v6432_v50, %v8514_v28  ;;  %v6222_v60 = vsel %vm2466_vm8, %v6158_v39, %v7884_v32  ;;  %v6095_v56 = vsel %vm2206_vm4, %v8953_v35, %v7568_v61  ;;  %v20020_v28 = vld [vmem:[#allocation37_spill] sm:$0xff]  ;;  %v20022_v39 = vld [vmem:[#allocation236_spill] sm:$0xff] }
 0x7de   :  { %v8522_v51 = vpop.permute.xlu0 %8521  ;;  %v8509_v57 = vunpack.i.h.bf16 %v8507_v7  ;;  %v8508_v16 = vunpack.i.l.bf16 %v8507_v7  ;;  %v6285_v15 = vsel %vm2596_vm10, %v6221_v1, %v8043_v37  ;;  %v6286_v5 = vsel %vm2596_vm10, %v6222_v60, %v8044_v33  ;;  %v20023_v35 = vld [vmem:[#allocation56_spill] sm:$0xff] }
 0x7df   :  { %v8524_v63 = vunpack.i.h.bf16 %v8522_v51  ;;  %v8523_v42 = vunpack.i.l.bf16 %v8522_v51  ;;  %v7609_v2 = vunpack.i.h.bf16 %v20017_v21  ;;  %v7608_v41 = vunpack.i.l.bf16 %v20017_v21 }
 0x7e0   :  { %v6350_v54 = vsel %vm6313_vm14, %v6285_v15, %v8498_v31  ;;  %v6351_v25 = vsel %vm6313_vm14, %v6286_v5, %v8499_v59  ;;  %v7769_v47 = vunpack.i.h.bf16 %v20018_v3  ;;  %v7768_v46 = vunpack.i.l.bf16 %v20018_v3 }
 0x7e1   :  { %v8517_v12 = vpop.permute.xlu1 %8516  ;;  %v6561_v53 = vsel %vm6508_vm3, %v6496_v8, %v8523_v42  ;;  %v6562_v48 = vsel %vm6508_vm3, %v6497_v44, %v8524_v63  ;;  %v6415_v30 = vsel %vm6378_vm15, %v6350_v54, %v8508_v16  ;;  %v6416_v61 = vsel %vm6378_vm15, %v6351_v25, %v8509_v57 }
 0x7e2   :  { %v7419_v62 = vpack.c.bf16 %v6562_v48, %v6561_v53  ;;  %v8532_v19 = vpop.permute.xlu0 %8531  ;;  %v8519_v43 = vunpack.i.h.bf16 %v8517_v12  ;;  %v8518_v0 = vunpack.i.l.bf16 %v8517_v12  ;;  %v7929_v40 = vunpack.i.h.bf16 %v20019_v22 }
 0x7e3   :  { %v7928_v4 = vunpack.i.l.bf16 %v20019_v22  ;;  %v7728_v34 = vunpack.i.l.bf16 %v20020_v28  ;;  %v8089_v11 = vunpack.i.h.bf16 %v20021_v49  ;;  %v8088_v23 = vunpack.i.l.bf16 %v20021_v49 }
 0x7e4   :  { %7421 = vmatprep.subr.msk.bf16.mxu1 %vm16456_vm7, %v7419_v62  ;;  %v6480_v45 = vsel %vm6443_vm2, %v6415_v30, %v8518_v0  ;;  %v6481_v6 = vsel %vm6443_vm2, %v6416_v61, %v8519_v43  ;;  %v6112_v32 = vsel %vm2206_vm4, %v8954_v29, %v7609_v2  ;;  %v6111_v36 = vsel %vm2206_vm4, %v8955_v52, %v7608_v41 }
 0x7e5   :  { %v8527_v13 = vpop.permute.xlu1 %8526  ;;  %v8534_v9 = vunpack.i.h.bf16 %v8532_v19  ;;  %v8533_v51 = vunpack.i.l.bf16 %v8532_v19  ;;  %v6175_v50 = vsel %vm2336_vm6, %v6111_v36, %v7768_v46  ;;  %v6176_v63 = vsel %vm2336_vm6, %v6112_v32, %v7769_v47 }
 0x7e6   :  { %v8529_v20 = vunpack.i.h.bf16 %v8527_v13  ;;  %v8528_v26 = vunpack.i.l.bf16 %v8527_v13  ;;  %v8542_v58 = vpop.permute.xlu0 %8541  ;;  %v6239_v33 = vsel %vm2466_vm8, %v6175_v50, %v7928_v4  ;;  %v6240_v37 = vsel %vm2466_vm8, %v6176_v63, %v7929_v40  ;;  %v20024_v40 = vld [vmem:[#allocation148_spill] sm:$0xff] }
 0x7e7   :  { %v8544_v42 = vunpack.i.h.bf16 %v8542_v58  ;;  %v8543_v10 = vunpack.i.l.bf16 %v8542_v58  ;;  %v7729_v59 = vunpack.i.h.bf16 %v20020_v28  ;;  %v6159_v31 = vsel %vm2336_vm6, %v6095_v56, %v7728_v34 }
 0x7e8   :  { %v6545_v14 = vsel %vm6508_vm3, %v6480_v45, %v8528_v26  ;;  %v6546_v24 = vsel %vm6508_vm3, %v6481_v6, %v8529_v20  ;;  %v6303_v12 = vsel %vm2596_vm10, %v6239_v33, %v8088_v23  ;;  %v6304_v53 = vsel %vm2596_vm10, %v6240_v37, %v8089_v11 }
 0x7e9   :  { %v7422_v38 = vpack.c.bf16 %v6546_v24, %v6545_v14  ;;  %v8537_v7 = vpop.permute.xlu1 %8536  ;;  %v7889_v57 = vunpack.i.h.bf16 %v20022_v39  ;;  %v7888_v16 = vunpack.i.l.bf16 %v20022_v39  ;;  %v6369_v62 = vsel %vm6313_vm14, %v6304_v53, %v8534_v9  ;;  %v20026_v9 = vld [vmem:[#allocation232_spill] sm:$0xff]  ;;  %v20028_v53 = vld [vmem:[#allocation406_spill] sm:$0xff] }
 0x7ea   :  { %v8552_v18 = vpop.permute.xlu0 %8551  ;;  %v6368_v19 = vsel %vm6313_vm14, %v6303_v12, %v8533_v51  ;;  %v6434_v43 = vsel %vm6378_vm15, %v6369_v62, %v8544_v42  ;;  %v8049_v56 = vunpack.i.h.bf16 %v20023_v35  ;;  %v8048_v15 = vunpack.i.l.bf16 %v20023_v35  ;;  %v20027_v42 = vld [vmem:[#allocation339_spill] sm:$0xff]  ;;  %v8959_v35 = vld [vmem:[#allocation2 + $0x2d0] sm:$0xff] }
 0x7eb   :  { %7424 = vmatpush3.bf16.xpose.msk.msra.mxu1 %vm16456_vm7, %v7422_v38  ;;  %v8554_v8 = vunpack.i.h.bf16 %v8552_v18  ;;  %v8553_v44 = vunpack.i.l.bf16 %v8552_v18  ;;  %v6433_v60 = vsel %vm6378_vm15, %v6368_v19, %v8543_v10  ;;  %v8539_v2 = vunpack.i.h.bf16 %v8537_v7 }
 0x7ec   :  { %v8538_v41 = vunpack.i.l.bf16 %v8537_v7  ;;  %v6160_v30 = vsel %vm2336_vm6, %v17250_v17, %v7729_v59  ;;  %v6223_v3 = vsel %vm2466_vm8, %v6159_v31, %v7888_v16  ;;  %v7574_v17 = vunpack.i.h.bf16 %v20024_v40  ;;  %v20025_v7 = vld [vmem:[#allocation152_spill] sm:$0xff]  ;;  %v20029_v16 = vld [vmem:[#allocation46_spill] sm:$0xff] }
 0x7ed   :  { %v8547_v48 = vpop.permute.xlu1 %8546  ;;  %v6498_v5 = vsel %vm6443_vm2, %v6433_v60, %v8553_v44  ;;  %v6499_v21 = vsel %vm6443_vm2, %v6434_v43, %v8554_v8  ;;  %v6224_v47 = vsel %vm2466_vm8, %v6160_v30, %v7889_v57  ;;  %v6287_v6 = vsel %vm2596_vm10, %v6223_v3, %v8048_v15  ;;  %v8956_v44 = vld [vmem:[#allocation2 + $0x218] sm:$0xff]  ;;  %v8957_v31 = vld [vmem:[#allocation2 + $0x210] sm:$0xff] }
 0x7ee   :  { %v8562_v1 = vpop.permute.xlu0 %8561  ;;  %v8549_v61 = vunpack.i.h.bf16 %v8547_v48  ;;  %v8548_v20 = vunpack.i.l.bf16 %v8547_v48  ;;  %v6288_v22 = vsel %vm2596_vm10, %v6224_v47, %v8049_v56  ;;  %v7573_v4 = vunpack.i.l.bf16 %v20024_v40 }
 0x7ef   :  { %v8564_v0 = vunpack.i.h.bf16 %v8562_v1  ;;  %v8563_v55 = vunpack.i.l.bf16 %v8562_v1  ;;  %v6352_v14 = vsel %vm6313_vm14, %v6287_v6, %v8538_v41  ;;  %v6353_v24 = vsel %vm6313_vm14, %v6288_v22, %v8539_v2  ;;  %v20030_v1 = vld [vmem:[#allocation55_spill] sm:$0xff] }
 0x7f0   :  { %v6417_v34 = vsel %vm6378_vm15, %v6352_v14, %v8548_v20  ;;  %v6418_v49 = vsel %vm6378_vm15, %v6353_v24, %v8549_v61  ;;  %v7614_v29 = vunpack.i.h.bf16 %v20025_v7  ;;  %v7613_v32 = vunpack.i.l.bf16 %v20025_v7 }
 0x7f1   :  { %v8557_v54 = vpop.permute.xlu1 %8556  ;;  %v6563_v25 = vsel %vm6508_vm3, %v6498_v5, %v8563_v55  ;;  %v6564_v13 = vsel %vm6508_vm3, %v6499_v21, %v8564_v0  ;;  %v7734_v51 = vunpack.i.h.bf16 %v20026_v9  ;;  %v7733_v18 = vunpack.i.l.bf16 %v20026_v9  ;;  %v8958_v0 = vld [vmem:[#allocation2 + $0x2d8] sm:$0xff] }
 0x7f2   :  { %v7425_v26 = vpack.c.bf16 %v6564_v13, %v6563_v25  ;;  %v17302_v58 = vpop.permute.xlu0 %8571  ;;  %v8559_v46 = vunpack.i.h.bf16 %v8557_v54  ;;  %v8558_v45 = vunpack.i.l.bf16 %v8557_v54  ;;  %v7774_v10 = vunpack.i.h.bf16 %v20027_v42 }
 0x7f3   :  { %v7773_v33 = vunpack.i.l.bf16 %v20027_v42  ;;  %v6098_v59 = vsel %vm2206_vm4, %v8956_v44, %v7574_v17  ;;  %v6097_v12 = vsel %vm2206_vm4, %v8957_v31, %v7573_v4  ;;  %v7894_v48 = vunpack.i.h.bf16 %v20028_v53 }
 0x7f4   :  { %7427 = vmatprep.subr.msk.bf16.mxu1 %vm16456_vm7, %v7425_v26  ;;  %v6482_v52 = vsel %vm6443_vm2, %v6417_v34, %v8558_v45  ;;  %v6483_v36 = vsel %vm6443_vm2, %v6418_v49, %v8559_v46  ;;  %v7893_v39 = vunpack.i.l.bf16 %v20028_v53  ;;  %v7934_v62 = vunpack.i.h.bf16 %v20029_v16 }
 0x7f5   :  { %v8567_v28 = vpop.permute.xlu1 %8566  ;;  %v7933_v19 = vunpack.i.l.bf16 %v20029_v16  ;;  %v8054_v60 = vunpack.i.h.bf16 %v20030_v1  ;;  %v8053_v43 = vunpack.i.l.bf16 %v20030_v1  ;;  %v6114_v55 = vsel %vm2206_vm4, %v8958_v0, %v7614_v29  ;;  %v20032_v1 = vld [vmem:[#allocation233_spill] sm:$0xff] }
 0x7f6   :  { %v8569_v11 = vunpack.i.h.bf16 %v8567_v28  ;;  %v8568_v23 = vunpack.i.l.bf16 %v8567_v28  ;;  %v8582_v38 = vpop.permute.xlu0 %8581  ;;  %v6113_v56 = vsel %vm2206_vm4, %v8959_v35, %v7613_v32  ;;  %v6161_v15 = vsel %vm2336_vm6, %v6097_v12, %v7733_v18  ;;  %v20031_v12 = vld [vmem:[#allocation32_spill] sm:$0xff] }
 0x7f7   :  { %v6162_v5 = vsel %vm2336_vm6, %v6098_v59, %v7734_v51  ;;  %v6177_v21 = vsel %vm2336_vm6, %v6113_v56, %v7773_v33  ;;  %v6178_v2 = vsel %vm2336_vm6, %v6114_v55, %v7774_v10  ;;  %v8584_v41 = vunpack.i.h.bf16 %v8582_v38  ;;  %v20033_v35 = vld [vmem:[#allocation48_spill] sm:$0xff] }
 0x7f8   :  { %v6547_v50 = vsel %vm6508_vm3, %v6482_v52, %v8568_v23  ;;  %v6548_v63 = vsel %vm6508_vm3, %v6483_v36, %v8569_v11  ;;  %v8583_v54 = vunpack.i.l.bf16 %v8582_v38  ;;  %v6225_v13 = vsel %vm2466_vm8, %v6161_v15, %v7893_v39 }
 0x7f9   :  { %v7428_v37 = vpack.c.bf16 %v6548_v63, %v6547_v50  ;;  %v8577_v8 = vpop.permute.xlu1 %8576  ;;  %v6226_v30 = vsel %vm2466_vm8, %v6162_v5, %v7894_v48  ;;  %v6241_v3 = vsel %vm2466_vm8, %v6177_v21, %v7933_v19  ;;  %v6242_v47 = vsel %vm2466_vm8, %v6178_v2, %v7934_v62 }
 0x7fa   :  { %v8592_v57 = vpop.permute.xlu0 %8591  ;;  %v6289_v46 = vsel %vm2596_vm10, %v6225_v13, %v8053_v43  ;;  %v6290_v45 = vsel %vm2596_vm10, %v6226_v30, %v8054_v60  ;;  %v8574_v6 = vunpack.i.h.bf16 %v17302_v58  ;;  %v8573_v22 = vunpack.i.l.bf16 %v17302_v58  ;;  %v8961_v30 = vld [vmem:[#allocation2 + $0x2e8] sm:$0xff] }
 0x7fb   :  { %7430 = vmatpush3.bf16.xpose.msk.msra.mxu1 %vm16456_vm7, %v7428_v37  ;;  %v8594_v61 = vunpack.i.h.bf16 %v8592_v57  ;;  %v8593_v20 = vunpack.i.l.bf16 %v8592_v57  ;;  %v8579_v4 = vunpack.i.h.bf16 %v8577_v8  ;;  %v8578_v14 = vunpack.i.l.bf16 %v8577_v8 }
 0x7fc   :  { %v6354_v24 = vsel %vm6313_vm14, %v6289_v46, %v8583_v54  ;;  %v6355_v28 = vsel %vm6313_vm14, %v6290_v45, %v8584_v41  ;;  %v6305_v36 = vsel %vm2596_vm10, %v6241_v3, %v8573_v22  ;;  %v6306_v9 = vsel %vm2596_vm10, %v6242_v47, %v8574_v6  ;;  %v20034_v41 = vld [vmem:[#allocation31_spill] sm:$0xff] }
 0x7fd   :  { %v8587_v25 = vpop.permute.xlu1 %8586  ;;  %v6419_v23 = vsel %vm6378_vm15, %v6354_v24, %v8593_v20  ;;  %v6420_v38 = vsel %vm6378_vm15, %v6355_v28, %v8594_v61  ;;  %v6370_v50 = vsel %vm6313_vm14, %v6305_v36, %v8578_v14  ;;  %v6371_v63 = vsel %vm6313_vm14, %v6306_v9, %v8579_v4  ;;  %v20036_v36 = vld [vmem:[#allocation407_spill] sm:$0xff] }
 0x7fe   :  { %v8602_v26 = vpop.permute.xlu0 %8601  ;;  %v8589_v49 = vunpack.i.h.bf16 %v8587_v25  ;;  %v8588_v11 = vunpack.i.l.bf16 %v8587_v25  ;;  %v7619_v53 = vunpack.i.h.bf16 %v20031_v12  ;;  %v7618_v57 = vunpack.i.l.bf16 %v20031_v12  ;;  %v8960_v25 = vld [vmem:[#allocation2 + $0x2f0] sm:$0xff] }
 0x7ff   :  { %v8604_v40 = vunpack.i.h.bf16 %v8602_v26  ;;  %v8603_v17 = vunpack.i.l.bf16 %v8602_v26  ;;  %v7779_v60 = vunpack.i.h.bf16 %v20032_v1  ;;  %v7778_v43 = vunpack.i.l.bf16 %v20032_v1  ;;  %v20035_v26 = vld [vmem:[#allocation413_spill] sm:$0xff] }
 0x800   :  { %v6435_v37 = vsel %vm6378_vm15, %v6370_v50, %v8588_v11  ;;  %v6436_v8 = vsel %vm6378_vm15, %v6371_v63, %v8589_v49  ;;  %v7939_v56 = vunpack.i.h.bf16 %v20033_v35  ;;  %v7938_v15 = vunpack.i.l.bf16 %v20033_v35  ;;  %v8962_v49 = vld [vmem:[#allocation2 + $0x228] sm:$0xff] }
 0x801   :  { %v8597_v34 = vpop.permute.xlu1 %8596  ;;  %v6484_v51 = vsel %vm6443_vm2, %v6419_v23, %v8603_v17  ;;  %v6485_v18 = vsel %vm6443_vm2, %v6420_v38, %v8604_v40  ;;  %v7578_v54 = vunpack.i.l.bf16 %v20034_v41  ;;  %v6116_v13 = vsel %vm2206_vm4, %v8960_v25, %v7619_v53 }
 0x802   :  { %v8612_v7 = vpop.permute.xlu0 %8611  ;;  %v8599_v29 = vunpack.i.h.bf16 %v8597_v34  ;;  %v8598_v32 = vunpack.i.l.bf16 %v8597_v34  ;;  %v6115_v61 = vsel %vm2206_vm4, %v8961_v30, %v7618_v57  ;;  %v7579_v20 = vunpack.i.h.bf16 %v20034_v41 }
 0x803   :  { %v8614_v52 = vunpack.i.h.bf16 %v8612_v7  ;;  %v8613_v58 = vunpack.i.l.bf16 %v8612_v7  ;;  %v7738_v3 = vunpack.i.l.bf16 %v20035_v26  ;;  %v6179_v47 = vsel %vm2336_vm6, %v6115_v61, %v7778_v43  ;;  %v8963_v7 = vld [vmem:[#allocation2 + $0x230] sm:$0xff] }
 0x804   :  { %v6500_v48 = vsel %vm6443_vm2, %v6435_v37, %v8598_v32  ;;  %v6501_v39 = vsel %vm6443_vm2, %v6436_v8, %v8599_v29  ;;  %v6180_v46 = vsel %vm2336_vm6, %v6116_v13, %v7779_v60  ;;  %v6243_v6 = vsel %vm2466_vm8, %v6179_v47, %v7938_v15  ;;  %v20037_v8 = vld [vmem:[#allocation377_spill] sm:$0xff]  ;;  %v20039_v47 = vld [vmem:[#allocation226_spill] sm:$0xff] }
 0x805   :  { %v8607_v42 = vpop.permute.xlu1 %8606  ;;  %v6549_v10 = vsel %vm6508_vm3, %v6484_v51, %v8613_v58  ;;  %v6550_v33 = vsel %vm6508_vm3, %v6485_v18, %v8614_v52  ;;  %v6244_v22 = vsel %vm2466_vm8, %v6180_v46, %v7939_v56  ;;  %v6099_v11 = vsel %vm2206_vm4, %v8962_v49, %v7578_v54 }
 0x806   :  { %v8609_v44 = vunpack.i.h.bf16 %v8607_v42  ;;  %v8608_v59 = vunpack.i.l.bf16 %v8607_v42  ;;  %v8622_v31 = vpop.permute.xlu0 %8621  ;;  %v7434_v19 = vpack.c.bf16 %v6550_v33, %v6549_v10  ;;  %v6100_v29 = vsel %vm2206_vm4, %v8963_v7, %v7579_v20 }
 0x807   :  { %v8624_v40 = vunpack.i.h.bf16 %v8622_v31  ;;  %v8623_v17 = vunpack.i.l.bf16 %v8622_v31  ;;  %v7739_v32 = vunpack.i.h.bf16 %v20035_v26  ;;  %v6163_v52 = vsel %vm2336_vm6, %v6099_v11, %v7738_v3 }
 0x808   :  { %v6565_v16 = vsel %vm6508_vm3, %v6500_v48, %v8608_v59  ;;  %v6566_v62 = vsel %vm6508_vm3, %v6501_v39, %v8609_v44  ;;  %v7899_v9 = vunpack.i.h.bf16 %v20036_v36  ;;  %v7898_v51 = vunpack.i.l.bf16 %v20036_v36 }
 0x809   :  { %v7431_v0 = vpack.c.bf16 %v6566_v62, %v6565_v16  ;;  %v8617_v55 = vpop.permute.xlu1 %8616  ;;  %v8059_v44 = vunpack.i.h.bf16 %v20037_v8  ;;  %v8058_v59 = vunpack.i.l.bf16 %v20037_v8  ;;  %v6164_v62 = vsel %vm2336_vm6, %v6100_v29, %v7739_v32  ;;  %v8965_v29 = vld [vmem:[#allocation2 + $0x240] sm:$0xff] }
 0x80a   :  { %v8632_v5 = vpop.permute.xlu0 %8631  ;;  %v8619_v21 = vunpack.i.h.bf16 %v8617_v55  ;;  %v8618_v2 = vunpack.i.l.bf16 %v8617_v55  ;;  %v6228_v55 = vsel %vm2466_vm8, %v6164_v62, %v7899_v9  ;;  %v7624_v46 = vunpack.i.h.bf16 %v20039_v47  ;;  %v8967_v8 = vld [vmem:[#allocation2 + $0x300] sm:$0xff] }
 0x80b   :  { %7433 = vmatprep.subr.msk.bf16.mxu1 %vm16456_vm7, %v7431_v0  ;;  %v8634_v28 = vunpack.i.h.bf16 %v8632_v5  ;;  %v8633_v34 = vunpack.i.l.bf16 %v8632_v5  ;;  %v6227_v0 = vsel %vm2466_vm8, %v6163_v52, %v7898_v51  ;;  %v6292_v5 = vsel %vm2596_vm10, %v6228_v55, %v8059_v44  ;;  %v20042_v52 = vld [vmem:[#allocation44_spill] sm:$0xff]  ;;  %v20043_v51 = vld [vmem:[#allocation237_spill] sm:$0xff] }
 0x80c   :  { %7436 = vmatpush3.bf16.xpose.msk.msra.mxu1 %vm16456_vm7, %v7434_v19  ;;  %v6307_v14 = vsel %vm2596_vm10, %v6243_v6, %v8618_v2  ;;  %v6308_v24 = vsel %vm2596_vm10, %v6244_v22, %v8619_v21  ;;  %v6291_v15 = vsel %vm2596_vm10, %v6227_v0, %v8058_v59  ;;  %v20038_v21 = vld [vmem:[#allocation224_spill] sm:$0xff]  ;;  %v7903_v36 = vunpack.i.l.bf16 %v20042_v52 }
 0x80d   :  { %v8627_v45 = vpop.permute.xlu1 %8626  ;;  %v6373_v18 = vsel %vm6313_vm14, %v6308_v24, %v8624_v40  ;;  %v6372_v50 = vsel %vm6313_vm14, %v6307_v14, %v8623_v17  ;;  %v7584_v2 = vunpack.i.h.bf16 %v20038_v21  ;;  %v7583_v41 = vunpack.i.l.bf16 %v20038_v21  ;;  %v20040_v40 = vld [vmem:[#allocation405_spill] sm:$0xff] }
 0x80e   :  { %v8642_v4 = vpop.permute.xlu0 %8641  ;;  %v6437_v42 = vsel %vm6378_vm15, %v6372_v50, %v8633_v34  ;;  %v6438_v10 = vsel %vm6378_vm15, %v6373_v18, %v8634_v28  ;;  %v8629_v53 = vunpack.i.h.bf16 %v8627_v45  ;;  %v8628_v48 = vunpack.i.l.bf16 %v8627_v45  ;;  %v20041_v28 = vld [vmem:[#allocation39_spill] sm:$0xff] }
 0x80f   :  { %v8644_v23 = vunpack.i.h.bf16 %v8642_v4  ;;  %v8643_v38 = vunpack.i.l.bf16 %v8642_v4  ;;  %v7623_v45 = vunpack.i.l.bf16 %v20039_v47  ;;  %v7744_v17 = vunpack.i.h.bf16 %v20040_v40 }
 0x810   :  { %v6356_v54 = vsel %vm6313_vm14, %v6291_v15, %v8628_v48  ;;  %v6357_v25 = vsel %vm6313_vm14, %v6292_v5, %v8629_v53  ;;  %v7743_v4 = vunpack.i.l.bf16 %v20040_v40  ;;  %v7784_v34 = vunpack.i.h.bf16 %v20041_v28 }
 0x811   :  { %v8637_v58 = vpop.permute.xlu1 %8636  ;;  %v6502_v31 = vsel %vm6443_vm2, %v6437_v42, %v8643_v38  ;;  %v6503_v12 = vsel %vm6443_vm2, %v6438_v10, %v8644_v23  ;;  %v7783_v49 = vunpack.i.l.bf16 %v20041_v28  ;;  %v8964_v38 = vld [vmem:[#allocation2 + $0x248] sm:$0xff]  ;;  %v6101_v32 = vsel %vm2206_vm4, %v8965_v29, %v7583_v41 }
 0x812   :  { %v8652_v63 = vpop.permute.xlu0 %8651  ;;  %v8639_v19 = vunpack.i.h.bf16 %v8637_v58  ;;  %v8638_v1 = vunpack.i.l.bf16 %v8637_v58  ;;  %v6102_v7 = vsel %vm2206_vm4, %v8964_v38, %v7584_v2  ;;  %v7904_v58 = vunpack.i.h.bf16 %v20042_v52 }
 0x813   :  { %v8654_v33 = vunpack.i.h.bf16 %v8652_v63  ;;  %v8653_v37 = vunpack.i.l.bf16 %v8652_v63  ;;  %v7944_v18 = vunpack.i.h.bf16 %v20043_v51  ;;  %v7943_v50 = vunpack.i.l.bf16 %v20043_v51  ;;  %v20044_v63 = vld [vmem:[#allocation376_spill] sm:$0xff] }
 0x814   :  { %v6421_v30 = vsel %vm6378_vm15, %v6356_v54, %v8638_v1  ;;  %v6422_v61 = vsel %vm6378_vm15, %v6357_v25, %v8639_v19  ;;  %v8064_v42 = vunpack.i.h.bf16 %v20044_v63  ;;  %v8063_v10 = vunpack.i.l.bf16 %v20044_v63  ;;  %v20046_v63 = vld [vmem:[#allocation370_spill] sm:$0xff] }
 0x815   :  { %v8647_v39 = vpop.permute.xlu1 %8646  ;;  %v6567_v57 = vsel %vm6508_vm3, %v6502_v31, %v8653_v37  ;;  %v6568_v16 = vsel %vm6508_vm3, %v6503_v12, %v8654_v33  ;;  %v8966_v33 = vld [vmem:[#allocation2 + $0x308] sm:$0xff]  ;;  %v6117_v44 = vsel %vm2206_vm4, %v8967_v8, %v7623_v45  ;;  %v6165_v59 = vsel %vm2336_vm6, %v6101_v32, %v7743_v4  ;;  %v20045_v32 = vld [vmem:[#allocation228_spill] sm:$0xff]  ;;  %v20047_v8 = vld [vmem:[#allocation238_spill] sm:$0xff] }
 0x816   :  { %v7437_v60 = vpack.c.bf16 %v6568_v16, %v6567_v57  ;;  %v17406_v43 = vpop.permute.xlu0 %8661  ;;  %v8649_v35 = vunpack.i.h.bf16 %v8647_v39  ;;  %v8648_v56 = vunpack.i.l.bf16 %v8647_v39  ;;  %v6118_v37 = vsel %vm2206_vm4, %v8966_v33, %v7624_v46 }
 0x817   :  { %v6166_v31 = vsel %vm2336_vm6, %v6102_v7, %v7744_v17  ;;  %v6181_v12 = vsel %vm2336_vm6, %v6117_v44, %v7783_v49  ;;  %v6182_v53 = vsel %vm2336_vm6, %v6118_v37, %v7784_v34  ;;  %v6229_v16 = vsel %vm2466_vm8, %v6165_v59, %v7903_v36 }
 0x818   :  { %7439 = vmatprep.subr.msk.bf16.mxu1 %vm16456_vm7, %v7437_v60  ;;  %v6486_v6 = vsel %vm6443_vm2, %v6421_v30, %v8648_v56  ;;  %v6487_v22 = vsel %vm6443_vm2, %v6422_v61, %v8649_v35  ;;  %v6230_v62 = vsel %vm2466_vm8, %v6166_v31, %v7904_v58  ;;  %v6245_v0 = vsel %vm2466_vm8, %v6181_v12, %v7943_v50 }
 0x819   :  { %v8657_v13 = vpop.permute.xlu1 %8656  ;;  %v6246_v55 = vsel %vm2466_vm8, %v6182_v53, %v7944_v18  ;;  %v6293_v35 = vsel %vm2596_vm10, %v6229_v16, %v8063_v10  ;;  %v6294_v56 = vsel %vm2596_vm10, %v6230_v62, %v8064_v42  ;;  %v8664_v15 = vunpack.i.h.bf16 %v17406_v43  ;;  %v8969_v62 = vld [vmem:[#allocation2 + $0x318] sm:$0xff] }
 0x81a   :  { %v8659_v20 = vunpack.i.h.bf16 %v8657_v13  ;;  %v8658_v26 = vunpack.i.l.bf16 %v8657_v13  ;;  %v8672_v3 = vpop.permute.xlu0 %8671  ;;  %v8663_v5 = vunpack.i.l.bf16 %v17406_v43  ;;  %v7629_v52 = vunpack.i.h.bf16 %v20045_v32 }
 0x81b   :  { %v8674_v48 = vunpack.i.h.bf16 %v8672_v3  ;;  %v8673_v39 = vunpack.i.l.bf16 %v8672_v3  ;;  %v6310_v40 = vsel %vm2596_vm10, %v6246_v55, %v8664_v15  ;;  %v7789_v42 = vunpack.i.h.bf16 %v20046_v63 }
 0x81c   :  { %v6551_v14 = vsel %vm6508_vm3, %v6486_v6, %v8658_v26  ;;  %v6552_v24 = vsel %vm6508_vm3, %v6487_v22, %v8659_v20  ;;  %v6309_v22 = vsel %vm2596_vm10, %v6245_v0, %v8663_v5  ;;  %v7788_v10 = vunpack.i.l.bf16 %v20046_v63 }
 0x81d   :  { %v7440_v11 = vpack.c.bf16 %v6552_v24, %v6551_v14  ;;  %v8667_v23 = vpop.permute.xlu1 %8666  ;;  %v6358_v25 = vsel %vm6313_vm14, %v6293_v35, %v8673_v39  ;;  %v6359_v13 = vsel %vm6313_vm14, %v6294_v56, %v8674_v48  ;;  %v7949_v44 = vunpack.i.h.bf16 %v20047_v8  ;;  %v20048_v48 = vld [vmem:[#allocation334_spill] sm:$0xff] }
 0x81e   :  { %v8682_v9 = vpop.permute.xlu0 %8681  ;;  %v8669_v41 = vunpack.i.h.bf16 %v8667_v23  ;;  %v8668_v54 = vunpack.i.l.bf16 %v8667_v23  ;;  %v7948_v59 = vunpack.i.l.bf16 %v20047_v8  ;;  %v7588_v39 = vunpack.i.l.bf16 %v20048_v48 }
 0x81f   :  { %7442 = vmatpush3.bf16.xpose.msk.msra.mxu1 %vm16456_vm7, %v7440_v11  ;;  %v8684_v19 = vunpack.i.h.bf16 %v8682_v9  ;;  %v8683_v1 = vunpack.i.l.bf16 %v8682_v9  ;;  %v7628_v9 = vunpack.i.l.bf16 %v20045_v32 }
 0x820   :  { %v6374_v14 = vsel %vm6313_vm14, %v6309_v22, %v8668_v54  ;;  %v6375_v24 = vsel %vm6313_vm14, %v6310_v40, %v8669_v41  ;;  %v20050_v22 = vld [vmem:[#allocation45_spill] sm:$0xff] }
 0x821   :  { %v8677_v57 = vpop.permute.xlu1 %8676  ;;  %v6423_v26 = vsel %vm6378_vm15, %v6358_v25, %v8683_v1  ;;  %v6424_v3 = vsel %vm6378_vm15, %v6359_v13, %v8684_v19  ;;  %v6119_v19 = vsel %vm2206_vm4, %v8969_v62, %v7628_v9  ;;  %v7589_v1 = vunpack.i.h.bf16 %v20048_v48 }
 0x822   :  { %v8692_v60 = vpop.permute.xlu0 %8691  ;;  %v8679_v61 = vunpack.i.h.bf16 %v8677_v57  ;;  %v8678_v20 = vunpack.i.l.bf16 %v8677_v57  ;;  %v8968_v57 = vld [vmem:[#allocation2 + $0x320] sm:$0xff]  ;;  %v6183_v55 = vsel %vm2336_vm6, %v6119_v19, %v7788_v10  ;;  %v7909_v40 = vunpack.i.h.bf16 %v20050_v22 }
 0x823   :  { %v8694_v21 = vunpack.i.h.bf16 %v8692_v60  ;;  %v8693_v2 = vunpack.i.l.bf16 %v8692_v60  ;;  %v6120_v16 = vsel %vm2206_vm4, %v8968_v57, %v7629_v52  ;;  %v20049_v60 = vld [vmem:[#allocation154_spill] sm:$0xff]  ;;  %v6247_v15 = vsel %vm2466_vm8, %v6183_v55, %v7948_v59 }
 0x824   :  { %v6439_v11 = vsel %vm6378_vm15, %v6374_v14, %v8678_v20  ;;  %v6440_v23 = vsel %vm6378_vm15, %v6375_v24, %v8679_v61  ;;  %v7748_v0 = vunpack.i.l.bf16 %v20049_v60  ;;  %v6184_v35 = vsel %vm2336_vm6, %v6120_v16, %v7789_v42  ;;  %v8970_v61 = vld [vmem:[#allocation2 + $0x258] sm:$0xff]  ;;  %v8972_v55 = vld [vmem:[%s17552_s4] sm:$0xff] }
 0x825   :  { %v8687_v30 = vpop.permute.xlu1 %8686  ;;  %v6488_v17 = vsel %vm6443_vm2, %v6423_v26, %v8693_v2  ;;  %v6489_v4 = vsel %vm6443_vm2, %v6424_v3, %v8694_v21  ;;  %v6248_v5 = vsel %vm2466_vm8, %v6184_v35, %v7949_v44  ;;  %v6103_v20 = vsel %vm2206_vm4, %v8970_v61, %v7588_v39 }
 0x826   :  { %v8702_v47 = vpop.permute.xlu0 %8701  ;;  %v8689_v46 = vunpack.i.h.bf16 %v8687_v30  ;;  %v8688_v45 = vunpack.i.l.bf16 %v8687_v30 }
 0x827   :  { %v8704_v6 = vunpack.i.h.bf16 %v8702_v47  ;;  %v8703_v43 = vunpack.i.l.bf16 %v8702_v47  ;;  %v8971_v47 = vld [vmem:[#allocation2 + $0x260] sm:$0xff] }
 0x828   :  { %v6504_v58 = vsel %vm6443_vm2, %v6439_v11, %v8688_v45  ;;  %v6505_v36 = vsel %vm6443_vm2, %v6440_v23, %v8689_v46  ;;  %v6104_v46 = vsel %vm2206_vm4, %v8971_v47, %v7589_v1  ;;  %v7749_v45 = vunpack.i.h.bf16 %v20049_v60  ;;  %v20051_v23 = vld [vmem:[#allocation286_spill] sm:$0xff] }
 0x829   :  { %v8697_v28 = vpop.permute.xlu1 %8696  ;;  %v6553_v34 = vsel %vm6508_vm3, %v6488_v17, %v8703_v43  ;;  %v6554_v49 = vsel %vm6508_vm3, %v6489_v4, %v8704_v6  ;;  %v6167_v6 = vsel %vm2336_vm6, %v6103_v20, %v7748_v0  ;;  %v7908_v17 = vunpack.i.l.bf16 %v20050_v22 }
 0x82a   :  { %v8699_v38 = vunpack.i.h.bf16 %v8697_v28  ;;  %v8698_v7 = vunpack.i.l.bf16 %v8697_v28  ;;  %v8712_v29 = vpop.permute.xlu0 %8711  ;;  %v7446_v50 = vpack.c.bf16 %v6554_v49, %v6553_v34 }
 0x82b   :  { %v8714_v21 = vunpack.i.h.bf16 %v8712_v29  ;;  %v8713_v2 = vunpack.i.l.bf16 %v8712_v29  ;;  %v6231_v10 = vsel %vm2466_vm8, %v6167_v6, %v7908_v17 }
 0x82c   :  { %v6569_v51 = vsel %vm6508_vm3, %v6504_v58, %v8698_v7  ;;  %v6570_v18 = vsel %vm6508_vm3, %v6505_v36, %v8699_v38  ;;  %v8069_v38 = vunpack.i.h.bf16 %v20051_v23  ;;  %v8068_v7 = vunpack.i.l.bf16 %v20051_v23 }
 0x82d   :  { %v7443_v33 = vpack.c.bf16 %v6570_v18, %v6569_v51  ;;  %v8707_v37 = vpop.permute.xlu1 %8706  ;;  %v6168_v18 = vsel %vm2336_vm6, %v6104_v46, %v7749_v45 }
 0x82e   :  { %v8722_v31 = vpop.permute.xlu0 %8721  ;;  %v8709_v12 = vunpack.i.h.bf16 %v8707_v37  ;;  %v8708_v53 = vunpack.i.l.bf16 %v8707_v37  ;;  %v6295_v44 = vsel %vm2596_vm10, %v6231_v10, %v8068_v7 }
 0x82f   :  { %7445 = vmatprep.subr.msk.bf16.mxu1 %vm16456_vm7, %v7443_v33  ;;  %v8724_v13 = vunpack.i.h.bf16 %v8722_v31  ;;  %v8723_v30 = vunpack.i.l.bf16 %v8722_v31  ;;  %v6232_v33 = vsel %vm2466_vm8, %v6168_v18, %v7909_v40  ;;  %v6930_v40 = vld [vmem:[%s17553_s5] sm:$0xff]  ;;  %s8973_s5 = scalar_lea.vmem %s6970_s8, 512 }
 0x830   :  { %7448 = vmatpush3.bf16.xpose.msk.msra.mxu1 %vm16456_vm7, %v7446_v50  ;;  %v6311_v54 = vsel %vm2596_vm10, %v6247_v15, %v8708_v53  ;;  %v6312_v25 = vsel %vm2596_vm10, %v6248_v5, %v8709_v12  ;;  %v6296_v59 = vsel %vm2596_vm10, %v6232_v33, %v8069_v38  ;;  %p8974_p0 = scmp.ne.s32.totalorder %s6970_s8, %s8973_s5  ;;  %p8979_p2 = scmp.lt.s32.totalorder %s8973_s5, %s8973_s5 }
 0x831   :  { %v8717_v56 = vpop.permute.xlu1 %8716  ;;  %v6377_v4 = vsel %vm6313_vm14, %v6312_v25, %v8714_v21  ;;  %v6376_v14 = vsel %vm6313_vm14, %v6311_v54, %v8713_v2 }
 0x832   :  { %v8732_v41 = vpop.permute.xlu0 %8731  ;;  %v6441_v28 = vsel %vm6378_vm15, %v6376_v14, %v8723_v30  ;;  %v6442_v34 = vsel %vm6378_vm15, %v6377_v4, %v8724_v13  ;;  %v8719_v52 = vunpack.i.h.bf16 %v8717_v56  ;;  %v8718_v58 = vunpack.i.l.bf16 %v8717_v56  ;;  %v6934_v14 = vld [vmem:[%s17554_s6] sm:$0xff]  ;;  %p8980_p3 = por %p8979_p2, %p8978_p1 }
 0x833   :  { %v8734_v26 = vunpack.i.h.bf16 %v8732_v41  ;;  %v8733_v3 = vunpack.i.l.bf16 %v8732_v41 }
 0x834   :  { %v6360_v31 = vsel %vm6313_vm14, %v6295_v44, %v8718_v58  ;;  %v6361_v12 = vsel %vm6313_vm14, %v6296_v59, %v8719_v52  ;;  %p8981_p4 = pnand %p8980_p3, %p8974_p0 }
 0x835   :  { %v8727_v43 = vpop.permute.xlu1 %8726  ;;  %v6506_v29 = vsel %vm6443_vm2, %v6441_v28, %v8733_v3  ;;  %v6507_v32 = vsel %vm6443_vm2, %v6442_v34, %v8734_v26  ;;  %v9010_v26 = vmov 0  }
 0x836   :  { %v8742_v24 = vpop.permute.xlu0 %8741  ;;  %v8729_v50 = vunpack.i.h.bf16 %v8727_v43  ;;  %v8728_v63 = vunpack.i.l.bf16 %v8727_v43  ;;  %8750 = vset.pattern.permute.xlu0 %v9010_v26  ;;  %8751 = vset.pattern.permute.xlu1 %v9010_v26 }
 0x837   :  { %v8744_v49 = vunpack.i.h.bf16 %v8742_v24  ;;  %v8743_v11 = vunpack.i.l.bf16 %v8742_v24 }
 0x838   :  { %v6425_v48 = vsel %vm6378_vm15, %v6360_v31, %v8728_v63  ;;  %v6426_v39 = vsel %vm6378_vm15, %v6361_v12, %v8729_v50 }
 0x839   :  { %v8737_v36 = vpop.permute.xlu1 %8736  ;;  %v6571_v9 = vsel %vm6508_vm3, %v6506_v29, %v8743_v11  ;;  %v6572_v51 = vsel %vm6508_vm3, %v6507_v32, %v8744_v49 }
 0x83a   :  { %v7449_v42 = vpack.c.bf16 %v6572_v51, %v6571_v9  ;;  %v8739_v37 = vunpack.i.h.bf16 %v8737_v36  ;;  %v8738_v8 = vunpack.i.l.bf16 %v8737_v36 }
 0x83c   :  { %7451 = vmatprep.subr.msk.bf16.mxu1 %vm16456_vm7, %v7449_v42  ;;  %v6490_v62 = vsel %vm6443_vm2, %v6425_v48, %v8738_v8  ;;  %v6491_v19 = vsel %vm6443_vm2, %v6426_v39, %v8739_v37 }
 0x83d   :  { %v8747_v53 = vpop.permute.xlu1 %8746 }
 0x83e   :  { %v8749_v57 = vunpack.i.h.bf16 %v8747_v53  ;;  %v8748_v16 = vunpack.i.l.bf16 %v8747_v53 }
 0x840   :  { %v6555_v1 = vsel %vm6508_vm3, %v6490_v62, %v8748_v16  ;;  %v6556_v60 = vsel %vm6508_vm3, %v6491_v19, %v8749_v57 }
 0x841   :  { %v7452_v0 = vpack.c.bf16 %v6556_v60, %v6555_v1 }
 0x843   :  { %7454 = vmatpush3.bf16.xpose.msk.msra.mxu1 %vm16456_vm7, %v7452_v0 }
 0x84a   :  { %7244 = vmatmul.mubr.msk.f32.vlgmr.msra.gmra.mrb[2].mxu1 %vm6574_vm5, %v8972_v55 }
 0x895   :  { %v6836_v35 = vpop.f32.mrb[0].mxu1 }
 0x896   :  { %v6917_v56 = vmul.f32 %v6836_v35, %v6836_v35  ;;  %v6838_v15 = vpop.f32.mrb[1].mxu1 }
 0x897   :  { %v6912_v5 = vadd.f32 %v6838_v15, %v6836_v35  ;;  %v6918_v21 = vmul.f32 %v6838_v15, %v6838_v15 }
 0x899   :  { %v6921_v2 = vadd.f32 %v6918_v21, %v6917_v56 }
 0x91d   :  { %v6907_v41 = vpop.f32.mrb[2].mxu1 }
 0x91e   :  { %v6913_v54 = vadd.f32 %v6912_v5, %v6907_v41  ;;  %v6919_v25 = vmul.f32 %v6907_v41, %v6907_v41  ;;  %v6909_v13 = vpop.f32.mrb[3].mxu1 }
 0x91f   :  { %v6920_v30 = vmul.f32 %v6909_v13, %v6909_v13 }
 0x920   :  { %v6922_v61 = vadd.f32 %v6921_v2, %v6919_v25  ;;  %v6914_v27 = vadd.f32 %v6913_v54, %v6909_v13 }
 0x922   :  { %v6923_v20 = vadd.f32 %v6922_v61, %v6920_v30  ;;  %6915 = vadd.xlane.f32.xlu0 %v6914_v27 }
 0x924   :  { %6924 = vadd.xlane.f32.xlu1 %v6923_v20 }
 0x9af   :  { %v6916_v3 = vpop.xlane.xlu0 %6915 }
 0x9b0   :  { %v6926_v47 = vmul.f32 0.001953125, %v6916_v3 }
 0x9b1   :  { %v6925_v46 = vpop.xlane.xlu1 %6924 }
 0x9b2   :  { %v6928_v45 = vmul.f32 %v6926_v47, %v6926_v47  ;;  %v6927_v6 = vmul.f32 0.001953125, %v6925_v46 }
 0x9b4   :  { %v6929_v43 = vsub.f32 %v6927_v6, %v6928_v45 }
 0x9b6   :  { %v6931_v22 = vadd.f32 1e-05, %v6929_v43 }
 0x9b8   :  { %8754 = vrsqrt.f32 %v6931_v22 }
 0x9c2   :  { %v8755_v17 = vpop.eup %8754 }
 0x9c3   :  { %v6933_v4 = vmul.f32 %v8755_v17, %v6930_v40 }
 0x9c5   :  { %6939 = vperm.xlu0 %8750, %v6933_v4   ;;  %v6935_v24 = vmul.f32 %v6933_v4, %v6926_v47 }
 0x9c7   :  { %v6936_v28 = vsub.f32 %v6934_v14, %v6935_v24 }
 0x9c9   :  { %6948 = vperm.xlu1 %8751, %v6936_v28  }
 0xa44   :  { %v6940_v34 = vpop.permute.xlu0 %6939 }
 0xa45   :  { %v6942_v49 = vmul.f32 %v6940_v34, %v6836_v35  ;;  %v6943_v11 = vmul.f32 %v6940_v34, %v6838_v15  ;;  %v6944_v23 = vmul.f32 %v6940_v34, %v6907_v41  ;;  %v6945_v38 = vmul.f32 %v6940_v34, %v6909_v13 }
 0xa48   :  { %v6949_v7 = vpop.permute.xlu1 %6948 }
 0xa49   :  { %v6951_v29 = vadd.f32 %v6949_v7, %v6942_v49  ;;  %v6952_v32 = vadd.f32 %v6949_v7, %v6943_v11  ;;  %v6953_v52 = vadd.f32 %v6949_v7, %v6944_v23  ;;  %v6954_v58 = vadd.f32 %v6949_v7, %v6945_v38 }
 0xa4b   :  { %v6955_v36 = vmax.f32 %v6951_v29, 0.0  ;;  %v6956_v9 = vmax.f32 %v6952_v32, 0.0  ;;  %v6957_v51 = vmax.f32 %v6953_v52, 0.0  ;;  %v6958_v18 = vmax.f32 %v6954_v58, 0.0 }
 0xa4d   :  { %6959 = vst [vmem:[#allocation3] sm:$0xff] %v6955_v36  ;;  %6960 = vst [vmem:[#allocation3 + $0x8] sm:$0xff] %v6956_v9 }
 0xa4e   :  { %6961 = vst [vmem:[#allocation3 + $0x10] sm:$0xff] %v6957_v51  ;;  %6962 = vst [vmem:[#allocation3 + $0x18] sm:$0xff] %v6958_v18 }
 0xa4f   :  { %8984 = shalt.err (!%p8981_p4)
}
 0xa50   :  { %s8985_s10 = scalar_lea.hbm %s17555_s7, 512 }
 0xa51   :  { %p8986_p5 = scmp.ne.s32.totalorder %s17555_s7, %s8985_s10  ;;  %p8989_p6 = scmp.lt.u32.totalorder %s8985_s10, %s17555_s7 }
 0xa53   :  { %p8991_p7 = pnand %p8989_p6, %p8986_p5 }
 0xa55   :  { %8994 = shalt.err (!%p8991_p7)
}
 0xa56   :  { %6972 = dma.vmem_to_hbm [thread:$0]  %s6970_s8, 512, %s17555_s7, [#allocation4]  }
 0xa57   :  { %8995 = dma.done.wait [#allocation4], 512  }
 0xa58   :  { %8996 = vsyncadd [#allocation4], 4294966784 }
 0xa59   :  { %6976 = vsyncpa [#allocation4], 1 }

</bundles_post_ra>
